<compile_context>
chip_gen: v6e
topology: v6e:2x2x1
jax: 0.10.0
libtpu: 0.0.40
codegen_flags: <defaults>
</compile_context>

<pallas_src>
import jax
import jax.numpy as jnp
from jax.experimental import pallas as pl
from jax.experimental.pallas import tpu as pltpu

HIDDEN_SIZE = 200
INPUT_SIZE = 1
OUTPUT_SIZE = 1
HIDDEN_PAD = 256   # pad H so 4*H = 1024 (lane-aligned gate slices / MXU tiles)
BATCH_PAD = 8      # sublane alignment for h/c/gates


def _lstm_fc_kernel(x_ref, w_ih_t_ref, w_hh_t_ref, b_ref, w_fc_ref, b_fc_ref,
                    out_ref, xp_scr):
    """Whole sequence resident in VMEM; serial recurrence inside the kernel.

    x_ref     : (T, Bp, 1)    time-major input (batch padded to 8)
    w_ih_t_ref: (1, 4H)       input->gate weights (row, since I == 1)
    w_hh_t_ref: (H, 4H)       recurrent weights, transposed
    b_ref     : (1, 4H)       fused b_ih + b_hh
    w_fc_ref  : (1, H)        fc weight row (O == 1)
    b_fc_ref  : (1, 1)        fc bias
    out_ref   : (Bp, 1)
    xp_scr    : (T, Bp, 4H)   precomputed input projection (VMEM scratch)
    """
    T, B, _ = x_ref.shape
    H = w_hh_t_ref.shape[0]

    # ---- prologue: hoist the input projection out of the recurrence --------
    # (T, Bp, 1) * (1, 4H) + (1, 4H)  ->  (T, Bp, 4H), done once on the VPU.
    xp_scr[...] = x_ref[...].astype(jnp.float32) * w_ih_t_ref[...] + b_ref[...]

    w_hh = w_hh_t_ref[...]  # (H, 4H), hoisted load

    # ---- serial LSTM recurrence; h/c carried in vregs ------------------------
    def step(t, carry):
        h, c = carry
        gates = (jnp.dot(h, w_hh, preferred_element_type=jnp.float32)
                 + xp_scr[t])                       # (Bp, 4H)
        # PyTorch gate order: i, f, g, o (slices aligned to 256-lane offsets)
        i_g = jax.nn.sigmoid(gates[:, 0 * H:1 * H])
        f_g = jax.nn.sigmoid(gates[:, 1 * H:2 * H])
        g_g = jnp.tanh(gates[:, 2 * H:3 * H])
        o_g = jax.nn.sigmoid(gates[:, 3 * H:4 * H])
        c_new = f_g * c + i_g * g_g
        h_new = o_g * jnp.tanh(c_new)
        return h_new, c_new

    h0 = jnp.zeros((B, H), jnp.float32)
    c0 = jnp.zeros((B, H), jnp.float32)
    h_T, _ = jax.lax.fori_loop(0, T, step, (h0, c0), unroll=(T <= 32))

    # ---- fc head as a VPU mul + lane reduction (avoid an N=1 MXU matmul) -----
    out = jnp.sum(h_T * w_fc_ref[...], axis=-1, keepdims=True) + b_fc_ref[...]
    out_ref[...] = out.astype(out_ref.dtype)


@jax.jit
def time_series_predictor(x, w_ih_t, w_hh_t, b, w_fc_row, b_fc):
    """x: (B, T, I) float32, batch_first — same layout as the PyTorch module."""
    B, T, I = x.shape
    assert I == 1, "kernel is specialized for input_size == 1"
    H = w_hh_t.shape[0]
    O = w_fc_row.shape[0]
    assert O == 1, "fc head reduction is specialized for output_size == 1"

    # Layout plumbing in the wrapper (cheap XLA ops, not in the kernel):
    # time-major + batch padded to a multiple of 8 (sublane alignment).
    Bp = max(BATCH_PAD, ((B + BATCH_PAD - 1) // BATCH_PAD) * BATCH_PAD)
    x_tb = jnp.transpose(x, (1, 0, 2))               # (T, B, I)
    x_tb = jnp.pad(x_tb, ((0, 0), (0, Bp - B), (0, 0)))

    out = pl.pallas_call(
        _lstm_fc_kernel,
        out_shape=jax.ShapeDtypeStruct((Bp, O), x.dtype),
        in_specs=[pl.BlockSpec(memory_space=pltpu.MemorySpace.VMEM)] * 6,
        out_specs=pl.BlockSpec(memory_space=pltpu.MemorySpace.VMEM),
        scratch_shapes=[pltpu.VMEM((T, Bp, 4 * H), jnp.float32)],
    )(x_tb, w_ih_t, w_hh_t, b, w_fc_row, b_fc)
    return out[:B]


def init_raw_params(key, input_size=INPUT_SIZE, hidden_size=HIDDEN_SIZE,
                    output_size=OUTPUT_SIZE):
    """PyTorch-style raw LSTM/Linear params, U(-1/sqrt(H), 1/sqrt(H))."""
    H = hidden_size
    k = 1.0 / jnp.sqrt(jnp.float32(H))
    ks = jax.random.split(key, 6)
    w_ih = jax.random.uniform(ks[0], (4 * H, input_size), jnp.float32, -k, k)
    w_hh = jax.random.uniform(ks[1], (4 * H, H), jnp.float32, -k, k)
    b_ih = jax.random.uniform(ks[2], (4 * H,), jnp.float32, -k, k)
    b_hh = jax.random.uniform(ks[3], (4 * H,), jnp.float32, -k, k)
    w_fc = jax.random.uniform(ks[4], (output_size, H), jnp.float32, -k, k)
    b_fc = jax.random.uniform(ks[5], (output_size,), jnp.float32, -k, k)
    return w_ih, w_hh, b_ih, b_hh, w_fc, b_fc


def pad_params_for_kernel(w_ih, w_hh, b_ih, b_hh, w_fc, b_fc,
                          hidden_pad=HIDDEN_PAD):
    """Zero-pad H -> hidden_pad per gate (4H -> 4*256 = 1024, lane aligned).

    Padded weight/bias columns are exactly zero, so the padded h/c entries stay
    zero through the recurrence and the output matches the unpadded model.
    """
    H4, I = w_ih.shape
    H = H4 // 4
    O = w_fc.shape[0]
    Hp = hidden_pad
    pad = Hp - H

    # Input->gate weights: (4H, I) -> per-gate pad -> transposed (I, 4*Hp)
    w_ih_p = jnp.pad(w_ih.reshape(4, H, I), ((0, 0), (0, pad), (0, 0)))
    w_ih_t = w_ih_p.reshape(4 * Hp, I).T

    # Recurrent weights: (4H, H) -> per-gate pad both axes -> (Hp, 4*Hp)
    w_hh_p = jnp.pad(w_hh.reshape(4, H, H), ((0, 0), (0, pad), (0, pad)))
    w_hh_t = w_hh_p.reshape(4 * Hp, Hp).T

    # Fused bias: (4H,) -> per-gate pad -> (1, 4*Hp)
    b = jnp.pad((b_ih + b_hh).reshape(4, H), ((0, 0), (0, pad)))
    b = b.reshape(1, 4 * Hp)

    # fc head: (O, H) -> (O, Hp) row, bias (O,) -> (1, O)
    w_fc_row = jnp.pad(w_fc, ((0, 0), (0, pad)))
    b_fc2 = b_fc.reshape(1, O)
    return w_ih_t, w_hh_t, b, w_fc_row, b_fc2


def reference_forward(x, w_ih, w_hh, b_ih, b_hh, w_fc, b_fc):
    """Pure-JAX reference with the *unpadded* params (PyTorch semantics)."""
    B, T, _ = x.shape
    H = w_hh.shape[1]
    h = jnp.zeros((B, H), jnp.float32)
    c = jnp.zeros((B, H), jnp.float32)
    bias = (b_ih + b_hh)[None, :]
    for t in range(T):
        gates = x[:, t, :] @ w_ih.T + h @ w_hh.T + bias
        i_g = jax.nn.sigmoid(gates[:, 0:H])
        f_g = jax.nn.sigmoid(gates[:, H:2 * H])
        g_g = jnp.tanh(gates[:, 2 * H:3 * H])
        o_g = jax.nn.sigmoid(gates[:, 3 * H:4 * H])
        c = f_g * c + i_g * g_g
        h = o_g * jnp.tanh(c)
    return h @ w_fc.T + b_fc[None, :]


if __name__ == "__main__":
    key = jax.random.PRNGKey(0)
    k_x, k_p = jax.random.split(key)

    B, T = 2, 8
    x = jax.random.normal(k_x, (B, T, INPUT_SIZE), jnp.float32)

    raw = init_raw_params(k_p)
    kparams = pad_params_for_kernel(*raw)

    out = time_series_predictor(x, *kparams)
    out = jax.block_until_ready(out)

    ref = reference_forward(x, *raw)
    assert out.shape == (B, OUTPUT_SIZE), out.shape
    assert jnp.max(jnp.abs(out - ref)) < 2e-3, (out, ref)

    print("KERNEL_OK")
</pallas_src>

<mosaic_0001>
module attributes {stable_mosaic.version = 11 : i64} {
  func.func @_lstm_fc_kernel(%arg0: memref<8x8x1xf32, #tpu.memory_space<vmem>>, %arg1: memref<1x1024xf32, #tpu.memory_space<vmem>>, %arg2: memref<256x1024xf32, #tpu.memory_space<vmem>>, %arg3: memref<1x1024xf32, #tpu.memory_space<vmem>>, %arg4: memref<1x256xf32, #tpu.memory_space<vmem>>, %arg5: memref<1x1xf32, #tpu.memory_space<vmem>>, %arg6: memref<8x1xf32, #tpu.memory_space<vmem>>, %arg7: memref<8x8x1024xf32, #tpu.memory_space<vmem>>) attributes {dimension_semantics = [], scalar_prefetch = 0 : i64, scratch_operands = 1 : i64, tpu.core_type = #tpu.core_type<tc>} {
    %c0 = arith.constant 0 : index
    %c0_0 = arith.constant 0 : index
    %c0_1 = arith.constant 0 : index
    %0 = vector.load %arg0[%c0, %c0_0, %c0_1] : memref<8x8x1xf32, #tpu.memory_space<vmem>>, vector<8x8x1xf32>
    %c0_2 = arith.constant 0 : index
    %c0_3 = arith.constant 0 : index
    %1 = vector.load %arg1[%c0_2, %c0_3] : memref<1x1024xf32, #tpu.memory_space<vmem>>, vector<1x1024xf32>
    %2 = vector.shape_cast %1 : vector<1x1024xf32> to vector<1x1x1024xf32>
    %3 = vector.broadcast %0 : vector<8x8x1xf32> to vector<8x8x1024xf32>
    %4 = vector.broadcast %2 : vector<1x1x1024xf32> to vector<8x8x1024xf32>
    %5 = arith.mulf %3, %4 : vector<8x8x1024xf32>
    %c0_4 = arith.constant 0 : index
    %c0_5 = arith.constant 0 : index
    %6 = vector.load %arg3[%c0_4, %c0_5] : memref<1x1024xf32, #tpu.memory_space<vmem>>, vector<1x1024xf32>
    %7 = vector.shape_cast %6 : vector<1x1024xf32> to vector<1x1x1024xf32>
    %8 = vector.broadcast %7 : vector<1x1x1024xf32> to vector<8x8x1024xf32>
    %9 = arith.addf %5, %8 : vector<8x8x1024xf32>
    %c0_6 = arith.constant 0 : index
    %c0_7 = arith.constant 0 : index
    %c0_8 = arith.constant 0 : index
    %10 = vector.load %arg7[%c0_6, %c0_7, %c0_8] : memref<8x8x1024xf32, #tpu.memory_space<vmem>>, vector<8x8x1024xf32>
    tpu.vector_store %arg7[%c0_6, %c0_7, %c0_8], %9 {strides = array<i32>} : memref<8x8x1024xf32, #tpu.memory_space<vmem>>, vector<8x8x1024xf32>,
    %c0_9 = arith.constant 0 : index
    %c0_10 = arith.constant 0 : index
    %11 = vector.load %arg2[%c0_9, %c0_10] : memref<256x1024xf32, #tpu.memory_space<vmem>>, vector<256x1024xf32>
    %cst = arith.constant 0.000000e+00 : f32
    %12 = vector.broadcast %cst : f32 to vector<8x256xf32>
    %cst_11 = arith.constant 0.000000e+00 : f32
    %13 = vector.broadcast %cst_11 : f32 to vector<8x256xf32>
    %c0_i32 = arith.constant 0 : i32
    %cst_12 = arith.constant dense<0.000000e+00> : vector<8x1024xf32>
    %14 = tpu.matmul %12, %11, %cst_12 {dimension_numbers = #tpu.dot_dimension_numbers<[1], [0], [0], [1], [0, 0, 1, 1], [], []>} : vector<8x256xf32>, vector<256x1024xf32>, vector<8x1024xf32> -> vector<8x1024xf32>
    %15 = arith.index_cast %c0_i32 : i32 to index
    %c0_13 = arith.constant 0 : index
    %c0_14 = arith.constant 0 : index
    %16 = vector.load %arg7[%15, %c0_13, %c0_14] : memref<8x8x1024xf32, #tpu.memory_space<vmem>>, vector<1x8x1024xf32>
    %17 = vector.shape_cast %16 : vector<1x8x1024xf32> to vector<8x1024xf32>
    %18 = arith.addf %14, %17 : vector<8x1024xf32>
    %19 = vector.extract_strided_slice %18 {offsets = [0, 0], sizes = [8, 256], strides = [1, 1]} : vector<8x1024xf32> to vector<8x256xf32>
    %20 = arith.negf %19 : vector<8x256xf32>
    %21 = math.exp %20 : vector<8x256xf32>
    %cst_15 = arith.constant 1.000000e+00 : f32
    %22 = vector.broadcast %cst_15 : f32 to vector<8x256xf32>
    %23 = arith.addf %22, %21 : vector<8x256xf32>
    %24 = arith.divf %22, %23 : vector<8x256xf32>
    %25 = vector.extract_strided_slice %18 {offsets = [0, 256], sizes = [8, 256], strides = [1, 1]} : vector<8x1024xf32> to vector<8x256xf32>
    %26 = arith.negf %25 : vector<8x256xf32>
    %27 = math.exp %26 : vector<8x256xf32>
    %cst_16 = arith.constant 1.000000e+00 : f32
    %28 = vector.broadcast %cst_16 : f32 to vector<8x256xf32>
    %29 = arith.addf %28, %27 : vector<8x256xf32>
    %30 = arith.divf %28, %29 : vector<8x256xf32>
    %31 = vector.extract_strided_slice %18 {offsets = [0, 512], sizes = [8, 256], strides = [1, 1]} : vector<8x1024xf32> to vector<8x256xf32>
    %32 = math.tanh %31 : vector<8x256xf32>
    %33 = vector.extract_strided_slice %18 {offsets = [0, 768], sizes = [8, 256], strides = [1, 1]} : vector<8x1024xf32> to vector<8x256xf32>
    %34 = arith.negf %33 : vector<8x256xf32>
    %35 = math.exp %34 : vector<8x256xf32>
    %cst_17 = arith.constant 1.000000e+00 : f32
    %36 = vector.broadcast %cst_17 : f32 to vector<8x256xf32>
    %37 = arith.addf %36, %35 : vector<8x256xf32>
    %38 = arith.divf %36, %37 : vector<8x256xf32>
    %39 = arith.mulf %30, %13 : vector<8x256xf32>
    %40 = arith.mulf %24, %32 : vector<8x256xf32>
    %41 = arith.addf %39, %40 : vector<8x256xf32>
    %42 = math.tanh %41 : vector<8x256xf32>
    %43 = arith.mulf %38, %42 : vector<8x256xf32>
    %c1_i32 = arith.constant 1 : i32
    %cst_18 = arith.constant dense<0.000000e+00> : vector<8x1024xf32>
    %44 = tpu.matmul %43, %11, %cst_18 {dimension_numbers = #tpu.dot_dimension_numbers<[1], [0], [0], [1], [0, 0, 1, 1], [], []>} : vector<8x256xf32>, vector<256x1024xf32>, vector<8x1024xf32> -> vector<8x1024xf32>
    %45 = arith.index_cast %c1_i32 : i32 to index
    %c0_19 = arith.constant 0 : index
    %c0_20 = arith.constant 0 : index
    %46 = vector.load %arg7[%45, %c0_19, %c0_20] : memref<8x8x1024xf32, #tpu.memory_space<vmem>>, vector<1x8x1024xf32>
    %47 = vector.shape_cast %46 : vector<1x8x1024xf32> to vector<8x1024xf32>
    %48 = arith.addf %44, %47 : vector<8x1024xf32>
    %49 = vector.extract_strided_slice %48 {offsets = [0, 0], sizes = [8, 256], strides = [1, 1]} : vector<8x1024xf32> to vector<8x256xf32>
    %50 = arith.negf %49 : vector<8x256xf32>
    %51 = math.exp %50 : vector<8x256xf32>
    %cst_21 = arith.constant 1.000000e+00 : f32
    %52 = vector.broadcast %cst_21 : f32 to vector<8x256xf32>
    %53 = arith.addf %52, %51 : vector<8x256xf32>
    %54 = arith.divf %52, %53 : vector<8x256xf32>
    %55 = vector.extract_strided_slice %48 {offsets = [0, 256], sizes = [8, 256], strides = [1, 1]} : vector<8x1024xf32> to vector<8x256xf32>
    %56 = arith.negf %55 : vector<8x256xf32>
    %57 = math.exp %56 : vector<8x256xf32>
    %cst_22 = arith.constant 1.000000e+00 : f32
    %58 = vector.broadcast %cst_22 : f32 to vector<8x256xf32>
    %59 = arith.addf %58, %57 : vector<8x256xf32>
    %60 = arith.divf %58, %59 : vector<8x256xf32>
    %61 = vector.extract_strided_slice %48 {offsets = [0, 512], sizes = [8, 256], strides = [1, 1]} : vector<8x1024xf32> to vector<8x256xf32>
    %62 = math.tanh %61 : vector<8x256xf32>
    %63 = vector.extract_strided_slice %48 {offsets = [0, 768], sizes = [8, 256], strides = [1, 1]} : vector<8x1024xf32> to vector<8x256xf32>
    %64 = arith.negf %63 : vector<8x256xf32>
    %65 = math.exp %64 : vector<8x256xf32>
    %cst_23 = arith.constant 1.000000e+00 : f32
    %66 = vector.broadcast %cst_23 : f32 to vector<8x256xf32>
    %67 = arith.addf %66, %65 : vector<8x256xf32>
    %68 = arith.divf %66, %67 : vector<8x256xf32>
    %69 = arith.mulf %60, %41 : vector<8x256xf32>
    %70 = arith.mulf %54, %62 : vector<8x256xf32>
    %71 = arith.addf %69, %70 : vector<8x256xf32>
    %72 = math.tanh %71 : vector<8x256xf32>
    %73 = arith.mulf %68, %72 : vector<8x256xf32>
    %c2_i32 = arith.constant 2 : i32
    %cst_24 = arith.constant dense<0.000000e+00> : vector<8x1024xf32>
    %74 = tpu.matmul %73, %11, %cst_24 {dimension_numbers = #tpu.dot_dimension_numbers<[1], [0], [0], [1], [0, 0, 1, 1], [], []>} : vector<8x256xf32>, vector<256x1024xf32>, vector<8x1024xf32> -> vector<8x1024xf32>
    %75 = arith.index_cast %c2_i32 : i32 to index
    %c0_25 = arith.constant 0 : index
    %c0_26 = arith.constant 0 : index
    %76 = vector.load %arg7[%75, %c0_25, %c0_26] : memref<8x8x1024xf32, #tpu.memory_space<vmem>>, vector<1x8x1024xf32>
    %77 = vector.shape_cast %76 : vector<1x8x1024xf32> to vector<8x1024xf32>
    %78 = arith.addf %74, %77 : vector<8x1024xf32>
    %79 = vector.extract_strided_slice %78 {offsets = [0, 0], sizes = [8, 256], strides = [1, 1]} : vector<8x1024xf32> to vector<8x256xf32>
    %80 = arith.negf %79 : vector<8x256xf32>
    %81 = math.exp %80 : vector<8x256xf32>
    %cst_27 = arith.constant 1.000000e+00 : f32
    %82 = vector.broadcast %cst_27 : f32 to vector<8x256xf32>
    %83 = arith.addf %82, %81 : vector<8x256xf32>
    %84 = arith.divf %82, %83 : vector<8x256xf32>
    %85 = vector.extract_strided_slice %78 {offsets = [0, 256], sizes = [8, 256], strides = [1, 1]} : vector<8x1024xf32> to vector<8x256xf32>
    %86 = arith.negf %85 : vector<8x256xf32>
    %87 = math.exp %86 : vector<8x256xf32>
    %cst_28 = arith.constant 1.000000e+00 : f32
    %88 = vector.broadcast %cst_28 : f32 to vector<8x256xf32>
    %89 = arith.addf %88, %87 : vector<8x256xf32>
    %90 = arith.divf %88, %89 : vector<8x256xf32>
    %91 = vector.extract_strided_slice %78 {offsets = [0, 512], sizes = [8, 256], strides = [1, 1]} : vector<8x1024xf32> to vector<8x256xf32>
    %92 = math.tanh %91 : vector<8x256xf32>
    %93 = vector.extract_strided_slice %78 {offsets = [0, 768], sizes = [8, 256], strides = [1, 1]} : vector<8x1024xf32> to vector<8x256xf32>
    %94 = arith.negf %93 : vector<8x256xf32>
    %95 = math.exp %94 : vector<8x256xf32>
    %cst_29 = arith.constant 1.000000e+00 : f32
    %96 = vector.broadcast %cst_29 : f32 to vector<8x256xf32>
    %97 = arith.addf %96, %95 : vector<8x256xf32>
    %98 = arith.divf %96, %97 : vector<8x256xf32>
    %99 = arith.mulf %90, %71 : vector<8x256xf32>
    %100 = arith.mulf %84, %92 : vector<8x256xf32>
    %101 = arith.addf %99, %100 : vector<8x256xf32>
    %102 = math.tanh %101 : vector<8x256xf32>
    %103 = arith.mulf %98, %102 : vector<8x256xf32>
    %c3_i32 = arith.constant 3 : i32
    %cst_30 = arith.constant dense<0.000000e+00> : vector<8x1024xf32>
    %104 = tpu.matmul %103, %11, %cst_30 {dimension_numbers = #tpu.dot_dimension_numbers<[1], [0], [0], [1], [0, 0, 1, 1], [], []>} : vector<8x256xf32>, vector<256x1024xf32>, vector<8x1024xf32> -> vector<8x1024xf32>
    %105 = arith.index_cast %c3_i32 : i32 to index
    %c0_31 = arith.constant 0 : index
    %c0_32 = arith.constant 0 : index
    %106 = vector.load %arg7[%105, %c0_31, %c0_32] : memref<8x8x1024xf32, #tpu.memory_space<vmem>>, vector<1x8x1024xf32>
    %107 = vector.shape_cast %106 : vector<1x8x1024xf32> to vector<8x1024xf32>
    %108 = arith.addf %104, %107 : vector<8x1024xf32>
    %109 = vector.extract_strided_slice %108 {offsets = [0, 0], sizes = [8, 256], strides = [1, 1]} : vector<8x1024xf32> to vector<8x256xf32>
    %110 = arith.negf %109 : vector<8x256xf32>
    %111 = math.exp %110 : vector<8x256xf32>
    %cst_33 = arith.constant 1.000000e+00 : f32
    %112 = vector.broadcast %cst_33 : f32 to vector<8x256xf32>
    %113 = arith.addf %112, %111 : vector<8x256xf32>
    %114 = arith.divf %112, %113 : vector<8x256xf32>
    %115 = vector.extract_strided_slice %108 {offsets = [0, 256], sizes = [8, 256], strides = [1, 1]} : vector<8x1024xf32> to vector<8x256xf32>
    %116 = arith.negf %115 : vector<8x256xf32>
    %117 = math.exp %116 : vector<8x256xf32>
    %cst_34 = arith.constant 1.000000e+00 : f32
    %118 = vector.broadcast %cst_34 : f32 to vector<8x256xf32>
    %119 = arith.addf %118, %117 : vector<8x256xf32>
    %120 = arith.divf %118, %119 : vector<8x256xf32>
    %121 = vector.extract_strided_slice %108 {offsets = [0, 512], sizes = [8, 256], strides = [1, 1]} : vector<8x1024xf32> to vector<8x256xf32>
    %122 = math.tanh %121 : vector<8x256xf32>
    %123 = vector.extract_strided_slice %108 {offsets = [0, 768], sizes = [8, 256], strides = [1, 1]} : vector<8x1024xf32> to vector<8x256xf32>
    %124 = arith.negf %123 : vector<8x256xf32>
    %125 = math.exp %124 : vector<8x256xf32>
    %cst_35 = arith.constant 1.000000e+00 : f32
    %126 = vector.broadcast %cst_35 : f32 to vector<8x256xf32>
    %127 = arith.addf %126, %125 : vector<8x256xf32>
    %128 = arith.divf %126, %127 : vector<8x256xf32>
    %129 = arith.mulf %120, %101 : vector<8x256xf32>
    %130 = arith.mulf %114, %122 : vector<8x256xf32>
    %131 = arith.addf %129, %130 : vector<8x256xf32>
    %132 = math.tanh %131 : vector<8x256xf32>
    %133 = arith.mulf %128, %132 : vector<8x256xf32>
    %c4_i32 = arith.constant 4 : i32
    %cst_36 = arith.constant dense<0.000000e+00> : vector<8x1024xf32>
    %134 = tpu.matmul %133, %11, %cst_36 {dimension_numbers = #tpu.dot_dimension_numbers<[1], [0], [0], [1], [0, 0, 1, 1], [], []>} : vector<8x256xf32>, vector<256x1024xf32>, vector<8x1024xf32> -> vector<8x1024xf32>
    %135 = arith.index_cast %c4_i32 : i32 to index
    %c0_37 = arith.constant 0 : index
    %c0_38 = arith.constant 0 : index
    %136 = vector.load %arg7[%135, %c0_37, %c0_38] : memref<8x8x1024xf32, #tpu.memory_space<vmem>>, vector<1x8x1024xf32>
    %137 = vector.shape_cast %136 : vector<1x8x1024xf32> to vector<8x1024xf32>
    %138 = arith.addf %134, %137 : vector<8x1024xf32>
    %139 = vector.extract_strided_slice %138 {offsets = [0, 0], sizes = [8, 256], strides = [1, 1]} : vector<8x1024xf32> to vector<8x256xf32>
    %140 = arith.negf %139 : vector<8x256xf32>
    %141 = math.exp %140 : vector<8x256xf32>
    %cst_39 = arith.constant 1.000000e+00 : f32
    %142 = vector.broadcast %cst_39 : f32 to vector<8x256xf32>
    %143 = arith.addf %142, %141 : vector<8x256xf32>
    %144 = arith.divf %142, %143 : vector<8x256xf32>
    %145 = vector.extract_strided_slice %138 {offsets = [0, 256], sizes = [8, 256], strides = [1, 1]} : vector<8x1024xf32> to vector<8x256xf32>
    %146 = arith.negf %145 : vector<8x256xf32>
    %147 = math.exp %146 : vector<8x256xf32>
    %cst_40 = arith.constant 1.000000e+00 : f32
    %148 = vector.broadcast %cst_40 : f32 to vector<8x256xf32>
    %149 = arith.addf %148, %147 : vector<8x256xf32>
    %150 = arith.divf %148, %149 : vector<8x256xf32>
    %151 = vector.extract_strided_slice %138 {offsets = [0, 512], sizes = [8, 256], strides = [1, 1]} : vector<8x1024xf32> to vector<8x256xf32>
    %152 = math.tanh %151 : vector<8x256xf32>
    %153 = vector.extract_strided_slice %138 {offsets = [0, 768], sizes = [8, 256], strides = [1, 1]} : vector<8x1024xf32> to vector<8x256xf32>
    %154 = arith.negf %153 : vector<8x256xf32>
    %155 = math.exp %154 : vector<8x256xf32>
    %cst_41 = arith.constant 1.000000e+00 : f32
    %156 = vector.broadcast %cst_41 : f32 to vector<8x256xf32>
    %157 = arith.addf %156, %155 : vector<8x256xf32>
    %158 = arith.divf %156, %157 : vector<8x256xf32>
    %159 = arith.mulf %150, %131 : vector<8x256xf32>
    %160 = arith.mulf %144, %152 : vector<8x256xf32>
    %161 = arith.addf %159, %160 : vector<8x256xf32>
    %162 = math.tanh %161 : vector<8x256xf32>
    %163 = arith.mulf %158, %162 : vector<8x256xf32>
    %c5_i32 = arith.constant 5 : i32
    %cst_42 = arith.constant dense<0.000000e+00> : vector<8x1024xf32>
    %164 = tpu.matmul %163, %11, %cst_42 {dimension_numbers = #tpu.dot_dimension_numbers<[1], [0], [0], [1], [0, 0, 1, 1], [], []>} : vector<8x256xf32>, vector<256x1024xf32>, vector<8x1024xf32> -> vector<8x1024xf32>
    %165 = arith.index_cast %c5_i32 : i32 to index
    %c0_43 = arith.constant 0 : index
    %c0_44 = arith.constant 0 : index
    %166 = vector.load %arg7[%165, %c0_43, %c0_44] : memref<8x8x1024xf32, #tpu.memory_space<vmem>>, vector<1x8x1024xf32>
    %167 = vector.shape_cast %166 : vector<1x8x1024xf32> to vector<8x1024xf32>
    %168 = arith.addf %164, %167 : vector<8x1024xf32>
    %169 = vector.extract_strided_slice %168 {offsets = [0, 0], sizes = [8, 256], strides = [1, 1]} : vector<8x1024xf32> to vector<8x256xf32>
    %170 = arith.negf %169 : vector<8x256xf32>
    %171 = math.exp %170 : vector<8x256xf32>
    %cst_45 = arith.constant 1.000000e+00 : f32
    %172 = vector.broadcast %cst_45 : f32 to vector<8x256xf32>
    %173 = arith.addf %172, %171 : vector<8x256xf32>
    %174 = arith.divf %172, %173 : vector<8x256xf32>
    %175 = vector.extract_strided_slice %168 {offsets = [0, 256], sizes = [8, 256], strides = [1, 1]} : vector<8x1024xf32> to vector<8x256xf32>
    %176 = arith.negf %175 : vector<8x256xf32>
    %177 = math.exp %176 : vector<8x256xf32>
    %cst_46 = arith.constant 1.000000e+00 : f32
    %178 = vector.broadcast %cst_46 : f32 to vector<8x256xf32>
    %179 = arith.addf %178, %177 : vector<8x256xf32>
    %180 = arith.divf %178, %179 : vector<8x256xf32>
    %181 = vector.extract_strided_slice %168 {offsets = [0, 512], sizes = [8, 256], strides = [1, 1]} : vector<8x1024xf32> to vector<8x256xf32>
    %182 = math.tanh %181 : vector<8x256xf32>
    %183 = vector.extract_strided_slice %168 {offsets = [0, 768], sizes = [8, 256], strides = [1, 1]} : vector<8x1024xf32> to vector<8x256xf32>
    %184 = arith.negf %183 : vector<8x256xf32>
    %185 = math.exp %184 : vector<8x256xf32>
    %cst_47 = arith.constant 1.000000e+00 : f32
    %186 = vector.broadcast %cst_47 : f32 to vector<8x256xf32>
    %187 = arith.addf %186, %185 : vector<8x256xf32>
    %188 = arith.divf %186, %187 : vector<8x256xf32>
    %189 = arith.mulf %180, %161 : vector<8x256xf32>
    %190 = arith.mulf %174, %182 : vector<8x256xf32>
    %191 = arith.addf %189, %190 : vector<8x256xf32>
    %192 = math.tanh %191 : vector<8x256xf32>
    %193 = arith.mulf %188, %192 : vector<8x256xf32>
    %c6_i32 = arith.constant 6 : i32
    %cst_48 = arith.constant dense<0.000000e+00> : vector<8x1024xf32>
    %194 = tpu.matmul %193, %11, %cst_48 {dimension_numbers = #tpu.dot_dimension_numbers<[1], [0], [0], [1], [0, 0, 1, 1], [], []>} : vector<8x256xf32>, vector<256x1024xf32>, vector<8x1024xf32> -> vector<8x1024xf32>
    %195 = arith.index_cast %c6_i32 : i32 to index
    %c0_49 = arith.constant 0 : index
    %c0_50 = arith.constant 0 : index
    %196 = vector.load %arg7[%195, %c0_49, %c0_50] : memref<8x8x1024xf32, #tpu.memory_space<vmem>>, vector<1x8x1024xf32>
    %197 = vector.shape_cast %196 : vector<1x8x1024xf32> to vector<8x1024xf32>
    %198 = arith.addf %194, %197 : vector<8x1024xf32>
    %199 = vector.extract_strided_slice %198 {offsets = [0, 0], sizes = [8, 256], strides = [1, 1]} : vector<8x1024xf32> to vector<8x256xf32>
    %200 = arith.negf %199 : vector<8x256xf32>
    %201 = math.exp %200 : vector<8x256xf32>
    %cst_51 = arith.constant 1.000000e+00 : f32
    %202 = vector.broadcast %cst_51 : f32 to vector<8x256xf32>
    %203 = arith.addf %202, %201 : vector<8x256xf32>
    %204 = arith.divf %202, %203 : vector<8x256xf32>
    %205 = vector.extract_strided_slice %198 {offsets = [0, 256], sizes = [8, 256], strides = [1, 1]} : vector<8x1024xf32> to vector<8x256xf32>
    %206 = arith.negf %205 : vector<8x256xf32>
    %207 = math.exp %206 : vector<8x256xf32>
    %cst_52 = arith.constant 1.000000e+00 : f32
    %208 = vector.broadcast %cst_52 : f32 to vector<8x256xf32>
    %209 = arith.addf %208, %207 : vector<8x256xf32>
    %210 = arith.divf %208, %209 : vector<8x256xf32>
    %211 = vector.extract_strided_slice %198 {offsets = [0, 512], sizes = [8, 256], strides = [1, 1]} : vector<8x1024xf32> to vector<8x256xf32>
    %212 = math.tanh %211 : vector<8x256xf32>
    %213 = vector.extract_strided_slice %198 {offsets = [0, 768], sizes = [8, 256], strides = [1, 1]} : vector<8x1024xf32> to vector<8x256xf32>
    %214 = arith.negf %213 : vector<8x256xf32>
    %215 = math.exp %214 : vector<8x256xf32>
    %cst_53 = arith.constant 1.000000e+00 : f32
    %216 = vector.broadcast %cst_53 : f32 to vector<8x256xf32>
    %217 = arith.addf %216, %215 : vector<8x256xf32>
    %218 = arith.divf %216, %217 : vector<8x256xf32>
    %219 = arith.mulf %210, %191 : vector<8x256xf32>
    %220 = arith.mulf %204, %212 : vector<8x256xf32>
    %221 = arith.addf %219, %220 : vector<8x256xf32>
    %222 = math.tanh %221 : vector<8x256xf32>
    %223 = arith.mulf %218, %222 : vector<8x256xf32>
    %c7_i32 = arith.constant 7 : i32
    %cst_54 = arith.constant dense<0.000000e+00> : vector<8x1024xf32>
    %224 = tpu.matmul %223, %11, %cst_54 {dimension_numbers = #tpu.dot_dimension_numbers<[1], [0], [0], [1], [0, 0, 1, 1], [], []>} : vector<8x256xf32>, vector<256x1024xf32>, vector<8x1024xf32> -> vector<8x1024xf32>
    %225 = arith.index_cast %c7_i32 : i32 to index
    %c0_55 = arith.constant 0 : index
    %c0_56 = arith.constant 0 : index
    %226 = vector.load %arg7[%225, %c0_55, %c0_56] : memref<8x8x1024xf32, #tpu.memory_space<vmem>>, vector<1x8x1024xf32>
    %227 = vector.shape_cast %226 : vector<1x8x1024xf32> to vector<8x1024xf32>
    %228 = arith.addf %224, %227 : vector<8x1024xf32>
    %229 = vector.extract_strided_slice %228 {offsets = [0, 0], sizes = [8, 256], strides = [1, 1]} : vector<8x1024xf32> to vector<8x256xf32>
    %230 = arith.negf %229 : vector<8x256xf32>
    %231 = math.exp %230 : vector<8x256xf32>
    %cst_57 = arith.constant 1.000000e+00 : f32
    %232 = vector.broadcast %cst_57 : f32 to vector<8x256xf32>
    %233 = arith.addf %232, %231 : vector<8x256xf32>
    %234 = arith.divf %232, %233 : vector<8x256xf32>
    %235 = vector.extract_strided_slice %228 {offsets = [0, 256], sizes = [8, 256], strides = [1, 1]} : vector<8x1024xf32> to vector<8x256xf32>
    %236 = arith.negf %235 : vector<8x256xf32>
    %237 = math.exp %236 : vector<8x256xf32>
    %cst_58 = arith.constant 1.000000e+00 : f32
    %238 = vector.broadcast %cst_58 : f32 to vector<8x256xf32>
    %239 = arith.addf %238, %237 : vector<8x256xf32>
    %240 = arith.divf %238, %239 : vector<8x256xf32>
    %241 = vector.extract_strided_slice %228 {offsets = [0, 512], sizes = [8, 256], strides = [1, 1]} : vector<8x1024xf32> to vector<8x256xf32>
    %242 = math.tanh %241 : vector<8x256xf32>
    %243 = vector.extract_strided_slice %228 {offsets = [0, 768], sizes = [8, 256], strides = [1, 1]} : vector<8x1024xf32> to vector<8x256xf32>
    %244 = arith.negf %243 : vector<8x256xf32>
    %245 = math.exp %244 : vector<8x256xf32>
    %cst_59 = arith.constant 1.000000e+00 : f32
    %246 = vector.broadcast %cst_59 : f32 to vector<8x256xf32>
    %247 = arith.addf %246, %245 : vector<8x256xf32>
    %248 = arith.divf %246, %247 : vector<8x256xf32>
    %249 = arith.mulf %240, %221 : vector<8x256xf32>
    %250 = arith.mulf %234, %242 : vector<8x256xf32>
    %251 = arith.addf %249, %250 : vector<8x256xf32>
    %252 = math.tanh %251 : vector<8x256xf32>
    %253 = arith.mulf %248, %252 : vector<8x256xf32>
    %c8_i32 = arith.constant 8 : i32
    %c0_60 = arith.constant 0 : index
    %c0_61 = arith.constant 0 : index
    %254 = vector.load %arg4[%c0_60, %c0_61] : memref<1x256xf32, #tpu.memory_space<vmem>>, vector<1x256xf32>
    %255 = vector.broadcast %254 : vector<1x256xf32> to vector<8x256xf32>
    %256 = arith.mulf %253, %255 : vector<8x256xf32>
    %cst_62 = arith.constant dense<0.000000e+00> : vector<8xf32>
    %257 = vector.multi_reduction <add>, %256, %cst_62 [1] : vector<8x256xf32> to vector<8xf32>
    %258 = vector.shape_cast %257 : vector<8xf32> to vector<8x1xf32>
    %c0_63 = arith.constant 0 : index
    %c0_64 = arith.constant 0 : index
    %259 = vector.load %arg5[%c0_63, %c0_64] : memref<1x1xf32, #tpu.memory_space<vmem>>, vector<1x1xf32>
    %260 = vector.broadcast %259 : vector<1x1xf32> to vector<8x1xf32>
    %261 = arith.addf %258, %260 : vector<8x1xf32>
    %c0_65 = arith.constant 0 : index
    %c0_66 = arith.constant 0 : index
    %262 = vector.load %arg6[%c0_65, %c0_66] : memref<8x1xf32, #tpu.memory_space<vmem>>, vector<8x1xf32>
    tpu.vector_store %arg6[%c0_65, %c0_66], %261 {strides = array<i32>} : memref<8x1xf32, #tpu.memory_space<vmem>>, vector<8x1xf32>,
    return
  }
}

</mosaic_0001>

<bundles_post_ra>
// kernel: time_series_predictor.1
= control target key start
LH: loop header
LB: loop body
LE: loop exit
PB: predicated region body
PF: predicated region fallthrough
CT: control target
= control target key end

     0   :  { %s8846_s0 = inlined_call_operand.vmem [shape: f32[8,8,1], index: 0, kind: input, shape index: {}]   ;;  %s8847_s1 = inlined_call_operand.vmem [shape: f32[1,1024], index: 1, kind: input, shape index: {}]   ;;  %s8848_s2 = inlined_call_operand.hbm [shape: f32[256,1024], index: 2, kind: input, shape index: {}]   ;;  %s8849_s3 = inlined_call_operand.vmem [shape: f32[1,1024], index: 3, kind: input, shape index: {}]   ;;  %s8850_s4 = inlined_call_operand.vmem [shape: f32[1,256], index: 4, kind: input, shape index: {}]   ;;  %s8851_s5 = inlined_call_operand.<no memory space> [shape: f32[1,1], index: 5, kind: input, shape index: {}]   ;;  %s8852_s6 = inlined_call_operand.vmem [shape: f32[8,1], index: 6, kind: output, shape index: {}]  }
   0x1   :  { %v11_v0 = vstv %s8851_s5 }
   0x2   :  { %12 = vst [vmem:[#allocation3] sm:$0x1] %v11_v0 }
   0x3   :  { %13 = vsyncpa [#allocation5], 0  ;;  %s4510_s23 = smov [#allocation4]  }
   0x4   :  { %s23_s24 = sshll.u32 %s4510_s23, 4  ;;  %s24_s24 = int_to_ptr.vmem [resolvable:$true] %s23_s24 }
   0x5   :  { %s4496_s25 = scalar_lea.vmem %s24_s24, 32768  ;;  %p4501_p1 = scmp.lt.s32.totalorder %s24_s24, %s24_s24 }
   0x6   :  { %p4497_p0 = scmp.ne.s32.totalorder %s24_s24, %s4496_s25  ;;  %p4502_p2 = scmp.lt.s32.totalorder %s4496_s25, %s4496_s25 }
   0x8   :  { %p4503_p3 = por %p4502_p2, %p4501_p1 }
   0xa   :  { %p4504_p4 = pnand %p4503_p3, %p4497_p0 }
   0xc   :  { %4507 = shalt.err (!%p4504_p4)
}
   0xd   :  { %s4511_s26 = smov 1024   ;;  %s4512_s27 = smov 64  }
   0xe   :  { %29 = dma.hbm_to_vmem [thread:$0]  %s8848_s2, 32768, %s24_s24, [#allocation5], %s4511_s26, %s4511_s26, %s4512_s27  }
   0xf   :  { %4508 = dma.done.wait [#allocation5], 32768  }
  0x10   :  { %4509 = vsyncadd [#allocation5], 4294934528  ;;  %v8853_v1 = vmov 0.0   ;;  %v484_v2 = vld [vmem:[#allocation4 + $0x3c8] sm:$0xff]  ;;  %v486_v3 = vld [vmem:[#allocation4 + $0x3d8] sm:$0xff]  ;;  %vm3371_vm0 = vcmask 7168  }
  0x11   :  { %691 = vmatprep.mubr.f32.mxu0 %v8853_v1  ;;  %762 = vmatprep.mubr.f32.mxu1 %v8853_v1  ;;  %v483_v4 = vld [vmem:[#allocation4 + $0x3c0] sm:$0xff]  ;;  %v485_v5 = vld [vmem:[#allocation4 + $0x3d0] sm:$0xff]  ;;  %v476_v6 = vld [vmem:[#allocation4 + $0x388] sm:$0xff] }
  0x12   :  { %627 = vmatprep.subr.mxu0 %v484_v2  ;;  %698 = vmatprep.subr.mxu1 %v486_v3  ;;  %v478_v7 = vld [vmem:[#allocation4 + $0x398] sm:$0xff]  ;;  %v475_v8 = vld [vmem:[#allocation4 + $0x380] sm:$0xff]  ;;  %v477_v9 = vld [vmem:[#allocation4 + $0x390] sm:$0xff] }
  0x13   :  { %628 = vmatpush1.msra.mxu0 %v483_v4  ;;  %699 = vmatpush1.msra.mxu1 %v485_v5  ;;  %v468_v10 = vld [vmem:[#allocation4 + $0x348] sm:$0xff]  ;;  %v470_v11 = vld [vmem:[#allocation4 + $0x358] sm:$0xff]  ;;  %v467_v12 = vld [vmem:[#allocation4 + $0x340] sm:$0xff] }
  0x14   :  { %629 = vmatprep.subr.mxu0 %v476_v6  ;;  %700 = vmatprep.subr.mxu1 %v478_v7  ;;  %v469_v13 = vld [vmem:[#allocation4 + $0x350] sm:$0xff]  ;;  %v460_v14 = vld [vmem:[#allocation4 + $0x308] sm:$0xff]  ;;  %v462_v15 = vld [vmem:[#allocation4 + $0x318] sm:$0xff] }
  0x15   :  { %630 = vmatpush1.msra.mxu0 %v475_v8  ;;  %701 = vmatpush1.msra.mxu1 %v477_v9  ;;  %v459_v16 = vld [vmem:[#allocation4 + $0x300] sm:$0xff]  ;;  %v461_v17 = vld [vmem:[#allocation4 + $0x310] sm:$0xff]  ;;  %v452_v18 = vld [vmem:[#allocation4 + $0x2c8] sm:$0xff] }
  0x16   :  { %631 = vmatprep.subr.mxu0 %v468_v10  ;;  %702 = vmatprep.subr.mxu1 %v470_v11  ;;  %v454_v19 = vld [vmem:[#allocation4 + $0x2d8] sm:$0xff]  ;;  %v451_v20 = vld [vmem:[#allocation4 + $0x2c0] sm:$0xff]  ;;  %v453_v21 = vld [vmem:[#allocation4 + $0x2d0] sm:$0xff] }
  0x17   :  { %632 = vmatpush1.msra.mxu0 %v467_v12  ;;  %703 = vmatpush1.msra.mxu1 %v469_v13  ;;  %v4558_v22 = vld [vmem:[#allocation4 + $0x288] sm:$0xff]  ;;  %v4560_v23 = vld [vmem:[#allocation4 + $0x298] sm:$0xff]  ;;  %v4562_v24 = vld [vmem:[#allocation4 + $0x280] sm:$0xff] }
  0x18   :  { %633 = vmatprep.subr.mxu0 %v460_v14  ;;  %704 = vmatprep.subr.mxu1 %v462_v15  ;;  %v4564_v25 = vld [vmem:[#allocation4 + $0x290] sm:$0xff]  ;;  %v4566_v26 = vld [vmem:[#allocation4 + $0x248] sm:$0xff]  ;;  %v4568_v27 = vld [vmem:[#allocation4 + $0x258] sm:$0xff] }
  0x19   :  { %634 = vmatpush1.msra.mxu0 %v459_v16  ;;  %705 = vmatpush1.msra.mxu1 %v461_v17  ;;  %v4572_v28 = vld [vmem:[#allocation4 + $0x240] sm:$0xff]  ;;  %v4574_v29 = vld [vmem:[#allocation4 + $0x250] sm:$0xff]  ;;  %v4578_v30 = vld [vmem:[#allocation4 + $0x208] sm:$0xff] }
  0x1a   :  { %635 = vmatprep.subr.mxu0 %v452_v18  ;;  %706 = vmatprep.subr.mxu1 %v454_v19  ;;  %v4580_v31 = vld [vmem:[#allocation4 + $0x218] sm:$0xff]  ;;  %v4584_v32 = vld [vmem:[#allocation4 + $0x200] sm:$0xff]  ;;  %v4586_v33 = vld [vmem:[#allocation4 + $0x210] sm:$0xff] }
  0x1b   :  { %636 = vmatpush1.msra.mxu0 %v451_v20  ;;  %707 = vmatpush1.msra.mxu1 %v453_v21  ;;  %v4590_v34 = vld [vmem:[#allocation4 + $0x1c8] sm:$0xff]  ;;  %v4592_v35 = vld [vmem:[#allocation4 + $0x1d8] sm:$0xff]  ;;  %v4596_v36 = vld [vmem:[#allocation4 + $0x1c0] sm:$0xff] }
  0x1c   :  { %637 = vmatprep.subr.mxu0 %v4558_v22  ;;  %708 = vmatprep.subr.mxu1 %v4560_v23  ;;  %v4598_v37 = vld [vmem:[#allocation4 + $0x1d0] sm:$0xff]  ;;  %v4602_v38 = vld [vmem:[#allocation4 + $0x188] sm:$0xff]  ;;  %v4604_v39 = vld [vmem:[#allocation4 + $0x198] sm:$0xff] }
  0x1d   :  { %638 = vmatpush1.msra.mxu0 %v4562_v24  ;;  %709 = vmatpush1.msra.mxu1 %v4564_v25  ;;  %v4608_v40 = vld [vmem:[#allocation4 + $0x180] sm:$0xff]  ;;  %v4610_v41 = vld [vmem:[#allocation4 + $0x190] sm:$0xff]  ;;  %v4614_v42 = vld [vmem:[#allocation4 + $0x148] sm:$0xff] }
  0x1e   :  { %639 = vmatprep.subr.mxu0 %v4566_v26  ;;  %710 = vmatprep.subr.mxu1 %v4568_v27  ;;  %v4616_v43 = vld [vmem:[#allocation4 + $0x158] sm:$0xff]  ;;  %v4620_v44 = vld [vmem:[#allocation4 + $0x140] sm:$0xff]  ;;  %v4622_v45 = vld [vmem:[#allocation4 + $0x150] sm:$0xff] }
  0x1f   :  { %640 = vmatpush1.msra.mxu0 %v4572_v28  ;;  %711 = vmatpush1.msra.mxu1 %v4574_v29  ;;  %v4626_v46 = vld [vmem:[#allocation4 + $0x108] sm:$0xff]  ;;  %v4628_v47 = vld [vmem:[#allocation4 + $0x118] sm:$0xff]  ;;  %v4632_v48 = vld [vmem:[#allocation4 + $0x100] sm:$0xff] }
  0x20   :  { %641 = vmatprep.subr.mxu0 %v4578_v30  ;;  %712 = vmatprep.subr.mxu1 %v4580_v31  ;;  %v4634_v49 = vld [vmem:[#allocation4 + $0x110] sm:$0xff]  ;;  %v4638_v50 = vld [vmem:[#allocation4 + $0xc8] sm:$0xff]  ;;  %v4640_v51 = vld [vmem:[#allocation4 + $0xd8] sm:$0xff] }
  0x21   :  { %642 = vmatpush1.msra.mxu0 %v4584_v32  ;;  %713 = vmatpush1.msra.mxu1 %v4586_v33  ;;  %v4644_v52 = vld [vmem:[#allocation4 + $0xc0] sm:$0xff]  ;;  %v4646_v53 = vld [vmem:[#allocation4 + $0xd0] sm:$0xff]  ;;  %v4650_v54 = vld [vmem:[#allocation4 + $0x88] sm:$0xff] }
  0x22   :  { %643 = vmatprep.subr.mxu0 %v4590_v34  ;;  %714 = vmatprep.subr.mxu1 %v4592_v35  ;;  %v4652_v55 = vld [vmem:[#allocation4 + $0x98] sm:$0xff]  ;;  %v4656_v56 = vld [vmem:[#allocation4 + $0x80] sm:$0xff]  ;;  %v4658_v57 = vld [vmem:[#allocation4 + $0x90] sm:$0xff] }
  0x23   :  { %644 = vmatpush1.msra.mxu0 %v4596_v36  ;;  %715 = vmatpush1.msra.mxu1 %v4598_v37  ;;  %v4662_v58 = vld [vmem:[#allocation4 + $0x48] sm:$0xff]  ;;  %v4664_v59 = vld [vmem:[#allocation4 + $0x58] sm:$0xff]  ;;  %v4668_v60 = vld [vmem:[#allocation4 + $0x40] sm:$0xff] }
  0x24   :  { %645 = vmatprep.subr.mxu0 %v4602_v38  ;;  %716 = vmatprep.subr.mxu1 %v4604_v39  ;;  %v4670_v61 = vld [vmem:[#allocation4 + $0x50] sm:$0xff]  ;;  %v4674_v62 = vld [vmem:[#allocation4 + $0x8] sm:$0xff]  ;;  %v4676_v63 = vld [vmem:[#allocation4 + $0x18] sm:$0xff] }
  0x25   :  { %646 = vmatpush1.msra.mxu0 %v4608_v40  ;;  %717 = vmatpush1.msra.mxu1 %v4610_v41  ;;  %v4680_v0 = vld [vmem:[#allocation4] sm:$0xff]  ;;  %v4682_v2 = vld [vmem:[#allocation4 + $0x10] sm:$0xff]  ;;  %v4686_v3 = vld [vmem:[#allocation4 + $0x7c8] sm:$0xff] }
  0x26   :  { %647 = vmatprep.subr.mxu0 %v4614_v42  ;;  %718 = vmatprep.subr.mxu1 %v4616_v43  ;;  %v4688_v4 = vld [vmem:[#allocation4 + $0x7d8] sm:$0xff]  ;;  %v4692_v5 = vld [vmem:[#allocation4 + $0x7c0] sm:$0xff]  ;;  %v4694_v6 = vld [vmem:[#allocation4 + $0x7d0] sm:$0xff] }
  0x27   :  { %648 = vmatpush1.msra.mxu0 %v4620_v44  ;;  %719 = vmatpush1.msra.mxu1 %v4622_v45  ;;  %v4698_v7 = vld [vmem:[#allocation4 + $0x788] sm:$0xff]  ;;  %v4700_v8 = vld [vmem:[#allocation4 + $0x798] sm:$0xff]  ;;  %v4704_v9 = vld [vmem:[#allocation4 + $0x780] sm:$0xff] }
  0x28   :  { %649 = vmatprep.subr.mxu0 %v4626_v46  ;;  %720 = vmatprep.subr.mxu1 %v4628_v47  ;;  %9637 = vst [vmem:[#allocation7_spill] sm:$0xff] %v4700_v8  ;;  %9638 = vst [vmem:[#allocation8_spill] sm:$0xff] %v4704_v9  ;;  %v4706_v10 = vld [vmem:[#allocation4 + $0x790] sm:$0xff]  ;;  %v4710_v11 = vld [vmem:[#allocation4 + $0x748] sm:$0xff] }
  0x29   :  { %650 = vmatpush1.msra.mxu0 %v4632_v48  ;;  %721 = vmatpush1.msra.mxu1 %v4634_v49  ;;  %9639 = vst [vmem:[#allocation9_spill] sm:$0xff] %v4706_v10  ;;  %9640 = vst [vmem:[#allocation10_spill] sm:$0xff] %v4710_v11  ;;  %v4712_v12 = vld [vmem:[#allocation4 + $0x758] sm:$0xff]  ;;  %v4716_v13 = vld [vmem:[#allocation4 + $0x740] sm:$0xff] }
  0x2a   :  { %651 = vmatprep.subr.mxu0 %v4638_v50  ;;  %722 = vmatprep.subr.mxu1 %v4640_v51  ;;  %9641 = vst [vmem:[#allocation11_spill] sm:$0xff] %v4712_v12  ;;  %9642 = vst [vmem:[#allocation12_spill] sm:$0xff] %v4716_v13  ;;  %v4718_v14 = vld [vmem:[#allocation4 + $0x750] sm:$0xff]  ;;  %v4722_v15 = vld [vmem:[#allocation4 + $0x708] sm:$0xff] }
  0x2b   :  { %652 = vmatpush1.msra.mxu0 %v4644_v52  ;;  %723 = vmatpush1.msra.mxu1 %v4646_v53  ;;  %9643 = vst [vmem:[#allocation13_spill] sm:$0xff] %v4718_v14  ;;  %9644 = vst [vmem:[#allocation14_spill] sm:$0xff] %v4722_v15  ;;  %v4724_v16 = vld [vmem:[#allocation4 + $0x718] sm:$0xff]  ;;  %v4728_v17 = vld [vmem:[#allocation4 + $0x700] sm:$0xff] }
  0x2c   :  { %653 = vmatprep.subr.mxu0 %v4650_v54  ;;  %724 = vmatprep.subr.mxu1 %v4652_v55  ;;  %9645 = vst [vmem:[#allocation15_spill] sm:$0xff] %v4724_v16  ;;  %9646 = vst [vmem:[#allocation16_spill] sm:$0xff] %v4728_v17  ;;  %v4730_v18 = vld [vmem:[#allocation4 + $0x710] sm:$0xff]  ;;  %v4734_v19 = vld [vmem:[#allocation4 + $0x6c8] sm:$0xff] }
  0x2d   :  { %654 = vmatpush1.msra.mxu0 %v4656_v56  ;;  %725 = vmatpush1.msra.mxu1 %v4658_v57  ;;  %9647 = vst [vmem:[#allocation17_spill] sm:$0xff] %v4730_v18  ;;  %9648 = vst [vmem:[#allocation18_spill] sm:$0xff] %v4734_v19  ;;  %v4736_v20 = vld [vmem:[#allocation4 + $0x6d8] sm:$0xff]  ;;  %v4740_v21 = vld [vmem:[#allocation4 + $0x6c0] sm:$0xff] }
  0x2e   :  { %655 = vmatprep.subr.mxu0 %v4662_v58  ;;  %726 = vmatprep.subr.mxu1 %v4664_v59  ;;  %9649 = vst [vmem:[#allocation19_spill] sm:$0xff] %v4736_v20  ;;  %9650 = vst [vmem:[#allocation20_spill] sm:$0xff] %v4740_v21  ;;  %v4742_v1 = vld [vmem:[#allocation4 + $0x6d0] sm:$0xff] }
  0x2f   :  { %656 = vmatpush1.msra.mxu0 %v4668_v60  ;;  %727 = vmatpush1.msra.mxu1 %v4670_v61  ;;  %9651 = vst [vmem:[#allocation21_spill] sm:$0xff] %v4742_v1 }
  0x30   :  { %657 = vmatprep.subr.mxu0 %v4674_v62  ;;  %728 = vmatprep.subr.mxu1 %v4676_v63 }
  0x31   :  { %658 = vmatpush1.msra.mxu0 %v4680_v0  ;;  %729 = vmatpush1.msra.mxu1 %v4682_v2 }
  0x32   :  { %659 = vmatprep.subr.mxu0 %v4686_v3  ;;  %730 = vmatprep.subr.mxu1 %v4688_v4 }
  0x33   :  { %660 = vmatpush2.msra.mxu0 %v4692_v5  ;;  %731 = vmatpush2.msra.mxu1 %v4694_v6 }
  0x34   :  { %661 = vmatprep.subr.mxu0 %v4698_v7  ;;  %732 = vmatprep.subr.mxu1 %v4700_v8  ;;  %v4892_v8 = vld [vmem:[#allocation4 + $0x338] sm:$0xff] }
  0x35   :  { %662 = vmatpush2.msra.mxu0 %v4704_v9  ;;  %733 = vmatpush2.msra.mxu1 %v4706_v10  ;;  %v473_v10 = vld [vmem:[#allocation4 + $0x370] sm:$0xff]  ;;  %v4890_v9 = vld [vmem:[#allocation4 + $0x328] sm:$0xff] }
  0x36   :  { %663 = vmatprep.subr.mxu0 %v4710_v11  ;;  %734 = vmatprep.subr.mxu1 %v4712_v12  ;;  %v4746_v12 = vld [vmem:[#allocation4 + $0x688] sm:$0xff] }
  0x37   :  { %664 = vmatpush2.msra.mxu0 %v4716_v13  ;;  %735 = vmatpush2.msra.mxu1 %v4718_v14  ;;  %9652 = vst [vmem:[#allocation22_spill] sm:$0xff] %v4746_v12  ;;  %v4748_v13 = vld [vmem:[#allocation4 + $0x698] sm:$0xff]  ;;  %v4752_v14 = vld [vmem:[#allocation4 + $0x680] sm:$0xff]  ;;  %v472_v11 = vld [vmem:[#allocation4 + $0x368] sm:$0xff] }
  0x38   :  { %665 = vmatprep.subr.mxu0 %v4722_v15  ;;  %736 = vmatprep.subr.mxu1 %v4724_v16  ;;  %9653 = vst [vmem:[#allocation23_spill] sm:$0xff] %v4748_v13  ;;  %9654 = vst [vmem:[#allocation24_spill] sm:$0xff] %v4752_v14  ;;  %v4754_v15 = vld [vmem:[#allocation4 + $0x690] sm:$0xff]  ;;  %v4758_v16 = vld [vmem:[#allocation4 + $0x648] sm:$0xff] }
  0x39   :  { %666 = vmatpush2.msra.mxu0 %v4728_v17  ;;  %737 = vmatpush2.msra.mxu1 %v4730_v18  ;;  %9655 = vst [vmem:[#allocation25_spill] sm:$0xff] %v4754_v15  ;;  %9656 = vst [vmem:[#allocation26_spill] sm:$0xff] %v4758_v16  ;;  %v4760_v17 = vld [vmem:[#allocation4 + $0x658] sm:$0xff]  ;;  %v4764_v18 = vld [vmem:[#allocation4 + $0x640] sm:$0xff] }
  0x3a   :  { %667 = vmatprep.subr.mxu0 %v4734_v19  ;;  %738 = vmatprep.subr.mxu1 %v4736_v20  ;;  %9657 = vst [vmem:[#allocation27_spill] sm:$0xff] %v4760_v17  ;;  %9658 = vst [vmem:[#allocation28_spill] sm:$0xff] %v4764_v18  ;;  %v4766_v19 = vld [vmem:[#allocation4 + $0x650] sm:$0xff]  ;;  %v4770_v20 = vld [vmem:[#allocation4 + $0x608] sm:$0xff] }
  0x3b   :  { %668 = vmatpush2.msra.mxu0 %v4740_v21  ;;  %739 = vmatpush2.msra.mxu1 %v4742_v1  ;;  %9659 = vst [vmem:[#allocation29_spill] sm:$0xff] %v4766_v19  ;;  %9660 = vst [vmem:[#allocation30_spill] sm:$0xff] %v4770_v20  ;;  %v4772_v21 = vld [vmem:[#allocation4 + $0x618] sm:$0xff]  ;;  %v4776_v1 = vld [vmem:[#allocation4 + $0x600] sm:$0xff] }
  0x3c   :  { %669 = vmatprep.subr.mxu0 %v4746_v12  ;;  %740 = vmatprep.subr.mxu1 %v4748_v13  ;;  %9661 = vst [vmem:[#allocation31_spill] sm:$0xff] %v4772_v21  ;;  %9662 = vst [vmem:[#allocation32_spill] sm:$0xff] %v4776_v1  ;;  %v4778_v12 = vld [vmem:[#allocation4 + $0x610] sm:$0xff]  ;;  %v4782_v13 = vld [vmem:[#allocation4 + $0x5c8] sm:$0xff] }
  0x3d   :  { %670 = vmatpush2.msra.mxu0 %v4752_v14  ;;  %741 = vmatpush2.msra.mxu1 %v4754_v15  ;;  %9663 = vst [vmem:[#allocation33_spill] sm:$0xff] %v4778_v12  ;;  %9664 = vst [vmem:[#allocation34_spill] sm:$0xff] %v4782_v13  ;;  %v4784_v14 = vld [vmem:[#allocation4 + $0x5d8] sm:$0xff]  ;;  %v4788_v15 = vld [vmem:[#allocation4 + $0x5c0] sm:$0xff] }
  0x3e   :  { %671 = vmatprep.subr.mxu0 %v4758_v16  ;;  %742 = vmatprep.subr.mxu1 %v4760_v17  ;;  %9665 = vst [vmem:[#allocation35_spill] sm:$0xff] %v4784_v14  ;;  %9666 = vst [vmem:[#allocation36_spill] sm:$0xff] %v4788_v15  ;;  %v4790_v16 = vld [vmem:[#allocation4 + $0x5d0] sm:$0xff]  ;;  %v4794_v17 = vld [vmem:[#allocation4 + $0x588] sm:$0xff] }
  0x3f   :  { %672 = vmatpush2.msra.mxu0 %v4764_v18  ;;  %743 = vmatpush2.msra.mxu1 %v4766_v19  ;;  %9667 = vst [vmem:[#allocation37_spill] sm:$0xff] %v4790_v16  ;;  %9668 = vst [vmem:[#allocation38_spill] sm:$0xff] %v4794_v17  ;;  %v4796_v18 = vld [vmem:[#allocation4 + $0x598] sm:$0xff]  ;;  %v4800_v19 = vld [vmem:[#allocation4 + $0x580] sm:$0xff] }
  0x40   :  { %673 = vmatprep.subr.mxu0 %v4770_v20  ;;  %744 = vmatprep.subr.mxu1 %v4772_v21  ;;  %9669 = vst [vmem:[#allocation39_spill] sm:$0xff] %v4796_v18  ;;  %9670 = vst [vmem:[#allocation40_spill] sm:$0xff] %v4800_v19  ;;  %v4802_v20 = vld [vmem:[#allocation4 + $0x590] sm:$0xff]  ;;  %v4806_v21 = vld [vmem:[#allocation4 + $0x548] sm:$0xff] }
  0x41   :  { %674 = vmatpush2.msra.mxu0 %v4776_v1  ;;  %745 = vmatpush2.msra.mxu1 %v4778_v12  ;;  %9671 = vst [vmem:[#allocation41_spill] sm:$0xff] %v4802_v20  ;;  %9672 = vst [vmem:[#allocation42_spill] sm:$0xff] %v4806_v21  ;;  %v4808_v1 = vld [vmem:[#allocation4 + $0x558] sm:$0xff]  ;;  %v4812_v12 = vld [vmem:[#allocation4 + $0x540] sm:$0xff] }
  0x42   :  { %675 = vmatprep.subr.mxu0 %v4782_v13  ;;  %746 = vmatprep.subr.mxu1 %v4784_v14  ;;  %9673 = vst [vmem:[#allocation43_spill] sm:$0xff] %v4808_v1  ;;  %9674 = vst [vmem:[#allocation44_spill] sm:$0xff] %v4812_v12  ;;  %v4814_v13 = vld [vmem:[#allocation4 + $0x550] sm:$0xff]  ;;  %v4818_v14 = vld [vmem:[#allocation4 + $0x508] sm:$0xff] }
  0x43   :  { %676 = vmatpush2.msra.mxu0 %v4788_v15  ;;  %747 = vmatpush2.msra.mxu1 %v4790_v16  ;;  %9675 = vst [vmem:[#allocation45_spill] sm:$0xff] %v4814_v13  ;;  %9676 = vst [vmem:[#allocation46_spill] sm:$0xff] %v4818_v14  ;;  %v4820_v15 = vld [vmem:[#allocation4 + $0x518] sm:$0xff]  ;;  %v4824_v16 = vld [vmem:[#allocation4 + $0x500] sm:$0xff] }
  0x44   :  { %677 = vmatprep.subr.mxu0 %v4794_v17  ;;  %748 = vmatprep.subr.mxu1 %v4796_v18  ;;  %9677 = vst [vmem:[#allocation47_spill] sm:$0xff] %v4820_v15  ;;  %9678 = vst [vmem:[#allocation48_spill] sm:$0xff] %v4824_v16  ;;  %v4826_v17 = vld [vmem:[#allocation4 + $0x510] sm:$0xff]  ;;  %v4830_v18 = vld [vmem:[#allocation4 + $0x4c8] sm:$0xff] }
  0x45   :  { %678 = vmatpush2.msra.mxu0 %v4800_v19  ;;  %749 = vmatpush2.msra.mxu1 %v4802_v20  ;;  %9679 = vst [vmem:[#allocation49_spill] sm:$0xff] %v4826_v17  ;;  %9680 = vst [vmem:[#allocation50_spill] sm:$0xff] %v4830_v18  ;;  %v4832_v19 = vld [vmem:[#allocation4 + $0x4d8] sm:$0xff]  ;;  %v4836_v20 = vld [vmem:[#allocation4 + $0x4c0] sm:$0xff] }
  0x46   :  { %679 = vmatprep.subr.mxu0 %v4806_v21  ;;  %750 = vmatprep.subr.mxu1 %v4808_v1  ;;  %9681 = vst [vmem:[#allocation51_spill] sm:$0xff] %v4832_v19  ;;  %9682 = vst [vmem:[#allocation52_spill] sm:$0xff] %v4836_v20  ;;  %v4838_v21 = vld [vmem:[#allocation4 + $0x4d0] sm:$0xff]  ;;  %v4842_v1 = vld [vmem:[#allocation4 + $0x488] sm:$0xff] }
  0x47   :  { %680 = vmatpush2.msra.mxu0 %v4812_v12  ;;  %751 = vmatpush2.msra.mxu1 %v4814_v13  ;;  %9683 = vst [vmem:[#allocation53_spill] sm:$0xff] %v4838_v21  ;;  %9684 = vst [vmem:[#allocation54_spill] sm:$0xff] %v4842_v1  ;;  %v4844_v12 = vld [vmem:[#allocation4 + $0x498] sm:$0xff]  ;;  %v4848_v13 = vld [vmem:[#allocation4 + $0x480] sm:$0xff] }
  0x48   :  { %681 = vmatprep.subr.mxu0 %v4818_v14  ;;  %752 = vmatprep.subr.mxu1 %v4820_v15  ;;  %9685 = vst [vmem:[#allocation55_spill] sm:$0xff] %v4844_v12  ;;  %9686 = vst [vmem:[#allocation56_spill] sm:$0xff] %v4848_v13  ;;  %v4850_v14 = vld [vmem:[#allocation4 + $0x490] sm:$0xff]  ;;  %v4854_v15 = vld [vmem:[#allocation4 + $0x448] sm:$0xff] }
  0x49   :  { %682 = vmatpush2.msra.mxu0 %v4824_v16  ;;  %753 = vmatpush2.msra.mxu1 %v4826_v17  ;;  %9687 = vst [vmem:[#allocation57_spill] sm:$0xff] %v4850_v14  ;;  %9688 = vst [vmem:[#allocation58_spill] sm:$0xff] %v4854_v15  ;;  %v4856_v16 = vld [vmem:[#allocation4 + $0x458] sm:$0xff]  ;;  %v4860_v17 = vld [vmem:[#allocation4 + $0x440] sm:$0xff] }
  0x4a   :  { %683 = vmatprep.subr.mxu0 %v4830_v18  ;;  %754 = vmatprep.subr.mxu1 %v4832_v19  ;;  %9689 = vst [vmem:[#allocation59_spill] sm:$0xff] %v4856_v16  ;;  %9690 = vst [vmem:[#allocation60_spill] sm:$0xff] %v4860_v17  ;;  %v4862_v18 = vld [vmem:[#allocation4 + $0x450] sm:$0xff]  ;;  %v4866_v19 = vld [vmem:[#allocation4 + $0x408] sm:$0xff] }
  0x4b   :  { %684 = vmatpush2.msra.mxu0 %v4836_v20  ;;  %755 = vmatpush2.msra.mxu1 %v4838_v21  ;;  %9691 = vst [vmem:[#allocation61_spill] sm:$0xff] %v4862_v18  ;;  %9692 = vst [vmem:[#allocation62_spill] sm:$0xff] %v4866_v19  ;;  %v4868_v20 = vld [vmem:[#allocation4 + $0x418] sm:$0xff]  ;;  %v4872_v21 = vld [vmem:[#allocation4 + $0x400] sm:$0xff] }
  0x4c   :  { %685 = vmatprep.subr.mxu0 %v4842_v1  ;;  %756 = vmatprep.subr.mxu1 %v4844_v12  ;;  %9693 = vst [vmem:[#allocation63_spill] sm:$0xff] %v4868_v20  ;;  %9694 = vst [vmem:[#allocation64_spill] sm:$0xff] %v4872_v21  ;;  %v4874_v1 = vld [vmem:[#allocation4 + $0x410] sm:$0xff]  ;;  %v9698_v12 = vmov 0.0  }
  0x4d   :  { %686 = vmatpush2.msra.mxu0 %v4848_v13  ;;  %757 = vmatpush2.msra.mxu1 %v4850_v14  ;;  %9695 = vst [vmem:[#allocation65_spill] sm:$0xff] %v4874_v1  ;;  %v4880_v14 = vld [vmem:[#allocation4 + $0x3e8] sm:$0xff]  ;;  %v4882_v13 = vld [vmem:[#allocation4 + $0x3f8] sm:$0xff] }
  0x4e   :  { %687 = vmatprep.subr.mxu0 %v4854_v15  ;;  %758 = vmatprep.subr.mxu1 %v4856_v16  ;;  %9696 = vst [vmem:[#allocation66_spill] sm:$0xff] %v4880_v14  ;;  %9697 = vst [vmem:[#allocation67_spill] sm:$0xff] %v4882_v13  ;;  %v487_v16 = vld [vmem:[#allocation4 + $0x3e0] sm:$0xff]  ;;  %v489_v15 = vld [vmem:[#allocation4 + $0x3f0] sm:$0xff] }
  0x4f   :  { %688 = vmatpush2.msra.mxu0 %v4860_v17  ;;  %759 = vmatpush2.msra.mxu1 %v4862_v18  ;;  %v480_v17 = vld [vmem:[#allocation4 + $0x3a8] sm:$0xff]  ;;  %v482_v18 = vld [vmem:[#allocation4 + $0x3b8] sm:$0xff] }
  0x50   :  { %689 = vmatprep.subr.mxu0 %v4866_v19  ;;  %760 = vmatprep.subr.mxu1 %v4868_v20  ;;  %v479_v20 = vld [vmem:[#allocation4 + $0x3a0] sm:$0xff]  ;;  %v481_v19 = vld [vmem:[#allocation4 + $0x3b0] sm:$0xff] }
  0x51   :  { %690 = vmatpush2.msra.mxu0 %v4872_v21  ;;  %761 = vmatpush2.msra.mxu1 %v4874_v1  ;;  %v474_v21 = vld [vmem:[#allocation4 + $0x378] sm:$0xff]  ;;  %v471_v1 = vld [vmem:[#allocation4 + $0x360] sm:$0xff] }
  0x52   :  { %692 = vmatmul.mubr.f32.vlgmr.msra.gmra.mxu0 %v9698_v12  ;;  %763 = vmatmul.mubr.f32.vlgmr.msra.gmra.mxu1 %v9698_v12 }
  0x53   :  { %769 = vmatprep.subr.mxu0 %v4880_v14  ;;  %840 = vmatprep.subr.mxu1 %v4882_v13  ;;  %v4894_v14 = vld [vmem:[#allocation4 + $0x320] sm:$0xff]  ;;  %v4896_v13 = vld [vmem:[#allocation4 + $0x330] sm:$0xff] }
  0x54   :  { %770 = vmatpush1.msra.mxu0 %v487_v16  ;;  %841 = vmatpush1.msra.mxu1 %v489_v15  ;;  %9699 = vst [vmem:[#allocation68_spill] sm:$0xff] %v4896_v13  ;;  %v4898_v15 = vld [vmem:[#allocation4 + $0x2e8] sm:$0xff]  ;;  %v4900_v16 = vld [vmem:[#allocation4 + $0x2f8] sm:$0xff] }
  0x55   :  { %771 = vmatprep.subr.mxu0 %v480_v17  ;;  %842 = vmatprep.subr.mxu1 %v482_v18  ;;  %9700 = vst [vmem:[#allocation69_spill] sm:$0xff] %v4898_v15  ;;  %9701 = vst [vmem:[#allocation70_spill] sm:$0xff] %v4900_v16  ;;  %v4904_v17 = vld [vmem:[#allocation4 + $0x2e0] sm:$0xff]  ;;  %v4906_v18 = vld [vmem:[#allocation4 + $0x2f0] sm:$0xff] }
  0x56   :  { %772 = vmatpush1.msra.mxu0 %v479_v20  ;;  %843 = vmatpush1.msra.mxu1 %v481_v19  ;;  %9702 = vst [vmem:[#allocation71_spill] sm:$0xff] %v4904_v17  ;;  %9703 = vst [vmem:[#allocation72_spill] sm:$0xff] %v4906_v18  ;;  %v4918_v19 = vld [vmem:[#allocation4 + $0x2b0] sm:$0xff]  ;;  %v4922_v20 = vld [vmem:[#allocation4 + $0x268] sm:$0xff] }
  0x57   :  { %773 = vmatprep.subr.mxu0 %v472_v11  ;;  %844 = vmatprep.subr.mxu1 %v474_v21  ;;  %v4910_v11 = vld [vmem:[#allocation4 + $0x2a8] sm:$0xff]  ;;  %9707 = vst [vmem:[#allocation76_spill] sm:$0xff] %v4918_v19  ;;  %9708 = vst [vmem:[#allocation77_spill] sm:$0xff] %v4922_v20  ;;  %v4924_v21 = vld [vmem:[#allocation4 + $0x278] sm:$0xff] }
  0x58   :  { %774 = vmatpush1.msra.mxu0 %v471_v1  ;;  %845 = vmatpush1.msra.mxu1 %v473_v10  ;;  %9704 = vst [vmem:[#allocation73_spill] sm:$0xff] %v4910_v11  ;;  %v4912_v1 = vld [vmem:[#allocation4 + $0x2b8] sm:$0xff]  ;;  %v4916_v10 = vld [vmem:[#allocation4 + $0x2a0] sm:$0xff]  ;;  %9709 = vst [vmem:[#allocation78_spill] sm:$0xff] %v4924_v21 }
  0x59   :  { %775 = vmatprep.subr.mxu0 %v4890_v9  ;;  %846 = vmatprep.subr.mxu1 %v4892_v8  ;;  %9705 = vst [vmem:[#allocation74_spill] sm:$0xff] %v4912_v1  ;;  %9706 = vst [vmem:[#allocation75_spill] sm:$0xff] %v4916_v10 }
  0x5a   :  { %776 = vmatpush1.msra.mxu0 %v4894_v14  ;;  %847 = vmatpush1.msra.mxu1 %v4896_v13  ;;  %v4928_v13 = vld [vmem:[#allocation4 + $0x260] sm:$0xff] }
  0x5b   :  { %777 = vmatprep.subr.mxu0 %v4898_v15  ;;  %848 = vmatprep.subr.mxu1 %v4900_v16  ;;  %9710 = vst [vmem:[#allocation79_spill] sm:$0xff] %v4928_v13  ;;  %v4930_v15 = vld [vmem:[#allocation4 + $0x270] sm:$0xff]  ;;  %v4934_v16 = vld [vmem:[#allocation4 + $0x228] sm:$0xff] }
  0x5c   :  { %778 = vmatpush1.msra.mxu0 %v4904_v17  ;;  %849 = vmatpush1.msra.mxu1 %v4906_v18  ;;  %9711 = vst [vmem:[#allocation80_spill] sm:$0xff] %v4930_v15  ;;  %9712 = vst [vmem:[#allocation81_spill] sm:$0xff] %v4934_v16  ;;  %v4936_v17 = vld [vmem:[#allocation4 + $0x238] sm:$0xff]  ;;  %v4940_v18 = vld [vmem:[#allocation4 + $0x220] sm:$0xff] }
  0x5d   :  { %779 = vmatprep.subr.mxu0 %v4910_v11  ;;  %850 = vmatprep.subr.mxu1 %v4912_v1  ;;  %9713 = vst [vmem:[#allocation82_spill] sm:$0xff] %v4936_v17  ;;  %9714 = vst [vmem:[#allocation83_spill] sm:$0xff] %v4940_v18  ;;  %v4942_v11 = vld [vmem:[#allocation4 + $0x230] sm:$0xff]  ;;  %v4946_v1 = vld [vmem:[#allocation4 + $0x1e8] sm:$0xff] }
  0x5e   :  { %780 = vmatpush1.msra.mxu0 %v4916_v10  ;;  %851 = vmatpush1.msra.mxu1 %v4918_v19  ;;  %9715 = vst [vmem:[#allocation84_spill] sm:$0xff] %v4942_v11  ;;  %9716 = vst [vmem:[#allocation85_spill] sm:$0xff] %v4946_v1  ;;  %v4948_v10 = vld [vmem:[#allocation4 + $0x1f8] sm:$0xff]  ;;  %v4952_v19 = vld [vmem:[#allocation4 + $0x1e0] sm:$0xff] }
  0x5f   :  { %781 = vmatprep.subr.mxu0 %v4922_v20  ;;  %852 = vmatprep.subr.mxu1 %v4924_v21  ;;  %9717 = vst [vmem:[#allocation86_spill] sm:$0xff] %v4948_v10  ;;  %9718 = vst [vmem:[#allocation87_spill] sm:$0xff] %v4952_v19  ;;  %v4954_v20 = vld [vmem:[#allocation4 + $0x1f0] sm:$0xff]  ;;  %v4958_v21 = vld [vmem:[#allocation4 + $0x1a8] sm:$0xff] }
  0x60   :  { %782 = vmatpush1.msra.mxu0 %v4928_v13  ;;  %853 = vmatpush1.msra.mxu1 %v4930_v15  ;;  %9719 = vst [vmem:[#allocation88_spill] sm:$0xff] %v4954_v20  ;;  %9720 = vst [vmem:[#allocation89_spill] sm:$0xff] %v4958_v21  ;;  %v4960_v13 = vld [vmem:[#allocation4 + $0x1b8] sm:$0xff]  ;;  %v4964_v15 = vld [vmem:[#allocation4 + $0x1a0] sm:$0xff] }
  0x61   :  { %783 = vmatprep.subr.mxu0 %v4934_v16  ;;  %854 = vmatprep.subr.mxu1 %v4936_v17  ;;  %9721 = vst [vmem:[#allocation90_spill] sm:$0xff] %v4960_v13  ;;  %9722 = vst [vmem:[#allocation91_spill] sm:$0xff] %v4964_v15  ;;  %v4966_v16 = vld [vmem:[#allocation4 + $0x1b0] sm:$0xff]  ;;  %v4970_v17 = vld [vmem:[#allocation4 + $0x168] sm:$0xff] }
  0x62   :  { %784 = vmatpush1.msra.mxu0 %v4940_v18  ;;  %855 = vmatpush1.msra.mxu1 %v4942_v11  ;;  %9723 = vst [vmem:[#allocation92_spill] sm:$0xff] %v4966_v16  ;;  %9724 = vst [vmem:[#allocation93_spill] sm:$0xff] %v4970_v17  ;;  %v4972_v18 = vld [vmem:[#allocation4 + $0x178] sm:$0xff]  ;;  %v4976_v11 = vld [vmem:[#allocation4 + $0x160] sm:$0xff] }
  0x63   :  { %785 = vmatprep.subr.mxu0 %v4946_v1  ;;  %856 = vmatprep.subr.mxu1 %v4948_v10  ;;  %9725 = vst [vmem:[#allocation94_spill] sm:$0xff] %v4972_v18  ;;  %9726 = vst [vmem:[#allocation95_spill] sm:$0xff] %v4976_v11  ;;  %v4978_v1 = vld [vmem:[#allocation4 + $0x170] sm:$0xff]  ;;  %v4982_v10 = vld [vmem:[#allocation4 + $0x128] sm:$0xff] }
  0x64   :  { %786 = vmatpush1.msra.mxu0 %v4952_v19  ;;  %857 = vmatpush1.msra.mxu1 %v4954_v20  ;;  %9727 = vst [vmem:[#allocation96_spill] sm:$0xff] %v4978_v1  ;;  %9728 = vst [vmem:[#allocation97_spill] sm:$0xff] %v4982_v10  ;;  %v4984_v19 = vld [vmem:[#allocation4 + $0x138] sm:$0xff]  ;;  %v4988_v20 = vld [vmem:[#allocation4 + $0x120] sm:$0xff] }
  0x65   :  { %787 = vmatprep.subr.mxu0 %v4958_v21  ;;  %858 = vmatprep.subr.mxu1 %v4960_v13  ;;  %9729 = vst [vmem:[#allocation98_spill] sm:$0xff] %v4984_v19  ;;  %9730 = vst [vmem:[#allocation99_spill] sm:$0xff] %v4988_v20  ;;  %v4990_v21 = vld [vmem:[#allocation4 + $0x130] sm:$0xff]  ;;  %v4994_v13 = vld [vmem:[#allocation4 + $0xe8] sm:$0xff] }
  0x66   :  { %788 = vmatpush1.msra.mxu0 %v4964_v15  ;;  %859 = vmatpush1.msra.mxu1 %v4966_v16  ;;  %9731 = vst [vmem:[#allocation100_spill] sm:$0xff] %v4990_v21  ;;  %9732 = vst [vmem:[#allocation101_spill] sm:$0xff] %v4994_v13  ;;  %v4996_v15 = vld [vmem:[#allocation4 + $0xf8] sm:$0xff]  ;;  %v5000_v16 = vld [vmem:[#allocation4 + $0xe0] sm:$0xff] }
  0x67   :  { %789 = vmatprep.subr.mxu0 %v4970_v17  ;;  %860 = vmatprep.subr.mxu1 %v4972_v18  ;;  %9733 = vst [vmem:[#allocation102_spill] sm:$0xff] %v4996_v15  ;;  %9734 = vst [vmem:[#allocation103_spill] sm:$0xff] %v5000_v16  ;;  %v5002_v17 = vld [vmem:[#allocation4 + $0xf0] sm:$0xff]  ;;  %v5006_v18 = vld [vmem:[#allocation4 + $0xa8] sm:$0xff] }
  0x68   :  { %790 = vmatpush1.msra.mxu0 %v4976_v11  ;;  %861 = vmatpush1.msra.mxu1 %v4978_v1  ;;  %9735 = vst [vmem:[#allocation104_spill] sm:$0xff] %v5002_v17  ;;  %9736 = vst [vmem:[#allocation105_spill] sm:$0xff] %v5006_v18  ;;  %v5008_v11 = vld [vmem:[#allocation4 + $0xb8] sm:$0xff]  ;;  %v5012_v1 = vld [vmem:[#allocation4 + $0xa0] sm:$0xff] }
  0x69   :  { %791 = vmatprep.subr.mxu0 %v4982_v10  ;;  %862 = vmatprep.subr.mxu1 %v4984_v19  ;;  %9737 = vst [vmem:[#allocation106_spill] sm:$0xff] %v5008_v11  ;;  %9738 = vst [vmem:[#allocation107_spill] sm:$0xff] %v5012_v1  ;;  %v5014_v10 = vld [vmem:[#allocation4 + $0xb0] sm:$0xff]  ;;  %v5018_v19 = vld [vmem:[#allocation4 + $0x68] sm:$0xff] }
  0x6a   :  { %792 = vmatpush1.msra.mxu0 %v4988_v20  ;;  %863 = vmatpush1.msra.mxu1 %v4990_v21  ;;  %9739 = vst [vmem:[#allocation108_spill] sm:$0xff] %v5014_v10  ;;  %9740 = vst [vmem:[#allocation109_spill] sm:$0xff] %v5018_v19  ;;  %v5020_v20 = vld [vmem:[#allocation4 + $0x78] sm:$0xff]  ;;  %v5024_v21 = vld [vmem:[#allocation4 + $0x60] sm:$0xff] }
  0x6b   :  { %793 = vmatprep.subr.mxu0 %v4994_v13  ;;  %864 = vmatprep.subr.mxu1 %v4996_v15  ;;  %9741 = vst [vmem:[#allocation110_spill] sm:$0xff] %v5020_v20  ;;  %9742 = vst [vmem:[#allocation111_spill] sm:$0xff] %v5024_v21  ;;  %v5026_v13 = vld [vmem:[#allocation4 + $0x70] sm:$0xff]  ;;  %v5030_v15 = vld [vmem:[#allocation4 + $0x28] sm:$0xff] }
  0x6c   :  { %794 = vmatpush1.msra.mxu0 %v5000_v16  ;;  %865 = vmatpush1.msra.mxu1 %v5002_v17  ;;  %9743 = vst [vmem:[#allocation112_spill] sm:$0xff] %v5026_v13  ;;  %9744 = vst [vmem:[#allocation113_spill] sm:$0xff] %v5030_v15  ;;  %v5032_v16 = vld [vmem:[#allocation4 + $0x38] sm:$0xff]  ;;  %v5036_v17 = vld [vmem:[#allocation4 + $0x20] sm:$0xff] }
  0x6d   :  { %795 = vmatprep.subr.mxu0 %v5006_v18  ;;  %866 = vmatprep.subr.mxu1 %v5008_v11  ;;  %9745 = vst [vmem:[#allocation114_spill] sm:$0xff] %v5032_v16  ;;  %9746 = vst [vmem:[#allocation115_spill] sm:$0xff] %v5036_v17  ;;  %v5038_v18 = vld [vmem:[#allocation4 + $0x30] sm:$0xff]  ;;  %v5042_v11 = vld [vmem:[#allocation4 + $0x7e8] sm:$0xff] }
  0x6e   :  { %796 = vmatpush1.msra.mxu0 %v5012_v1  ;;  %867 = vmatpush1.msra.mxu1 %v5014_v10  ;;  %9747 = vst [vmem:[#allocation116_spill] sm:$0xff] %v5038_v18  ;;  %9748 = vst [vmem:[#allocation117_spill] sm:$0xff] %v5042_v11  ;;  %v5044_v1 = vld [vmem:[#allocation4 + $0x7f8] sm:$0xff]  ;;  %v5048_v10 = vld [vmem:[#allocation4 + $0x7e0] sm:$0xff] }
  0x6f   :  { %797 = vmatprep.subr.mxu0 %v5018_v19  ;;  %868 = vmatprep.subr.mxu1 %v5020_v20  ;;  %9749 = vst [vmem:[#allocation118_spill] sm:$0xff] %v5044_v1  ;;  %9750 = vst [vmem:[#allocation119_spill] sm:$0xff] %v5048_v10  ;;  %v5050_v19 = vld [vmem:[#allocation4 + $0x7f0] sm:$0xff]  ;;  %v5054_v20 = vld [vmem:[#allocation4 + $0x7a8] sm:$0xff] }
  0x70   :  { %798 = vmatpush1.msra.mxu0 %v5024_v21  ;;  %869 = vmatpush1.msra.mxu1 %v5026_v13  ;;  %9751 = vst [vmem:[#allocation120_spill] sm:$0xff] %v5050_v19  ;;  %9752 = vst [vmem:[#allocation121_spill] sm:$0xff] %v5054_v20  ;;  %v5056_v21 = vld [vmem:[#allocation4 + $0x7b8] sm:$0xff]  ;;  %v5060_v13 = vld [vmem:[#allocation4 + $0x7a0] sm:$0xff] }
  0x71   :  { %799 = vmatprep.subr.mxu0 %v5030_v15  ;;  %870 = vmatprep.subr.mxu1 %v5032_v16  ;;  %9753 = vst [vmem:[#allocation122_spill] sm:$0xff] %v5056_v21  ;;  %9754 = vst [vmem:[#allocation123_spill] sm:$0xff] %v5060_v13  ;;  %v5062_v15 = vld [vmem:[#allocation4 + $0x7b0] sm:$0xff]  ;;  %v5066_v16 = vld [vmem:[#allocation4 + $0x768] sm:$0xff] }
  0x72   :  { %800 = vmatpush1.msra.mxu0 %v5036_v17  ;;  %871 = vmatpush1.msra.mxu1 %v5038_v18  ;;  %9755 = vst [vmem:[#allocation124_spill] sm:$0xff] %v5062_v15  ;;  %9756 = vst [vmem:[#allocation125_spill] sm:$0xff] %v5066_v16  ;;  %v5068_v17 = vld [vmem:[#allocation4 + $0x778] sm:$0xff]  ;;  %v5072_v18 = vld [vmem:[#allocation4 + $0x760] sm:$0xff] }
  0x73   :  { %801 = vmatprep.subr.mxu0 %v5042_v11  ;;  %872 = vmatprep.subr.mxu1 %v5044_v1  ;;  %9757 = vst [vmem:[#allocation126_spill] sm:$0xff] %v5068_v17  ;;  %9758 = vst [vmem:[#allocation127_spill] sm:$0xff] %v5072_v18  ;;  %v5074_v11 = vld [vmem:[#allocation4 + $0x770] sm:$0xff]  ;;  %v5078_v1 = vld [vmem:[#allocation4 + $0x728] sm:$0xff] }
  0x74   :  { %802 = vmatpush2.msra.mxu0 %v5048_v10  ;;  %873 = vmatpush2.msra.mxu1 %v5050_v19  ;;  %9759 = vst [vmem:[#allocation128_spill] sm:$0xff] %v5074_v11  ;;  %9760 = vst [vmem:[#allocation129_spill] sm:$0xff] %v5078_v1  ;;  %v5080_v10 = vld [vmem:[#allocation4 + $0x738] sm:$0xff]  ;;  %v5084_v19 = vld [vmem:[#allocation4 + $0x720] sm:$0xff] }
  0x75   :  { %803 = vmatprep.subr.mxu0 %v5054_v20  ;;  %874 = vmatprep.subr.mxu1 %v5056_v21  ;;  %9761 = vst [vmem:[#allocation130_spill] sm:$0xff] %v5080_v10  ;;  %9762 = vst [vmem:[#allocation131_spill] sm:$0xff] %v5084_v19  ;;  %v5086_v20 = vld [vmem:[#allocation4 + $0x730] sm:$0xff]  ;;  %v5090_v21 = vld [vmem:[#allocation4 + $0x6e8] sm:$0xff] }
  0x76   :  { %804 = vmatpush2.msra.mxu0 %v5060_v13  ;;  %875 = vmatpush2.msra.mxu1 %v5062_v15  ;;  %9763 = vst [vmem:[#allocation132_spill] sm:$0xff] %v5086_v20  ;;  %9764 = vst [vmem:[#allocation133_spill] sm:$0xff] %v5090_v21  ;;  %v5092_v13 = vld [vmem:[#allocation4 + $0x6f8] sm:$0xff]  ;;  %v5096_v15 = vld [vmem:[#allocation4 + $0x6e0] sm:$0xff] }
  0x77   :  { %805 = vmatprep.subr.mxu0 %v5066_v16  ;;  %876 = vmatprep.subr.mxu1 %v5068_v17  ;;  %9765 = vst [vmem:[#allocation134_spill] sm:$0xff] %v5092_v13  ;;  %9766 = vst [vmem:[#allocation135_spill] sm:$0xff] %v5096_v15  ;;  %v5098_v16 = vld [vmem:[#allocation4 + $0x6f0] sm:$0xff]  ;;  %v5102_v17 = vld [vmem:[#allocation4 + $0x6a8] sm:$0xff] }
  0x78   :  { %806 = vmatpush2.msra.mxu0 %v5072_v18  ;;  %877 = vmatpush2.msra.mxu1 %v5074_v11  ;;  %9767 = vst [vmem:[#allocation136_spill] sm:$0xff] %v5098_v16  ;;  %9768 = vst [vmem:[#allocation137_spill] sm:$0xff] %v5102_v17  ;;  %v5104_v18 = vld [vmem:[#allocation4 + $0x6b8] sm:$0xff]  ;;  %v5108_v11 = vld [vmem:[#allocation4 + $0x6a0] sm:$0xff] }
  0x79   :  { %807 = vmatprep.subr.mxu0 %v5078_v1  ;;  %878 = vmatprep.subr.mxu1 %v5080_v10  ;;  %9769 = vst [vmem:[#allocation138_spill] sm:$0xff] %v5104_v18  ;;  %9770 = vst [vmem:[#allocation139_spill] sm:$0xff] %v5108_v11  ;;  %v5110_v1 = vld [vmem:[#allocation4 + $0x6b0] sm:$0xff]  ;;  %v5114_v10 = vld [vmem:[#allocation4 + $0x668] sm:$0xff] }
  0x7a   :  { %808 = vmatpush2.msra.mxu0 %v5084_v19  ;;  %879 = vmatpush2.msra.mxu1 %v5086_v20  ;;  %9771 = vst [vmem:[#allocation140_spill] sm:$0xff] %v5110_v1  ;;  %9772 = vst [vmem:[#allocation141_spill] sm:$0xff] %v5114_v10  ;;  %v5116_v19 = vld [vmem:[#allocation4 + $0x678] sm:$0xff]  ;;  %v5120_v20 = vld [vmem:[#allocation4 + $0x660] sm:$0xff] }
  0x7b   :  { %809 = vmatprep.subr.mxu0 %v5090_v21  ;;  %880 = vmatprep.subr.mxu1 %v5092_v13  ;;  %9773 = vst [vmem:[#allocation142_spill] sm:$0xff] %v5116_v19  ;;  %9774 = vst [vmem:[#allocation143_spill] sm:$0xff] %v5120_v20  ;;  %v5122_v21 = vld [vmem:[#allocation4 + $0x670] sm:$0xff]  ;;  %v5126_v13 = vld [vmem:[#allocation4 + $0x628] sm:$0xff] }
  0x7c   :  { %810 = vmatpush2.msra.mxu0 %v5096_v15  ;;  %881 = vmatpush2.msra.mxu1 %v5098_v16  ;;  %9775 = vst [vmem:[#allocation144_spill] sm:$0xff] %v5122_v21  ;;  %9776 = vst [vmem:[#allocation145_spill] sm:$0xff] %v5126_v13  ;;  %v5128_v15 = vld [vmem:[#allocation4 + $0x638] sm:$0xff]  ;;  %v5132_v16 = vld [vmem:[#allocation4 + $0x620] sm:$0xff] }
  0x7d   :  { %811 = vmatprep.subr.mxu0 %v5102_v17  ;;  %882 = vmatprep.subr.mxu1 %v5104_v18  ;;  %9777 = vst [vmem:[#allocation146_spill] sm:$0xff] %v5128_v15  ;;  %9778 = vst [vmem:[#allocation147_spill] sm:$0xff] %v5132_v16  ;;  %v5134_v17 = vld [vmem:[#allocation4 + $0x630] sm:$0xff]  ;;  %v5138_v18 = vld [vmem:[#allocation4 + $0x5e8] sm:$0xff] }
  0x7e   :  { %812 = vmatpush2.msra.mxu0 %v5108_v11  ;;  %883 = vmatpush2.msra.mxu1 %v5110_v1  ;;  %9779 = vst [vmem:[#allocation148_spill] sm:$0xff] %v5134_v17  ;;  %9780 = vst [vmem:[#allocation149_spill] sm:$0xff] %v5138_v18  ;;  %v5140_v11 = vld [vmem:[#allocation4 + $0x5f8] sm:$0xff]  ;;  %v5144_v1 = vld [vmem:[#allocation4 + $0x5e0] sm:$0xff] }
  0x7f   :  { %813 = vmatprep.subr.mxu0 %v5114_v10  ;;  %884 = vmatprep.subr.mxu1 %v5116_v19  ;;  %9781 = vst [vmem:[#allocation150_spill] sm:$0xff] %v5140_v11  ;;  %9782 = vst [vmem:[#allocation151_spill] sm:$0xff] %v5144_v1  ;;  %v5146_v10 = vld [vmem:[#allocation4 + $0x5f0] sm:$0xff]  ;;  %v5150_v19 = vld [vmem:[#allocation4 + $0x5a8] sm:$0xff] }
  0x80   :  { %814 = vmatpush2.msra.mxu0 %v5120_v20  ;;  %885 = vmatpush2.msra.mxu1 %v5122_v21  ;;  %9783 = vst [vmem:[#allocation152_spill] sm:$0xff] %v5146_v10  ;;  %9784 = vst [vmem:[#allocation153_spill] sm:$0xff] %v5150_v19  ;;  %v5152_v20 = vld [vmem:[#allocation4 + $0x5b8] sm:$0xff]  ;;  %v5156_v21 = vld [vmem:[#allocation4 + $0x5a0] sm:$0xff] }
  0x81   :  { %815 = vmatprep.subr.mxu0 %v5126_v13  ;;  %886 = vmatprep.subr.mxu1 %v5128_v15  ;;  %9785 = vst [vmem:[#allocation154_spill] sm:$0xff] %v5152_v20  ;;  %9786 = vst [vmem:[#allocation155_spill] sm:$0xff] %v5156_v21  ;;  %v5158_v13 = vld [vmem:[#allocation4 + $0x5b0] sm:$0xff]  ;;  %v5162_v15 = vld [vmem:[#allocation4 + $0x568] sm:$0xff] }
  0x82   :  { %816 = vmatpush2.msra.mxu0 %v5132_v16  ;;  %887 = vmatpush2.msra.mxu1 %v5134_v17  ;;  %9787 = vst [vmem:[#allocation156_spill] sm:$0xff] %v5158_v13  ;;  %9788 = vst [vmem:[#allocation157_spill] sm:$0xff] %v5162_v15  ;;  %v5164_v16 = vld [vmem:[#allocation4 + $0x578] sm:$0xff]  ;;  %v5168_v17 = vld [vmem:[#allocation4 + $0x560] sm:$0xff] }
  0x83   :  { %817 = vmatprep.subr.mxu0 %v5138_v18  ;;  %888 = vmatprep.subr.mxu1 %v5140_v11  ;;  %9789 = vst [vmem:[#allocation158_spill] sm:$0xff] %v5164_v16  ;;  %9790 = vst [vmem:[#allocation159_spill] sm:$0xff] %v5168_v17  ;;  %v5170_v18 = vld [vmem:[#allocation4 + $0x570] sm:$0xff]  ;;  %v5174_v11 = vld [vmem:[#allocation4 + $0x528] sm:$0xff] }
  0x84   :  { %818 = vmatpush2.msra.mxu0 %v5144_v1  ;;  %889 = vmatpush2.msra.mxu1 %v5146_v10  ;;  %9791 = vst [vmem:[#allocation160_spill] sm:$0xff] %v5170_v18  ;;  %9792 = vst [vmem:[#allocation161_spill] sm:$0xff] %v5174_v11  ;;  %v5176_v1 = vld [vmem:[#allocation4 + $0x538] sm:$0xff]  ;;  %v5180_v10 = vld [vmem:[#allocation4 + $0x520] sm:$0xff] }
  0x85   :  { %819 = vmatprep.subr.mxu0 %v5150_v19  ;;  %890 = vmatprep.subr.mxu1 %v5152_v20  ;;  %9793 = vst [vmem:[#allocation162_spill] sm:$0xff] %v5176_v1  ;;  %9794 = vst [vmem:[#allocation163_spill] sm:$0xff] %v5180_v10  ;;  %v5182_v19 = vld [vmem:[#allocation4 + $0x530] sm:$0xff]  ;;  %v5186_v20 = vld [vmem:[#allocation4 + $0x4e8] sm:$0xff] }
  0x86   :  { %820 = vmatpush2.msra.mxu0 %v5156_v21  ;;  %891 = vmatpush2.msra.mxu1 %v5158_v13  ;;  %9795 = vst [vmem:[#allocation164_spill] sm:$0xff] %v5182_v19  ;;  %9796 = vst [vmem:[#allocation165_spill] sm:$0xff] %v5186_v20  ;;  %v5188_v21 = vld [vmem:[#allocation4 + $0x4f8] sm:$0xff]  ;;  %v5192_v13 = vld [vmem:[#allocation4 + $0x4e0] sm:$0xff] }
  0x87   :  { %821 = vmatprep.subr.mxu0 %v5162_v15  ;;  %892 = vmatprep.subr.mxu1 %v5164_v16  ;;  %9797 = vst [vmem:[#allocation166_spill] sm:$0xff] %v5188_v21  ;;  %9798 = vst [vmem:[#allocation167_spill] sm:$0xff] %v5192_v13  ;;  %v5194_v15 = vld [vmem:[#allocation4 + $0x4f0] sm:$0xff]  ;;  %v5198_v16 = vld [vmem:[#allocation4 + $0x4a8] sm:$0xff] }
  0x88   :  { %822 = vmatpush2.msra.mxu0 %v5168_v17  ;;  %893 = vmatpush2.msra.mxu1 %v5170_v18  ;;  %9799 = vst [vmem:[#allocation168_spill] sm:$0xff] %v5194_v15  ;;  %v5200_v17 = vld [vmem:[#allocation4 + $0x4b8] sm:$0xff]  ;;  %v5204_v18 = vld [vmem:[#allocation4 + $0x4a0] sm:$0xff] }
  0x89   :  { %823 = vmatprep.subr.mxu0 %v5174_v11  ;;  %894 = vmatprep.subr.mxu1 %v5176_v1  ;;  %9800 = vst [vmem:[#allocation169_spill] sm:$0xff] %v5200_v17  ;;  %v5206_v11 = vld [vmem:[#allocation4 + $0x4b0] sm:$0xff]  ;;  %v5210_v1 = vld [vmem:[#allocation4 + $0x468] sm:$0xff] }
  0x8a   :  { %824 = vmatpush2.msra.mxu0 %v5180_v10  ;;  %895 = vmatpush2.msra.mxu1 %v5182_v19  ;;  %v5212_v10 = vld [vmem:[#allocation4 + $0x478] sm:$0xff]  ;;  %v5216_v19 = vld [vmem:[#allocation4 + $0x460] sm:$0xff] }
  0x8b   :  { %825 = vmatprep.subr.mxu0 %v5186_v20  ;;  %896 = vmatprep.subr.mxu1 %v5188_v21  ;;  %9801 = vst [vmem:[#allocation170_spill] sm:$0xff] %v5216_v19  ;;  %v5218_v20 = vld [vmem:[#allocation4 + $0x470] sm:$0xff]  ;;  %v5222_v21 = vld [vmem:[#allocation4 + $0x428] sm:$0xff] }
  0x8c   :  { %826 = vmatpush2.msra.mxu0 %v5192_v13  ;;  %897 = vmatpush2.msra.mxu1 %v5194_v15  ;;  %9802 = vst [vmem:[#allocation171_spill] sm:$0xff] %v5218_v20  ;;  %9803 = vst [vmem:[#allocation172_spill] sm:$0xff] %v5222_v21  ;;  %v5224_v13 = vld [vmem:[#allocation4 + $0x438] sm:$0xff]  ;;  %v5228_v15 = vld [vmem:[#allocation4 + $0x420] sm:$0xff] }
  0x8d   :  { %827 = vmatprep.subr.mxu0 %v5198_v16  ;;  %898 = vmatprep.subr.mxu1 %v5200_v17  ;;  %9804 = vst [vmem:[#allocation173_spill] sm:$0xff] %v5224_v13  ;;  %9805 = vst [vmem:[#allocation174_spill] sm:$0xff] %v5228_v15  ;;  %v5232_v17 = vld [vmem:[#allocation4 + $0x430] sm:$0xff] }
  0x8e   :  { %828 = vmatpush2.msra.mxu0 %v5204_v18  ;;  %899 = vmatpush2.msra.mxu1 %v5206_v11  ;;  %9806 = vst [vmem:[#allocation175_spill] sm:$0xff] %v5232_v17 }
  0x8f   :  { %829 = vmatprep.subr.mxu0 %v5210_v1  ;;  %900 = vmatprep.subr.mxu1 %v5212_v10 }
  0x90   :  { %830 = vmatpush2.msra.mxu0 %v5216_v19  ;;  %901 = vmatpush2.msra.mxu1 %v5218_v20  ;;  %v39_v19 = vld [vmem:[%s8846_s0] sm:$0xff]  ;;  %v9024_v20 = vmov 0  }
  0x91   :  { %831 = vmatprep.subr.mxu0 %v5222_v21  ;;  %902 = vmatprep.subr.mxu1 %v5224_v13  ;;  %v5246_v13 = vld [vmem:[#allocation4 + $0x3c8] sm:$0xff]  ;;  %v5255_v21 = vld [vmem:[#allocation4 + $0x3c0] sm:$0xff] }
  0x92   :  { %832 = vmatpush2.msra.mxu0 %v5228_v15  ;;  %833 = vmatprep.mubr.f32.mxu0 %v9698_v12  ;;  %9807 = vst [vmem:[#allocation176_spill] sm:$0xff] %v5246_v13  ;;  %v5249_v15 = vld [vmem:[#allocation4 + $0x3d8] sm:$0xff]  ;;  %9809 = vst [vmem:[#allocation178_spill] sm:$0xff] %v5255_v21 }
  0x93   :  { %903 = vmatpush2.msra.mxu1 %v5232_v17  ;;  %904 = vmatprep.mubr.f32.mxu1 %v9698_v12  ;;  %9808 = vst [vmem:[#allocation177_spill] sm:$0xff] %v5249_v15  ;;  %v40_v17 = vld [vmem:[%s8846_s0 + $0x8] sm:$0xff] }
  0x94   :  { %834 = vmatmul.mubr.f32.vlgmr.msra.gmra.mxu0 %v9698_v12  ;;  %905 = vmatmul.mubr.f32.vlgmr.msra.gmra.mxu1 %v9698_v12  ;;  %v5258_v12 = vld [vmem:[#allocation4 + $0x3d0] sm:$0xff] }
  0x95   :  { %3432 = vset.pattern.permute.xlu0 %v9024_v20  ;;  %968 = vmatprep.subr.mxu0 %v5246_v13  ;;  %9810 = vst [vmem:[#allocation179_spill] sm:$0xff] %v5258_v12  ;;  %v5261_v20 = vld [vmem:[#allocation4 + $0x388] sm:$0xff]  ;;  %v5270_v13 = vld [vmem:[#allocation4 + $0x390] sm:$0xff] }
  0x96   :  { %50 = vperm.xlu0 %3432, %v39_v19   ;;  %1039 = vmatprep.subr.mxu1 %v5249_v15  ;;  %9811 = vst [vmem:[#allocation180_spill] sm:$0xff] %v5261_v20  ;;  %v5264_v19 = vld [vmem:[#allocation4 + $0x398] sm:$0xff]  ;;  %v5267_v15 = vld [vmem:[#allocation4 + $0x380] sm:$0xff]  ;;  %9814 = vst [vmem:[#allocation183_spill] sm:$0xff] %v5270_v13 }
  0x97   :  { %969 = vmatpush1.msra.mxu0 %v5255_v21  ;;  %1040 = vmatpush1.msra.mxu1 %v5258_v12  ;;  %9812 = vst [vmem:[#allocation181_spill] sm:$0xff] %v5264_v19  ;;  %9813 = vst [vmem:[#allocation182_spill] sm:$0xff] %v5267_v15  ;;  %v5273_v21 = vld [vmem:[#allocation4 + $0x348] sm:$0xff]  ;;  %v5279_v12 = vld [vmem:[#allocation4 + $0x358] sm:$0xff] }
  0x98   :  { %970 = vmatprep.subr.mxu0 %v5261_v20  ;;  %1041 = vmatprep.subr.mxu1 %v5264_v19  ;;  %9815 = vst [vmem:[#allocation184_spill] sm:$0xff] %v5273_v21  ;;  %v43_v20 = vld [vmem:[%s8846_s0 + $0x20] sm:$0xff]  ;;  %9816 = vst [vmem:[#allocation185_spill] sm:$0xff] %v5279_v12 }
  0x99   :  { %971 = vmatpush1.msra.mxu0 %v5267_v15  ;;  %1042 = vmatpush1.msra.mxu1 %v5270_v13  ;;  %v5282_v19 = vld [vmem:[#allocation4 + $0x340] sm:$0xff]  ;;  %v5285_v15 = vld [vmem:[#allocation4 + $0x350] sm:$0xff] }
  0x9a   :  { %55 = vperm.xlu0 %3432, %v40_v17   ;;  %972 = vmatprep.subr.mxu0 %v5273_v21  ;;  %9817 = vst [vmem:[#allocation186_spill] sm:$0xff] %v5282_v19  ;;  %9818 = vst [vmem:[#allocation187_spill] sm:$0xff] %v5285_v15  ;;  %v5288_v17 = vld [vmem:[#allocation4 + $0x308] sm:$0xff]  ;;  %v5291_v21 = vld [vmem:[#allocation4 + $0x318] sm:$0xff] }
  0x9b   :  { %1043 = vmatprep.subr.mxu1 %v5279_v12  ;;  %973 = vmatpush1.msra.mxu0 %v5282_v19  ;;  %9819 = vst [vmem:[#allocation188_spill] sm:$0xff] %v5288_v17  ;;  %9820 = vst [vmem:[#allocation189_spill] sm:$0xff] %v5291_v21  ;;  %v5294_v13 = vld [vmem:[#allocation4 + $0x300] sm:$0xff]  ;;  %v5297_v12 = vld [vmem:[#allocation4 + $0x310] sm:$0xff] }
  0x9c   :  { %1044 = vmatpush1.msra.mxu1 %v5285_v15  ;;  %974 = vmatprep.subr.mxu0 %v5288_v17  ;;  %v45_v15 = vld [vmem:[%s8846_s0 + $0x30] sm:$0xff]  ;;  %v5306_v17 = vld [vmem:[#allocation4 + $0x2d8] sm:$0xff] }
  0x9d   :  { %1045 = vmatprep.subr.mxu1 %v5291_v21  ;;  %975 = vmatpush1.msra.mxu0 %v5294_v13  ;;  %v5303_v19 = vld [vmem:[#allocation4 + $0x2c8] sm:$0xff]  ;;  %v5309_v21 = vld [vmem:[#allocation4 + $0x2c0] sm:$0xff] }
  0x9e   :  { %70 = vperm.xlu0 %3432, %v43_v20   ;;  %1046 = vmatpush1.msra.mxu1 %v5297_v12  ;;  %v5312_v20 = vld [vmem:[#allocation4 + $0x2d0] sm:$0xff] }
  0x9f   :  { %976 = vmatprep.subr.mxu0 %v5303_v19  ;;  %1047 = vmatprep.subr.mxu1 %v5306_v17 }
  0xa0   :  { %977 = vmatpush1.msra.mxu0 %v5309_v21  ;;  %1048 = vmatpush1.msra.mxu1 %v5312_v20 }
  0xa1   :  { %978 = vmatprep.subr.mxu0 %v4558_v22  ;;  %1049 = vmatprep.subr.mxu1 %v4560_v23  ;;  %v9821_v22 = vld [vmem:[#allocation7_spill] sm:$0xff]  ;;  %v9822_v23 = vld [vmem:[#allocation8_spill] sm:$0xff] }
  0xa2   :  { %80 = vperm.xlu0 %3432, %v45_v15   ;;  %979 = vmatpush1.msra.mxu0 %v4562_v24  ;;  %v9823_v24 = vld [vmem:[#allocation9_spill] sm:$0xff]  ;;  %v9870_v15 = vld [vmem:[#allocation56_spill] sm:$0xff] }
  0xa3   :  { %1050 = vmatpush1.msra.mxu1 %v4564_v25  ;;  %980 = vmatprep.subr.mxu0 %v4566_v26  ;;  %v9824_v25 = vld [vmem:[#allocation10_spill] sm:$0xff]  ;;  %v9825_v26 = vld [vmem:[#allocation11_spill] sm:$0xff] }
  0xa4   :  { %1051 = vmatprep.subr.mxu1 %v4568_v27  ;;  %981 = vmatpush1.msra.mxu0 %v4572_v28  ;;  %v9826_v27 = vld [vmem:[#allocation12_spill] sm:$0xff]  ;;  %v9827_v28 = vld [vmem:[#allocation13_spill] sm:$0xff] }
  0xa5   :  { %1052 = vmatpush1.msra.mxu1 %v4574_v29  ;;  %982 = vmatprep.subr.mxu0 %v4578_v30  ;;  %v9828_v29 = vld [vmem:[#allocation14_spill] sm:$0xff]  ;;  %v9829_v30 = vld [vmem:[#allocation15_spill] sm:$0xff] }
  0xa6   :  { %1053 = vmatprep.subr.mxu1 %v4580_v31  ;;  %983 = vmatpush1.msra.mxu0 %v4584_v32  ;;  %v9830_v31 = vld [vmem:[#allocation16_spill] sm:$0xff]  ;;  %v9831_v32 = vld [vmem:[#allocation17_spill] sm:$0xff] }
  0xa7   :  { %1054 = vmatpush1.msra.mxu1 %v4586_v33  ;;  %984 = vmatprep.subr.mxu0 %v4590_v34  ;;  %v9832_v33 = vld [vmem:[#allocation18_spill] sm:$0xff]  ;;  %v9833_v34 = vld [vmem:[#allocation19_spill] sm:$0xff] }
  0xa8   :  { %1055 = vmatprep.subr.mxu1 %v4592_v35  ;;  %985 = vmatpush1.msra.mxu0 %v4596_v36  ;;  %v9834_v35 = vld [vmem:[#allocation20_spill] sm:$0xff]  ;;  %v9835_v36 = vld [vmem:[#allocation21_spill] sm:$0xff] }
  0xa9   :  { %1056 = vmatpush1.msra.mxu1 %v4598_v37  ;;  %986 = vmatprep.subr.mxu0 %v4602_v38  ;;  %v9836_v37 = vld [vmem:[#allocation22_spill] sm:$0xff]  ;;  %v9837_v38 = vld [vmem:[#allocation23_spill] sm:$0xff] }
  0xaa   :  { %1057 = vmatprep.subr.mxu1 %v4604_v39  ;;  %987 = vmatpush1.msra.mxu0 %v4608_v40  ;;  %v9838_v39 = vld [vmem:[#allocation24_spill] sm:$0xff]  ;;  %v9839_v40 = vld [vmem:[#allocation25_spill] sm:$0xff] }
  0xab   :  { %1058 = vmatpush1.msra.mxu1 %v4610_v41  ;;  %988 = vmatprep.subr.mxu0 %v4614_v42  ;;  %v9840_v41 = vld [vmem:[#allocation26_spill] sm:$0xff]  ;;  %v9841_v42 = vld [vmem:[#allocation27_spill] sm:$0xff] }
  0xac   :  { %1059 = vmatprep.subr.mxu1 %v4616_v43  ;;  %989 = vmatpush1.msra.mxu0 %v4620_v44  ;;  %v9842_v43 = vld [vmem:[#allocation28_spill] sm:$0xff]  ;;  %v9843_v44 = vld [vmem:[#allocation29_spill] sm:$0xff] }
  0xad   :  { %1060 = vmatpush1.msra.mxu1 %v4622_v45  ;;  %990 = vmatprep.subr.mxu0 %v4626_v46  ;;  %v9844_v45 = vld [vmem:[#allocation30_spill] sm:$0xff]  ;;  %v9845_v46 = vld [vmem:[#allocation31_spill] sm:$0xff] }
  0xae   :  { %1061 = vmatprep.subr.mxu1 %v4628_v47  ;;  %991 = vmatpush1.msra.mxu0 %v4632_v48  ;;  %v9846_v47 = vld [vmem:[#allocation32_spill] sm:$0xff]  ;;  %v9847_v48 = vld [vmem:[#allocation33_spill] sm:$0xff] }
  0xaf   :  { %1062 = vmatpush1.msra.mxu1 %v4634_v49  ;;  %992 = vmatprep.subr.mxu0 %v4638_v50  ;;  %v9848_v49 = vld [vmem:[#allocation34_spill] sm:$0xff]  ;;  %v9849_v50 = vld [vmem:[#allocation35_spill] sm:$0xff] }
  0xb0   :  { %1063 = vmatprep.subr.mxu1 %v4640_v51  ;;  %993 = vmatpush1.msra.mxu0 %v4644_v52  ;;  %v9850_v51 = vld [vmem:[#allocation36_spill] sm:$0xff]  ;;  %v9851_v52 = vld [vmem:[#allocation37_spill] sm:$0xff] }
  0xb1   :  { %1064 = vmatpush1.msra.mxu1 %v4646_v53  ;;  %994 = vmatprep.subr.mxu0 %v4650_v54  ;;  %v9852_v53 = vld [vmem:[#allocation38_spill] sm:$0xff]  ;;  %v9853_v54 = vld [vmem:[#allocation39_spill] sm:$0xff] }
  0xb2   :  { %1065 = vmatprep.subr.mxu1 %v4652_v55  ;;  %995 = vmatpush1.msra.mxu0 %v4656_v56  ;;  %v9854_v55 = vld [vmem:[#allocation40_spill] sm:$0xff]  ;;  %v9855_v56 = vld [vmem:[#allocation41_spill] sm:$0xff] }
  0xb3   :  { %1066 = vmatpush1.msra.mxu1 %v4658_v57  ;;  %996 = vmatprep.subr.mxu0 %v4662_v58  ;;  %v9856_v57 = vld [vmem:[#allocation42_spill] sm:$0xff]  ;;  %v9857_v58 = vld [vmem:[#allocation43_spill] sm:$0xff] }
  0xb4   :  { %1067 = vmatprep.subr.mxu1 %v4664_v59  ;;  %997 = vmatpush1.msra.mxu0 %v4668_v60  ;;  %v9858_v59 = vld [vmem:[#allocation44_spill] sm:$0xff]  ;;  %v9859_v60 = vld [vmem:[#allocation45_spill] sm:$0xff] }
  0xb5   :  { %1068 = vmatpush1.msra.mxu1 %v4670_v61  ;;  %998 = vmatprep.subr.mxu0 %v4674_v62  ;;  %v9860_v61 = vld [vmem:[#allocation46_spill] sm:$0xff]  ;;  %v9861_v62 = vld [vmem:[#allocation47_spill] sm:$0xff] }
  0xb6   :  { %1069 = vmatprep.subr.mxu1 %v4676_v63  ;;  %999 = vmatpush1.msra.mxu0 %v4680_v0  ;;  %v9862_v63 = vld [vmem:[#allocation48_spill] sm:$0xff]  ;;  %v9863_v0 = vld [vmem:[#allocation49_spill] sm:$0xff] }
  0xb7   :  { %1070 = vmatpush1.msra.mxu1 %v4682_v2  ;;  %1000 = vmatprep.subr.mxu0 %v4686_v3  ;;  %v9864_v2 = vld [vmem:[#allocation50_spill] sm:$0xff]  ;;  %v9865_v3 = vld [vmem:[#allocation51_spill] sm:$0xff] }
  0xb8   :  { %1071 = vmatprep.subr.mxu1 %v4688_v4  ;;  %1001 = vmatpush2.msra.mxu0 %v4692_v5  ;;  %v9866_v4 = vld [vmem:[#allocation52_spill] sm:$0xff]  ;;  %v9867_v5 = vld [vmem:[#allocation53_spill] sm:$0xff] }
  0xb9   :  { %1072 = vmatpush2.msra.mxu1 %v4694_v6  ;;  %1002 = vmatprep.subr.mxu0 %v4698_v7  ;;  %v9868_v6 = vld [vmem:[#allocation54_spill] sm:$0xff]  ;;  %v9869_v7 = vld [vmem:[#allocation55_spill] sm:$0xff] }
  0xba   :  { %1073 = vmatprep.subr.mxu1 %v9821_v22  ;;  %1003 = vmatpush2.msra.mxu0 %v9822_v23  ;;  %v9871_v22 = vld [vmem:[#allocation57_spill] sm:$0xff]  ;;  %v9872_v23 = vld [vmem:[#allocation58_spill] sm:$0xff] }
  0xbb   :  { %1074 = vmatpush2.msra.mxu1 %v9823_v24  ;;  %1004 = vmatprep.subr.mxu0 %v9824_v25  ;;  %v9873_v24 = vld [vmem:[#allocation59_spill] sm:$0xff]  ;;  %v9874_v25 = vld [vmem:[#allocation60_spill] sm:$0xff] }
  0xbc   :  { %1075 = vmatprep.subr.mxu1 %v9825_v26  ;;  %1005 = vmatpush2.msra.mxu0 %v9826_v27  ;;  %v9875_v26 = vld [vmem:[#allocation61_spill] sm:$0xff]  ;;  %v9876_v27 = vld [vmem:[#allocation62_spill] sm:$0xff] }
  0xbd   :  { %1076 = vmatpush2.msra.mxu1 %v9827_v28  ;;  %1006 = vmatprep.subr.mxu0 %v9828_v29  ;;  %v9877_v28 = vld [vmem:[#allocation63_spill] sm:$0xff]  ;;  %v9878_v29 = vld [vmem:[#allocation64_spill] sm:$0xff] }
  0xbe   :  { %1077 = vmatprep.subr.mxu1 %v9829_v30  ;;  %1007 = vmatpush2.msra.mxu0 %v9830_v31  ;;  %v9879_v30 = vld [vmem:[#allocation65_spill] sm:$0xff]  ;;  %v9880_v31 = vld [vmem:[#allocation66_spill] sm:$0xff] }
  0xbf   :  { %1078 = vmatpush2.msra.mxu1 %v9831_v32  ;;  %1008 = vmatprep.subr.mxu0 %v9832_v33  ;;  %v9881_v32 = vld [vmem:[#allocation67_spill] sm:$0xff]  ;;  %v9882_v33 = vmov 0  }
  0xc0   :  { %1079 = vmatprep.subr.mxu1 %v9833_v34  ;;  %1009 = vmatpush2.msra.mxu0 %v9834_v35  ;;  %v89_v34 = vlaneseq }
  0xc1   :  { %1080 = vmatpush2.msra.mxu1 %v9835_v36  ;;  %1010 = vmatprep.subr.mxu0 %v9836_v37  ;;  %v47_v37 = vld [vmem:[%s8847_s1] sm:$0xff] }
  0xc2   :  { %1081 = vmatprep.subr.mxu1 %v9837_v38  ;;  %1011 = vmatpush2.msra.mxu0 %v9838_v39  ;;  %v90_v35 = vshrl.u32 %v89_v34, 7 }
  0xc3   :  { %1082 = vmatpush2.msra.mxu1 %v9839_v40  ;;  %1012 = vmatprep.subr.mxu0 %v9840_v41 }
  0xc4   :  { %1083 = vmatprep.subr.mxu1 %v9841_v42  ;;  %1013 = vmatpush2.msra.mxu0 %v9842_v43  ;;  %v5426_v36 = vsub.s32 0, %v90_v35  ;;  %v99_v38 = vsub.s32 2, %v90_v35  ;;  %v5431_v39 = vsub.s32 1, %v90_v35  ;;  %v103_v41 = vsub.s32 3, %v90_v35  ;;  %v193_v43 = vld [vmem:[%s8849_s3] sm:$0xff] }
  0xc5   :  { %1084 = vmatpush2.msra.mxu1 %v9843_v44  ;;  %1014 = vmatprep.subr.mxu0 %v9844_v45 }
  0xc6   :  { %1085 = vmatprep.subr.mxu1 %v9845_v46  ;;  %1015 = vmatpush2.msra.mxu0 %v9846_v47  ;;  %9883 = vst [vmem:[#allocation7_spill] sm:$0xff] %v5426_v36  ;;  %9884 = vst [vmem:[#allocation8_spill] sm:$0xff] %v5431_v39  ;;  %v5434_v40 = vrot.slane %v47_v37, %v5426_v36  ;;  %v5439_v44 = vrot.slane %v47_v37, %v99_v38 }
  0xc7   :  { %1086 = vmatpush2.msra.mxu1 %v9847_v48  ;;  %1016 = vmatprep.subr.mxu0 %v9848_v49  ;;  %v5442_v45 = vrot.slane %v47_v37, %v5431_v39  ;;  %v5446_v47 = vrot.slane %v193_v43, %v5426_v36  ;;  %v5448_v48 = vrot.slane %v47_v37, %v103_v41  ;;  %v5771_v36 = vld [vmem:[#allocation4 + $0x90] sm:$0xff] }
  0xc8   :  { %1087 = vmatprep.subr.mxu1 %v9849_v50  ;;  %1017 = vmatpush2.msra.mxu0 %v9850_v51  ;;  %9885 = vst [vmem:[#allocation9_spill] sm:$0xff] %v5434_v40  ;;  %9886 = vst [vmem:[#allocation10_spill] sm:$0xff] %v5439_v44  ;;  %v5451_v50 = vrot.slane %v193_v43, %v99_v38 }
  0xc9   :  { %1088 = vmatpush2.msra.mxu1 %v9851_v52  ;;  %1018 = vmatprep.subr.mxu0 %v9852_v53  ;;  %9887 = vst [vmem:[#allocation11_spill] sm:$0xff] %v5442_v45  ;;  %9888 = vst [vmem:[#allocation12_spill] sm:$0xff] %v5448_v48  ;;  %v5455_v52 = vrot.slane %v193_v43, %v5431_v39  ;;  %v5768_v39 = vld [vmem:[#allocation4 + $0x80] sm:$0xff] }
  0xca   :  { %1089 = vmatprep.subr.mxu1 %v9853_v54  ;;  %1019 = vmatpush2.msra.mxu0 %v9854_v55  ;;  %9889 = vst [vmem:[#allocation13_spill] sm:$0xff] %v5451_v50  ;;  %10028 = vst [vmem:[#allocation30_spill] sm:$0xff] %v5768_v39 }
  0xcb   :  { %1090 = vmatpush2.msra.mxu1 %v9855_v56  ;;  %1020 = vmatprep.subr.mxu0 %v9856_v57  ;;  %v5459_v56 = vrot.slane %v193_v43, %v103_v41  ;;  %10029 = vst [vmem:[#allocation31_spill] sm:$0xff] %v5771_v36 }
  0xcc   :  { %1091 = vmatprep.subr.mxu1 %v9857_v58  ;;  %1021 = vmatpush2.msra.mxu0 %v9858_v59 }
  0xcd   :  { %1092 = vmatpush2.msra.mxu1 %v9859_v60  ;;  %1022 = vmatprep.subr.mxu0 %v9860_v61 }
  0xce   :  { %1093 = vmatprep.subr.mxu1 %v9861_v62  ;;  %1023 = vmatpush2.msra.mxu0 %v9862_v63 }
  0xcf   :  { %1094 = vmatpush2.msra.mxu1 %v9863_v0  ;;  %1024 = vmatprep.subr.mxu0 %v9864_v2 }
  0xd0   :  { %1095 = vmatprep.subr.mxu1 %v9865_v3  ;;  %1025 = vmatpush2.msra.mxu0 %v9866_v4 }
  0xd1   :  { %1096 = vmatpush2.msra.mxu1 %v9867_v5  ;;  %1026 = vmatprep.subr.mxu0 %v9868_v6 }
  0xd2   :  { %1097 = vmatprep.subr.mxu1 %v9869_v7  ;;  %1027 = vmatpush2.msra.mxu0 %v9870_v15  ;;  %v107_v15 = vsub.s32 4, %v90_v35 }
  0xd3   :  { %1098 = vmatpush2.msra.mxu1 %v9871_v22  ;;  %1028 = vmatprep.subr.mxu0 %v9872_v23  ;;  %v115_v22 = vsub.s32 6, %v90_v35  ;;  %v111_v23 = vsub.s32 5, %v90_v35 }
  0xd4   :  { %1099 = vmatprep.subr.mxu1 %v9873_v24  ;;  %1029 = vmatpush2.msra.mxu0 %v9874_v25  ;;  %v119_v24 = vsub.s32 7, %v90_v35  ;;  %v5464_v25 = vrot.slane %v47_v37, %v107_v15 }
  0xd5   :  { %1100 = vmatpush2.msra.mxu1 %v9875_v26  ;;  %1030 = vmatprep.subr.mxu0 %v9876_v27  ;;  %v5466_v26 = vrot.slane %v47_v37, %v115_v22  ;;  %v5468_v27 = vrot.slane %v47_v37, %v111_v23  ;;  %v5476_v38 = vrot.slane %v193_v43, %v115_v22 }
  0xd6   :  { %1101 = vmatprep.subr.mxu1 %v9877_v28  ;;  %1031 = vmatpush2.msra.mxu0 %v9878_v29  ;;  %v5470_v29 = vrot.slane %v47_v37, %v119_v24 }
  0xd7   :  { %1102 = vmatpush2.msra.mxu1 %v9879_v30  ;;  %1110 = vmatprep.subr.mxu0 %v9880_v31  ;;  %9890 = vst [vmem:[#allocation14_spill] sm:$0xff] %v5468_v27 }
  0xd8   :  { %1181 = vmatprep.subr.mxu1 %v9881_v32  ;;  %3433 = vset.pattern.permute.xlu1 %v9882_v33  ;;  %v5473_v33 = vrot.slane %v193_v43, %v107_v15 }
 0x111   :  { %v51_v42 = vpop.permute.xlu0 %50 }
 0x112   :  { %v129_v46 = vmul.f32 %v5434_v40, %v51_v42  ;;  %v131_v49 = vmul.f32 %v5439_v44, %v51_v42  ;;  %v130_v51 = vmul.f32 %v5442_v45, %v51_v42  ;;  %v693_v53 = vpop.f32.mrf.mxu0  ;;  %v132_v55 = vmul.f32 %v5448_v48, %v51_v42  ;;  %v764_v58 = vpop.f32.mrf.mxu1 }
 0x113   :  { %v133_v32 = vmul.f32 %v5464_v25, %v51_v42  ;;  %v135_v34 = vmul.f32 %v5466_v26, %v51_v42  ;;  %v134_v41 = vmul.f32 %v5468_v27, %v51_v42  ;;  %v136_v37 = vmul.f32 %v5470_v29, %v51_v42 }
 0x114   :  { %v235_v54 = vadd.f32 %v5446_v47, %v129_v46  ;;  %v237_v57 = vadd.f32 %v5451_v50, %v131_v49  ;;  %v236_v59 = vadd.f32 %v5455_v52, %v130_v51  ;;  %v695_v60 = vpop.f32.mrf.mxu0  ;;  %v238_v62 = vadd.f32 %v5459_v56, %v132_v55  ;;  %v766_v0 = vpop.f32.mrf.mxu1 }
 0x115   :  { %v5479_v46 = vrot.slane %v193_v43, %v111_v23  ;;  %v239_v55 = vadd.f32 %v5473_v33, %v133_v32 }
 0x116   :  { %v694_v61 = vadd.f32 %v693_v53, %v235_v54  ;;  %v765_v63 = vadd.f32 %v764_v58, %v237_v57  ;;  %v696_v2 = vadd.f32 %v695_v60, %v236_v59  ;;  %v767_v4 = vadd.f32 %v766_v0, %v238_v62 }
 0x117   :  { %v5482_v53 = vrot.slane %v193_v43, %v119_v24  ;;  %v241_v57 = vadd.f32 %v5476_v38, %v135_v34 }
 0x118   :  { %v3378_v3 = vmul.f32 -1.442695, %v694_v61  ;;  %v3380_v5 = vmul.f32 -1.442695, %v765_v63  ;;  %v3379_v6 = vmul.f32 -1.442695, %v696_v2  ;;  %v240_v61 = vadd.f32 %v5479_v46, %v134_v41 }
 0x119   :  { %v3381_v7 = vmul.f32 -1.442695, %v767_v4  ;;  %v242_v0 = vadd.f32 %v5482_v53, %v136_v37 }
 0x11a   :  { %3434 = vpow2.f32 %v3378_v3 }
 0x11b   :  { %3436 = vpow2.f32 %v3380_v5 }
 0x11c   :  { %3438 = vpow2.f32 %v3379_v6 }
 0x11d   :  { %3440 = vpow2.f32 %v3381_v7 }
 0x127   :  { %v3435_v28 = vpop.eup %3434 }
 0x128   :  { %v3437_v30 = vpop.eup %3436  ;;  %v917_v35 = vadd.f32 1.0, %v3435_v28 }
 0x129   :  { %v3439_v31 = vpop.eup %3438  ;;  %v929_v51 = vadd.f32 1.0, %v3437_v30 }
 0x12a   :  { %v3441_v49 = vpop.eup %3440  ;;  %v918_v54 = vadd.f32 1.0, %v3439_v31  ;;  %3442 = vrcp.f32 %v917_v35 }
 0x12b   :  { %v930_v58 = vadd.f32 1.0, %v3441_v49  ;;  %3444 = vrcp.f32 %v929_v51 }
 0x12c   :  { %3446 = vrcp.f32 %v918_v54 }
 0x137   :  { %v3443_v6 = vpop.eup %3442 }
 0x138   :  { %v3445_v7 = vpop.eup %3444 }
 0x139   :  { %v3447_v15 = vpop.eup %3446  ;;  %v949_v24 = vmul.f32 0.0, %v3445_v7  ;;  %v9892_v7 = vld [vmem:[#allocation69_spill] sm:$0xff] }
 0x154   :  { %v835_v59 = vpop.f32.mrf.mxu0  ;;  %v906_v60 = vpop.f32.mrf.mxu1 }
 0x155   :  { %v836_v62 = vadd.f32 %v835_v59, %v239_v55  ;;  %v907_v63 = vadd.f32 %v906_v60, %v241_v57 }
 0x156   :  { %v837_v42 = vpop.f32.mrf.mxu0  ;;  %v908_v43 = vpop.f32.mrf.mxu1 }
 0x157   :  { %3448 = vtanh.f32 %v836_v62  ;;  %v3382_v2 = vmul.f32 -1.442695, %v907_v63  ;;  %v838_v3 = vadd.f32 %v837_v42, %v240_v61  ;;  %v909_v4 = vadd.f32 %v908_v43, %v242_v0  ;;  %v5498_v61 = vld [vmem:[#allocation4 + $0x3e0] sm:$0xff]  ;;  %v5501_v62 = vld [vmem:[#allocation4 + $0x3f0] sm:$0xff]  ;;  %v5504_v63 = vld [vmem:[#allocation4 + $0x3a8] sm:$0xff] }
 0x158   :  { %3450 = vrcp.f32 %v930_v58  ;;  %v5507_v0 = vld [vmem:[#allocation4 + $0x3b8] sm:$0xff]  ;;  %v5510_v42 = vld [vmem:[#allocation4 + $0x3a0] sm:$0xff]  ;;  %v5513_v43 = vld [vmem:[#allocation4 + $0x3b0] sm:$0xff] }
 0x159   :  { %3452 = vpow2.f32 %v3382_v2  ;;  %v3383_v5 = vmul.f32 -1.442695, %v909_v4  ;;  %v5516_v2 = vld [vmem:[#allocation4 + $0x368] sm:$0xff]  ;;  %v5522_v4 = vld [vmem:[#allocation4 + $0x360] sm:$0xff] }
 0x15a   :  { %3454 = vtanh.f32 %v838_v3  ;;  %v5519_v3 = vld [vmem:[#allocation4 + $0x378] sm:$0xff] }
 0x15b   :  { %3456 = vpow2.f32 %v3383_v5  ;;  %v5525_v5 = vld [vmem:[#allocation4 + $0x370] sm:$0xff] }
 0x164   :  { %v3449_v22 = vpop.eup %3448 }
 0x165   :  { %v3451_v23 = vpop.eup %3450  ;;  %v951_v28 = vmul.f32 %v3449_v22, %v3443_v6  ;;  %v9891_v6 = vld [vmem:[#allocation68_spill] sm:$0xff]  ;;  %v9894_v22 = vld [vmem:[#allocation71_spill] sm:$0xff] }
 0x166   :  { %v3453_v30 = vpop.eup %3452  ;;  %v950_v41 = vmul.f32 0.0, %v3451_v23  ;;  %v9895_v23 = vld [vmem:[#allocation72_spill] sm:$0xff] }
 0x167   :  { %v3455_v31 = vpop.eup %3454  ;;  %v5488_v32 = vadd.f32 %v951_v28, %v949_v24  ;;  %v943_v34 = vadd.f32 1.0, %v3453_v30  ;;  %v9896_v24 = vld [vmem:[#allocation73_spill] sm:$0xff]  ;;  %v9897_v28 = vld [vmem:[#allocation74_spill] sm:$0xff]  ;;  %v9898_v30 = vld [vmem:[#allocation75_spill] sm:$0xff] }
 0x168   :  { %v3457_v35 = vpop.eup %3456  ;;  %v952_v49 = vmul.f32 %v3455_v31, %v3447_v15  ;;  %v9893_v15 = vld [vmem:[#allocation70_spill] sm:$0xff]  ;;  %v9902_v31 = vld [vmem:[#allocation79_spill] sm:$0xff] }
 0x169   :  { %3458 = vtanh.f32 %v5488_v32  ;;  %v944_v51 = vadd.f32 1.0, %v3457_v35  ;;  %v9904_v35 = vld [vmem:[#allocation81_spill] sm:$0xff] }
 0x16a   :  { %3460 = vrcp.f32 %v943_v34  ;;  %v5491_v37 = vadd.f32 %v952_v49, %v950_v41  ;;  %v9903_v34 = vld [vmem:[#allocation80_spill] sm:$0xff]  ;;  %v9905_v41 = vld [vmem:[#allocation82_spill] sm:$0xff]  ;;  %v9906_v49 = vld [vmem:[#allocation83_spill] sm:$0xff] }
 0x16b   :  { %3462 = vrcp.f32 %v944_v51  ;;  %v9907_v51 = vld [vmem:[#allocation84_spill] sm:$0xff] }
 0x16c   :  { %3464 = vtanh.f32 %v5491_v37 }
 0x176   :  { %v3459_v54 = vpop.eup %3458 }
 0x177   :  { %v3461_v55 = vpop.eup %3460 }
 0x178   :  { %v3463_v57 = vpop.eup %3462  ;;  %v5494_v60 = vmul.f32 %v3461_v55, %v3459_v54  ;;  %v9908_v54 = vld [vmem:[#allocation85_spill] sm:$0xff]  ;;  %v9909_v55 = vld [vmem:[#allocation86_spill] sm:$0xff] }
 0x179   :  { %v3465_v58 = vpop.eup %3464 }
 0x17a   :  { %v958_v59 = vmul.f32 %v3465_v58, %v3463_v57  ;;  %v9910_v57 = vld [vmem:[#allocation87_spill] sm:$0xff]  ;;  %v9911_v58 = vld [vmem:[#allocation88_spill] sm:$0xff] }
 0x17c   :  { %1032 = vmatprep.mubr.f32.mxu0 %v958_v59  ;;  %1103 = vmatprep.mubr.f32.mxu1 %v958_v59 }
 0x17d   :  { %1033 = vmatmul.mubr.f32.vlgmr.msra.gmra.mxu0 %v5494_v60  ;;  %1104 = vmatmul.mubr.f32.vlgmr.msra.gmra.mxu1 %v5494_v60 }
 0x17e   :  { %1111 = vmatpush1.msra.mxu0 %v5498_v61  ;;  %1182 = vmatpush1.msra.mxu1 %v5501_v62 }
 0x17f   :  { %1112 = vmatprep.subr.mxu0 %v5504_v63  ;;  %1174 = vmatprep.mubr.f32.mxu0 %v958_v59 }
 0x180   :  { %1183 = vmatprep.subr.mxu1 %v5507_v0  ;;  %1245 = vmatprep.mubr.f32.mxu1 %v958_v59  ;;  %v9912_v59 = vld [vmem:[#allocation89_spill] sm:$0xff] }
 0x181   :  { %1113 = vmatpush1.msra.mxu0 %v5510_v42  ;;  %1184 = vmatpush1.msra.mxu1 %v5513_v43 }
 0x182   :  { %1114 = vmatprep.subr.mxu0 %v5516_v2  ;;  %1185 = vmatprep.subr.mxu1 %v5519_v3 }
 0x183   :  { %1115 = vmatpush1.msra.mxu0 %v5522_v4  ;;  %1186 = vmatpush1.msra.mxu1 %v5525_v5 }
 0x184   :  { %1116 = vmatprep.subr.mxu0 %v4890_v9  ;;  %1187 = vmatprep.subr.mxu1 %v4892_v8  ;;  %v9899_v9 = vld [vmem:[#allocation76_spill] sm:$0xff]  ;;  %v9900_v8 = vld [vmem:[#allocation77_spill] sm:$0xff] }
 0x185   :  { %1117 = vmatpush1.msra.mxu0 %v4894_v14  ;;  %1188 = vmatpush1.msra.mxu1 %v9891_v6  ;;  %v9901_v14 = vld [vmem:[#allocation78_spill] sm:$0xff] }
 0x186   :  { %1118 = vmatprep.subr.mxu0 %v9892_v7  ;;  %1189 = vmatprep.subr.mxu1 %v9893_v15  ;;  %v9913_v6 = vld [vmem:[#allocation90_spill] sm:$0xff]  ;;  %v9914_v7 = vld [vmem:[#allocation91_spill] sm:$0xff]  ;;  %v9915_v15 = vld [vmem:[#allocation92_spill] sm:$0xff] }
 0x187   :  { %1119 = vmatpush1.msra.mxu0 %v9894_v22  ;;  %1190 = vmatpush1.msra.mxu1 %v9895_v23  ;;  %v9916_v22 = vld [vmem:[#allocation93_spill] sm:$0xff]  ;;  %v9917_v23 = vld [vmem:[#allocation94_spill] sm:$0xff] }
 0x188   :  { %1120 = vmatprep.subr.mxu0 %v9896_v24  ;;  %1191 = vmatprep.subr.mxu1 %v9897_v28  ;;  %v9918_v24 = vld [vmem:[#allocation95_spill] sm:$0xff]  ;;  %v9919_v28 = vld [vmem:[#allocation96_spill] sm:$0xff] }
 0x189   :  { %1121 = vmatpush1.msra.mxu0 %v9898_v30  ;;  %1192 = vmatpush1.msra.mxu1 %v9899_v9  ;;  %v9920_v30 = vld [vmem:[#allocation97_spill] sm:$0xff]  ;;  %v9921_v9 = vld [vmem:[#allocation98_spill] sm:$0xff] }
 0x18a   :  { %1122 = vmatprep.subr.mxu0 %v9900_v8  ;;  %1193 = vmatprep.subr.mxu1 %v9901_v14  ;;  %v9922_v8 = vld [vmem:[#allocation99_spill] sm:$0xff]  ;;  %v9923_v14 = vld [vmem:[#allocation100_spill] sm:$0xff] }
 0x18b   :  { %1123 = vmatpush1.msra.mxu0 %v9902_v31  ;;  %1194 = vmatpush1.msra.mxu1 %v9903_v34  ;;  %v9924_v31 = vld [vmem:[#allocation101_spill] sm:$0xff]  ;;  %v9925_v34 = vld [vmem:[#allocation102_spill] sm:$0xff] }
 0x18c   :  { %1124 = vmatprep.subr.mxu0 %v9904_v35  ;;  %1195 = vmatprep.subr.mxu1 %v9905_v41  ;;  %v9926_v35 = vld [vmem:[#allocation103_spill] sm:$0xff]  ;;  %v9927_v41 = vld [vmem:[#allocation104_spill] sm:$0xff] }
 0x18d   :  { %1125 = vmatpush1.msra.mxu0 %v9906_v49  ;;  %1196 = vmatpush1.msra.mxu1 %v9907_v51  ;;  %v9928_v49 = vld [vmem:[#allocation105_spill] sm:$0xff]  ;;  %v9929_v51 = vld [vmem:[#allocation106_spill] sm:$0xff] }
 0x18e   :  { %1126 = vmatprep.subr.mxu0 %v9908_v54  ;;  %1197 = vmatprep.subr.mxu1 %v9909_v55  ;;  %v9930_v54 = vld [vmem:[#allocation107_spill] sm:$0xff]  ;;  %v9931_v55 = vld [vmem:[#allocation108_spill] sm:$0xff] }
 0x18f   :  { %1127 = vmatpush1.msra.mxu0 %v9910_v57  ;;  %1198 = vmatpush1.msra.mxu1 %v9911_v58  ;;  %v9932_v57 = vld [vmem:[#allocation109_spill] sm:$0xff]  ;;  %v9933_v58 = vld [vmem:[#allocation110_spill] sm:$0xff] }
 0x190   :  { %1128 = vmatprep.subr.mxu0 %v9912_v59  ;;  %1199 = vmatprep.subr.mxu1 %v9913_v6  ;;  %v9934_v59 = vld [vmem:[#allocation111_spill] sm:$0xff]  ;;  %v9935_v6 = vld [vmem:[#allocation112_spill] sm:$0xff] }
 0x191   :  { %1129 = vmatpush1.msra.mxu0 %v9914_v7  ;;  %1200 = vmatpush1.msra.mxu1 %v9915_v15  ;;  %v9936_v7 = vld [vmem:[#allocation113_spill] sm:$0xff]  ;;  %v9937_v15 = vld [vmem:[#allocation114_spill] sm:$0xff] }
 0x192   :  { %1130 = vmatprep.subr.mxu0 %v9916_v22  ;;  %1201 = vmatprep.subr.mxu1 %v9917_v23  ;;  %v9938_v22 = vld [vmem:[#allocation115_spill] sm:$0xff]  ;;  %v9939_v23 = vld [vmem:[#allocation116_spill] sm:$0xff] }
 0x193   :  { %1131 = vmatpush1.msra.mxu0 %v9918_v24  ;;  %1202 = vmatpush1.msra.mxu1 %v9919_v28  ;;  %v9940_v24 = vld [vmem:[#allocation117_spill] sm:$0xff]  ;;  %v9941_v28 = vld [vmem:[#allocation118_spill] sm:$0xff] }
 0x194   :  { %1132 = vmatprep.subr.mxu0 %v9920_v30  ;;  %1203 = vmatprep.subr.mxu1 %v9921_v9  ;;  %v9942_v30 = vld [vmem:[#allocation119_spill] sm:$0xff]  ;;  %v9943_v9 = vld [vmem:[#allocation120_spill] sm:$0xff] }
 0x195   :  { %1133 = vmatpush1.msra.mxu0 %v9922_v8  ;;  %1204 = vmatpush1.msra.mxu1 %v9923_v14  ;;  %v9944_v8 = vld [vmem:[#allocation121_spill] sm:$0xff]  ;;  %v9945_v14 = vld [vmem:[#allocation122_spill] sm:$0xff] }
 0x196   :  { %1134 = vmatprep.subr.mxu0 %v9924_v31  ;;  %1205 = vmatprep.subr.mxu1 %v9925_v34  ;;  %v9946_v31 = vld [vmem:[#allocation123_spill] sm:$0xff]  ;;  %v9947_v34 = vld [vmem:[#allocation124_spill] sm:$0xff] }
 0x197   :  { %1135 = vmatpush1.msra.mxu0 %v9926_v35  ;;  %1206 = vmatpush1.msra.mxu1 %v9927_v41  ;;  %v9948_v35 = vld [vmem:[#allocation125_spill] sm:$0xff]  ;;  %v9949_v41 = vld [vmem:[#allocation126_spill] sm:$0xff] }
 0x198   :  { %1136 = vmatprep.subr.mxu0 %v9928_v49  ;;  %1207 = vmatprep.subr.mxu1 %v9929_v51  ;;  %v9950_v49 = vld [vmem:[#allocation127_spill] sm:$0xff]  ;;  %v9951_v51 = vld [vmem:[#allocation128_spill] sm:$0xff] }
 0x199   :  { %1137 = vmatpush1.msra.mxu0 %v9930_v54  ;;  %1208 = vmatpush1.msra.mxu1 %v9931_v55  ;;  %v9952_v54 = vld [vmem:[#allocation129_spill] sm:$0xff]  ;;  %v9953_v55 = vld [vmem:[#allocation130_spill] sm:$0xff] }
 0x19a   :  { %1138 = vmatprep.subr.mxu0 %v9932_v57  ;;  %1209 = vmatprep.subr.mxu1 %v9933_v58  ;;  %v9954_v57 = vld [vmem:[#allocation131_spill] sm:$0xff]  ;;  %v9955_v58 = vld [vmem:[#allocation132_spill] sm:$0xff] }
 0x19b   :  { %1139 = vmatpush1.msra.mxu0 %v9934_v59  ;;  %1210 = vmatpush1.msra.mxu1 %v9935_v6  ;;  %v9956_v59 = vld [vmem:[#allocation133_spill] sm:$0xff]  ;;  %v9957_v6 = vld [vmem:[#allocation134_spill] sm:$0xff] }
 0x19c   :  { %1140 = vmatprep.subr.mxu0 %v9936_v7  ;;  %1211 = vmatprep.subr.mxu1 %v9937_v15  ;;  %v9958_v7 = vld [vmem:[#allocation135_spill] sm:$0xff]  ;;  %v9959_v15 = vld [vmem:[#allocation136_spill] sm:$0xff] }
 0x19d   :  { %1141 = vmatpush1.msra.mxu0 %v9938_v22  ;;  %1212 = vmatpush1.msra.mxu1 %v9939_v23  ;;  %v9960_v22 = vld [vmem:[#allocation137_spill] sm:$0xff]  ;;  %v9961_v23 = vld [vmem:[#allocation138_spill] sm:$0xff] }
 0x19e   :  { %1142 = vmatprep.subr.mxu0 %v9940_v24  ;;  %1213 = vmatprep.subr.mxu1 %v9941_v28  ;;  %v9962_v24 = vld [vmem:[#allocation139_spill] sm:$0xff]  ;;  %v9963_v28 = vld [vmem:[#allocation140_spill] sm:$0xff] }
 0x19f   :  { %1143 = vmatpush2.msra.mxu0 %v9942_v30  ;;  %1214 = vmatpush2.msra.mxu1 %v9943_v9  ;;  %v9964_v30 = vld [vmem:[#allocation141_spill] sm:$0xff]  ;;  %v9965_v9 = vld [vmem:[#allocation142_spill] sm:$0xff] }
 0x1a0   :  { %1144 = vmatprep.subr.mxu0 %v9944_v8  ;;  %1215 = vmatprep.subr.mxu1 %v9945_v14  ;;  %v9966_v8 = vld [vmem:[#allocation143_spill] sm:$0xff]  ;;  %v9967_v14 = vld [vmem:[#allocation144_spill] sm:$0xff] }
 0x1a1   :  { %1145 = vmatpush2.msra.mxu0 %v9946_v31  ;;  %1216 = vmatpush2.msra.mxu1 %v9947_v34  ;;  %v9968_v31 = vld [vmem:[#allocation145_spill] sm:$0xff]  ;;  %v9969_v34 = vld [vmem:[#allocation146_spill] sm:$0xff] }
 0x1a2   :  { %1146 = vmatprep.subr.mxu0 %v9948_v35  ;;  %1217 = vmatprep.subr.mxu1 %v9949_v41  ;;  %v9970_v35 = vld [vmem:[#allocation147_spill] sm:$0xff]  ;;  %v9971_v41 = vld [vmem:[#allocation148_spill] sm:$0xff] }
 0x1a3   :  { %1147 = vmatpush2.msra.mxu0 %v9950_v49  ;;  %1218 = vmatpush2.msra.mxu1 %v9951_v51  ;;  %v9972_v49 = vld [vmem:[#allocation149_spill] sm:$0xff]  ;;  %v9973_v51 = vld [vmem:[#allocation150_spill] sm:$0xff] }
 0x1a4   :  { %1148 = vmatprep.subr.mxu0 %v9952_v54  ;;  %1219 = vmatprep.subr.mxu1 %v9953_v55  ;;  %v9974_v54 = vld [vmem:[#allocation151_spill] sm:$0xff]  ;;  %v9975_v55 = vld [vmem:[#allocation152_spill] sm:$0xff] }
 0x1a5   :  { %1149 = vmatpush2.msra.mxu0 %v9954_v57  ;;  %1220 = vmatpush2.msra.mxu1 %v9955_v58  ;;  %v9976_v57 = vld [vmem:[#allocation153_spill] sm:$0xff]  ;;  %v9977_v58 = vld [vmem:[#allocation154_spill] sm:$0xff] }
 0x1a6   :  { %1150 = vmatprep.subr.mxu0 %v9956_v59  ;;  %1221 = vmatprep.subr.mxu1 %v9957_v6  ;;  %v9978_v59 = vld [vmem:[#allocation155_spill] sm:$0xff]  ;;  %v9979_v6 = vld [vmem:[#allocation156_spill] sm:$0xff] }
 0x1a7   :  { %1151 = vmatpush2.msra.mxu0 %v9958_v7  ;;  %1222 = vmatpush2.msra.mxu1 %v9959_v15  ;;  %v9980_v7 = vld [vmem:[#allocation157_spill] sm:$0xff]  ;;  %v9981_v15 = vld [vmem:[#allocation158_spill] sm:$0xff] }
 0x1a8   :  { %1152 = vmatprep.subr.mxu0 %v9960_v22  ;;  %1223 = vmatprep.subr.mxu1 %v9961_v23  ;;  %v9982_v22 = vld [vmem:[#allocation159_spill] sm:$0xff]  ;;  %v9983_v23 = vld [vmem:[#allocation160_spill] sm:$0xff] }
 0x1a9   :  { %1153 = vmatpush2.msra.mxu0 %v9962_v24  ;;  %1224 = vmatpush2.msra.mxu1 %v9963_v28  ;;  %v9984_v24 = vld [vmem:[#allocation161_spill] sm:$0xff]  ;;  %v9985_v28 = vld [vmem:[#allocation162_spill] sm:$0xff] }
 0x1aa   :  { %1154 = vmatprep.subr.mxu0 %v9964_v30  ;;  %1225 = vmatprep.subr.mxu1 %v9965_v9  ;;  %v9986_v30 = vld [vmem:[#allocation163_spill] sm:$0xff]  ;;  %v9987_v9 = vld [vmem:[#allocation164_spill] sm:$0xff] }
 0x1ab   :  { %1155 = vmatpush2.msra.mxu0 %v9966_v8  ;;  %1226 = vmatpush2.msra.mxu1 %v9967_v14  ;;  %v9988_v8 = vld [vmem:[#allocation165_spill] sm:$0xff]  ;;  %v9989_v14 = vld [vmem:[#allocation166_spill] sm:$0xff] }
 0x1ac   :  { %1156 = vmatprep.subr.mxu0 %v9968_v31  ;;  %1227 = vmatprep.subr.mxu1 %v9969_v34  ;;  %v9990_v31 = vld [vmem:[#allocation167_spill] sm:$0xff]  ;;  %v9991_v34 = vld [vmem:[#allocation168_spill] sm:$0xff] }
 0x1ad   :  { %1157 = vmatpush2.msra.mxu0 %v9970_v35  ;;  %1228 = vmatpush2.msra.mxu1 %v9971_v41  ;;  %v9992_v35 = vld [vmem:[#allocation169_spill] sm:$0xff]  ;;  %v9993_v41 = vld [vmem:[#allocation170_spill] sm:$0xff] }
 0x1ae   :  { %1158 = vmatprep.subr.mxu0 %v9972_v49  ;;  %1229 = vmatprep.subr.mxu1 %v9973_v51  ;;  %v9994_v49 = vld [vmem:[#allocation171_spill] sm:$0xff]  ;;  %v9995_v51 = vld [vmem:[#allocation172_spill] sm:$0xff] }
 0x1af   :  { %1159 = vmatpush2.msra.mxu0 %v9974_v54  ;;  %1230 = vmatpush2.msra.mxu1 %v9975_v55  ;;  %v9996_v54 = vld [vmem:[#allocation173_spill] sm:$0xff]  ;;  %v9997_v55 = vld [vmem:[#allocation174_spill] sm:$0xff] }
 0x1b0   :  { %1160 = vmatprep.subr.mxu0 %v9976_v57  ;;  %1231 = vmatprep.subr.mxu1 %v9977_v58  ;;  %v10003_v57 = vld [vmem:[#allocation180_spill] sm:$0xff]  ;;  %v10004_v58 = vld [vmem:[#allocation181_spill] sm:$0xff] }
 0x1b1   :  { %1161 = vmatpush2.msra.mxu0 %v9978_v59  ;;  %1232 = vmatpush2.msra.mxu1 %v9979_v6  ;;  %v10005_v59 = vld [vmem:[#allocation182_spill] sm:$0xff]  ;;  %v10006_v6 = vld [vmem:[#allocation183_spill] sm:$0xff] }
 0x1b2   :  { %1162 = vmatprep.subr.mxu0 %v9980_v7  ;;  %1233 = vmatprep.subr.mxu1 %v9981_v15  ;;  %v10007_v7 = vld [vmem:[#allocation184_spill] sm:$0xff]  ;;  %v10008_v15 = vld [vmem:[#allocation185_spill] sm:$0xff] }
 0x1b3   :  { %1163 = vmatpush2.msra.mxu0 %v9982_v22  ;;  %1234 = vmatpush2.msra.mxu1 %v9983_v23  ;;  %v10010_v22 = vld [vmem:[#allocation187_spill] sm:$0xff]  ;;  %v10011_v23 = vld [vmem:[#allocation188_spill] sm:$0xff] }
 0x1b4   :  { %1164 = vmatprep.subr.mxu0 %v9984_v24  ;;  %1235 = vmatprep.subr.mxu1 %v9985_v28  ;;  %v10012_v24 = vld [vmem:[#allocation189_spill] sm:$0xff]  ;;  %v5666_v28 = vld [vmem:[#allocation4 + $0x288] sm:$0xff] }
 0x1b5   :  { %1165 = vmatpush2.msra.mxu0 %v9986_v30  ;;  %1236 = vmatpush2.msra.mxu1 %v9987_v9  ;;  %v5669_v30 = vld [vmem:[#allocation4 + $0x298] sm:$0xff]  ;;  %v5672_v9 = vld [vmem:[#allocation4 + $0x280] sm:$0xff] }
 0x1b6   :  { %1166 = vmatprep.subr.mxu0 %v9988_v8  ;;  %1237 = vmatprep.subr.mxu1 %v9989_v14  ;;  %v5693_v8 = vld [vmem:[#allocation4 + $0x218] sm:$0xff]  ;;  %v5696_v14 = vld [vmem:[#allocation4 + $0x200] sm:$0xff] }
 0x1b7   :  { %1167 = vmatpush2.msra.mxu0 %v9990_v31  ;;  %1238 = vmatpush2.msra.mxu1 %v9991_v34  ;;  %v5699_v31 = vld [vmem:[#allocation4 + $0x210] sm:$0xff]  ;;  %v5702_v34 = vld [vmem:[#allocation4 + $0x1c8] sm:$0xff] }
 0x1b8   :  { %1168 = vmatprep.subr.mxu0 %v5198_v16  ;;  %1239 = vmatprep.subr.mxu1 %v9992_v35  ;;  %v9998_v16 = vld [vmem:[#allocation175_spill] sm:$0xff]  ;;  %v5705_v35 = vld [vmem:[#allocation4 + $0x1d8] sm:$0xff] }
 0x1b9   :  { %1169 = vmatpush2.msra.mxu0 %v5204_v18  ;;  %1240 = vmatpush2.msra.mxu1 %v5206_v11  ;;  %v9999_v18 = vld [vmem:[#allocation176_spill] sm:$0xff]  ;;  %v10000_v11 = vld [vmem:[#allocation177_spill] sm:$0xff] }
 0x1ba   :  { %1170 = vmatprep.subr.mxu0 %v5210_v1  ;;  %1241 = vmatprep.subr.mxu1 %v5212_v10  ;;  %v10001_v1 = vld [vmem:[#allocation178_spill] sm:$0xff]  ;;  %v10002_v10 = vld [vmem:[#allocation179_spill] sm:$0xff] }
 0x1bb   :  { %1171 = vmatpush2.msra.mxu0 %v9993_v41  ;;  %1242 = vmatpush2.msra.mxu1 %v9994_v49  ;;  %v5708_v41 = vld [vmem:[#allocation4 + $0x1c0] sm:$0xff]  ;;  %v5711_v49 = vld [vmem:[#allocation4 + $0x1d0] sm:$0xff] }
 0x1bc   :  { %1172 = vmatprep.subr.mxu0 %v9995_v51  ;;  %1243 = vmatprep.subr.mxu1 %v9996_v54  ;;  %v5714_v51 = vld [vmem:[#allocation4 + $0x188] sm:$0xff]  ;;  %v5717_v54 = vld [vmem:[#allocation4 + $0x198] sm:$0xff] }
 0x1bd   :  { %1173 = vmatpush2.msra.mxu0 %v9997_v55  ;;  %1244 = vmatpush2.msra.mxu1 %v9998_v16  ;;  %v5720_v55 = vld [vmem:[#allocation4 + $0x180] sm:$0xff]  ;;  %v5723_v16 = vld [vmem:[#allocation4 + $0x190] sm:$0xff] }
 0x1be   :  { %1175 = vmatmul.mubr.f32.vlgmr.msra.gmra.mxu0 %v5494_v60  ;;  %1246 = vmatmul.mubr.f32.vlgmr.msra.gmra.mxu1 %v5494_v60  ;;  %v10009_v60 = vld [vmem:[#allocation186_spill] sm:$0xff]  ;;  %10013 = vst [vmem:[#allocation15_spill] sm:$0xff] %v5723_v16 }
 0x1bf   :  { %1309 = vmatprep.subr.mxu0 %v9999_v18  ;;  %1380 = vmatprep.subr.mxu1 %v10000_v11  ;;  %v5726_v18 = vld [vmem:[#allocation4 + $0x148] sm:$0xff]  ;;  %v5729_v11 = vld [vmem:[#allocation4 + $0x158] sm:$0xff] }
 0x1c0   :  { %1310 = vmatpush1.msra.mxu0 %v10001_v1  ;;  %1381 = vmatpush1.msra.mxu1 %v10002_v10  ;;  %10014 = vst [vmem:[#allocation16_spill] sm:$0xff] %v5726_v18  ;;  %10015 = vst [vmem:[#allocation17_spill] sm:$0xff] %v5729_v11  ;;  %v5732_v1 = vld [vmem:[#allocation4 + $0x140] sm:$0xff]  ;;  %v5735_v10 = vld [vmem:[#allocation4 + $0x150] sm:$0xff] }
 0x1c1   :  { %1311 = vmatprep.subr.mxu0 %v10003_v57  ;;  %1382 = vmatprep.subr.mxu1 %v10004_v58  ;;  %10016 = vst [vmem:[#allocation18_spill] sm:$0xff] %v5732_v1  ;;  %10017 = vst [vmem:[#allocation19_spill] sm:$0xff] %v5735_v10  ;;  %v5738_v57 = vld [vmem:[#allocation4 + $0x108] sm:$0xff]  ;;  %v5741_v58 = vld [vmem:[#allocation4 + $0x118] sm:$0xff] }
 0x1c2   :  { %1312 = vmatpush1.msra.mxu0 %v10005_v59  ;;  %1383 = vmatpush1.msra.mxu1 %v10006_v6  ;;  %10018 = vst [vmem:[#allocation20_spill] sm:$0xff] %v5738_v57  ;;  %10019 = vst [vmem:[#allocation21_spill] sm:$0xff] %v5741_v58  ;;  %v5744_v59 = vld [vmem:[#allocation4 + $0x100] sm:$0xff]  ;;  %v5747_v6 = vld [vmem:[#allocation4 + $0x110] sm:$0xff] }
 0x1c3   :  { %1313 = vmatprep.subr.mxu0 %v10007_v7  ;;  %1384 = vmatprep.subr.mxu1 %v10008_v15  ;;  %10020 = vst [vmem:[#allocation22_spill] sm:$0xff] %v5744_v59  ;;  %10021 = vst [vmem:[#allocation23_spill] sm:$0xff] %v5747_v6  ;;  %v5750_v7 = vld [vmem:[#allocation4 + $0xc8] sm:$0xff]  ;;  %v5753_v15 = vld [vmem:[#allocation4 + $0xd8] sm:$0xff] }
 0x1c4   :  { %1314 = vmatpush1.msra.mxu0 %v10009_v60  ;;  %1385 = vmatpush1.msra.mxu1 %v10010_v22  ;;  %10022 = vst [vmem:[#allocation24_spill] sm:$0xff] %v5750_v7  ;;  %10023 = vst [vmem:[#allocation25_spill] sm:$0xff] %v5753_v15  ;;  %v5756_v60 = vld [vmem:[#allocation4 + $0xc0] sm:$0xff]  ;;  %v5759_v22 = vld [vmem:[#allocation4 + $0xd0] sm:$0xff] }
 0x1c5   :  { %1315 = vmatprep.subr.mxu0 %v10011_v23  ;;  %1386 = vmatprep.subr.mxu1 %v10012_v24  ;;  %10024 = vst [vmem:[#allocation26_spill] sm:$0xff] %v5756_v60  ;;  %10025 = vst [vmem:[#allocation27_spill] sm:$0xff] %v5759_v22  ;;  %v5762_v23 = vld [vmem:[#allocation4 + $0x88] sm:$0xff]  ;;  %v5765_v24 = vld [vmem:[#allocation4 + $0x98] sm:$0xff] }
 0x1c6   :  { %1316 = vmatpush1.msra.mxu0 %v5294_v13  ;;  %1387 = vmatpush1.msra.mxu1 %v5297_v12  ;;  %v5675_v13 = vld [vmem:[#allocation4 + $0x290] sm:$0xff]  ;;  %v5678_v12 = vld [vmem:[#allocation4 + $0x248] sm:$0xff]  ;;  %10026 = vst [vmem:[#allocation28_spill] sm:$0xff] %v5762_v23  ;;  %10027 = vst [vmem:[#allocation29_spill] sm:$0xff] %v5765_v24 }
 0x1c7   :  { %1317 = vmatprep.subr.mxu0 %v5303_v19  ;;  %1388 = vmatprep.subr.mxu1 %v5306_v17  ;;  %v5684_v19 = vld [vmem:[#allocation4 + $0x240] sm:$0xff]  ;;  %v5687_v17 = vld [vmem:[#allocation4 + $0x250] sm:$0xff] }
 0x1c8   :  { %1318 = vmatpush1.msra.mxu0 %v5309_v21  ;;  %1389 = vmatpush1.msra.mxu1 %v5312_v20  ;;  %v5681_v21 = vld [vmem:[#allocation4 + $0x258] sm:$0xff]  ;;  %v5690_v20 = vld [vmem:[#allocation4 + $0x208] sm:$0xff] }
 0x1c9   :  { %1319 = vmatprep.subr.mxu0 %v5666_v28  ;;  %1390 = vmatprep.subr.mxu1 %v5669_v30 }
 0x1ca   :  { %1320 = vmatpush1.msra.mxu0 %v5672_v9  ;;  %1391 = vmatpush1.msra.mxu1 %v5675_v13 }
 0x1cb   :  { %1321 = vmatprep.subr.mxu0 %v5678_v12  ;;  %1392 = vmatprep.subr.mxu1 %v5681_v21 }
 0x1cc   :  { %1322 = vmatpush1.msra.mxu0 %v5684_v19  ;;  %1393 = vmatpush1.msra.mxu1 %v5687_v17 }
 0x1cd   :  { %1323 = vmatprep.subr.mxu0 %v5690_v20  ;;  %1394 = vmatprep.subr.mxu1 %v5693_v8 }
 0x1ce   :  { %1324 = vmatpush1.msra.mxu0 %v5696_v14  ;;  %1395 = vmatpush1.msra.mxu1 %v5699_v31 }
 0x1cf   :  { %1325 = vmatprep.subr.mxu0 %v5702_v34  ;;  %1396 = vmatprep.subr.mxu1 %v5705_v35 }
 0x1d0   :  { %1326 = vmatpush1.msra.mxu0 %v5708_v41  ;;  %1397 = vmatpush1.msra.mxu1 %v5711_v49 }
 0x1d1   :  { %1327 = vmatprep.subr.mxu0 %v5714_v51  ;;  %1398 = vmatprep.subr.mxu1 %v5717_v54 }
 0x1d2   :  { %1328 = vmatpush1.msra.mxu0 %v5720_v55  ;;  %1399 = vmatpush1.msra.mxu1 %v5723_v16 }
 0x1d3   :  { %1329 = vmatprep.subr.mxu0 %v5726_v18  ;;  %1400 = vmatprep.subr.mxu1 %v5729_v11 }
 0x1d4   :  { %1330 = vmatpush1.msra.mxu0 %v5732_v1  ;;  %1401 = vmatpush1.msra.mxu1 %v5735_v10 }
 0x1d5   :  { %1331 = vmatprep.subr.mxu0 %v5738_v57  ;;  %1402 = vmatprep.subr.mxu1 %v5741_v58 }
 0x1d6   :  { %1332 = vmatpush1.msra.mxu0 %v5744_v59  ;;  %1403 = vmatpush1.msra.mxu1 %v5747_v6 }
 0x1d7   :  { %1333 = vmatprep.subr.mxu0 %v5750_v7  ;;  %1404 = vmatprep.subr.mxu1 %v5753_v15 }
 0x1d8   :  { %1334 = vmatpush1.msra.mxu0 %v5756_v60  ;;  %1405 = vmatpush1.msra.mxu1 %v5759_v22  ;;  %v5774_v60 = vld [vmem:[#allocation4 + $0x48] sm:$0xff]  ;;  %v5777_v22 = vld [vmem:[#allocation4 + $0x58] sm:$0xff] }
 0x1d9   :  { %1335 = vmatprep.subr.mxu0 %v5762_v23  ;;  %1406 = vmatprep.subr.mxu1 %v5765_v24  ;;  %10030 = vst [vmem:[#allocation32_spill] sm:$0xff] %v5774_v60  ;;  %10031 = vst [vmem:[#allocation33_spill] sm:$0xff] %v5777_v22  ;;  %v5780_v23 = vld [vmem:[#allocation4 + $0x40] sm:$0xff]  ;;  %v5783_v24 = vld [vmem:[#allocation4 + $0x50] sm:$0xff] }
 0x1da   :  { %1336 = vmatpush1.msra.mxu0 %v5768_v39  ;;  %1407 = vmatpush1.msra.mxu1 %v5771_v36  ;;  %10032 = vst [vmem:[#allocation34_spill] sm:$0xff] %v5780_v23  ;;  %10033 = vst [vmem:[#allocation35_spill] sm:$0xff] %v5783_v24  ;;  %v5786_v39 = vld [vmem:[#allocation4 + $0x8] sm:$0xff]  ;;  %v5789_v36 = vld [vmem:[#allocation4 + $0x18] sm:$0xff] }
 0x1db   :  { %1337 = vmatprep.subr.mxu0 %v5774_v60  ;;  %1408 = vmatprep.subr.mxu1 %v5777_v22  ;;  %10034 = vst [vmem:[#allocation36_spill] sm:$0xff] %v5786_v39  ;;  %10035 = vst [vmem:[#allocation37_spill] sm:$0xff] %v5789_v36  ;;  %v5792_v60 = vld [vmem:[#allocation4] sm:$0xff]  ;;  %v5795_v22 = vld [vmem:[#allocation4 + $0x10] sm:$0xff] }
 0x1dc   :  { %1338 = vmatpush1.msra.mxu0 %v5780_v23  ;;  %1409 = vmatpush1.msra.mxu1 %v5783_v24  ;;  %10036 = vst [vmem:[#allocation38_spill] sm:$0xff] %v5792_v60  ;;  %10037 = vst [vmem:[#allocation39_spill] sm:$0xff] %v5795_v22  ;;  %v5798_v23 = vld [vmem:[#allocation4 + $0x7c8] sm:$0xff]  ;;  %v5801_v24 = vld [vmem:[#allocation4 + $0x7d8] sm:$0xff] }
 0x1dd   :  { %1339 = vmatprep.subr.mxu0 %v5786_v39  ;;  %1410 = vmatprep.subr.mxu1 %v5789_v36  ;;  %10038 = vst [vmem:[#allocation40_spill] sm:$0xff] %v5798_v23  ;;  %10039 = vst [vmem:[#allocation41_spill] sm:$0xff] %v5801_v24  ;;  %v5804_v39 = vld [vmem:[#allocation4 + $0x7c0] sm:$0xff]  ;;  %v5807_v36 = vld [vmem:[#allocation4 + $0x7d0] sm:$0xff] }
 0x1de   :  { %1340 = vmatpush1.msra.mxu0 %v5792_v60  ;;  %1411 = vmatpush1.msra.mxu1 %v5795_v22  ;;  %10040 = vst [vmem:[#allocation42_spill] sm:$0xff] %v5804_v39  ;;  %10041 = vst [vmem:[#allocation43_spill] sm:$0xff] %v5807_v36  ;;  %v5810_v60 = vld [vmem:[#allocation4 + $0x788] sm:$0xff]  ;;  %v5813_v22 = vld [vmem:[#allocation4 + $0x798] sm:$0xff] }
 0x1df   :  { %1341 = vmatprep.subr.mxu0 %v5798_v23  ;;  %1412 = vmatprep.subr.mxu1 %v5801_v24  ;;  %10042 = vst [vmem:[#allocation44_spill] sm:$0xff] %v5810_v60  ;;  %10043 = vst [vmem:[#allocation45_spill] sm:$0xff] %v5813_v22  ;;  %v5816_v23 = vld [vmem:[#allocation4 + $0x780] sm:$0xff]  ;;  %v5819_v24 = vld [vmem:[#allocation4 + $0x790] sm:$0xff] }
 0x1e0   :  { %1342 = vmatpush2.msra.mxu0 %v5804_v39  ;;  %1413 = vmatpush2.msra.mxu1 %v5807_v36  ;;  %10044 = vst [vmem:[#allocation46_spill] sm:$0xff] %v5816_v23  ;;  %10045 = vst [vmem:[#allocation47_spill] sm:$0xff] %v5819_v24  ;;  %v5822_v39 = vld [vmem:[#allocation4 + $0x748] sm:$0xff]  ;;  %v5825_v36 = vld [vmem:[#allocation4 + $0x758] sm:$0xff] }
 0x1e1   :  { %1343 = vmatprep.subr.mxu0 %v5810_v60  ;;  %1414 = vmatprep.subr.mxu1 %v5813_v22  ;;  %10046 = vst [vmem:[#allocation48_spill] sm:$0xff] %v5822_v39  ;;  %10047 = vst [vmem:[#allocation49_spill] sm:$0xff] %v5825_v36  ;;  %v5828_v60 = vld [vmem:[#allocation4 + $0x740] sm:$0xff]  ;;  %v5831_v22 = vld [vmem:[#allocation4 + $0x750] sm:$0xff] }
 0x1e2   :  { %1344 = vmatpush2.msra.mxu0 %v5816_v23  ;;  %1415 = vmatpush2.msra.mxu1 %v5819_v24  ;;  %10048 = vst [vmem:[#allocation50_spill] sm:$0xff] %v5828_v60  ;;  %10049 = vst [vmem:[#allocation51_spill] sm:$0xff] %v5831_v22  ;;  %v5834_v23 = vld [vmem:[#allocation4 + $0x708] sm:$0xff]  ;;  %v5837_v24 = vld [vmem:[#allocation4 + $0x718] sm:$0xff] }
 0x1e3   :  { %1345 = vmatprep.subr.mxu0 %v5822_v39  ;;  %1416 = vmatprep.subr.mxu1 %v5825_v36  ;;  %10050 = vst [vmem:[#allocation52_spill] sm:$0xff] %v5834_v23  ;;  %10051 = vst [vmem:[#allocation53_spill] sm:$0xff] %v5837_v24  ;;  %v5840_v39 = vld [vmem:[#allocation4 + $0x700] sm:$0xff]  ;;  %v5843_v36 = vld [vmem:[#allocation4 + $0x710] sm:$0xff] }
 0x1e4   :  { %1346 = vmatpush2.msra.mxu0 %v5828_v60  ;;  %1417 = vmatpush2.msra.mxu1 %v5831_v22  ;;  %10052 = vst [vmem:[#allocation54_spill] sm:$0xff] %v5840_v39  ;;  %10053 = vst [vmem:[#allocation55_spill] sm:$0xff] %v5843_v36  ;;  %v5846_v60 = vld [vmem:[#allocation4 + $0x6c8] sm:$0xff]  ;;  %v5849_v22 = vld [vmem:[#allocation4 + $0x6d8] sm:$0xff] }
 0x1e5   :  { %1347 = vmatprep.subr.mxu0 %v5834_v23  ;;  %1418 = vmatprep.subr.mxu1 %v5837_v24  ;;  %10054 = vst [vmem:[#allocation56_spill] sm:$0xff] %v5846_v60  ;;  %10055 = vst [vmem:[#allocation57_spill] sm:$0xff] %v5849_v22  ;;  %v5852_v23 = vld [vmem:[#allocation4 + $0x6c0] sm:$0xff]  ;;  %v5855_v24 = vld [vmem:[#allocation4 + $0x6d0] sm:$0xff] }
 0x1e6   :  { %1348 = vmatpush2.msra.mxu0 %v5840_v39  ;;  %1419 = vmatpush2.msra.mxu1 %v5843_v36  ;;  %10056 = vst [vmem:[#allocation58_spill] sm:$0xff] %v5852_v23  ;;  %10057 = vst [vmem:[#allocation59_spill] sm:$0xff] %v5855_v24  ;;  %v5858_v39 = vld [vmem:[#allocation4 + $0x688] sm:$0xff]  ;;  %v5861_v36 = vld [vmem:[#allocation4 + $0x698] sm:$0xff] }
 0x1e7   :  { %1349 = vmatprep.subr.mxu0 %v5846_v60  ;;  %1420 = vmatprep.subr.mxu1 %v5849_v22  ;;  %10058 = vst [vmem:[#allocation60_spill] sm:$0xff] %v5858_v39  ;;  %10059 = vst [vmem:[#allocation61_spill] sm:$0xff] %v5861_v36  ;;  %v5864_v60 = vld [vmem:[#allocation4 + $0x680] sm:$0xff]  ;;  %v5867_v22 = vld [vmem:[#allocation4 + $0x690] sm:$0xff] }
 0x1e8   :  { %1350 = vmatpush2.msra.mxu0 %v5852_v23  ;;  %1421 = vmatpush2.msra.mxu1 %v5855_v24  ;;  %10060 = vst [vmem:[#allocation62_spill] sm:$0xff] %v5864_v60  ;;  %10061 = vst [vmem:[#allocation63_spill] sm:$0xff] %v5867_v22  ;;  %v5870_v23 = vld [vmem:[#allocation4 + $0x648] sm:$0xff]  ;;  %v5873_v24 = vld [vmem:[#allocation4 + $0x658] sm:$0xff] }
 0x1e9   :  { %1351 = vmatprep.subr.mxu0 %v5858_v39  ;;  %1422 = vmatprep.subr.mxu1 %v5861_v36  ;;  %10062 = vst [vmem:[#allocation64_spill] sm:$0xff] %v5870_v23  ;;  %10063 = vst [vmem:[#allocation65_spill] sm:$0xff] %v5873_v24  ;;  %v5876_v39 = vld [vmem:[#allocation4 + $0x640] sm:$0xff]  ;;  %v5879_v36 = vld [vmem:[#allocation4 + $0x650] sm:$0xff] }
 0x1ea   :  { %1352 = vmatpush2.msra.mxu0 %v5864_v60  ;;  %1423 = vmatpush2.msra.mxu1 %v5867_v22  ;;  %10064 = vst [vmem:[#allocation66_spill] sm:$0xff] %v5876_v39  ;;  %10065 = vst [vmem:[#allocation67_spill] sm:$0xff] %v5879_v36  ;;  %v5882_v60 = vld [vmem:[#allocation4 + $0x608] sm:$0xff]  ;;  %v5885_v22 = vld [vmem:[#allocation4 + $0x618] sm:$0xff] }
 0x1eb   :  { %1353 = vmatprep.subr.mxu0 %v5870_v23  ;;  %1424 = vmatprep.subr.mxu1 %v5873_v24  ;;  %10066 = vst [vmem:[#allocation68_spill] sm:$0xff] %v5882_v60  ;;  %10067 = vst [vmem:[#allocation69_spill] sm:$0xff] %v5885_v22  ;;  %v5888_v23 = vld [vmem:[#allocation4 + $0x600] sm:$0xff]  ;;  %v5891_v24 = vld [vmem:[#allocation4 + $0x610] sm:$0xff] }
 0x1ec   :  { %1354 = vmatpush2.msra.mxu0 %v5876_v39  ;;  %1425 = vmatpush2.msra.mxu1 %v5879_v36  ;;  %10068 = vst [vmem:[#allocation70_spill] sm:$0xff] %v5888_v23  ;;  %10069 = vst [vmem:[#allocation71_spill] sm:$0xff] %v5891_v24  ;;  %v5894_v39 = vld [vmem:[#allocation4 + $0x5c8] sm:$0xff]  ;;  %v5897_v36 = vld [vmem:[#allocation4 + $0x5d8] sm:$0xff] }
 0x1ed   :  { %1355 = vmatprep.subr.mxu0 %v5882_v60  ;;  %1426 = vmatprep.subr.mxu1 %v5885_v22  ;;  %10070 = vst [vmem:[#allocation72_spill] sm:$0xff] %v5894_v39  ;;  %10071 = vst [vmem:[#allocation73_spill] sm:$0xff] %v5897_v36  ;;  %v5900_v60 = vld [vmem:[#allocation4 + $0x5c0] sm:$0xff]  ;;  %v5903_v22 = vld [vmem:[#allocation4 + $0x5d0] sm:$0xff] }
 0x1ee   :  { %1356 = vmatpush2.msra.mxu0 %v5888_v23  ;;  %1427 = vmatpush2.msra.mxu1 %v5891_v24  ;;  %10072 = vst [vmem:[#allocation74_spill] sm:$0xff] %v5900_v60  ;;  %10073 = vst [vmem:[#allocation75_spill] sm:$0xff] %v5903_v22  ;;  %v5906_v23 = vld [vmem:[#allocation4 + $0x588] sm:$0xff]  ;;  %v5909_v24 = vld [vmem:[#allocation4 + $0x598] sm:$0xff] }
 0x1ef   :  { %1357 = vmatprep.subr.mxu0 %v5894_v39  ;;  %1428 = vmatprep.subr.mxu1 %v5897_v36  ;;  %10074 = vst [vmem:[#allocation76_spill] sm:$0xff] %v5906_v23  ;;  %10075 = vst [vmem:[#allocation77_spill] sm:$0xff] %v5909_v24  ;;  %v5912_v39 = vld [vmem:[#allocation4 + $0x580] sm:$0xff]  ;;  %v5915_v36 = vld [vmem:[#allocation4 + $0x590] sm:$0xff] }
 0x1f0   :  { %1358 = vmatpush2.msra.mxu0 %v5900_v60  ;;  %1429 = vmatpush2.msra.mxu1 %v5903_v22  ;;  %10076 = vst [vmem:[#allocation78_spill] sm:$0xff] %v5912_v39  ;;  %10077 = vst [vmem:[#allocation79_spill] sm:$0xff] %v5915_v36  ;;  %v5918_v60 = vld [vmem:[#allocation4 + $0x548] sm:$0xff]  ;;  %v5921_v22 = vld [vmem:[#allocation4 + $0x558] sm:$0xff] }
 0x1f1   :  { %1359 = vmatprep.subr.mxu0 %v5906_v23  ;;  %1430 = vmatprep.subr.mxu1 %v5909_v24  ;;  %10078 = vst [vmem:[#allocation80_spill] sm:$0xff] %v5918_v60  ;;  %10079 = vst [vmem:[#allocation81_spill] sm:$0xff] %v5921_v22  ;;  %v5924_v23 = vld [vmem:[#allocation4 + $0x540] sm:$0xff]  ;;  %v5927_v24 = vld [vmem:[#allocation4 + $0x550] sm:$0xff] }
 0x1f2   :  { %1360 = vmatpush2.msra.mxu0 %v5912_v39  ;;  %1431 = vmatpush2.msra.mxu1 %v5915_v36  ;;  %10080 = vst [vmem:[#allocation82_spill] sm:$0xff] %v5924_v23  ;;  %10081 = vst [vmem:[#allocation83_spill] sm:$0xff] %v5927_v24  ;;  %v5930_v39 = vld [vmem:[#allocation4 + $0x508] sm:$0xff]  ;;  %v5933_v36 = vld [vmem:[#allocation4 + $0x518] sm:$0xff] }
 0x1f3   :  { %1361 = vmatprep.subr.mxu0 %v5918_v60  ;;  %1432 = vmatprep.subr.mxu1 %v5921_v22  ;;  %10082 = vst [vmem:[#allocation84_spill] sm:$0xff] %v5930_v39  ;;  %10083 = vst [vmem:[#allocation85_spill] sm:$0xff] %v5933_v36  ;;  %v5936_v60 = vld [vmem:[#allocation4 + $0x500] sm:$0xff]  ;;  %v5939_v22 = vld [vmem:[#allocation4 + $0x510] sm:$0xff] }
 0x1f4   :  { %1362 = vmatpush2.msra.mxu0 %v5924_v23  ;;  %1433 = vmatpush2.msra.mxu1 %v5927_v24  ;;  %10084 = vst [vmem:[#allocation86_spill] sm:$0xff] %v5936_v60  ;;  %10085 = vst [vmem:[#allocation87_spill] sm:$0xff] %v5939_v22  ;;  %v5942_v23 = vld [vmem:[#allocation4 + $0x4c8] sm:$0xff]  ;;  %v5945_v24 = vld [vmem:[#allocation4 + $0x4d8] sm:$0xff] }
 0x1f5   :  { %1363 = vmatprep.subr.mxu0 %v5930_v39  ;;  %1434 = vmatprep.subr.mxu1 %v5933_v36  ;;  %10086 = vst [vmem:[#allocation88_spill] sm:$0xff] %v5942_v23  ;;  %10087 = vst [vmem:[#allocation89_spill] sm:$0xff] %v5945_v24  ;;  %v5948_v39 = vld [vmem:[#allocation4 + $0x4c0] sm:$0xff]  ;;  %v5951_v36 = vld [vmem:[#allocation4 + $0x4d0] sm:$0xff] }
 0x1f6   :  { %1364 = vmatpush2.msra.mxu0 %v5936_v60  ;;  %1435 = vmatpush2.msra.mxu1 %v5939_v22  ;;  %10088 = vst [vmem:[#allocation90_spill] sm:$0xff] %v5948_v39  ;;  %10089 = vst [vmem:[#allocation91_spill] sm:$0xff] %v5951_v36  ;;  %v5954_v60 = vld [vmem:[#allocation4 + $0x488] sm:$0xff]  ;;  %v5957_v22 = vld [vmem:[#allocation4 + $0x498] sm:$0xff] }
 0x1f7   :  { %1365 = vmatprep.subr.mxu0 %v5942_v23  ;;  %1436 = vmatprep.subr.mxu1 %v5945_v24  ;;  %10090 = vst [vmem:[#allocation92_spill] sm:$0xff] %v5954_v60  ;;  %10091 = vst [vmem:[#allocation93_spill] sm:$0xff] %v5957_v22  ;;  %v5960_v23 = vld [vmem:[#allocation4 + $0x480] sm:$0xff]  ;;  %v5963_v24 = vld [vmem:[#allocation4 + $0x490] sm:$0xff] }
 0x1f8   :  { %1366 = vmatpush2.msra.mxu0 %v5948_v39  ;;  %1437 = vmatpush2.msra.mxu1 %v5951_v36  ;;  %10092 = vst [vmem:[#allocation94_spill] sm:$0xff] %v5960_v23  ;;  %10093 = vst [vmem:[#allocation95_spill] sm:$0xff] %v5963_v24  ;;  %v5966_v39 = vld [vmem:[#allocation4 + $0x448] sm:$0xff]  ;;  %v5969_v36 = vld [vmem:[#allocation4 + $0x458] sm:$0xff] }
 0x1f9   :  { %1367 = vmatprep.subr.mxu0 %v5954_v60  ;;  %1438 = vmatprep.subr.mxu1 %v5957_v22  ;;  %10094 = vst [vmem:[#allocation96_spill] sm:$0xff] %v5966_v39  ;;  %10095 = vst [vmem:[#allocation97_spill] sm:$0xff] %v5969_v36  ;;  %v5972_v60 = vld [vmem:[#allocation4 + $0x440] sm:$0xff]  ;;  %v5975_v22 = vld [vmem:[#allocation4 + $0x450] sm:$0xff] }
 0x1fa   :  { %1368 = vmatpush2.msra.mxu0 %v5960_v23  ;;  %1439 = vmatpush2.msra.mxu1 %v5963_v24  ;;  %10096 = vst [vmem:[#allocation98_spill] sm:$0xff] %v5972_v60  ;;  %10097 = vst [vmem:[#allocation99_spill] sm:$0xff] %v5975_v22  ;;  %v5978_v23 = vld [vmem:[#allocation4 + $0x408] sm:$0xff]  ;;  %v5981_v24 = vld [vmem:[#allocation4 + $0x418] sm:$0xff] }
 0x1fb   :  { %1369 = vmatprep.subr.mxu0 %v5966_v39  ;;  %1440 = vmatprep.subr.mxu1 %v5969_v36  ;;  %10098 = vst [vmem:[#allocation100_spill] sm:$0xff] %v5978_v23  ;;  %10099 = vst [vmem:[#allocation101_spill] sm:$0xff] %v5981_v24  ;;  %v5984_v39 = vld [vmem:[#allocation4 + $0x400] sm:$0xff]  ;;  %v5987_v36 = vld [vmem:[#allocation4 + $0x410] sm:$0xff] }
 0x1fc   :  { %1370 = vmatpush2.msra.mxu0 %v5972_v60  ;;  %1441 = vmatpush2.msra.mxu1 %v5975_v22  ;;  %10100 = vst [vmem:[#allocation102_spill] sm:$0xff] %v5984_v39  ;;  %10101 = vst [vmem:[#allocation103_spill] sm:$0xff] %v5987_v36  ;;  %v5990_v60 = vld [vmem:[#allocation4 + $0x3e8] sm:$0xff]  ;;  %v5993_v22 = vld [vmem:[#allocation4 + $0x3f8] sm:$0xff] }
 0x1fd   :  { %1371 = vmatprep.subr.mxu0 %v5978_v23  ;;  %1442 = vmatprep.subr.mxu1 %v5981_v24  ;;  %10102 = vst [vmem:[#allocation104_spill] sm:$0xff] %v5990_v60  ;;  %10103 = vst [vmem:[#allocation105_spill] sm:$0xff] %v5993_v22  ;;  %v56_v23 = vpop.permute.xlu0 %55 }
 0x1fe   :  { %1372 = vmatpush2.msra.mxu0 %v5984_v39  ;;  %1443 = vmatpush2.msra.mxu1 %v5987_v36  ;;  %v137_v15 = vmul.f32 %v5434_v40, %v56_v23  ;;  %v139_v7 = vmul.f32 %v5439_v44, %v56_v23  ;;  %v138_v39 = vmul.f32 %v5442_v45, %v56_v23 }
 0x1ff   :  { %1451 = vmatprep.subr.mxu0 %v5990_v60  ;;  %1522 = vmatprep.subr.mxu1 %v5993_v22  ;;  %v140_v36 = vmul.f32 %v5448_v48, %v56_v23 }
 0x200   :  { %v243_v59 = vadd.f32 %v5446_v47, %v137_v15  ;;  %v245_v58 = vadd.f32 %v5451_v50, %v139_v7  ;;  %v244_v10 = vadd.f32 %v5455_v52, %v138_v39  ;;  %v41_v15 = vld [vmem:[%s8846_s0 + $0x10] sm:$0xff]  ;;  %v42_v39 = vld [vmem:[%s8846_s0 + $0x18] sm:$0xff] }
 0x201   :  { %v246_v40 = vadd.f32 %v5459_v56, %v140_v36  ;;  %60 = vperm.xlu1 %3433, %v41_v15   ;;  %v44_v36 = vld [vmem:[%s8846_s0 + $0x28] sm:$0xff] }
 0x205   :  { %65 = vperm.xlu1 %3433, %v42_v39  }
 0x209   :  { %75 = vperm.xlu1 %3433, %v44_v36  }
 0x23d   :  { %v1034_v24 = vpop.f32.mrf.mxu0  ;;  %v1105_v6 = vpop.f32.mrf.mxu1 }
 0x23e   :  { %v1035_v57 = vadd.f32 %v1034_v24, %v243_v59  ;;  %v1106_v22 = vadd.f32 %v1105_v6, %v245_v58  ;;  %v144_v59 = vmul.f32 %v5470_v29, %v56_v23 }
 0x23f   :  { %v1036_v60 = vpop.f32.mrf.mxu0  ;;  %v1107_v1 = vpop.f32.mrf.mxu1 }
 0x240   :  { %v1037_v11 = vadd.f32 %v1036_v60, %v244_v10  ;;  %v3384_v18 = vmul.f32 -1.442695, %v1035_v57  ;;  %v1108_v44 = vadd.f32 %v1107_v1, %v246_v40  ;;  %v3386_v16 = vmul.f32 -1.442695, %v1106_v22  ;;  %v46_v40 = vld [vmem:[%s8846_s0 + $0x38] sm:$0xff] }
 0x241   :  { %85 = vperm.xlu1 %3433, %v46_v40   ;;  %v141_v1 = vmul.f32 %v5464_v25, %v56_v23  ;;  %v142_v10 = vmul.f32 %v5468_v27, %v56_v23 }
 0x242   :  { %v3385_v45 = vmul.f32 -1.442695, %v1037_v11  ;;  %3466 = vpow2.f32 %v3384_v18  ;;  %v3387_v7 = vmul.f32 -1.442695, %v1108_v44 }
 0x243   :  { %3468 = vpow2.f32 %v3386_v16  ;;  %v143_v16 = vmul.f32 %v5466_v26, %v56_v23  ;;  %v247_v60 = vadd.f32 %v5473_v33, %v141_v1  ;;  %v248_v39 = vadd.f32 %v5479_v46, %v142_v10 }
 0x244   :  { %3470 = vpow2.f32 %v3385_v45 }
 0x245   :  { %3472 = vpow2.f32 %v3387_v7  ;;  %v249_v22 = vadd.f32 %v5476_v38, %v143_v16 }
 0x24f   :  { %v3467_v18 = vpop.eup %3466 }
 0x250   :  { %v3469_v44 = vpop.eup %3468  ;;  %v1258_v45 = vadd.f32 1.0, %v3467_v18  ;;  %v250_v18 = vadd.f32 %v5482_v53, %v144_v59 }
 0x251   :  { %v3471_v11 = vpop.eup %3470  ;;  %v1270_v58 = vadd.f32 1.0, %v3469_v44 }
 0x252   :  { %v3473_v57 = vpop.eup %3472  ;;  %v1259_v6 = vadd.f32 1.0, %v3471_v11  ;;  %3474 = vrcp.f32 %v1258_v45 }
 0x253   :  { %v1271_v24 = vadd.f32 1.0, %v3473_v57  ;;  %3476 = vrcp.f32 %v1270_v58 }
 0x254   :  { %3478 = vrcp.f32 %v1259_v6 }
 0x25f   :  { %v3475_v45 = vpop.eup %3474 }
 0x260   :  { %v3477_v57 = vpop.eup %3476 }
 0x261   :  { %v3479_v10 = vpop.eup %3478 }
 0x27e   :  { %v1176_v15 = vpop.f32.mrf.mxu0  ;;  %v1247_v7 = vpop.f32.mrf.mxu1 }
 0x27f   :  { %v1177_v36 = vadd.f32 %v1176_v15, %v247_v60  ;;  %v1248_v40 = vadd.f32 %v1247_v7, %v249_v22  ;;  %v1290_v22 = vmul.f32 %v3477_v57, %v5488_v32  ;;  %v6082_v57 = vld [vmem:[#allocation4 + $0x268] sm:$0xff] }
 0x280   :  { %v1178_v44 = vpop.f32.mrf.mxu0  ;;  %v1249_v27 = vpop.f32.mrf.mxu1 }
 0x281   :  { %3480 = vtanh.f32 %v1177_v36  ;;  %v3388_v23 = vmul.f32 -1.442695, %v1248_v40  ;;  %v1179_v11 = vadd.f32 %v1178_v44, %v248_v39  ;;  %v1250_v1 = vadd.f32 %v1249_v27, %v250_v18 }
 0x282   :  { %3482 = vrcp.f32 %v1271_v24 }
 0x283   :  { %3484 = vpow2.f32 %v3388_v23  ;;  %v3389_v16 = vmul.f32 -1.442695, %v1250_v1 }
 0x284   :  { %3486 = vtanh.f32 %v1179_v11 }
 0x285   :  { %3488 = vpow2.f32 %v3389_v16 }
 0x28e   :  { %v3481_v58 = vpop.eup %3480 }
 0x28f   :  { %v3483_v60 = vpop.eup %3482  ;;  %v1292_v59 = vmul.f32 %v3481_v58, %v3475_v45  ;;  %v6079_v45 = vld [vmem:[#allocation4 + $0x2b0] sm:$0xff]  ;;  %v6088_v58 = vld [vmem:[#allocation4 + $0x260] sm:$0xff] }
 0x290   :  { %v3485_v6 = vpop.eup %3484  ;;  %v1291_v27 = vmul.f32 %v3483_v60, %v5491_v37  ;;  %v6046_v37 = vld [vmem:[#allocation4 + $0x328] sm:$0xff]  ;;  %v6091_v60 = vld [vmem:[#allocation4 + $0x270] sm:$0xff] }
 0x291   :  { %v3487_v15 = vpop.eup %3486  ;;  %v6025_v7 = vadd.f32 %v1292_v59, %v1290_v22  ;;  %v1284_v36 = vadd.f32 1.0, %v3485_v6  ;;  %v6094_v22 = vld [vmem:[#allocation4 + $0x228] sm:$0xff]  ;;  %v6097_v59 = vld [vmem:[#allocation4 + $0x238] sm:$0xff]  ;;  %v6100_v6 = vld [vmem:[#allocation4 + $0x220] sm:$0xff] }
 0x292   :  { %v3489_v39 = vpop.eup %3488  ;;  %v1293_v24 = vmul.f32 %v3487_v15, %v3479_v10  ;;  %v6085_v10 = vld [vmem:[#allocation4 + $0x278] sm:$0xff]  ;;  %v6103_v15 = vld [vmem:[#allocation4 + $0x230] sm:$0xff] }
 0x293   :  { %3490 = vtanh.f32 %v6025_v7  ;;  %v1285_v40 = vadd.f32 1.0, %v3489_v39  ;;  %v6109_v39 = vld [vmem:[#allocation4 + $0x1f8] sm:$0xff] }
 0x294   :  { %3492 = vrcp.f32 %v1284_v36  ;;  %v6029_v18 = vadd.f32 %v1293_v24, %v1291_v27  ;;  %v6106_v36 = vld [vmem:[#allocation4 + $0x1e8] sm:$0xff]  ;;  %v6112_v27 = vld [vmem:[#allocation4 + $0x1e0] sm:$0xff]  ;;  %v6115_v24 = vld [vmem:[#allocation4 + $0x1f0] sm:$0xff] }
 0x295   :  { %3494 = vrcp.f32 %v1285_v40  ;;  %v6118_v40 = vld [vmem:[#allocation4 + $0x1a8] sm:$0xff] }
 0x296   :  { %3496 = vtanh.f32 %v6029_v18  ;;  %10104 = vst [vmem:[#allocation106_spill] sm:$0xff] %v6118_v40 }
 0x2a0   :  { %v3491_v32 = vpop.eup %3490 }
 0x2a1   :  { %v3493_v44 = vpop.eup %3492 }
 0x2a2   :  { %v3495_v23 = vpop.eup %3494  ;;  %v6032_v16 = vmul.f32 %v3493_v44, %v3491_v32  ;;  %v6121_v32 = vld [vmem:[#allocation4 + $0x1b8] sm:$0xff]  ;;  %v6124_v44 = vld [vmem:[#allocation4 + $0x1a0] sm:$0xff] }
 0x2a3   :  { %v3497_v11 = vpop.eup %3496  ;;  %10105 = vst [vmem:[#allocation107_spill] sm:$0xff] %v6121_v32  ;;  %10106 = vst [vmem:[#allocation108_spill] sm:$0xff] %v6124_v44 }
 0x2a4   :  { %v1299_v1 = vmul.f32 %v3497_v11, %v3495_v23  ;;  %v6127_v23 = vld [vmem:[#allocation4 + $0x1b0] sm:$0xff]  ;;  %v6130_v11 = vld [vmem:[#allocation4 + $0x168] sm:$0xff] }
 0x2a5   :  { %10107 = vst [vmem:[#allocation109_spill] sm:$0xff] %v6127_v23  ;;  %10108 = vst [vmem:[#allocation110_spill] sm:$0xff] %v6130_v11 }
 0x2a6   :  { %1373 = vmatprep.mubr.f32.mxu0 %v1299_v1  ;;  %1444 = vmatprep.mubr.f32.mxu1 %v1299_v1 }
 0x2a7   :  { %1374 = vmatmul.mubr.f32.vlgmr.msra.gmra.mxu0 %v6032_v16  ;;  %1445 = vmatmul.mubr.f32.vlgmr.msra.gmra.mxu1 %v6032_v16 }
 0x2a8   :  { %1452 = vmatpush1.msra.mxu0 %v5498_v61  ;;  %1523 = vmatpush1.msra.mxu1 %v5501_v62  ;;  %v6049_v61 = vld [vmem:[#allocation4 + $0x338] sm:$0xff]  ;;  %v6052_v62 = vld [vmem:[#allocation4 + $0x320] sm:$0xff] }
 0x2a9   :  { %1453 = vmatprep.subr.mxu0 %v5504_v63  ;;  %1515 = vmatprep.mubr.f32.mxu0 %v1299_v1  ;;  %v6055_v63 = vld [vmem:[#allocation4 + $0x330] sm:$0xff] }
 0x2aa   :  { %1524 = vmatprep.subr.mxu1 %v5507_v0  ;;  %1586 = vmatprep.mubr.f32.mxu1 %v1299_v1  ;;  %v6058_v0 = vld [vmem:[#allocation4 + $0x2e8] sm:$0xff]  ;;  %v6133_v1 = vld [vmem:[#allocation4 + $0x178] sm:$0xff] }
 0x2ab   :  { %1454 = vmatpush1.msra.mxu0 %v5510_v42  ;;  %1525 = vmatpush1.msra.mxu1 %v5513_v43  ;;  %v6061_v42 = vld [vmem:[#allocation4 + $0x2f8] sm:$0xff]  ;;  %v6064_v43 = vld [vmem:[#allocation4 + $0x2e0] sm:$0xff]  ;;  %10109 = vst [vmem:[#allocation111_spill] sm:$0xff] %v6133_v1 }
 0x2ac   :  { %1455 = vmatprep.subr.mxu0 %v5516_v2  ;;  %1526 = vmatprep.subr.mxu1 %v5519_v3  ;;  %v6067_v2 = vld [vmem:[#allocation4 + $0x2f0] sm:$0xff]  ;;  %v6070_v3 = vld [vmem:[#allocation4 + $0x2a8] sm:$0xff] }
 0x2ad   :  { %1456 = vmatpush1.msra.mxu0 %v5522_v4  ;;  %1527 = vmatpush1.msra.mxu1 %v5525_v5  ;;  %v6073_v4 = vld [vmem:[#allocation4 + $0x2b8] sm:$0xff]  ;;  %v6076_v5 = vld [vmem:[#allocation4 + $0x2a0] sm:$0xff] }
 0x2ae   :  { %1457 = vmatprep.subr.mxu0 %v6046_v37  ;;  %1528 = vmatprep.subr.mxu1 %v6049_v61 }
 0x2af   :  { %1458 = vmatpush1.msra.mxu0 %v6052_v62  ;;  %1529 = vmatpush1.msra.mxu1 %v6055_v63 }
 0x2b0   :  { %1459 = vmatprep.subr.mxu0 %v6058_v0  ;;  %1530 = vmatprep.subr.mxu1 %v6061_v42 }
 0x2b1   :  { %1460 = vmatpush1.msra.mxu0 %v6064_v43  ;;  %1531 = vmatpush1.msra.mxu1 %v6067_v2 }
 0x2b2   :  { %1461 = vmatprep.subr.mxu0 %v6070_v3  ;;  %1532 = vmatprep.subr.mxu1 %v6073_v4 }
 0x2b3   :  { %1462 = vmatpush1.msra.mxu0 %v6076_v5  ;;  %1533 = vmatpush1.msra.mxu1 %v6079_v45 }
 0x2b4   :  { %1463 = vmatprep.subr.mxu0 %v6082_v57  ;;  %1534 = vmatprep.subr.mxu1 %v6085_v10 }
 0x2b5   :  { %1464 = vmatpush1.msra.mxu0 %v6088_v58  ;;  %1535 = vmatpush1.msra.mxu1 %v6091_v60 }
 0x2b6   :  { %1465 = vmatprep.subr.mxu0 %v6094_v22  ;;  %1536 = vmatprep.subr.mxu1 %v6097_v59 }
 0x2b7   :  { %1466 = vmatpush1.msra.mxu0 %v6100_v6  ;;  %1537 = vmatpush1.msra.mxu1 %v6103_v15 }
 0x2b8   :  { %1467 = vmatprep.subr.mxu0 %v6106_v36  ;;  %1538 = vmatprep.subr.mxu1 %v6109_v39 }
 0x2b9   :  { %1468 = vmatpush1.msra.mxu0 %v6112_v27  ;;  %1539 = vmatpush1.msra.mxu1 %v6115_v24 }
 0x2ba   :  { %1469 = vmatprep.subr.mxu0 %v6118_v40  ;;  %1540 = vmatprep.subr.mxu1 %v6121_v32  ;;  %v6136_v40 = vld [vmem:[#allocation4 + $0x160] sm:$0xff]  ;;  %v6139_v32 = vld [vmem:[#allocation4 + $0x170] sm:$0xff] }
 0x2bb   :  { %1470 = vmatpush1.msra.mxu0 %v6124_v44  ;;  %1541 = vmatpush1.msra.mxu1 %v6127_v23  ;;  %10110 = vst [vmem:[#allocation112_spill] sm:$0xff] %v6136_v40  ;;  %10111 = vst [vmem:[#allocation113_spill] sm:$0xff] %v6139_v32  ;;  %v6142_v44 = vld [vmem:[#allocation4 + $0x128] sm:$0xff]  ;;  %v6145_v23 = vld [vmem:[#allocation4 + $0x138] sm:$0xff] }
 0x2bc   :  { %1471 = vmatprep.subr.mxu0 %v6130_v11  ;;  %1542 = vmatprep.subr.mxu1 %v6133_v1  ;;  %10112 = vst [vmem:[#allocation114_spill] sm:$0xff] %v6142_v44  ;;  %10113 = vst [vmem:[#allocation115_spill] sm:$0xff] %v6145_v23  ;;  %v6148_v11 = vld [vmem:[#allocation4 + $0x120] sm:$0xff]  ;;  %v6151_v1 = vld [vmem:[#allocation4 + $0x130] sm:$0xff] }
 0x2bd   :  { %1472 = vmatpush1.msra.mxu0 %v6136_v40  ;;  %1543 = vmatpush1.msra.mxu1 %v6139_v32  ;;  %10114 = vst [vmem:[#allocation116_spill] sm:$0xff] %v6148_v11  ;;  %10115 = vst [vmem:[#allocation117_spill] sm:$0xff] %v6151_v1  ;;  %v6154_v40 = vld [vmem:[#allocation4 + $0xe8] sm:$0xff]  ;;  %v6157_v32 = vld [vmem:[#allocation4 + $0xf8] sm:$0xff] }
 0x2be   :  { %1473 = vmatprep.subr.mxu0 %v6142_v44  ;;  %1544 = vmatprep.subr.mxu1 %v6145_v23  ;;  %10116 = vst [vmem:[#allocation118_spill] sm:$0xff] %v6154_v40  ;;  %10117 = vst [vmem:[#allocation119_spill] sm:$0xff] %v6157_v32  ;;  %v6160_v44 = vld [vmem:[#allocation4 + $0xe0] sm:$0xff]  ;;  %v6163_v23 = vld [vmem:[#allocation4 + $0xf0] sm:$0xff] }
 0x2bf   :  { %1474 = vmatpush1.msra.mxu0 %v6148_v11  ;;  %1545 = vmatpush1.msra.mxu1 %v6151_v1  ;;  %10118 = vst [vmem:[#allocation120_spill] sm:$0xff] %v6160_v44  ;;  %10119 = vst [vmem:[#allocation121_spill] sm:$0xff] %v6163_v23  ;;  %v6166_v11 = vld [vmem:[#allocation4 + $0xa8] sm:$0xff]  ;;  %v6169_v1 = vld [vmem:[#allocation4 + $0xb8] sm:$0xff] }
 0x2c0   :  { %1475 = vmatprep.subr.mxu0 %v6154_v40  ;;  %1546 = vmatprep.subr.mxu1 %v6157_v32  ;;  %10120 = vst [vmem:[#allocation122_spill] sm:$0xff] %v6166_v11  ;;  %10121 = vst [vmem:[#allocation123_spill] sm:$0xff] %v6169_v1  ;;  %v6172_v40 = vld [vmem:[#allocation4 + $0xa0] sm:$0xff]  ;;  %v6175_v32 = vld [vmem:[#allocation4 + $0xb0] sm:$0xff] }
 0x2c1   :  { %1476 = vmatpush1.msra.mxu0 %v6160_v44  ;;  %1547 = vmatpush1.msra.mxu1 %v6163_v23  ;;  %10122 = vst [vmem:[#allocation124_spill] sm:$0xff] %v6172_v40  ;;  %10123 = vst [vmem:[#allocation125_spill] sm:$0xff] %v6175_v32  ;;  %v6178_v44 = vld [vmem:[#allocation4 + $0x68] sm:$0xff]  ;;  %v6181_v23 = vld [vmem:[#allocation4 + $0x78] sm:$0xff] }
 0x2c2   :  { %1477 = vmatprep.subr.mxu0 %v6166_v11  ;;  %1548 = vmatprep.subr.mxu1 %v6169_v1  ;;  %10124 = vst [vmem:[#allocation126_spill] sm:$0xff] %v6178_v44  ;;  %10125 = vst [vmem:[#allocation127_spill] sm:$0xff] %v6181_v23  ;;  %v6184_v11 = vld [vmem:[#allocation4 + $0x60] sm:$0xff]  ;;  %v6187_v1 = vld [vmem:[#allocation4 + $0x70] sm:$0xff] }
 0x2c3   :  { %1478 = vmatpush1.msra.mxu0 %v6172_v40  ;;  %1549 = vmatpush1.msra.mxu1 %v6175_v32  ;;  %10126 = vst [vmem:[#allocation128_spill] sm:$0xff] %v6184_v11  ;;  %10127 = vst [vmem:[#allocation129_spill] sm:$0xff] %v6187_v1  ;;  %v6190_v40 = vld [vmem:[#allocation4 + $0x28] sm:$0xff]  ;;  %v6193_v32 = vld [vmem:[#allocation4 + $0x38] sm:$0xff] }
 0x2c4   :  { %1479 = vmatprep.subr.mxu0 %v6178_v44  ;;  %1550 = vmatprep.subr.mxu1 %v6181_v23  ;;  %10128 = vst [vmem:[#allocation130_spill] sm:$0xff] %v6190_v40  ;;  %10129 = vst [vmem:[#allocation131_spill] sm:$0xff] %v6193_v32  ;;  %v6196_v44 = vld [vmem:[#allocation4 + $0x20] sm:$0xff]  ;;  %v6199_v23 = vld [vmem:[#allocation4 + $0x30] sm:$0xff] }
 0x2c5   :  { %1480 = vmatpush1.msra.mxu0 %v6184_v11  ;;  %1551 = vmatpush1.msra.mxu1 %v6187_v1  ;;  %10130 = vst [vmem:[#allocation132_spill] sm:$0xff] %v6196_v44  ;;  %10131 = vst [vmem:[#allocation133_spill] sm:$0xff] %v6199_v23  ;;  %v6202_v11 = vld [vmem:[#allocation4 + $0x7e8] sm:$0xff]  ;;  %v6205_v1 = vld [vmem:[#allocation4 + $0x7f8] sm:$0xff] }
 0x2c6   :  { %1481 = vmatprep.subr.mxu0 %v6190_v40  ;;  %1552 = vmatprep.subr.mxu1 %v6193_v32  ;;  %10132 = vst [vmem:[#allocation134_spill] sm:$0xff] %v6202_v11  ;;  %10133 = vst [vmem:[#allocation135_spill] sm:$0xff] %v6205_v1  ;;  %v6208_v40 = vld [vmem:[#allocation4 + $0x7e0] sm:$0xff]  ;;  %v6211_v32 = vld [vmem:[#allocation4 + $0x7f0] sm:$0xff] }
 0x2c7   :  { %1482 = vmatpush1.msra.mxu0 %v6196_v44  ;;  %1553 = vmatpush1.msra.mxu1 %v6199_v23  ;;  %10134 = vst [vmem:[#allocation136_spill] sm:$0xff] %v6208_v40  ;;  %10135 = vst [vmem:[#allocation137_spill] sm:$0xff] %v6211_v32  ;;  %v6214_v44 = vld [vmem:[#allocation4 + $0x7a8] sm:$0xff]  ;;  %v6217_v23 = vld [vmem:[#allocation4 + $0x7b8] sm:$0xff] }
 0x2c8   :  { %1483 = vmatprep.subr.mxu0 %v6202_v11  ;;  %1554 = vmatprep.subr.mxu1 %v6205_v1  ;;  %10136 = vst [vmem:[#allocation138_spill] sm:$0xff] %v6214_v44  ;;  %10137 = vst [vmem:[#allocation139_spill] sm:$0xff] %v6217_v23  ;;  %v6220_v11 = vld [vmem:[#allocation4 + $0x7a0] sm:$0xff]  ;;  %v6223_v1 = vld [vmem:[#allocation4 + $0x7b0] sm:$0xff] }
 0x2c9   :  { %1484 = vmatpush2.msra.mxu0 %v6208_v40  ;;  %1555 = vmatpush2.msra.mxu1 %v6211_v32  ;;  %10138 = vst [vmem:[#allocation140_spill] sm:$0xff] %v6220_v11  ;;  %10139 = vst [vmem:[#allocation141_spill] sm:$0xff] %v6223_v1  ;;  %v6226_v40 = vld [vmem:[#allocation4 + $0x768] sm:$0xff]  ;;  %v6229_v32 = vld [vmem:[#allocation4 + $0x778] sm:$0xff] }
 0x2ca   :  { %1485 = vmatprep.subr.mxu0 %v6214_v44  ;;  %1556 = vmatprep.subr.mxu1 %v6217_v23  ;;  %10140 = vst [vmem:[#allocation142_spill] sm:$0xff] %v6226_v40  ;;  %10141 = vst [vmem:[#allocation143_spill] sm:$0xff] %v6229_v32  ;;  %v6232_v44 = vld [vmem:[#allocation4 + $0x760] sm:$0xff]  ;;  %v6235_v23 = vld [vmem:[#allocation4 + $0x770] sm:$0xff] }
 0x2cb   :  { %1486 = vmatpush2.msra.mxu0 %v6220_v11  ;;  %1557 = vmatpush2.msra.mxu1 %v6223_v1  ;;  %10142 = vst [vmem:[#allocation144_spill] sm:$0xff] %v6232_v44  ;;  %10143 = vst [vmem:[#allocation145_spill] sm:$0xff] %v6235_v23  ;;  %v6238_v11 = vld [vmem:[#allocation4 + $0x728] sm:$0xff]  ;;  %v6241_v1 = vld [vmem:[#allocation4 + $0x738] sm:$0xff] }
 0x2cc   :  { %1487 = vmatprep.subr.mxu0 %v6226_v40  ;;  %1558 = vmatprep.subr.mxu1 %v6229_v32  ;;  %10144 = vst [vmem:[#allocation146_spill] sm:$0xff] %v6238_v11  ;;  %10145 = vst [vmem:[#allocation147_spill] sm:$0xff] %v6241_v1  ;;  %v6244_v40 = vld [vmem:[#allocation4 + $0x720] sm:$0xff]  ;;  %v6247_v32 = vld [vmem:[#allocation4 + $0x730] sm:$0xff] }
 0x2cd   :  { %1488 = vmatpush2.msra.mxu0 %v6232_v44  ;;  %1559 = vmatpush2.msra.mxu1 %v6235_v23  ;;  %10146 = vst [vmem:[#allocation148_spill] sm:$0xff] %v6244_v40  ;;  %10147 = vst [vmem:[#allocation149_spill] sm:$0xff] %v6247_v32  ;;  %v6250_v44 = vld [vmem:[#allocation4 + $0x6e8] sm:$0xff]  ;;  %v6253_v23 = vld [vmem:[#allocation4 + $0x6f8] sm:$0xff] }
 0x2ce   :  { %1489 = vmatprep.subr.mxu0 %v6238_v11  ;;  %1560 = vmatprep.subr.mxu1 %v6241_v1  ;;  %10148 = vst [vmem:[#allocation150_spill] sm:$0xff] %v6250_v44  ;;  %10149 = vst [vmem:[#allocation151_spill] sm:$0xff] %v6253_v23  ;;  %v6256_v11 = vld [vmem:[#allocation4 + $0x6e0] sm:$0xff]  ;;  %v6259_v1 = vld [vmem:[#allocation4 + $0x6f0] sm:$0xff] }
 0x2cf   :  { %1490 = vmatpush2.msra.mxu0 %v6244_v40  ;;  %1561 = vmatpush2.msra.mxu1 %v6247_v32  ;;  %10150 = vst [vmem:[#allocation152_spill] sm:$0xff] %v6256_v11  ;;  %10151 = vst [vmem:[#allocation153_spill] sm:$0xff] %v6259_v1  ;;  %v6262_v40 = vld [vmem:[#allocation4 + $0x6a8] sm:$0xff]  ;;  %v6265_v32 = vld [vmem:[#allocation4 + $0x6b8] sm:$0xff] }
 0x2d0   :  { %1491 = vmatprep.subr.mxu0 %v6250_v44  ;;  %1562 = vmatprep.subr.mxu1 %v6253_v23  ;;  %10152 = vst [vmem:[#allocation154_spill] sm:$0xff] %v6262_v40  ;;  %10153 = vst [vmem:[#allocation155_spill] sm:$0xff] %v6265_v32  ;;  %v6268_v44 = vld [vmem:[#allocation4 + $0x6a0] sm:$0xff]  ;;  %v6271_v23 = vld [vmem:[#allocation4 + $0x6b0] sm:$0xff] }
 0x2d1   :  { %1492 = vmatpush2.msra.mxu0 %v6256_v11  ;;  %1563 = vmatpush2.msra.mxu1 %v6259_v1  ;;  %10154 = vst [vmem:[#allocation156_spill] sm:$0xff] %v6268_v44  ;;  %10155 = vst [vmem:[#allocation157_spill] sm:$0xff] %v6271_v23  ;;  %v6274_v11 = vld [vmem:[#allocation4 + $0x668] sm:$0xff]  ;;  %v6277_v1 = vld [vmem:[#allocation4 + $0x678] sm:$0xff] }
 0x2d2   :  { %1493 = vmatprep.subr.mxu0 %v6262_v40  ;;  %1564 = vmatprep.subr.mxu1 %v6265_v32  ;;  %10156 = vst [vmem:[#allocation158_spill] sm:$0xff] %v6274_v11  ;;  %10157 = vst [vmem:[#allocation159_spill] sm:$0xff] %v6277_v1  ;;  %v6280_v40 = vld [vmem:[#allocation4 + $0x660] sm:$0xff]  ;;  %v6283_v32 = vld [vmem:[#allocation4 + $0x670] sm:$0xff] }
 0x2d3   :  { %1494 = vmatpush2.msra.mxu0 %v6268_v44  ;;  %1565 = vmatpush2.msra.mxu1 %v6271_v23  ;;  %10158 = vst [vmem:[#allocation160_spill] sm:$0xff] %v6280_v40  ;;  %10159 = vst [vmem:[#allocation161_spill] sm:$0xff] %v6283_v32  ;;  %v6286_v44 = vld [vmem:[#allocation4 + $0x628] sm:$0xff]  ;;  %v6289_v23 = vld [vmem:[#allocation4 + $0x638] sm:$0xff] }
 0x2d4   :  { %1495 = vmatprep.subr.mxu0 %v6274_v11  ;;  %1566 = vmatprep.subr.mxu1 %v6277_v1  ;;  %10160 = vst [vmem:[#allocation162_spill] sm:$0xff] %v6286_v44  ;;  %10161 = vst [vmem:[#allocation163_spill] sm:$0xff] %v6289_v23  ;;  %v6292_v11 = vld [vmem:[#allocation4 + $0x620] sm:$0xff]  ;;  %v6295_v1 = vld [vmem:[#allocation4 + $0x630] sm:$0xff] }
 0x2d5   :  { %1496 = vmatpush2.msra.mxu0 %v6280_v40  ;;  %1567 = vmatpush2.msra.mxu1 %v6283_v32  ;;  %10162 = vst [vmem:[#allocation164_spill] sm:$0xff] %v6292_v11  ;;  %10163 = vst [vmem:[#allocation165_spill] sm:$0xff] %v6295_v1  ;;  %v6298_v40 = vld [vmem:[#allocation4 + $0x5e8] sm:$0xff]  ;;  %v6301_v32 = vld [vmem:[#allocation4 + $0x5f8] sm:$0xff] }
 0x2d6   :  { %1497 = vmatprep.subr.mxu0 %v6286_v44  ;;  %1568 = vmatprep.subr.mxu1 %v6289_v23  ;;  %10164 = vst [vmem:[#allocation166_spill] sm:$0xff] %v6298_v40  ;;  %10165 = vst [vmem:[#allocation167_spill] sm:$0xff] %v6301_v32  ;;  %v6304_v44 = vld [vmem:[#allocation4 + $0x5e0] sm:$0xff]  ;;  %v6307_v23 = vld [vmem:[#allocation4 + $0x5f0] sm:$0xff] }
 0x2d7   :  { %1498 = vmatpush2.msra.mxu0 %v6292_v11  ;;  %1569 = vmatpush2.msra.mxu1 %v6295_v1  ;;  %10166 = vst [vmem:[#allocation168_spill] sm:$0xff] %v6304_v44  ;;  %10167 = vst [vmem:[#allocation169_spill] sm:$0xff] %v6307_v23  ;;  %v6310_v11 = vld [vmem:[#allocation4 + $0x5a8] sm:$0xff]  ;;  %v6313_v1 = vld [vmem:[#allocation4 + $0x5b8] sm:$0xff] }
 0x2d8   :  { %1499 = vmatprep.subr.mxu0 %v6298_v40  ;;  %1570 = vmatprep.subr.mxu1 %v6301_v32  ;;  %10168 = vst [vmem:[#allocation170_spill] sm:$0xff] %v6310_v11  ;;  %10169 = vst [vmem:[#allocation171_spill] sm:$0xff] %v6313_v1  ;;  %v6316_v40 = vld [vmem:[#allocation4 + $0x5a0] sm:$0xff]  ;;  %v6319_v32 = vld [vmem:[#allocation4 + $0x5b0] sm:$0xff] }
 0x2d9   :  { %1500 = vmatpush2.msra.mxu0 %v6304_v44  ;;  %1571 = vmatpush2.msra.mxu1 %v6307_v23  ;;  %10170 = vst [vmem:[#allocation172_spill] sm:$0xff] %v6316_v40  ;;  %10171 = vst [vmem:[#allocation173_spill] sm:$0xff] %v6319_v32  ;;  %v6322_v44 = vld [vmem:[#allocation4 + $0x568] sm:$0xff]  ;;  %v6325_v23 = vld [vmem:[#allocation4 + $0x578] sm:$0xff] }
 0x2da   :  { %1501 = vmatprep.subr.mxu0 %v6310_v11  ;;  %1572 = vmatprep.subr.mxu1 %v6313_v1  ;;  %10172 = vst [vmem:[#allocation174_spill] sm:$0xff] %v6322_v44  ;;  %10173 = vst [vmem:[#allocation175_spill] sm:$0xff] %v6325_v23  ;;  %v6328_v11 = vld [vmem:[#allocation4 + $0x560] sm:$0xff]  ;;  %v6331_v1 = vld [vmem:[#allocation4 + $0x570] sm:$0xff] }
 0x2db   :  { %1502 = vmatpush2.msra.mxu0 %v6316_v40  ;;  %1573 = vmatpush2.msra.mxu1 %v6319_v32  ;;  %10174 = vst [vmem:[#allocation176_spill] sm:$0xff] %v6328_v11  ;;  %10175 = vst [vmem:[#allocation177_spill] sm:$0xff] %v6331_v1  ;;  %v6334_v40 = vld [vmem:[#allocation4 + $0x528] sm:$0xff]  ;;  %v6337_v32 = vld [vmem:[#allocation4 + $0x538] sm:$0xff] }
 0x2dc   :  { %1503 = vmatprep.subr.mxu0 %v6322_v44  ;;  %1574 = vmatprep.subr.mxu1 %v6325_v23  ;;  %10176 = vst [vmem:[#allocation178_spill] sm:$0xff] %v6334_v40  ;;  %10177 = vst [vmem:[#allocation179_spill] sm:$0xff] %v6337_v32  ;;  %v6340_v44 = vld [vmem:[#allocation4 + $0x520] sm:$0xff]  ;;  %v6343_v23 = vld [vmem:[#allocation4 + $0x530] sm:$0xff] }
 0x2dd   :  { %1504 = vmatpush2.msra.mxu0 %v6328_v11  ;;  %1575 = vmatpush2.msra.mxu1 %v6331_v1  ;;  %10178 = vst [vmem:[#allocation180_spill] sm:$0xff] %v6340_v44  ;;  %10179 = vst [vmem:[#allocation181_spill] sm:$0xff] %v6343_v23  ;;  %v6346_v11 = vld [vmem:[#allocation4 + $0x4e8] sm:$0xff]  ;;  %v6349_v1 = vld [vmem:[#allocation4 + $0x4f8] sm:$0xff] }
 0x2de   :  { %1505 = vmatprep.subr.mxu0 %v6334_v40  ;;  %1576 = vmatprep.subr.mxu1 %v6337_v32  ;;  %10180 = vst [vmem:[#allocation182_spill] sm:$0xff] %v6346_v11  ;;  %10181 = vst [vmem:[#allocation183_spill] sm:$0xff] %v6349_v1  ;;  %v6352_v40 = vld [vmem:[#allocation4 + $0x4e0] sm:$0xff]  ;;  %v6355_v32 = vld [vmem:[#allocation4 + $0x4f0] sm:$0xff] }
 0x2df   :  { %1506 = vmatpush2.msra.mxu0 %v6340_v44  ;;  %1577 = vmatpush2.msra.mxu1 %v6343_v23  ;;  %10182 = vst [vmem:[#allocation184_spill] sm:$0xff] %v6352_v40  ;;  %10183 = vst [vmem:[#allocation185_spill] sm:$0xff] %v6355_v32  ;;  %v6358_v44 = vld [vmem:[#allocation4 + $0x4a8] sm:$0xff]  ;;  %v6361_v23 = vld [vmem:[#allocation4 + $0x4b8] sm:$0xff] }
 0x2e0   :  { %1507 = vmatprep.subr.mxu0 %v6346_v11  ;;  %1578 = vmatprep.subr.mxu1 %v6349_v1  ;;  %10184 = vst [vmem:[#allocation186_spill] sm:$0xff] %v6358_v44  ;;  %10185 = vst [vmem:[#allocation187_spill] sm:$0xff] %v6361_v23  ;;  %v6364_v11 = vld [vmem:[#allocation4 + $0x4a0] sm:$0xff]  ;;  %v6367_v1 = vld [vmem:[#allocation4 + $0x4b0] sm:$0xff] }
 0x2e1   :  { %1508 = vmatpush2.msra.mxu0 %v6352_v40  ;;  %1579 = vmatpush2.msra.mxu1 %v6355_v32  ;;  %10186 = vst [vmem:[#allocation188_spill] sm:$0xff] %v6364_v11  ;;  %10187 = vst [vmem:[#allocation189_spill] sm:$0xff] %v6367_v1  ;;  %v6370_v40 = vld [vmem:[#allocation4 + $0x468] sm:$0xff]  ;;  %v6373_v32 = vld [vmem:[#allocation4 + $0x478] sm:$0xff] }
 0x2e2   :  { %1509 = vmatprep.subr.mxu0 %v6358_v44  ;;  %1580 = vmatprep.subr.mxu1 %v6361_v23  ;;  %10188 = vst [vmem:[#allocation190_spill] sm:$0xff] %v6370_v40  ;;  %10189 = vst [vmem:[#allocation191_spill] sm:$0xff] %v6373_v32  ;;  %v6376_v44 = vld [vmem:[#allocation4 + $0x460] sm:$0xff]  ;;  %v6379_v23 = vld [vmem:[#allocation4 + $0x470] sm:$0xff] }
 0x2e3   :  { %1510 = vmatpush2.msra.mxu0 %v6364_v11  ;;  %1581 = vmatpush2.msra.mxu1 %v6367_v1  ;;  %10190 = vst [vmem:[#allocation192_spill] sm:$0xff] %v6379_v23  ;;  %v6382_v11 = vld [vmem:[#allocation4 + $0x428] sm:$0xff]  ;;  %v6385_v1 = vld [vmem:[#allocation4 + $0x438] sm:$0xff] }
 0x2e4   :  { %1511 = vmatprep.subr.mxu0 %v6370_v40  ;;  %1582 = vmatprep.subr.mxu1 %v6373_v32  ;;  %10191 = vst [vmem:[#allocation193_spill] sm:$0xff] %v6382_v11  ;;  %10192 = vst [vmem:[#allocation194_spill] sm:$0xff] %v6385_v1  ;;  %v6388_v40 = vld [vmem:[#allocation4 + $0x420] sm:$0xff]  ;;  %v6391_v32 = vld [vmem:[#allocation4 + $0x430] sm:$0xff] }
 0x2e5   :  { %1512 = vmatpush2.msra.mxu0 %v6376_v44  ;;  %1583 = vmatpush2.msra.mxu1 %v6379_v23  ;;  %10193 = vst [vmem:[#allocation195_spill] sm:$0xff] %v6388_v40  ;;  %10194 = vst [vmem:[#allocation196_spill] sm:$0xff] %v6391_v32  ;;  %v6396_v23 = vld [vmem:[#allocation4 + $0x3c8] sm:$0xff] }
 0x2e6   :  { %1513 = vmatprep.subr.mxu0 %v6382_v11  ;;  %1584 = vmatprep.subr.mxu1 %v6385_v1  ;;  %10195 = vst [vmem:[#allocation197_spill] sm:$0xff] %v6396_v23  ;;  %v6399_v11 = vld [vmem:[#allocation4 + $0x3d8] sm:$0xff]  ;;  %v6402_v1 = vld [vmem:[#allocation4 + $0x3c0] sm:$0xff] }
 0x2e7   :  { %1514 = vmatpush2.msra.mxu0 %v6388_v40  ;;  %1585 = vmatpush2.msra.mxu1 %v6391_v32  ;;  %10196 = vst [vmem:[#allocation198_spill] sm:$0xff] %v6399_v11  ;;  %10197 = vst [vmem:[#allocation199_spill] sm:$0xff] %v6402_v1  ;;  %v6405_v40 = vld [vmem:[#allocation4 + $0x3d0] sm:$0xff]  ;;  %v6408_v32 = vld [vmem:[#allocation4 + $0x388] sm:$0xff] }
 0x2e8   :  { %1516 = vmatmul.mubr.f32.vlgmr.msra.gmra.mxu0 %v6032_v16  ;;  %1587 = vmatmul.mubr.f32.vlgmr.msra.gmra.mxu1 %v6032_v16  ;;  %10198 = vst [vmem:[#allocation200_spill] sm:$0xff] %v6405_v40  ;;  %10199 = vst [vmem:[#allocation201_spill] sm:$0xff] %v6408_v32  ;;  %v6411_v16 = vld [vmem:[#allocation4 + $0x398] sm:$0xff] }
 0x2e9   :  { %1650 = vmatprep.subr.mxu0 %v6396_v23  ;;  %1721 = vmatprep.subr.mxu1 %v6399_v11  ;;  %10200 = vst [vmem:[#allocation202_spill] sm:$0xff] %v6411_v16  ;;  %v6414_v23 = vld [vmem:[#allocation4 + $0x380] sm:$0xff]  ;;  %v6417_v11 = vld [vmem:[#allocation4 + $0x390] sm:$0xff] }
 0x2ea   :  { %1651 = vmatpush1.msra.mxu0 %v6402_v1  ;;  %1722 = vmatpush1.msra.mxu1 %v6405_v40  ;;  %10201 = vst [vmem:[#allocation203_spill] sm:$0xff] %v6414_v23  ;;  %10202 = vst [vmem:[#allocation204_spill] sm:$0xff] %v6417_v11  ;;  %v6420_v1 = vld [vmem:[#allocation4 + $0x348] sm:$0xff]  ;;  %v6423_v40 = vld [vmem:[#allocation4 + $0x358] sm:$0xff] }
 0x2eb   :  { %1652 = vmatprep.subr.mxu0 %v6408_v32  ;;  %1723 = vmatprep.subr.mxu1 %v6411_v16  ;;  %10203 = vst [vmem:[#allocation205_spill] sm:$0xff] %v6420_v1  ;;  %10204 = vst [vmem:[#allocation206_spill] sm:$0xff] %v6423_v40  ;;  %v6426_v32 = vld [vmem:[#allocation4 + $0x340] sm:$0xff]  ;;  %v6429_v16 = vld [vmem:[#allocation4 + $0x350] sm:$0xff] }
 0x2ec   :  { %1653 = vmatpush1.msra.mxu0 %v6414_v23  ;;  %1724 = vmatpush1.msra.mxu1 %v6417_v11  ;;  %10205 = vst [vmem:[#allocation207_spill] sm:$0xff] %v6426_v32  ;;  %10206 = vst [vmem:[#allocation208_spill] sm:$0xff] %v6429_v16  ;;  %v6432_v23 = vld [vmem:[#allocation4 + $0x308] sm:$0xff]  ;;  %v6435_v11 = vld [vmem:[#allocation4 + $0x318] sm:$0xff] }
 0x2ed   :  { %1654 = vmatprep.subr.mxu0 %v6420_v1  ;;  %1725 = vmatprep.subr.mxu1 %v6423_v40  ;;  %10207 = vst [vmem:[#allocation209_spill] sm:$0xff] %v6432_v23  ;;  %10208 = vst [vmem:[#allocation210_spill] sm:$0xff] %v6435_v11  ;;  %v6438_v1 = vld [vmem:[#allocation4 + $0x300] sm:$0xff]  ;;  %v6441_v40 = vld [vmem:[#allocation4 + $0x310] sm:$0xff] }
 0x2ee   :  { %1655 = vmatpush1.msra.mxu0 %v6426_v32  ;;  %1726 = vmatpush1.msra.mxu1 %v6429_v16  ;;  %v6444_v32 = vld [vmem:[#allocation4 + $0x2c8] sm:$0xff]  ;;  %v6447_v16 = vld [vmem:[#allocation4 + $0x2d8] sm:$0xff] }
 0x2ef   :  { %1656 = vmatprep.subr.mxu0 %v6432_v23  ;;  %1727 = vmatprep.subr.mxu1 %v6435_v11  ;;  %v6450_v23 = vld [vmem:[#allocation4 + $0x2c0] sm:$0xff]  ;;  %v6453_v11 = vld [vmem:[#allocation4 + $0x2d0] sm:$0xff] }
 0x2f0   :  { %1657 = vmatpush1.msra.mxu0 %v6438_v1  ;;  %1728 = vmatpush1.msra.mxu1 %v6441_v40  ;;  %10209 = vst [vmem:[#allocation211_spill] sm:$0xff] %v6453_v11 }
 0x2f1   :  { %1658 = vmatprep.subr.mxu0 %v6444_v32  ;;  %1729 = vmatprep.subr.mxu1 %v6447_v16 }
 0x2f2   :  { %1659 = vmatpush1.msra.mxu0 %v6450_v23  ;;  %1730 = vmatpush1.msra.mxu1 %v6453_v11 }
 0x2f3   :  { %1660 = vmatprep.subr.mxu0 %v5666_v28  ;;  %1731 = vmatprep.subr.mxu1 %v5669_v30  ;;  %v10210_v28 = vld [vmem:[#allocation15_spill] sm:$0xff]  ;;  %v10211_v30 = vld [vmem:[#allocation16_spill] sm:$0xff] }
 0x2f4   :  { %1661 = vmatpush1.msra.mxu0 %v5672_v9  ;;  %1732 = vmatpush1.msra.mxu1 %v5675_v13  ;;  %v10212_v9 = vld [vmem:[#allocation17_spill] sm:$0xff]  ;;  %v10213_v13 = vld [vmem:[#allocation18_spill] sm:$0xff] }
 0x2f5   :  { %1662 = vmatprep.subr.mxu0 %v5678_v12  ;;  %1733 = vmatprep.subr.mxu1 %v5681_v21  ;;  %v10214_v12 = vld [vmem:[#allocation19_spill] sm:$0xff]  ;;  %v10215_v21 = vld [vmem:[#allocation20_spill] sm:$0xff] }
 0x2f6   :  { %1663 = vmatpush1.msra.mxu0 %v5684_v19  ;;  %1734 = vmatpush1.msra.mxu1 %v5687_v17  ;;  %v10216_v19 = vld [vmem:[#allocation21_spill] sm:$0xff]  ;;  %v10217_v17 = vld [vmem:[#allocation22_spill] sm:$0xff] }
 0x2f7   :  { %1664 = vmatprep.subr.mxu0 %v5690_v20  ;;  %1735 = vmatprep.subr.mxu1 %v5693_v8  ;;  %v10218_v20 = vld [vmem:[#allocation23_spill] sm:$0xff]  ;;  %v10219_v8 = vld [vmem:[#allocation24_spill] sm:$0xff] }
 0x2f8   :  { %1665 = vmatpush1.msra.mxu0 %v5696_v14  ;;  %1736 = vmatpush1.msra.mxu1 %v5699_v31  ;;  %v10220_v14 = vld [vmem:[#allocation25_spill] sm:$0xff]  ;;  %v10221_v31 = vld [vmem:[#allocation26_spill] sm:$0xff] }
 0x2f9   :  { %1666 = vmatprep.subr.mxu0 %v5702_v34  ;;  %1737 = vmatprep.subr.mxu1 %v5705_v35  ;;  %v10222_v34 = vld [vmem:[#allocation27_spill] sm:$0xff]  ;;  %v10223_v35 = vld [vmem:[#allocation28_spill] sm:$0xff] }
 0x2fa   :  { %1667 = vmatpush1.msra.mxu0 %v5708_v41  ;;  %1738 = vmatpush1.msra.mxu1 %v5711_v49  ;;  %v10224_v41 = vld [vmem:[#allocation29_spill] sm:$0xff]  ;;  %v10225_v49 = vld [vmem:[#allocation30_spill] sm:$0xff] }
 0x2fb   :  { %1668 = vmatprep.subr.mxu0 %v5714_v51  ;;  %1739 = vmatprep.subr.mxu1 %v5717_v54  ;;  %v10226_v51 = vld [vmem:[#allocation31_spill] sm:$0xff]  ;;  %v10227_v54 = vld [vmem:[#allocation32_spill] sm:$0xff] }
 0x2fc   :  { %1669 = vmatpush1.msra.mxu0 %v5720_v55  ;;  %1740 = vmatpush1.msra.mxu1 %v10210_v28  ;;  %v10228_v55 = vld [vmem:[#allocation33_spill] sm:$0xff]  ;;  %v10229_v28 = vld [vmem:[#allocation34_spill] sm:$0xff] }
 0x2fd   :  { %1670 = vmatprep.subr.mxu0 %v10211_v30  ;;  %1741 = vmatprep.subr.mxu1 %v10212_v9  ;;  %v10230_v30 = vld [vmem:[#allocation35_spill] sm:$0xff]  ;;  %v10231_v9 = vld [vmem:[#allocation36_spill] sm:$0xff] }
 0x2fe   :  { %1671 = vmatpush1.msra.mxu0 %v10213_v13  ;;  %1742 = vmatpush1.msra.mxu1 %v10214_v12  ;;  %v10232_v13 = vld [vmem:[#allocation37_spill] sm:$0xff]  ;;  %v10233_v12 = vld [vmem:[#allocation38_spill] sm:$0xff] }
 0x2ff   :  { %1672 = vmatprep.subr.mxu0 %v10215_v21  ;;  %1743 = vmatprep.subr.mxu1 %v10216_v19  ;;  %v10234_v21 = vld [vmem:[#allocation39_spill] sm:$0xff]  ;;  %v10235_v19 = vld [vmem:[#allocation40_spill] sm:$0xff] }
 0x300   :  { %1673 = vmatpush1.msra.mxu0 %v10217_v17  ;;  %1744 = vmatpush1.msra.mxu1 %v10218_v20  ;;  %v10236_v17 = vld [vmem:[#allocation41_spill] sm:$0xff]  ;;  %v10237_v20 = vld [vmem:[#allocation42_spill] sm:$0xff] }
 0x301   :  { %1674 = vmatprep.subr.mxu0 %v10219_v8  ;;  %1745 = vmatprep.subr.mxu1 %v10220_v14  ;;  %v10238_v8 = vld [vmem:[#allocation43_spill] sm:$0xff]  ;;  %v10239_v14 = vld [vmem:[#allocation44_spill] sm:$0xff] }
 0x302   :  { %1675 = vmatpush1.msra.mxu0 %v10221_v31  ;;  %1746 = vmatpush1.msra.mxu1 %v10222_v34  ;;  %v10240_v31 = vld [vmem:[#allocation45_spill] sm:$0xff]  ;;  %v10241_v34 = vld [vmem:[#allocation46_spill] sm:$0xff] }
 0x303   :  { %1676 = vmatprep.subr.mxu0 %v10223_v35  ;;  %1747 = vmatprep.subr.mxu1 %v10224_v41  ;;  %v10242_v35 = vld [vmem:[#allocation47_spill] sm:$0xff]  ;;  %v10243_v41 = vld [vmem:[#allocation48_spill] sm:$0xff] }
 0x304   :  { %1677 = vmatpush1.msra.mxu0 %v10225_v49  ;;  %1748 = vmatpush1.msra.mxu1 %v10226_v51  ;;  %v10244_v49 = vld [vmem:[#allocation49_spill] sm:$0xff]  ;;  %v10245_v51 = vld [vmem:[#allocation50_spill] sm:$0xff] }
 0x305   :  { %1678 = vmatprep.subr.mxu0 %v10227_v54  ;;  %1749 = vmatprep.subr.mxu1 %v10228_v55  ;;  %v10246_v54 = vld [vmem:[#allocation51_spill] sm:$0xff]  ;;  %v10247_v55 = vld [vmem:[#allocation52_spill] sm:$0xff] }
 0x306   :  { %1679 = vmatpush1.msra.mxu0 %v10229_v28  ;;  %1750 = vmatpush1.msra.mxu1 %v10230_v30  ;;  %v10248_v28 = vld [vmem:[#allocation53_spill] sm:$0xff]  ;;  %v10249_v30 = vld [vmem:[#allocation54_spill] sm:$0xff] }
 0x307   :  { %1680 = vmatprep.subr.mxu0 %v10231_v9  ;;  %1751 = vmatprep.subr.mxu1 %v10232_v13  ;;  %v10250_v9 = vld [vmem:[#allocation55_spill] sm:$0xff]  ;;  %v10251_v13 = vld [vmem:[#allocation56_spill] sm:$0xff] }
 0x308   :  { %1681 = vmatpush1.msra.mxu0 %v10233_v12  ;;  %1752 = vmatpush1.msra.mxu1 %v10234_v21  ;;  %v10252_v12 = vld [vmem:[#allocation57_spill] sm:$0xff]  ;;  %v10253_v21 = vld [vmem:[#allocation58_spill] sm:$0xff] }
 0x309   :  { %1682 = vmatprep.subr.mxu0 %v10235_v19  ;;  %1753 = vmatprep.subr.mxu1 %v10236_v17  ;;  %v10254_v19 = vld [vmem:[#allocation59_spill] sm:$0xff]  ;;  %v10255_v17 = vld [vmem:[#allocation60_spill] sm:$0xff] }
 0x30a   :  { %1683 = vmatpush2.msra.mxu0 %v10237_v20  ;;  %1754 = vmatpush2.msra.mxu1 %v10238_v8  ;;  %v10256_v20 = vld [vmem:[#allocation61_spill] sm:$0xff]  ;;  %v10257_v8 = vld [vmem:[#allocation62_spill] sm:$0xff] }
 0x30b   :  { %1684 = vmatprep.subr.mxu0 %v10239_v14  ;;  %1755 = vmatprep.subr.mxu1 %v10240_v31  ;;  %v10258_v14 = vld [vmem:[#allocation63_spill] sm:$0xff]  ;;  %v10259_v31 = vld [vmem:[#allocation64_spill] sm:$0xff] }
 0x30c   :  { %1685 = vmatpush2.msra.mxu0 %v10241_v34  ;;  %1756 = vmatpush2.msra.mxu1 %v10242_v35  ;;  %v10260_v34 = vld [vmem:[#allocation65_spill] sm:$0xff]  ;;  %v10261_v35 = vld [vmem:[#allocation66_spill] sm:$0xff] }
 0x30d   :  { %1686 = vmatprep.subr.mxu0 %v10243_v41  ;;  %1757 = vmatprep.subr.mxu1 %v10244_v49  ;;  %v10262_v41 = vld [vmem:[#allocation67_spill] sm:$0xff]  ;;  %v10263_v49 = vld [vmem:[#allocation68_spill] sm:$0xff] }
 0x30e   :  { %1687 = vmatpush2.msra.mxu0 %v10245_v51  ;;  %1758 = vmatpush2.msra.mxu1 %v10246_v54  ;;  %v10264_v51 = vld [vmem:[#allocation69_spill] sm:$0xff]  ;;  %v10265_v54 = vld [vmem:[#allocation70_spill] sm:$0xff] }
 0x30f   :  { %1688 = vmatprep.subr.mxu0 %v10247_v55  ;;  %1759 = vmatprep.subr.mxu1 %v10248_v28  ;;  %v10266_v55 = vld [vmem:[#allocation71_spill] sm:$0xff]  ;;  %v10267_v28 = vld [vmem:[#allocation72_spill] sm:$0xff] }
 0x310   :  { %1689 = vmatpush2.msra.mxu0 %v10249_v30  ;;  %1760 = vmatpush2.msra.mxu1 %v10250_v9  ;;  %v10268_v30 = vld [vmem:[#allocation73_spill] sm:$0xff]  ;;  %v10269_v9 = vld [vmem:[#allocation74_spill] sm:$0xff] }
 0x311   :  { %1690 = vmatprep.subr.mxu0 %v10251_v13  ;;  %1761 = vmatprep.subr.mxu1 %v10252_v12  ;;  %v10270_v13 = vld [vmem:[#allocation75_spill] sm:$0xff]  ;;  %v10271_v12 = vld [vmem:[#allocation76_spill] sm:$0xff] }
 0x312   :  { %1691 = vmatpush2.msra.mxu0 %v10253_v21  ;;  %1762 = vmatpush2.msra.mxu1 %v10254_v19  ;;  %v10272_v21 = vld [vmem:[#allocation77_spill] sm:$0xff]  ;;  %v10273_v19 = vld [vmem:[#allocation78_spill] sm:$0xff] }
 0x313   :  { %1692 = vmatprep.subr.mxu0 %v10255_v17  ;;  %1763 = vmatprep.subr.mxu1 %v10256_v20  ;;  %v10274_v17 = vld [vmem:[#allocation79_spill] sm:$0xff]  ;;  %v10275_v20 = vld [vmem:[#allocation80_spill] sm:$0xff] }
 0x314   :  { %1693 = vmatpush2.msra.mxu0 %v10257_v8  ;;  %1764 = vmatpush2.msra.mxu1 %v10258_v14  ;;  %v10276_v8 = vld [vmem:[#allocation81_spill] sm:$0xff]  ;;  %v10277_v14 = vld [vmem:[#allocation82_spill] sm:$0xff] }
 0x315   :  { %1694 = vmatprep.subr.mxu0 %v10259_v31  ;;  %1765 = vmatprep.subr.mxu1 %v10260_v34  ;;  %v10278_v31 = vld [vmem:[#allocation83_spill] sm:$0xff]  ;;  %v10279_v34 = vld [vmem:[#allocation84_spill] sm:$0xff] }
 0x316   :  { %1695 = vmatpush2.msra.mxu0 %v10261_v35  ;;  %1766 = vmatpush2.msra.mxu1 %v10262_v41  ;;  %v10280_v35 = vld [vmem:[#allocation85_spill] sm:$0xff]  ;;  %v10281_v41 = vld [vmem:[#allocation86_spill] sm:$0xff] }
 0x317   :  { %1696 = vmatprep.subr.mxu0 %v10263_v49  ;;  %1767 = vmatprep.subr.mxu1 %v10264_v51  ;;  %v10282_v49 = vld [vmem:[#allocation87_spill] sm:$0xff]  ;;  %v10283_v51 = vld [vmem:[#allocation88_spill] sm:$0xff] }
 0x318   :  { %1697 = vmatpush2.msra.mxu0 %v10265_v54  ;;  %1768 = vmatpush2.msra.mxu1 %v10266_v55  ;;  %v10284_v54 = vld [vmem:[#allocation89_spill] sm:$0xff]  ;;  %v10285_v55 = vld [vmem:[#allocation90_spill] sm:$0xff] }
 0x319   :  { %1698 = vmatprep.subr.mxu0 %v10267_v28  ;;  %1769 = vmatprep.subr.mxu1 %v10268_v30  ;;  %v10286_v28 = vld [vmem:[#allocation91_spill] sm:$0xff]  ;;  %v10287_v30 = vld [vmem:[#allocation92_spill] sm:$0xff] }
 0x31a   :  { %1699 = vmatpush2.msra.mxu0 %v10269_v9  ;;  %1770 = vmatpush2.msra.mxu1 %v10270_v13  ;;  %v10288_v9 = vld [vmem:[#allocation93_spill] sm:$0xff]  ;;  %v10289_v13 = vld [vmem:[#allocation94_spill] sm:$0xff] }
 0x31b   :  { %1700 = vmatprep.subr.mxu0 %v10271_v12  ;;  %1771 = vmatprep.subr.mxu1 %v10272_v21  ;;  %v10290_v12 = vld [vmem:[#allocation95_spill] sm:$0xff]  ;;  %v10291_v21 = vld [vmem:[#allocation96_spill] sm:$0xff] }
 0x31c   :  { %1701 = vmatpush2.msra.mxu0 %v10273_v19  ;;  %1772 = vmatpush2.msra.mxu1 %v10274_v17  ;;  %v10292_v19 = vld [vmem:[#allocation97_spill] sm:$0xff]  ;;  %v10293_v17 = vld [vmem:[#allocation98_spill] sm:$0xff] }
 0x31d   :  { %1702 = vmatprep.subr.mxu0 %v10275_v20  ;;  %1773 = vmatprep.subr.mxu1 %v10276_v8  ;;  %v10294_v20 = vld [vmem:[#allocation99_spill] sm:$0xff]  ;;  %v10295_v8 = vld [vmem:[#allocation100_spill] sm:$0xff] }
 0x31e   :  { %1703 = vmatpush2.msra.mxu0 %v10277_v14  ;;  %1774 = vmatpush2.msra.mxu1 %v10278_v31  ;;  %v10296_v14 = vld [vmem:[#allocation101_spill] sm:$0xff]  ;;  %v10297_v31 = vld [vmem:[#allocation102_spill] sm:$0xff] }
 0x31f   :  { %1704 = vmatprep.subr.mxu0 %v10279_v34  ;;  %1775 = vmatprep.subr.mxu1 %v10280_v35  ;;  %v10298_v34 = vld [vmem:[#allocation103_spill] sm:$0xff]  ;;  %v10299_v35 = vld [vmem:[#allocation104_spill] sm:$0xff] }
 0x320   :  { %1705 = vmatpush2.msra.mxu0 %v10281_v41  ;;  %1776 = vmatpush2.msra.mxu1 %v10282_v49  ;;  %v10300_v41 = vld [vmem:[#allocation105_spill] sm:$0xff]  ;;  %v61_v49 = vpop.permute.xlu1 %60 }
 0x321   :  { %1706 = vmatprep.subr.mxu0 %v10283_v51  ;;  %1777 = vmatprep.subr.mxu1 %v10284_v54  ;;  %v10301_v51 = vld [vmem:[#allocation9_spill] sm:$0xff] }
 0x322   :  { %1707 = vmatpush2.msra.mxu0 %v10285_v55  ;;  %1778 = vmatpush2.msra.mxu1 %v10286_v28  ;;  %v145_v54 = vmul.f32 %v10301_v51, %v61_v49  ;;  %v10302_v55 = vld [vmem:[#allocation10_spill] sm:$0xff] }
 0x323   :  { %1708 = vmatprep.subr.mxu0 %v10287_v30  ;;  %1779 = vmatprep.subr.mxu1 %v10288_v9  ;;  %v147_v28 = vmul.f32 %v10302_v55, %v61_v49  ;;  %v10303_v30 = vld [vmem:[#allocation11_spill] sm:$0xff] }
 0x324   :  { %1709 = vmatpush2.msra.mxu0 %v10289_v13  ;;  %1780 = vmatpush2.msra.mxu1 %v10290_v12  ;;  %v146_v9 = vmul.f32 %v10303_v30, %v61_v49  ;;  %v251_v12 = vadd.f32 %v5446_v47, %v145_v54 }
 0x325   :  { %1710 = vmatprep.subr.mxu0 %v10291_v21  ;;  %1781 = vmatprep.subr.mxu1 %v10292_v19  ;;  %v148_v21 = vmul.f32 %v5448_v48, %v61_v49  ;;  %v253_v19 = vadd.f32 %v5451_v50, %v147_v28 }
 0x326   :  { %1711 = vmatpush2.msra.mxu0 %v10293_v17  ;;  %1782 = vmatpush2.msra.mxu1 %v10294_v20  ;;  %v252_v20 = vadd.f32 %v5455_v52, %v146_v9  ;;  %v149_v9 = vmul.f32 %v5464_v25, %v61_v49 }
 0x327   :  { %1712 = vmatprep.subr.mxu0 %v10295_v8  ;;  %1783 = vmatprep.subr.mxu1 %v10296_v14 }
 0x328   :  { %1713 = vmatpush2.msra.mxu0 %v10297_v31  ;;  %1784 = vmatpush2.msra.mxu1 %v10298_v34  ;;  %v254_v31 = vadd.f32 %v5459_v56, %v148_v21  ;;  %v10304_v21 = vld [vmem:[#allocation14_spill] sm:$0xff] }
 0x329   :  { %1792 = vmatprep.subr.mxu0 %v10299_v35  ;;  %1863 = vmatprep.subr.mxu1 %v10300_v41 }
 0x367   :  { %v1375_v13 = vpop.f32.mrf.mxu0  ;;  %v1446_v17 = vpop.f32.mrf.mxu1 }
 0x368   :  { %v1376_v14 = vadd.f32 %v1375_v13, %v251_v12  ;;  %v1447_v34 = vadd.f32 %v1446_v17, %v253_v19  ;;  %v151_v13 = vmul.f32 %v5466_v26, %v61_v49  ;;  %v150_v19 = vmul.f32 %v10304_v21, %v61_v49 }
 0x369   :  { %v1377_v8 = vpop.f32.mrf.mxu0  ;;  %v1448_v35 = vpop.f32.mrf.mxu1 }
 0x36a   :  { %v1378_v41 = vadd.f32 %v1377_v8, %v252_v20  ;;  %v3390_v55 = vmul.f32 -1.442695, %v1376_v14  ;;  %v1449_v51 = vadd.f32 %v1448_v35, %v254_v31  ;;  %v3392_v30 = vmul.f32 -1.442695, %v1447_v34 }
 0x36b   :  { %v152_v8 = vmul.f32 %v5470_v29, %v61_v49  ;;  %v256_v34 = vadd.f32 %v5479_v46, %v150_v19 }
 0x36c   :  { %v3391_v11 = vmul.f32 -1.442695, %v1378_v41  ;;  %3498 = vpow2.f32 %v3390_v55  ;;  %v3393_v54 = vmul.f32 -1.442695, %v1449_v51  ;;  %v255_v51 = vadd.f32 %v5473_v33, %v149_v9 }
 0x36d   :  { %3500 = vpow2.f32 %v3392_v30 }
 0x36e   :  { %3502 = vpow2.f32 %v3391_v11  ;;  %v257_v11 = vadd.f32 %v5476_v38, %v151_v13 }
 0x36f   :  { %3504 = vpow2.f32 %v3393_v54  ;;  %v258_v54 = vadd.f32 %v5482_v53, %v152_v8 }
 0x379   :  { %v3499_v28 = vpop.eup %3498 }
 0x37a   :  { %v3501_v50 = vpop.eup %3500  ;;  %v1599_v12 = vadd.f32 1.0, %v3499_v28 }
 0x37b   :  { %v3503_v48 = vpop.eup %3502  ;;  %v1611_v20 = vadd.f32 1.0, %v3501_v50 }
 0x37c   :  { %v3505_v17 = vpop.eup %3504  ;;  %v1600_v14 = vadd.f32 1.0, %v3503_v48  ;;  %3506 = vrcp.f32 %v1599_v12 }
 0x37d   :  { %v1612_v55 = vadd.f32 1.0, %v3505_v17  ;;  %3508 = vrcp.f32 %v1611_v20 }
 0x37e   :  { %3510 = vrcp.f32 %v1600_v14 }
 0x389   :  { %v3507_v12 = vpop.eup %3506 }
 0x38a   :  { %v3509_v17 = vpop.eup %3508 }
 0x38b   :  { %v3511_v19 = vpop.eup %3510 }
 0x3a8   :  { %v1517_v30 = vpop.f32.mrf.mxu0  ;;  %v1588_v31 = vpop.f32.mrf.mxu1 }
 0x3a9   :  { %v1518_v35 = vadd.f32 %v1517_v30, %v255_v51  ;;  %v1589_v41 = vadd.f32 %v1588_v31, %v257_v11  ;;  %v1631_v11 = vmul.f32 %v3509_v17, %v6025_v7  ;;  %v6600_v17 = vld [vmem:[#allocation4 + $0x3a8] sm:$0xff] }
 0x3aa   :  { %v1519_v50 = vpop.f32.mrf.mxu0  ;;  %v1590_v28 = vpop.f32.mrf.mxu1 }
 0x3ab   :  { %3512 = vtanh.f32 %v1518_v35  ;;  %v3394_v48 = vmul.f32 -1.442695, %v1589_v41  ;;  %v1520_v49 = vadd.f32 %v1519_v50, %v256_v34  ;;  %v1591_v9 = vadd.f32 %v1590_v28, %v258_v54 }
 0x3ac   :  { %3514 = vrcp.f32 %v1612_v55 }
 0x3ad   :  { %3516 = vpow2.f32 %v3394_v48  ;;  %v3395_v13 = vmul.f32 -1.442695, %v1591_v9 }
 0x3ae   :  { %3518 = vtanh.f32 %v1520_v49 }
 0x3af   :  { %3520 = vpow2.f32 %v3395_v13 }
 0x3b8   :  { %v3513_v20 = vpop.eup %3512 }
 0x3b9   :  { %v3515_v51 = vpop.eup %3514  ;;  %v1633_v8 = vmul.f32 %v3513_v20, %v3507_v12  ;;  %v6597_v12 = vld [vmem:[#allocation4 + $0x3f0] sm:$0xff]  ;;  %v6606_v20 = vld [vmem:[#allocation4 + $0x3a0] sm:$0xff] }
 0x3ba   :  { %v3517_v14 = vpop.eup %3516  ;;  %v1632_v55 = vmul.f32 %v3515_v51, %v6029_v18  ;;  %v6594_v18 = vld [vmem:[#allocation4 + $0x3e0] sm:$0xff]  ;;  %v6609_v51 = vld [vmem:[#allocation4 + $0x3b0] sm:$0xff] }
 0x3bb   :  { %v3519_v30 = vpop.eup %3518  ;;  %v6583_v31 = vadd.f32 %v1633_v8, %v1631_v11  ;;  %v1625_v35 = vadd.f32 1.0, %v3517_v14  ;;  %v6612_v11 = vld [vmem:[#allocation4 + $0x368] sm:$0xff]  ;;  %v6615_v8 = vld [vmem:[#allocation4 + $0x378] sm:$0xff]  ;;  %v6618_v14 = vld [vmem:[#allocation4 + $0x360] sm:$0xff] }
 0x3bc   :  { %v3521_v34 = vpop.eup %3520  ;;  %v1634_v41 = vmul.f32 %v3519_v30, %v3511_v19  ;;  %v6603_v19 = vld [vmem:[#allocation4 + $0x3b8] sm:$0xff]  ;;  %v6621_v30 = vld [vmem:[#allocation4 + $0x370] sm:$0xff] }
 0x3bd   :  { %3522 = vtanh.f32 %v6583_v31  ;;  %v1626_v54 = vadd.f32 1.0, %v3521_v34  ;;  %v10330_v34 = vld [vmem:[#allocation131_spill] sm:$0xff] }
 0x3be   :  { %3524 = vrcp.f32 %v1625_v35  ;;  %v6587_v50 = vadd.f32 %v1634_v41, %v1632_v55  ;;  %v10329_v35 = vld [vmem:[#allocation130_spill] sm:$0xff]  ;;  %v10331_v55 = vld [vmem:[#allocation132_spill] sm:$0xff]  ;;  %v10332_v41 = vld [vmem:[#allocation133_spill] sm:$0xff] }
 0x3bf   :  { %3526 = vrcp.f32 %v1626_v54  ;;  %v10333_v54 = vld [vmem:[#allocation134_spill] sm:$0xff] }
 0x3c0   :  { %3528 = vtanh.f32 %v6587_v50 }
 0x3ca   :  { %v3523_v7 = vpop.eup %3522 }
 0x3cb   :  { %v3525_v28 = vpop.eup %3524 }
 0x3cc   :  { %v3527_v48 = vpop.eup %3526  ;;  %v6590_v13 = vmul.f32 %v3525_v28, %v3523_v7  ;;  %v10334_v7 = vld [vmem:[#allocation135_spill] sm:$0xff]  ;;  %v10335_v28 = vld [vmem:[#allocation136_spill] sm:$0xff] }
 0x3cd   :  { %v3529_v49 = vpop.eup %3528 }
 0x3ce   :  { %v1640_v9 = vmul.f32 %v3529_v49, %v3527_v48  ;;  %v10336_v48 = vld [vmem:[#allocation137_spill] sm:$0xff]  ;;  %v10337_v49 = vld [vmem:[#allocation138_spill] sm:$0xff] }
 0x3d0   :  { %1714 = vmatprep.mubr.f32.mxu0 %v1640_v9  ;;  %1785 = vmatprep.mubr.f32.mxu1 %v1640_v9 }
 0x3d1   :  { %1715 = vmatmul.mubr.f32.vlgmr.msra.gmra.mxu0 %v6590_v13  ;;  %1786 = vmatmul.mubr.f32.vlgmr.msra.gmra.mxu1 %v6590_v13 }
 0x3d2   :  { %1793 = vmatpush1.msra.mxu0 %v6594_v18  ;;  %1864 = vmatpush1.msra.mxu1 %v6597_v12 }
 0x3d3   :  { %1794 = vmatprep.subr.mxu0 %v6600_v17  ;;  %1856 = vmatprep.mubr.f32.mxu0 %v1640_v9 }
 0x3d4   :  { %1865 = vmatprep.subr.mxu1 %v6603_v19  ;;  %1927 = vmatprep.mubr.f32.mxu1 %v1640_v9  ;;  %v10338_v9 = vld [vmem:[#allocation139_spill] sm:$0xff] }
 0x3d5   :  { %1795 = vmatpush1.msra.mxu0 %v6606_v20  ;;  %1866 = vmatpush1.msra.mxu1 %v6609_v51 }
 0x3d6   :  { %1796 = vmatprep.subr.mxu0 %v6612_v11  ;;  %1867 = vmatprep.subr.mxu1 %v6615_v8 }
 0x3d7   :  { %1797 = vmatpush1.msra.mxu0 %v6618_v14  ;;  %1868 = vmatpush1.msra.mxu1 %v6621_v30 }
 0x3d8   :  { %1798 = vmatprep.subr.mxu0 %v6046_v37  ;;  %1869 = vmatprep.subr.mxu1 %v6049_v61  ;;  %v10305_v37 = vld [vmem:[#allocation106_spill] sm:$0xff]  ;;  %v10306_v61 = vld [vmem:[#allocation107_spill] sm:$0xff] }
 0x3d9   :  { %1799 = vmatpush1.msra.mxu0 %v6052_v62  ;;  %1870 = vmatpush1.msra.mxu1 %v6055_v63  ;;  %v10307_v62 = vld [vmem:[#allocation108_spill] sm:$0xff]  ;;  %v10308_v63 = vld [vmem:[#allocation109_spill] sm:$0xff] }
 0x3da   :  { %1800 = vmatprep.subr.mxu0 %v6058_v0  ;;  %1871 = vmatprep.subr.mxu1 %v6061_v42  ;;  %v10309_v0 = vld [vmem:[#allocation110_spill] sm:$0xff]  ;;  %v10310_v42 = vld [vmem:[#allocation111_spill] sm:$0xff] }
 0x3db   :  { %1801 = vmatpush1.msra.mxu0 %v6064_v43  ;;  %1872 = vmatpush1.msra.mxu1 %v6067_v2  ;;  %v10311_v43 = vld [vmem:[#allocation112_spill] sm:$0xff]  ;;  %v10312_v2 = vld [vmem:[#allocation113_spill] sm:$0xff] }
 0x3dc   :  { %1802 = vmatprep.subr.mxu0 %v6070_v3  ;;  %1873 = vmatprep.subr.mxu1 %v6073_v4  ;;  %v10313_v3 = vld [vmem:[#allocation114_spill] sm:$0xff]  ;;  %v10314_v4 = vld [vmem:[#allocation115_spill] sm:$0xff] }
 0x3dd   :  { %1803 = vmatpush1.msra.mxu0 %v6076_v5  ;;  %1874 = vmatpush1.msra.mxu1 %v6079_v45  ;;  %v10315_v5 = vld [vmem:[#allocation116_spill] sm:$0xff]  ;;  %v10316_v45 = vld [vmem:[#allocation117_spill] sm:$0xff] }
 0x3de   :  { %1804 = vmatprep.subr.mxu0 %v6082_v57  ;;  %1875 = vmatprep.subr.mxu1 %v6085_v10  ;;  %v10317_v57 = vld [vmem:[#allocation118_spill] sm:$0xff]  ;;  %v10318_v10 = vld [vmem:[#allocation119_spill] sm:$0xff] }
 0x3df   :  { %1805 = vmatpush1.msra.mxu0 %v6088_v58  ;;  %1876 = vmatpush1.msra.mxu1 %v6091_v60  ;;  %v10319_v58 = vld [vmem:[#allocation120_spill] sm:$0xff]  ;;  %v10320_v60 = vld [vmem:[#allocation121_spill] sm:$0xff] }
 0x3e0   :  { %1806 = vmatprep.subr.mxu0 %v6094_v22  ;;  %1877 = vmatprep.subr.mxu1 %v6097_v59  ;;  %v10321_v22 = vld [vmem:[#allocation122_spill] sm:$0xff]  ;;  %v10322_v59 = vld [vmem:[#allocation123_spill] sm:$0xff] }
 0x3e1   :  { %1807 = vmatpush1.msra.mxu0 %v6100_v6  ;;  %1878 = vmatpush1.msra.mxu1 %v6103_v15  ;;  %v10323_v6 = vld [vmem:[#allocation124_spill] sm:$0xff]  ;;  %v10324_v15 = vld [vmem:[#allocation125_spill] sm:$0xff] }
 0x3e2   :  { %1808 = vmatprep.subr.mxu0 %v6106_v36  ;;  %1879 = vmatprep.subr.mxu1 %v6109_v39  ;;  %v10325_v36 = vld [vmem:[#allocation126_spill] sm:$0xff]  ;;  %v10326_v39 = vld [vmem:[#allocation127_spill] sm:$0xff] }
 0x3e3   :  { %1809 = vmatpush1.msra.mxu0 %v6112_v27  ;;  %1880 = vmatpush1.msra.mxu1 %v6115_v24  ;;  %v10327_v27 = vld [vmem:[#allocation128_spill] sm:$0xff]  ;;  %v10328_v24 = vld [vmem:[#allocation129_spill] sm:$0xff] }
 0x3e4   :  { %1810 = vmatprep.subr.mxu0 %v10305_v37  ;;  %1881 = vmatprep.subr.mxu1 %v10306_v61  ;;  %v10339_v37 = vld [vmem:[#allocation140_spill] sm:$0xff]  ;;  %v10340_v61 = vld [vmem:[#allocation141_spill] sm:$0xff] }
 0x3e5   :  { %1811 = vmatpush1.msra.mxu0 %v10307_v62  ;;  %1882 = vmatpush1.msra.mxu1 %v10308_v63  ;;  %v10341_v62 = vld [vmem:[#allocation142_spill] sm:$0xff]  ;;  %v10342_v63 = vld [vmem:[#allocation143_spill] sm:$0xff] }
 0x3e6   :  { %1812 = vmatprep.subr.mxu0 %v10309_v0  ;;  %1883 = vmatprep.subr.mxu1 %v10310_v42  ;;  %v10343_v0 = vld [vmem:[#allocation144_spill] sm:$0xff]  ;;  %v10344_v42 = vld [vmem:[#allocation145_spill] sm:$0xff] }
 0x3e7   :  { %1813 = vmatpush1.msra.mxu0 %v10311_v43  ;;  %1884 = vmatpush1.msra.mxu1 %v10312_v2  ;;  %v10345_v43 = vld [vmem:[#allocation146_spill] sm:$0xff]  ;;  %v10346_v2 = vld [vmem:[#allocation147_spill] sm:$0xff] }
 0x3e8   :  { %1814 = vmatprep.subr.mxu0 %v10313_v3  ;;  %1885 = vmatprep.subr.mxu1 %v10314_v4  ;;  %v10347_v3 = vld [vmem:[#allocation148_spill] sm:$0xff]  ;;  %v10348_v4 = vld [vmem:[#allocation149_spill] sm:$0xff] }
 0x3e9   :  { %1815 = vmatpush1.msra.mxu0 %v10315_v5  ;;  %1886 = vmatpush1.msra.mxu1 %v10316_v45  ;;  %v10349_v5 = vld [vmem:[#allocation150_spill] sm:$0xff]  ;;  %v10350_v45 = vld [vmem:[#allocation151_spill] sm:$0xff] }
 0x3ea   :  { %1816 = vmatprep.subr.mxu0 %v10317_v57  ;;  %1887 = vmatprep.subr.mxu1 %v10318_v10  ;;  %v10351_v57 = vld [vmem:[#allocation152_spill] sm:$0xff]  ;;  %v10352_v10 = vld [vmem:[#allocation153_spill] sm:$0xff] }
 0x3eb   :  { %1817 = vmatpush1.msra.mxu0 %v10319_v58  ;;  %1888 = vmatpush1.msra.mxu1 %v10320_v60  ;;  %v10353_v58 = vld [vmem:[#allocation154_spill] sm:$0xff]  ;;  %v10354_v60 = vld [vmem:[#allocation155_spill] sm:$0xff] }
 0x3ec   :  { %1818 = vmatprep.subr.mxu0 %v10321_v22  ;;  %1889 = vmatprep.subr.mxu1 %v10322_v59  ;;  %v10355_v22 = vld [vmem:[#allocation156_spill] sm:$0xff]  ;;  %v10356_v59 = vld [vmem:[#allocation157_spill] sm:$0xff] }
 0x3ed   :  { %1819 = vmatpush1.msra.mxu0 %v10323_v6  ;;  %1890 = vmatpush1.msra.mxu1 %v10324_v15  ;;  %v10357_v6 = vld [vmem:[#allocation158_spill] sm:$0xff]  ;;  %v10358_v15 = vld [vmem:[#allocation159_spill] sm:$0xff] }
 0x3ee   :  { %1820 = vmatprep.subr.mxu0 %v10325_v36  ;;  %1891 = vmatprep.subr.mxu1 %v10326_v39  ;;  %v10359_v36 = vld [vmem:[#allocation160_spill] sm:$0xff]  ;;  %v10360_v39 = vld [vmem:[#allocation161_spill] sm:$0xff] }
 0x3ef   :  { %1821 = vmatpush1.msra.mxu0 %v10327_v27  ;;  %1892 = vmatpush1.msra.mxu1 %v10328_v24  ;;  %v10361_v27 = vld [vmem:[#allocation162_spill] sm:$0xff]  ;;  %v10362_v24 = vld [vmem:[#allocation163_spill] sm:$0xff] }
 0x3f0   :  { %1822 = vmatprep.subr.mxu0 %v10329_v35  ;;  %1893 = vmatprep.subr.mxu1 %v10330_v34  ;;  %v10363_v35 = vld [vmem:[#allocation164_spill] sm:$0xff]  ;;  %v10364_v34 = vld [vmem:[#allocation165_spill] sm:$0xff] }
 0x3f1   :  { %1823 = vmatpush1.msra.mxu0 %v10331_v55  ;;  %1894 = vmatpush1.msra.mxu1 %v10332_v41  ;;  %v10365_v55 = vld [vmem:[#allocation166_spill] sm:$0xff]  ;;  %v10366_v41 = vld [vmem:[#allocation167_spill] sm:$0xff] }
 0x3f2   :  { %1824 = vmatprep.subr.mxu0 %v10333_v54  ;;  %1895 = vmatprep.subr.mxu1 %v10334_v7  ;;  %v10367_v54 = vld [vmem:[#allocation168_spill] sm:$0xff]  ;;  %v10368_v7 = vld [vmem:[#allocation169_spill] sm:$0xff] }
 0x3f3   :  { %1825 = vmatpush2.msra.mxu0 %v10335_v28  ;;  %1896 = vmatpush2.msra.mxu1 %v10336_v48  ;;  %v10369_v28 = vld [vmem:[#allocation170_spill] sm:$0xff]  ;;  %v10370_v48 = vld [vmem:[#allocation171_spill] sm:$0xff] }
 0x3f4   :  { %1826 = vmatprep.subr.mxu0 %v10337_v49  ;;  %1897 = vmatprep.subr.mxu1 %v10338_v9  ;;  %v10371_v49 = vld [vmem:[#allocation172_spill] sm:$0xff]  ;;  %v10372_v9 = vld [vmem:[#allocation173_spill] sm:$0xff] }
 0x3f5   :  { %1827 = vmatpush2.msra.mxu0 %v10339_v37  ;;  %1898 = vmatpush2.msra.mxu1 %v10340_v61  ;;  %v10373_v37 = vld [vmem:[#allocation174_spill] sm:$0xff]  ;;  %v10374_v61 = vld [vmem:[#allocation175_spill] sm:$0xff] }
 0x3f6   :  { %1828 = vmatprep.subr.mxu0 %v10341_v62  ;;  %1899 = vmatprep.subr.mxu1 %v10342_v63  ;;  %v10375_v62 = vld [vmem:[#allocation176_spill] sm:$0xff]  ;;  %v10376_v63 = vld [vmem:[#allocation177_spill] sm:$0xff] }
 0x3f7   :  { %1829 = vmatpush2.msra.mxu0 %v10343_v0  ;;  %1900 = vmatpush2.msra.mxu1 %v10344_v42  ;;  %v10377_v0 = vld [vmem:[#allocation178_spill] sm:$0xff]  ;;  %v10378_v42 = vld [vmem:[#allocation179_spill] sm:$0xff] }
 0x3f8   :  { %1830 = vmatprep.subr.mxu0 %v10345_v43  ;;  %1901 = vmatprep.subr.mxu1 %v10346_v2  ;;  %v10379_v43 = vld [vmem:[#allocation180_spill] sm:$0xff]  ;;  %v10380_v2 = vld [vmem:[#allocation181_spill] sm:$0xff] }
 0x3f9   :  { %1831 = vmatpush2.msra.mxu0 %v10347_v3  ;;  %1902 = vmatpush2.msra.mxu1 %v10348_v4  ;;  %v10381_v3 = vld [vmem:[#allocation182_spill] sm:$0xff]  ;;  %v10382_v4 = vld [vmem:[#allocation183_spill] sm:$0xff] }
 0x3fa   :  { %1832 = vmatprep.subr.mxu0 %v10349_v5  ;;  %1903 = vmatprep.subr.mxu1 %v10350_v45  ;;  %v10383_v5 = vld [vmem:[#allocation184_spill] sm:$0xff]  ;;  %v10384_v45 = vld [vmem:[#allocation185_spill] sm:$0xff] }
 0x3fb   :  { %1833 = vmatpush2.msra.mxu0 %v10351_v57  ;;  %1904 = vmatpush2.msra.mxu1 %v10352_v10  ;;  %v10385_v57 = vld [vmem:[#allocation186_spill] sm:$0xff]  ;;  %v10386_v10 = vld [vmem:[#allocation187_spill] sm:$0xff] }
 0x3fc   :  { %1834 = vmatprep.subr.mxu0 %v10353_v58  ;;  %1905 = vmatprep.subr.mxu1 %v10354_v60  ;;  %v10387_v58 = vld [vmem:[#allocation188_spill] sm:$0xff]  ;;  %v10388_v60 = vld [vmem:[#allocation189_spill] sm:$0xff] }
 0x3fd   :  { %1835 = vmatpush2.msra.mxu0 %v10355_v22  ;;  %1906 = vmatpush2.msra.mxu1 %v10356_v59  ;;  %v10389_v22 = vld [vmem:[#allocation190_spill] sm:$0xff]  ;;  %v10390_v59 = vld [vmem:[#allocation191_spill] sm:$0xff] }
 0x3fe   :  { %1836 = vmatprep.subr.mxu0 %v10357_v6  ;;  %1907 = vmatprep.subr.mxu1 %v10358_v15  ;;  %v10391_v6 = vld [vmem:[#allocation192_spill] sm:$0xff]  ;;  %v10392_v15 = vld [vmem:[#allocation193_spill] sm:$0xff] }
 0x3ff   :  { %1837 = vmatpush2.msra.mxu0 %v10359_v36  ;;  %1908 = vmatpush2.msra.mxu1 %v10360_v39  ;;  %v10393_v36 = vld [vmem:[#allocation194_spill] sm:$0xff]  ;;  %v10394_v39 = vld [vmem:[#allocation195_spill] sm:$0xff] }
 0x400   :  { %1838 = vmatprep.subr.mxu0 %v10361_v27  ;;  %1909 = vmatprep.subr.mxu1 %v10362_v24  ;;  %v10395_v27 = vld [vmem:[#allocation196_spill] sm:$0xff]  ;;  %v10396_v24 = vld [vmem:[#allocation197_spill] sm:$0xff] }
 0x401   :  { %1839 = vmatpush2.msra.mxu0 %v10363_v35  ;;  %1910 = vmatpush2.msra.mxu1 %v10364_v34  ;;  %v10397_v35 = vld [vmem:[#allocation198_spill] sm:$0xff]  ;;  %v10398_v34 = vld [vmem:[#allocation199_spill] sm:$0xff] }
 0x402   :  { %1840 = vmatprep.subr.mxu0 %v10365_v55  ;;  %1911 = vmatprep.subr.mxu1 %v10366_v41  ;;  %v10400_v55 = vld [vmem:[#allocation201_spill] sm:$0xff]  ;;  %v10401_v41 = vld [vmem:[#allocation202_spill] sm:$0xff] }
 0x403   :  { %1841 = vmatpush2.msra.mxu0 %v10367_v54  ;;  %1912 = vmatpush2.msra.mxu1 %v10368_v7  ;;  %v10402_v54 = vld [vmem:[#allocation203_spill] sm:$0xff]  ;;  %v10403_v7 = vld [vmem:[#allocation204_spill] sm:$0xff] }
 0x404   :  { %1842 = vmatprep.subr.mxu0 %v10369_v28  ;;  %1913 = vmatprep.subr.mxu1 %v10370_v48  ;;  %v10404_v28 = vld [vmem:[#allocation205_spill] sm:$0xff]  ;;  %v10405_v48 = vld [vmem:[#allocation206_spill] sm:$0xff] }
 0x405   :  { %1843 = vmatpush2.msra.mxu0 %v10371_v49  ;;  %1914 = vmatpush2.msra.mxu1 %v10372_v9  ;;  %v10407_v49 = vld [vmem:[#allocation208_spill] sm:$0xff]  ;;  %v10408_v9 = vld [vmem:[#allocation209_spill] sm:$0xff] }
 0x406   :  { %1844 = vmatprep.subr.mxu0 %v10373_v37  ;;  %1915 = vmatprep.subr.mxu1 %v10374_v61  ;;  %v10409_v37 = vld [vmem:[#allocation210_spill] sm:$0xff]  ;;  %v10410_v61 = vld [vmem:[#allocation211_spill] sm:$0xff] }
 0x407   :  { %1845 = vmatpush2.msra.mxu0 %v10375_v62  ;;  %1916 = vmatpush2.msra.mxu1 %v10376_v63  ;;  %v6762_v62 = vld [vmem:[#allocation4 + $0x288] sm:$0xff]  ;;  %v6765_v63 = vld [vmem:[#allocation4 + $0x298] sm:$0xff] }
 0x408   :  { %1846 = vmatprep.subr.mxu0 %v10377_v0  ;;  %1917 = vmatprep.subr.mxu1 %v10378_v42  ;;  %v6768_v0 = vld [vmem:[#allocation4 + $0x280] sm:$0xff]  ;;  %v6786_v42 = vld [vmem:[#allocation4 + $0x208] sm:$0xff] }
 0x409   :  { %1847 = vmatpush2.msra.mxu0 %v10379_v43  ;;  %1918 = vmatpush2.msra.mxu1 %v10380_v2  ;;  %v6789_v43 = vld [vmem:[#allocation4 + $0x218] sm:$0xff]  ;;  %v6792_v2 = vld [vmem:[#allocation4 + $0x200] sm:$0xff] }
 0x40a   :  { %1848 = vmatprep.subr.mxu0 %v10381_v3  ;;  %1919 = vmatprep.subr.mxu1 %v10382_v4  ;;  %v6795_v3 = vld [vmem:[#allocation4 + $0x210] sm:$0xff]  ;;  %v6798_v4 = vld [vmem:[#allocation4 + $0x1c8] sm:$0xff] }
 0x40b   :  { %1849 = vmatpush2.msra.mxu0 %v10383_v5  ;;  %1920 = vmatpush2.msra.mxu1 %v10384_v45  ;;  %v6801_v5 = vld [vmem:[#allocation4 + $0x1d8] sm:$0xff]  ;;  %v6804_v45 = vld [vmem:[#allocation4 + $0x1c0] sm:$0xff] }
 0x40c   :  { %1850 = vmatprep.subr.mxu0 %v10385_v57  ;;  %1921 = vmatprep.subr.mxu1 %v10386_v10  ;;  %v6807_v57 = vld [vmem:[#allocation4 + $0x1d0] sm:$0xff]  ;;  %v6810_v10 = vld [vmem:[#allocation4 + $0x188] sm:$0xff] }
 0x40d   :  { %1851 = vmatpush2.msra.mxu0 %v10387_v58  ;;  %1922 = vmatpush2.msra.mxu1 %v10388_v60  ;;  %v6813_v58 = vld [vmem:[#allocation4 + $0x198] sm:$0xff]  ;;  %v6816_v60 = vld [vmem:[#allocation4 + $0x180] sm:$0xff] }
 0x40e   :  { %1852 = vmatprep.subr.mxu0 %v10389_v22  ;;  %1923 = vmatprep.subr.mxu1 %v10390_v59  ;;  %10411 = vst [vmem:[#allocation15_spill] sm:$0xff] %v6816_v60  ;;  %v6819_v22 = vld [vmem:[#allocation4 + $0x190] sm:$0xff]  ;;  %v6822_v59 = vld [vmem:[#allocation4 + $0x148] sm:$0xff] }
 0x40f   :  { %1853 = vmatpush2.msra.mxu0 %v6376_v44  ;;  %1924 = vmatpush2.msra.mxu1 %v10391_v6  ;;  %v10399_v44 = vld [vmem:[#allocation200_spill] sm:$0xff]  ;;  %10412 = vst [vmem:[#allocation16_spill] sm:$0xff] %v6819_v22  ;;  %10413 = vst [vmem:[#allocation17_spill] sm:$0xff] %v6822_v59  ;;  %v6825_v6 = vld [vmem:[#allocation4 + $0x158] sm:$0xff] }
 0x410   :  { %1854 = vmatprep.subr.mxu0 %v10392_v15  ;;  %1925 = vmatprep.subr.mxu1 %v10393_v36  ;;  %10414 = vst [vmem:[#allocation18_spill] sm:$0xff] %v6825_v6  ;;  %v6828_v15 = vld [vmem:[#allocation4 + $0x140] sm:$0xff]  ;;  %v6831_v36 = vld [vmem:[#allocation4 + $0x150] sm:$0xff] }
 0x411   :  { %1855 = vmatpush2.msra.mxu0 %v10394_v39  ;;  %1926 = vmatpush2.msra.mxu1 %v10395_v27  ;;  %10415 = vst [vmem:[#allocation19_spill] sm:$0xff] %v6828_v15  ;;  %10416 = vst [vmem:[#allocation20_spill] sm:$0xff] %v6831_v36  ;;  %v6834_v39 = vld [vmem:[#allocation4 + $0x108] sm:$0xff]  ;;  %v6837_v27 = vld [vmem:[#allocation4 + $0x118] sm:$0xff] }
 0x412   :  { %1857 = vmatmul.mubr.f32.vlgmr.msra.gmra.mxu0 %v6590_v13  ;;  %1928 = vmatmul.mubr.f32.vlgmr.msra.gmra.mxu1 %v6590_v13  ;;  %v10406_v13 = vld [vmem:[#allocation207_spill] sm:$0xff]  ;;  %10417 = vst [vmem:[#allocation21_spill] sm:$0xff] %v6834_v39  ;;  %10418 = vst [vmem:[#allocation22_spill] sm:$0xff] %v6837_v27 }
 0x413   :  { %1991 = vmatprep.subr.mxu0 %v10396_v24  ;;  %2062 = vmatprep.subr.mxu1 %v10397_v35  ;;  %v6840_v24 = vld [vmem:[#allocation4 + $0x100] sm:$0xff]  ;;  %v6843_v35 = vld [vmem:[#allocation4 + $0x110] sm:$0xff] }
 0x414   :  { %1992 = vmatpush1.msra.mxu0 %v10398_v34  ;;  %2063 = vmatpush1.msra.mxu1 %v10399_v44  ;;  %10419 = vst [vmem:[#allocation23_spill] sm:$0xff] %v6840_v24  ;;  %10420 = vst [vmem:[#allocation24_spill] sm:$0xff] %v6843_v35  ;;  %v6846_v34 = vld [vmem:[#allocation4 + $0xc8] sm:$0xff]  ;;  %v6849_v44 = vld [vmem:[#allocation4 + $0xd8] sm:$0xff] }
 0x415   :  { %1993 = vmatprep.subr.mxu0 %v10400_v55  ;;  %2064 = vmatprep.subr.mxu1 %v10401_v41  ;;  %10421 = vst [vmem:[#allocation25_spill] sm:$0xff] %v6846_v34  ;;  %10422 = vst [vmem:[#allocation26_spill] sm:$0xff] %v6849_v44  ;;  %v6852_v55 = vld [vmem:[#allocation4 + $0xc0] sm:$0xff]  ;;  %v6855_v41 = vld [vmem:[#allocation4 + $0xd0] sm:$0xff] }
 0x416   :  { %1994 = vmatpush1.msra.mxu0 %v10402_v54  ;;  %2065 = vmatpush1.msra.mxu1 %v10403_v7  ;;  %10423 = vst [vmem:[#allocation27_spill] sm:$0xff] %v6852_v55  ;;  %10424 = vst [vmem:[#allocation28_spill] sm:$0xff] %v6855_v41  ;;  %v6858_v54 = vld [vmem:[#allocation4 + $0x88] sm:$0xff]  ;;  %v6861_v7 = vld [vmem:[#allocation4 + $0x98] sm:$0xff] }
 0x417   :  { %1995 = vmatprep.subr.mxu0 %v10404_v28  ;;  %2066 = vmatprep.subr.mxu1 %v10405_v48  ;;  %10425 = vst [vmem:[#allocation29_spill] sm:$0xff] %v6858_v54  ;;  %10426 = vst [vmem:[#allocation30_spill] sm:$0xff] %v6861_v7  ;;  %v6864_v28 = vld [vmem:[#allocation4 + $0x80] sm:$0xff]  ;;  %v6867_v48 = vld [vmem:[#allocation4 + $0x90] sm:$0xff] }
 0x418   :  { %1996 = vmatpush1.msra.mxu0 %v10406_v13  ;;  %2067 = vmatpush1.msra.mxu1 %v10407_v49  ;;  %10427 = vst [vmem:[#allocation31_spill] sm:$0xff] %v6864_v28  ;;  %10428 = vst [vmem:[#allocation32_spill] sm:$0xff] %v6867_v48  ;;  %v6870_v13 = vld [vmem:[#allocation4 + $0x48] sm:$0xff]  ;;  %v6873_v49 = vld [vmem:[#allocation4 + $0x58] sm:$0xff] }
 0x419   :  { %1997 = vmatprep.subr.mxu0 %v10408_v9  ;;  %2068 = vmatprep.subr.mxu1 %v10409_v37  ;;  %10429 = vst [vmem:[#allocation33_spill] sm:$0xff] %v6870_v13  ;;  %10430 = vst [vmem:[#allocation34_spill] sm:$0xff] %v6873_v49  ;;  %v6876_v9 = vld [vmem:[#allocation4 + $0x40] sm:$0xff]  ;;  %v6879_v37 = vld [vmem:[#allocation4 + $0x50] sm:$0xff] }
 0x41a   :  { %1998 = vmatpush1.msra.mxu0 %v6438_v1  ;;  %2069 = vmatpush1.msra.mxu1 %v6441_v40  ;;  %v6771_v40 = vld [vmem:[#allocation4 + $0x290] sm:$0xff]  ;;  %v6780_v1 = vld [vmem:[#allocation4 + $0x240] sm:$0xff]  ;;  %10431 = vst [vmem:[#allocation35_spill] sm:$0xff] %v6876_v9  ;;  %10432 = vst [vmem:[#allocation36_spill] sm:$0xff] %v6879_v37 }
 0x41b   :  { %1999 = vmatprep.subr.mxu0 %v6444_v32  ;;  %2070 = vmatprep.subr.mxu1 %v6447_v16  ;;  %v6774_v32 = vld [vmem:[#allocation4 + $0x248] sm:$0xff]  ;;  %v6783_v16 = vld [vmem:[#allocation4 + $0x250] sm:$0xff] }
 0x41c   :  { %2000 = vmatpush1.msra.mxu0 %v6450_v23  ;;  %2071 = vmatpush1.msra.mxu1 %v10410_v61  ;;  %v6777_v23 = vld [vmem:[#allocation4 + $0x258] sm:$0xff]  ;;  %v6882_v61 = vld [vmem:[#allocation4 + $0x8] sm:$0xff] }
 0x41d   :  { %2001 = vmatprep.subr.mxu0 %v6762_v62  ;;  %2072 = vmatprep.subr.mxu1 %v6765_v63  ;;  %10433 = vst [vmem:[#allocation37_spill] sm:$0xff] %v6882_v61 }
 0x41e   :  { %2002 = vmatpush1.msra.mxu0 %v6768_v0  ;;  %2073 = vmatpush1.msra.mxu1 %v6771_v40 }
 0x41f   :  { %2003 = vmatprep.subr.mxu0 %v6774_v32  ;;  %2074 = vmatprep.subr.mxu1 %v6777_v23 }
 0x420   :  { %2004 = vmatpush1.msra.mxu0 %v6780_v1  ;;  %2075 = vmatpush1.msra.mxu1 %v6783_v16 }
 0x421   :  { %2005 = vmatprep.subr.mxu0 %v6786_v42  ;;  %2076 = vmatprep.subr.mxu1 %v6789_v43 }
 0x422   :  { %2006 = vmatpush1.msra.mxu0 %v6792_v2  ;;  %2077 = vmatpush1.msra.mxu1 %v6795_v3 }
 0x423   :  { %2007 = vmatprep.subr.mxu0 %v6798_v4  ;;  %2078 = vmatprep.subr.mxu1 %v6801_v5 }
 0x424   :  { %2008 = vmatpush1.msra.mxu0 %v6804_v45  ;;  %2079 = vmatpush1.msra.mxu1 %v6807_v57 }
 0x425   :  { %2009 = vmatprep.subr.mxu0 %v6810_v10  ;;  %2080 = vmatprep.subr.mxu1 %v6813_v58 }
 0x426   :  { %2010 = vmatpush1.msra.mxu0 %v6816_v60  ;;  %2081 = vmatpush1.msra.mxu1 %v6819_v22 }
 0x427   :  { %2011 = vmatprep.subr.mxu0 %v6822_v59  ;;  %2082 = vmatprep.subr.mxu1 %v6825_v6 }
 0x428   :  { %2012 = vmatpush1.msra.mxu0 %v6828_v15  ;;  %2083 = vmatpush1.msra.mxu1 %v6831_v36 }
 0x429   :  { %2013 = vmatprep.subr.mxu0 %v6834_v39  ;;  %2084 = vmatprep.subr.mxu1 %v6837_v27 }
 0x42a   :  { %2014 = vmatpush1.msra.mxu0 %v6840_v24  ;;  %2085 = vmatpush1.msra.mxu1 %v6843_v35  ;;  %v10507_v24 = vld [vmem:[#allocation13_spill] sm:$0xff] }
 0x42b   :  { %2015 = vmatprep.subr.mxu0 %v6846_v34  ;;  %2086 = vmatprep.subr.mxu1 %v6849_v44 }
 0x42c   :  { %2016 = vmatpush1.msra.mxu0 %v6852_v55  ;;  %2087 = vmatpush1.msra.mxu1 %v6855_v41  ;;  %v10505_v55 = vld [vmem:[#allocation11_spill] sm:$0xff] }
 0x42d   :  { %2017 = vmatprep.subr.mxu0 %v6858_v54  ;;  %2088 = vmatprep.subr.mxu1 %v6861_v7  ;;  %v10504_v54 = vld [vmem:[#allocation10_spill] sm:$0xff] }
 0x42e   :  { %2018 = vmatpush1.msra.mxu0 %v6864_v28  ;;  %2089 = vmatpush1.msra.mxu1 %v6867_v48  ;;  %v6885_v48 = vld [vmem:[#allocation4 + $0x18] sm:$0xff]  ;;  %v10503_v28 = vld [vmem:[#allocation9_spill] sm:$0xff] }
 0x42f   :  { %2019 = vmatprep.subr.mxu0 %v6870_v13  ;;  %2090 = vmatprep.subr.mxu1 %v6873_v49  ;;  %10434 = vst [vmem:[#allocation38_spill] sm:$0xff] %v6885_v48  ;;  %v6888_v13 = vld [vmem:[#allocation4] sm:$0xff]  ;;  %v6891_v49 = vld [vmem:[#allocation4 + $0x10] sm:$0xff] }
 0x430   :  { %2020 = vmatpush1.msra.mxu0 %v6876_v9  ;;  %2091 = vmatpush1.msra.mxu1 %v6879_v37  ;;  %10435 = vst [vmem:[#allocation39_spill] sm:$0xff] %v6888_v13  ;;  %10436 = vst [vmem:[#allocation40_spill] sm:$0xff] %v6891_v49  ;;  %v6894_v9 = vld [vmem:[#allocation4 + $0x7c8] sm:$0xff]  ;;  %v6897_v37 = vld [vmem:[#allocation4 + $0x7d8] sm:$0xff] }
 0x431   :  { %2021 = vmatprep.subr.mxu0 %v6882_v61  ;;  %2092 = vmatprep.subr.mxu1 %v6885_v48  ;;  %10437 = vst [vmem:[#allocation41_spill] sm:$0xff] %v6894_v9  ;;  %10438 = vst [vmem:[#allocation42_spill] sm:$0xff] %v6897_v37  ;;  %v6900_v61 = vld [vmem:[#allocation4 + $0x7c0] sm:$0xff]  ;;  %v6903_v48 = vld [vmem:[#allocation4 + $0x7d0] sm:$0xff] }
 0x432   :  { %2022 = vmatpush1.msra.mxu0 %v6888_v13  ;;  %2093 = vmatpush1.msra.mxu1 %v6891_v49  ;;  %10439 = vst [vmem:[#allocation43_spill] sm:$0xff] %v6900_v61  ;;  %10440 = vst [vmem:[#allocation44_spill] sm:$0xff] %v6903_v48  ;;  %v6906_v13 = vld [vmem:[#allocation4 + $0x788] sm:$0xff]  ;;  %v6909_v49 = vld [vmem:[#allocation4 + $0x798] sm:$0xff] }
 0x433   :  { %2023 = vmatprep.subr.mxu0 %v6894_v9  ;;  %2094 = vmatprep.subr.mxu1 %v6897_v37  ;;  %10441 = vst [vmem:[#allocation45_spill] sm:$0xff] %v6906_v13  ;;  %10442 = vst [vmem:[#allocation46_spill] sm:$0xff] %v6909_v49  ;;  %v6912_v9 = vld [vmem:[#allocation4 + $0x780] sm:$0xff]  ;;  %v6915_v37 = vld [vmem:[#allocation4 + $0x790] sm:$0xff] }
 0x434   :  { %2024 = vmatpush2.msra.mxu0 %v6900_v61  ;;  %2095 = vmatpush2.msra.mxu1 %v6903_v48  ;;  %10443 = vst [vmem:[#allocation47_spill] sm:$0xff] %v6912_v9  ;;  %10444 = vst [vmem:[#allocation48_spill] sm:$0xff] %v6915_v37  ;;  %v6918_v61 = vld [vmem:[#allocation4 + $0x748] sm:$0xff]  ;;  %v6921_v48 = vld [vmem:[#allocation4 + $0x758] sm:$0xff] }
 0x435   :  { %2025 = vmatprep.subr.mxu0 %v6906_v13  ;;  %2096 = vmatprep.subr.mxu1 %v6909_v49  ;;  %10445 = vst [vmem:[#allocation49_spill] sm:$0xff] %v6918_v61  ;;  %10446 = vst [vmem:[#allocation50_spill] sm:$0xff] %v6921_v48  ;;  %v6924_v13 = vld [vmem:[#allocation4 + $0x740] sm:$0xff]  ;;  %v6927_v49 = vld [vmem:[#allocation4 + $0x750] sm:$0xff] }
 0x436   :  { %2026 = vmatpush2.msra.mxu0 %v6912_v9  ;;  %2097 = vmatpush2.msra.mxu1 %v6915_v37  ;;  %10447 = vst [vmem:[#allocation51_spill] sm:$0xff] %v6924_v13  ;;  %10448 = vst [vmem:[#allocation52_spill] sm:$0xff] %v6927_v49  ;;  %v6930_v9 = vld [vmem:[#allocation4 + $0x708] sm:$0xff]  ;;  %v6933_v37 = vld [vmem:[#allocation4 + $0x718] sm:$0xff] }
 0x437   :  { %2027 = vmatprep.subr.mxu0 %v6918_v61  ;;  %2098 = vmatprep.subr.mxu1 %v6921_v48  ;;  %10449 = vst [vmem:[#allocation53_spill] sm:$0xff] %v6930_v9  ;;  %10450 = vst [vmem:[#allocation54_spill] sm:$0xff] %v6933_v37  ;;  %v6936_v61 = vld [vmem:[#allocation4 + $0x700] sm:$0xff]  ;;  %v6939_v48 = vld [vmem:[#allocation4 + $0x710] sm:$0xff] }
 0x438   :  { %2028 = vmatpush2.msra.mxu0 %v6924_v13  ;;  %2099 = vmatpush2.msra.mxu1 %v6927_v49  ;;  %10451 = vst [vmem:[#allocation55_spill] sm:$0xff] %v6936_v61  ;;  %10452 = vst [vmem:[#allocation56_spill] sm:$0xff] %v6939_v48  ;;  %v6942_v13 = vld [vmem:[#allocation4 + $0x6c8] sm:$0xff]  ;;  %v6945_v49 = vld [vmem:[#allocation4 + $0x6d8] sm:$0xff] }
 0x439   :  { %2029 = vmatprep.subr.mxu0 %v6930_v9  ;;  %2100 = vmatprep.subr.mxu1 %v6933_v37  ;;  %10453 = vst [vmem:[#allocation57_spill] sm:$0xff] %v6942_v13  ;;  %10454 = vst [vmem:[#allocation58_spill] sm:$0xff] %v6945_v49  ;;  %v6948_v9 = vld [vmem:[#allocation4 + $0x6c0] sm:$0xff]  ;;  %v6951_v37 = vld [vmem:[#allocation4 + $0x6d0] sm:$0xff] }
 0x43a   :  { %2030 = vmatpush2.msra.mxu0 %v6936_v61  ;;  %2101 = vmatpush2.msra.mxu1 %v6939_v48  ;;  %10455 = vst [vmem:[#allocation59_spill] sm:$0xff] %v6948_v9  ;;  %10456 = vst [vmem:[#allocation60_spill] sm:$0xff] %v6951_v37  ;;  %v6954_v61 = vld [vmem:[#allocation4 + $0x688] sm:$0xff]  ;;  %v6957_v48 = vld [vmem:[#allocation4 + $0x698] sm:$0xff] }
 0x43b   :  { %2031 = vmatprep.subr.mxu0 %v6942_v13  ;;  %2102 = vmatprep.subr.mxu1 %v6945_v49  ;;  %10457 = vst [vmem:[#allocation61_spill] sm:$0xff] %v6954_v61  ;;  %10458 = vst [vmem:[#allocation62_spill] sm:$0xff] %v6957_v48  ;;  %v6960_v13 = vld [vmem:[#allocation4 + $0x680] sm:$0xff]  ;;  %v6963_v49 = vld [vmem:[#allocation4 + $0x690] sm:$0xff] }
 0x43c   :  { %2032 = vmatpush2.msra.mxu0 %v6948_v9  ;;  %2103 = vmatpush2.msra.mxu1 %v6951_v37  ;;  %10459 = vst [vmem:[#allocation63_spill] sm:$0xff] %v6960_v13  ;;  %10460 = vst [vmem:[#allocation64_spill] sm:$0xff] %v6963_v49  ;;  %v6966_v9 = vld [vmem:[#allocation4 + $0x648] sm:$0xff]  ;;  %v6969_v37 = vld [vmem:[#allocation4 + $0x658] sm:$0xff] }
 0x43d   :  { %2033 = vmatprep.subr.mxu0 %v6954_v61  ;;  %2104 = vmatprep.subr.mxu1 %v6957_v48  ;;  %10461 = vst [vmem:[#allocation65_spill] sm:$0xff] %v6966_v9  ;;  %10462 = vst [vmem:[#allocation66_spill] sm:$0xff] %v6969_v37  ;;  %v6972_v61 = vld [vmem:[#allocation4 + $0x640] sm:$0xff]  ;;  %v6975_v48 = vld [vmem:[#allocation4 + $0x650] sm:$0xff] }
 0x43e   :  { %2034 = vmatpush2.msra.mxu0 %v6960_v13  ;;  %2105 = vmatpush2.msra.mxu1 %v6963_v49  ;;  %10463 = vst [vmem:[#allocation67_spill] sm:$0xff] %v6972_v61  ;;  %10464 = vst [vmem:[#allocation68_spill] sm:$0xff] %v6975_v48  ;;  %v6978_v13 = vld [vmem:[#allocation4 + $0x608] sm:$0xff]  ;;  %v6981_v49 = vld [vmem:[#allocation4 + $0x618] sm:$0xff] }
 0x43f   :  { %2035 = vmatprep.subr.mxu0 %v6966_v9  ;;  %2106 = vmatprep.subr.mxu1 %v6969_v37  ;;  %10465 = vst [vmem:[#allocation69_spill] sm:$0xff] %v6978_v13  ;;  %10466 = vst [vmem:[#allocation70_spill] sm:$0xff] %v6981_v49  ;;  %v6984_v9 = vld [vmem:[#allocation4 + $0x600] sm:$0xff]  ;;  %v6987_v37 = vld [vmem:[#allocation4 + $0x610] sm:$0xff] }
 0x440   :  { %2036 = vmatpush2.msra.mxu0 %v6972_v61  ;;  %2107 = vmatpush2.msra.mxu1 %v6975_v48  ;;  %10467 = vst [vmem:[#allocation71_spill] sm:$0xff] %v6984_v9  ;;  %10468 = vst [vmem:[#allocation72_spill] sm:$0xff] %v6987_v37  ;;  %v6990_v61 = vld [vmem:[#allocation4 + $0x5c8] sm:$0xff]  ;;  %v6993_v48 = vld [vmem:[#allocation4 + $0x5d8] sm:$0xff] }
 0x441   :  { %2037 = vmatprep.subr.mxu0 %v6978_v13  ;;  %2108 = vmatprep.subr.mxu1 %v6981_v49  ;;  %10469 = vst [vmem:[#allocation73_spill] sm:$0xff] %v6990_v61  ;;  %10470 = vst [vmem:[#allocation74_spill] sm:$0xff] %v6993_v48  ;;  %v6996_v13 = vld [vmem:[#allocation4 + $0x5c0] sm:$0xff]  ;;  %v6999_v49 = vld [vmem:[#allocation4 + $0x5d0] sm:$0xff] }
 0x442   :  { %2038 = vmatpush2.msra.mxu0 %v6984_v9  ;;  %2109 = vmatpush2.msra.mxu1 %v6987_v37  ;;  %10471 = vst [vmem:[#allocation75_spill] sm:$0xff] %v6996_v13  ;;  %10472 = vst [vmem:[#allocation76_spill] sm:$0xff] %v6999_v49  ;;  %v7002_v9 = vld [vmem:[#allocation4 + $0x588] sm:$0xff]  ;;  %v7005_v37 = vld [vmem:[#allocation4 + $0x598] sm:$0xff] }
 0x443   :  { %2039 = vmatprep.subr.mxu0 %v6990_v61  ;;  %2110 = vmatprep.subr.mxu1 %v6993_v48  ;;  %10473 = vst [vmem:[#allocation77_spill] sm:$0xff] %v7002_v9  ;;  %10474 = vst [vmem:[#allocation78_spill] sm:$0xff] %v7005_v37  ;;  %v7008_v61 = vld [vmem:[#allocation4 + $0x580] sm:$0xff]  ;;  %v7011_v48 = vld [vmem:[#allocation4 + $0x590] sm:$0xff] }
 0x444   :  { %2040 = vmatpush2.msra.mxu0 %v6996_v13  ;;  %2111 = vmatpush2.msra.mxu1 %v6999_v49  ;;  %10475 = vst [vmem:[#allocation79_spill] sm:$0xff] %v7008_v61  ;;  %10476 = vst [vmem:[#allocation80_spill] sm:$0xff] %v7011_v48  ;;  %v7014_v13 = vld [vmem:[#allocation4 + $0x548] sm:$0xff]  ;;  %v7017_v49 = vld [vmem:[#allocation4 + $0x558] sm:$0xff] }
 0x445   :  { %2041 = vmatprep.subr.mxu0 %v7002_v9  ;;  %2112 = vmatprep.subr.mxu1 %v7005_v37  ;;  %10477 = vst [vmem:[#allocation81_spill] sm:$0xff] %v7014_v13  ;;  %10478 = vst [vmem:[#allocation82_spill] sm:$0xff] %v7017_v49  ;;  %v7020_v9 = vld [vmem:[#allocation4 + $0x540] sm:$0xff]  ;;  %v7023_v37 = vld [vmem:[#allocation4 + $0x550] sm:$0xff] }
 0x446   :  { %2042 = vmatpush2.msra.mxu0 %v7008_v61  ;;  %2113 = vmatpush2.msra.mxu1 %v7011_v48  ;;  %10479 = vst [vmem:[#allocation83_spill] sm:$0xff] %v7020_v9  ;;  %10480 = vst [vmem:[#allocation84_spill] sm:$0xff] %v7023_v37  ;;  %v7026_v61 = vld [vmem:[#allocation4 + $0x508] sm:$0xff]  ;;  %v7029_v48 = vld [vmem:[#allocation4 + $0x518] sm:$0xff] }
 0x447   :  { %2043 = vmatprep.subr.mxu0 %v7014_v13  ;;  %2114 = vmatprep.subr.mxu1 %v7017_v49  ;;  %10481 = vst [vmem:[#allocation85_spill] sm:$0xff] %v7026_v61  ;;  %10482 = vst [vmem:[#allocation86_spill] sm:$0xff] %v7029_v48  ;;  %v7032_v13 = vld [vmem:[#allocation4 + $0x500] sm:$0xff]  ;;  %v7035_v49 = vld [vmem:[#allocation4 + $0x510] sm:$0xff] }
 0x448   :  { %2044 = vmatpush2.msra.mxu0 %v7020_v9  ;;  %2115 = vmatpush2.msra.mxu1 %v7023_v37  ;;  %10483 = vst [vmem:[#allocation87_spill] sm:$0xff] %v7032_v13  ;;  %10484 = vst [vmem:[#allocation88_spill] sm:$0xff] %v7035_v49  ;;  %v7038_v9 = vld [vmem:[#allocation4 + $0x4c8] sm:$0xff]  ;;  %v7041_v37 = vld [vmem:[#allocation4 + $0x4d8] sm:$0xff] }
 0x449   :  { %2045 = vmatprep.subr.mxu0 %v7026_v61  ;;  %2116 = vmatprep.subr.mxu1 %v7029_v48  ;;  %10485 = vst [vmem:[#allocation89_spill] sm:$0xff] %v7038_v9  ;;  %10486 = vst [vmem:[#allocation90_spill] sm:$0xff] %v7041_v37  ;;  %v7044_v61 = vld [vmem:[#allocation4 + $0x4c0] sm:$0xff]  ;;  %v7047_v48 = vld [vmem:[#allocation4 + $0x4d0] sm:$0xff] }
 0x44a   :  { %2046 = vmatpush2.msra.mxu0 %v7032_v13  ;;  %2117 = vmatpush2.msra.mxu1 %v7035_v49  ;;  %10487 = vst [vmem:[#allocation91_spill] sm:$0xff] %v7044_v61  ;;  %10488 = vst [vmem:[#allocation92_spill] sm:$0xff] %v7047_v48  ;;  %v7050_v13 = vld [vmem:[#allocation4 + $0x488] sm:$0xff]  ;;  %v7053_v49 = vld [vmem:[#allocation4 + $0x498] sm:$0xff] }
 0x44b   :  { %2047 = vmatprep.subr.mxu0 %v7038_v9  ;;  %2118 = vmatprep.subr.mxu1 %v7041_v37  ;;  %10489 = vst [vmem:[#allocation93_spill] sm:$0xff] %v7050_v13  ;;  %10490 = vst [vmem:[#allocation94_spill] sm:$0xff] %v7053_v49  ;;  %v7056_v9 = vld [vmem:[#allocation4 + $0x480] sm:$0xff]  ;;  %v7059_v37 = vld [vmem:[#allocation4 + $0x490] sm:$0xff] }
 0x44c   :  { %2048 = vmatpush2.msra.mxu0 %v7044_v61  ;;  %2119 = vmatpush2.msra.mxu1 %v7047_v48  ;;  %10491 = vst [vmem:[#allocation95_spill] sm:$0xff] %v7056_v9  ;;  %10492 = vst [vmem:[#allocation96_spill] sm:$0xff] %v7059_v37  ;;  %v7062_v61 = vld [vmem:[#allocation4 + $0x448] sm:$0xff]  ;;  %v7065_v48 = vld [vmem:[#allocation4 + $0x458] sm:$0xff] }
 0x44d   :  { %2049 = vmatprep.subr.mxu0 %v7050_v13  ;;  %2120 = vmatprep.subr.mxu1 %v7053_v49  ;;  %10493 = vst [vmem:[#allocation97_spill] sm:$0xff] %v7062_v61  ;;  %10494 = vst [vmem:[#allocation98_spill] sm:$0xff] %v7065_v48  ;;  %v7068_v13 = vld [vmem:[#allocation4 + $0x440] sm:$0xff]  ;;  %v7071_v49 = vld [vmem:[#allocation4 + $0x450] sm:$0xff] }
 0x44e   :  { %2050 = vmatpush2.msra.mxu0 %v7056_v9  ;;  %2121 = vmatpush2.msra.mxu1 %v7059_v37  ;;  %10495 = vst [vmem:[#allocation99_spill] sm:$0xff] %v7068_v13  ;;  %10496 = vst [vmem:[#allocation100_spill] sm:$0xff] %v7071_v49  ;;  %v7074_v9 = vld [vmem:[#allocation4 + $0x408] sm:$0xff]  ;;  %v7077_v37 = vld [vmem:[#allocation4 + $0x418] sm:$0xff] }
 0x44f   :  { %2051 = vmatprep.subr.mxu0 %v7062_v61  ;;  %2122 = vmatprep.subr.mxu1 %v7065_v48  ;;  %10497 = vst [vmem:[#allocation101_spill] sm:$0xff] %v7074_v9  ;;  %10498 = vst [vmem:[#allocation102_spill] sm:$0xff] %v7077_v37  ;;  %v7080_v61 = vld [vmem:[#allocation4 + $0x400] sm:$0xff]  ;;  %v7083_v48 = vld [vmem:[#allocation4 + $0x410] sm:$0xff] }
 0x450   :  { %2052 = vmatpush2.msra.mxu0 %v7068_v13  ;;  %2123 = vmatpush2.msra.mxu1 %v7071_v49  ;;  %10499 = vst [vmem:[#allocation103_spill] sm:$0xff] %v7080_v61  ;;  %10500 = vst [vmem:[#allocation104_spill] sm:$0xff] %v7083_v48  ;;  %v7086_v13 = vld [vmem:[#allocation4 + $0x3e8] sm:$0xff]  ;;  %v7089_v49 = vld [vmem:[#allocation4 + $0x3f8] sm:$0xff] }
 0x451   :  { %2053 = vmatprep.subr.mxu0 %v7074_v9  ;;  %2124 = vmatprep.subr.mxu1 %v7077_v37  ;;  %10501 = vst [vmem:[#allocation105_spill] sm:$0xff] %v7086_v13  ;;  %10502 = vst [vmem:[#allocation14_spill] sm:$0xff] %v7089_v49  ;;  %v66_v9 = vpop.permute.xlu1 %65 }
 0x452   :  { %2054 = vmatpush2.msra.mxu0 %v7080_v61  ;;  %2125 = vmatpush2.msra.mxu1 %v7083_v48  ;;  %v153_v7 = vmul.f32 %v10503_v28, %v66_v9  ;;  %v155_v41 = vmul.f32 %v10504_v54, %v66_v9  ;;  %v154_v61 = vmul.f32 %v10505_v55, %v66_v9  ;;  %v10506_v48 = vld [vmem:[#allocation12_spill] sm:$0xff] }
 0x453   :  { %2133 = vmatprep.subr.mxu0 %v7086_v13  ;;  %2204 = vmatprep.subr.mxu1 %v7089_v49  ;;  %v156_v35 = vmul.f32 %v10506_v48, %v66_v9 }
 0x454   :  { %v259_v34 = vadd.f32 %v5446_v47, %v153_v7  ;;  %v261_v27 = vadd.f32 %v10507_v24, %v155_v41  ;;  %v260_v36 = vadd.f32 %v5455_v52, %v154_v61 }
 0x455   :  { %v262_v28 = vadd.f32 %v5459_v56, %v156_v35 }
 0x491   :  { %v1716_v37 = vpop.f32.mrf.mxu0  ;;  %v1787_v44 = vpop.f32.mrf.mxu1 }
 0x492   :  { %v1717_v39 = vadd.f32 %v1716_v37, %v259_v34  ;;  %v1788_v49 = vadd.f32 %v1787_v44, %v261_v27  ;;  %v157_v34 = vmul.f32 %v5464_v25, %v66_v9  ;;  %v159_v27 = vmul.f32 %v5466_v26, %v66_v9 }
 0x493   :  { %v1718_v13 = vpop.f32.mrf.mxu0  ;;  %v1789_v15 = vpop.f32.mrf.mxu1 }
 0x494   :  { %v1719_v6 = vadd.f32 %v1718_v13, %v260_v36  ;;  %v3396_v59 = vmul.f32 -1.442695, %v1717_v39  ;;  %v1790_v54 = vadd.f32 %v1789_v15, %v262_v28  ;;  %v3398_v22 = vmul.f32 -1.442695, %v1788_v49 }
 0x495   :  { %v158_v36 = vmul.f32 %v10304_v21, %v66_v9  ;;  %v160_v15 = vmul.f32 %v5470_v29, %v66_v9 }
 0x496   :  { %v3397_v55 = vmul.f32 -1.442695, %v1719_v6  ;;  %3530 = vpow2.f32 %v3396_v59  ;;  %v3399_v60 = vmul.f32 -1.442695, %v1790_v54  ;;  %v263_v59 = vadd.f32 %v5473_v33, %v157_v34 }
 0x497   :  { %3532 = vpow2.f32 %v3398_v22  ;;  %v265_v22 = vadd.f32 %v5476_v38, %v159_v27  ;;  %v264_v28 = vadd.f32 %v5479_v46, %v158_v36  ;;  %v266_v37 = vadd.f32 %v5482_v53, %v160_v15 }
 0x498   :  { %3534 = vpow2.f32 %v3397_v55 }
 0x499   :  { %3536 = vpow2.f32 %v3399_v60 }
 0x4a3   :  { %v3531_v7 = vpop.eup %3530 }
 0x4a4   :  { %v3533_v41 = vpop.eup %3532  ;;  %v1940_v44 = vadd.f32 1.0, %v3531_v7 }
 0x4a5   :  { %v3535_v24 = vpop.eup %3534  ;;  %v1952_v39 = vadd.f32 1.0, %v3533_v41 }
 0x4a6   :  { %v3537_v35 = vpop.eup %3536  ;;  %v1941_v6 = vadd.f32 1.0, %v3535_v24  ;;  %3538 = vrcp.f32 %v1940_v44 }
 0x4a7   :  { %v1953_v60 = vadd.f32 1.0, %v3537_v35  ;;  %3540 = vrcp.f32 %v1952_v39 }
 0x4a8   :  { %3542 = vrcp.f32 %v1941_v6 }
 0x4b3   :  { %v3539_v27 = vpop.eup %3538 }
 0x4b4   :  { %v3541_v44 = vpop.eup %3540 }
 0x4b5   :  { %v3543_v36 = vpop.eup %3542 }
 0x4d2   :  { %v1858_v55 = vpop.f32.mrf.mxu0  ;;  %v1929_v54 = vpop.f32.mrf.mxu1 }
 0x4d3   :  { %v1859_v13 = vadd.f32 %v1858_v55, %v263_v59  ;;  %v1930_v49 = vadd.f32 %v1929_v54, %v265_v22  ;;  %v1972_v59 = vmul.f32 %v3541_v44, %v6583_v31  ;;  %v7169_v44 = vld [vmem:[#allocation4 + $0x278] sm:$0xff] }
 0x4d4   :  { %v1860_v61 = vpop.f32.mrf.mxu0  ;;  %v1931_v7 = vpop.f32.mrf.mxu1 }
 0x4d5   :  { %3544 = vtanh.f32 %v1859_v13  ;;  %v3400_v24 = vmul.f32 -1.442695, %v1930_v49  ;;  %v1861_v9 = vadd.f32 %v1860_v61, %v264_v28  ;;  %v1932_v41 = vadd.f32 %v1931_v7, %v266_v37 }
 0x4d6   :  { %3546 = vrcp.f32 %v1953_v60 }
 0x4d7   :  { %3548 = vpow2.f32 %v3400_v24  ;;  %v3401_v34 = vmul.f32 -1.442695, %v1932_v41 }
 0x4d8   :  { %3550 = vtanh.f32 %v1861_v9 }
 0x4d9   :  { %3552 = vpow2.f32 %v3401_v34  ;;  %v7163_v34 = vld [vmem:[#allocation4 + $0x2b0] sm:$0xff] }
 0x4e2   :  { %v3545_v35 = vpop.eup %3544 }
 0x4e3   :  { %v3547_v39 = vpop.eup %3546  ;;  %v1974_v15 = vmul.f32 %v3545_v35, %v3539_v27  ;;  %v7166_v27 = vld [vmem:[#allocation4 + $0x268] sm:$0xff]  ;;  %v7175_v35 = vld [vmem:[#allocation4 + $0x270] sm:$0xff] }
 0x4e4   :  { %v3549_v6 = vpop.eup %3548  ;;  %v1973_v60 = vmul.f32 %v3547_v39, %v6587_v50  ;;  %v7130_v50 = vld [vmem:[#allocation4 + $0x328] sm:$0xff] }
 0x4e5   :  { %v3551_v22 = vpop.eup %3550  ;;  %v7109_v55 = vadd.f32 %v1974_v15, %v1972_v59  ;;  %v1966_v54 = vadd.f32 1.0, %v3549_v6  ;;  %v7178_v39 = vld [vmem:[#allocation4 + $0x228] sm:$0xff]  ;;  %v7181_v59 = vld [vmem:[#allocation4 + $0x238] sm:$0xff]  ;;  %v7184_v15 = vld [vmem:[#allocation4 + $0x220] sm:$0xff] }
 0x4e6   :  { %v3553_v28 = vpop.eup %3552  ;;  %v1975_v13 = vmul.f32 %v3551_v22, %v3543_v36  ;;  %v7172_v36 = vld [vmem:[#allocation4 + $0x260] sm:$0xff]  ;;  %v7187_v6 = vld [vmem:[#allocation4 + $0x230] sm:$0xff]  ;;  %v7190_v22 = vld [vmem:[#allocation4 + $0x1e8] sm:$0xff] }
 0x4e7   :  { %3554 = vtanh.f32 %v7109_v55  ;;  %v1967_v49 = vadd.f32 1.0, %v3553_v28  ;;  %v7196_v28 = vld [vmem:[#allocation4 + $0x1e0] sm:$0xff] }
 0x4e8   :  { %3556 = vrcp.f32 %v1966_v54  ;;  %v7113_v37 = vadd.f32 %v1975_v13, %v1973_v60  ;;  %v7193_v54 = vld [vmem:[#allocation4 + $0x1f8] sm:$0xff]  ;;  %v7199_v60 = vld [vmem:[#allocation4 + $0x1f0] sm:$0xff]  ;;  %v7202_v13 = vld [vmem:[#allocation4 + $0x1a8] sm:$0xff] }
 0x4e9   :  { %3558 = vrcp.f32 %v1967_v49  ;;  %v7205_v49 = vld [vmem:[#allocation4 + $0x1b8] sm:$0xff] }
 0x4ea   :  { %3560 = vtanh.f32 %v7113_v37  ;;  %10508 = vst [vmem:[#allocation106_spill] sm:$0xff] %v7205_v49 }
 0x4f4   :  { %v3555_v31 = vpop.eup %3554 }
 0x4f5   :  { %v3557_v61 = vpop.eup %3556 }
 0x4f6   :  { %v3559_v7 = vpop.eup %3558  ;;  %v7116_v41 = vmul.f32 %v3557_v61, %v3555_v31  ;;  %v7208_v31 = vld [vmem:[#allocation4 + $0x1a0] sm:$0xff]  ;;  %v7211_v61 = vld [vmem:[#allocation4 + $0x1b0] sm:$0xff] }
 0x4f7   :  { %v3561_v24 = vpop.eup %3560  ;;  %10509 = vst [vmem:[#allocation107_spill] sm:$0xff] %v7208_v31  ;;  %10510 = vst [vmem:[#allocation108_spill] sm:$0xff] %v7211_v61 }
 0x4f8   :  { %v1981_v9 = vmul.f32 %v3561_v24, %v3559_v7  ;;  %v7214_v7 = vld [vmem:[#allocation4 + $0x168] sm:$0xff]  ;;  %v7217_v24 = vld [vmem:[#allocation4 + $0x178] sm:$0xff] }
 0x4f9   :  { %10511 = vst [vmem:[#allocation109_spill] sm:$0xff] %v7214_v7  ;;  %10512 = vst [vmem:[#allocation110_spill] sm:$0xff] %v7217_v24 }
 0x4fa   :  { %2055 = vmatprep.mubr.f32.mxu0 %v1981_v9  ;;  %2126 = vmatprep.mubr.f32.mxu1 %v1981_v9 }
 0x4fb   :  { %2056 = vmatmul.mubr.f32.vlgmr.msra.gmra.mxu0 %v7116_v41  ;;  %2127 = vmatmul.mubr.f32.vlgmr.msra.gmra.mxu1 %v7116_v41 }
 0x4fc   :  { %2134 = vmatpush1.msra.mxu0 %v6594_v18  ;;  %2205 = vmatpush1.msra.mxu1 %v6597_v12  ;;  %v7133_v18 = vld [vmem:[#allocation4 + $0x338] sm:$0xff]  ;;  %v7136_v12 = vld [vmem:[#allocation4 + $0x320] sm:$0xff] }
 0x4fd   :  { %2135 = vmatprep.subr.mxu0 %v6600_v17  ;;  %2197 = vmatprep.mubr.f32.mxu0 %v1981_v9  ;;  %v7139_v17 = vld [vmem:[#allocation4 + $0x330] sm:$0xff] }
 0x4fe   :  { %2206 = vmatprep.subr.mxu1 %v6603_v19  ;;  %2268 = vmatprep.mubr.f32.mxu1 %v1981_v9  ;;  %v7142_v19 = vld [vmem:[#allocation4 + $0x2e8] sm:$0xff]  ;;  %v7220_v9 = vld [vmem:[#allocation4 + $0x160] sm:$0xff] }
 0x4ff   :  { %2136 = vmatpush1.msra.mxu0 %v6606_v20  ;;  %2207 = vmatpush1.msra.mxu1 %v6609_v51  ;;  %v7145_v20 = vld [vmem:[#allocation4 + $0x2f8] sm:$0xff]  ;;  %v7148_v51 = vld [vmem:[#allocation4 + $0x2e0] sm:$0xff]  ;;  %10513 = vst [vmem:[#allocation111_spill] sm:$0xff] %v7220_v9 }
 0x500   :  { %2137 = vmatprep.subr.mxu0 %v6612_v11  ;;  %2208 = vmatprep.subr.mxu1 %v6615_v8  ;;  %v7151_v11 = vld [vmem:[#allocation4 + $0x2f0] sm:$0xff]  ;;  %v7154_v8 = vld [vmem:[#allocation4 + $0x2a8] sm:$0xff] }
 0x501   :  { %2138 = vmatpush1.msra.mxu0 %v6618_v14  ;;  %2209 = vmatpush1.msra.mxu1 %v6621_v30  ;;  %v7157_v14 = vld [vmem:[#allocation4 + $0x2b8] sm:$0xff]  ;;  %v7160_v30 = vld [vmem:[#allocation4 + $0x2a0] sm:$0xff] }
 0x502   :  { %2139 = vmatprep.subr.mxu0 %v7130_v50  ;;  %2210 = vmatprep.subr.mxu1 %v7133_v18 }
 0x503   :  { %2140 = vmatpush1.msra.mxu0 %v7136_v12  ;;  %2211 = vmatpush1.msra.mxu1 %v7139_v17 }
 0x504   :  { %2141 = vmatprep.subr.mxu0 %v7142_v19  ;;  %2212 = vmatprep.subr.mxu1 %v7145_v20 }
 0x505   :  { %2142 = vmatpush1.msra.mxu0 %v7148_v51  ;;  %2213 = vmatpush1.msra.mxu1 %v7151_v11 }
 0x506   :  { %2143 = vmatprep.subr.mxu0 %v7154_v8  ;;  %2214 = vmatprep.subr.mxu1 %v7157_v14 }
 0x507   :  { %2144 = vmatpush1.msra.mxu0 %v7160_v30  ;;  %2215 = vmatpush1.msra.mxu1 %v7163_v34 }
 0x508   :  { %2145 = vmatprep.subr.mxu0 %v7166_v27  ;;  %2216 = vmatprep.subr.mxu1 %v7169_v44 }
 0x509   :  { %2146 = vmatpush1.msra.mxu0 %v7172_v36  ;;  %2217 = vmatpush1.msra.mxu1 %v7175_v35 }
 0x50a   :  { %2147 = vmatprep.subr.mxu0 %v7178_v39  ;;  %2218 = vmatprep.subr.mxu1 %v7181_v59 }
 0x50b   :  { %2148 = vmatpush1.msra.mxu0 %v7184_v15  ;;  %2219 = vmatpush1.msra.mxu1 %v7187_v6 }
 0x50c   :  { %2149 = vmatprep.subr.mxu0 %v7190_v22  ;;  %2220 = vmatprep.subr.mxu1 %v7193_v54 }
 0x50d   :  { %2150 = vmatpush1.msra.mxu0 %v7196_v28  ;;  %2221 = vmatpush1.msra.mxu1 %v7199_v60 }
 0x50e   :  { %2151 = vmatprep.subr.mxu0 %v7202_v13  ;;  %2222 = vmatprep.subr.mxu1 %v7205_v49  ;;  %v7223_v49 = vld [vmem:[#allocation4 + $0x170] sm:$0xff] }
 0x50f   :  { %2152 = vmatpush1.msra.mxu0 %v7208_v31  ;;  %2223 = vmatpush1.msra.mxu1 %v7211_v61  ;;  %10514 = vst [vmem:[#allocation112_spill] sm:$0xff] %v7223_v49  ;;  %v7226_v31 = vld [vmem:[#allocation4 + $0x128] sm:$0xff]  ;;  %v7229_v61 = vld [vmem:[#allocation4 + $0x138] sm:$0xff] }
 0x510   :  { %2153 = vmatprep.subr.mxu0 %v7214_v7  ;;  %2224 = vmatprep.subr.mxu1 %v7217_v24  ;;  %10515 = vst [vmem:[#allocation113_spill] sm:$0xff] %v7226_v31  ;;  %10516 = vst [vmem:[#allocation114_spill] sm:$0xff] %v7229_v61  ;;  %v7232_v7 = vld [vmem:[#allocation4 + $0x120] sm:$0xff]  ;;  %v7235_v24 = vld [vmem:[#allocation4 + $0x130] sm:$0xff] }
 0x511   :  { %2154 = vmatpush1.msra.mxu0 %v7220_v9  ;;  %2225 = vmatpush1.msra.mxu1 %v7223_v49  ;;  %10517 = vst [vmem:[#allocation115_spill] sm:$0xff] %v7232_v7  ;;  %10518 = vst [vmem:[#allocation116_spill] sm:$0xff] %v7235_v24  ;;  %v7238_v9 = vld [vmem:[#allocation4 + $0xe8] sm:$0xff]  ;;  %v7241_v49 = vld [vmem:[#allocation4 + $0xf8] sm:$0xff] }
 0x512   :  { %2155 = vmatprep.subr.mxu0 %v7226_v31  ;;  %2226 = vmatprep.subr.mxu1 %v7229_v61  ;;  %10519 = vst [vmem:[#allocation117_spill] sm:$0xff] %v7238_v9  ;;  %10520 = vst [vmem:[#allocation118_spill] sm:$0xff] %v7241_v49  ;;  %v7244_v31 = vld [vmem:[#allocation4 + $0xe0] sm:$0xff]  ;;  %v7247_v61 = vld [vmem:[#allocation4 + $0xf0] sm:$0xff] }
 0x513   :  { %2156 = vmatpush1.msra.mxu0 %v7232_v7  ;;  %2227 = vmatpush1.msra.mxu1 %v7235_v24  ;;  %10521 = vst [vmem:[#allocation119_spill] sm:$0xff] %v7244_v31  ;;  %10522 = vst [vmem:[#allocation120_spill] sm:$0xff] %v7247_v61  ;;  %v7250_v7 = vld [vmem:[#allocation4 + $0xa8] sm:$0xff]  ;;  %v7253_v24 = vld [vmem:[#allocation4 + $0xb8] sm:$0xff] }
 0x514   :  { %2157 = vmatprep.subr.mxu0 %v7238_v9  ;;  %2228 = vmatprep.subr.mxu1 %v7241_v49  ;;  %10523 = vst [vmem:[#allocation121_spill] sm:$0xff] %v7250_v7  ;;  %10524 = vst [vmem:[#allocation122_spill] sm:$0xff] %v7253_v24  ;;  %v7256_v9 = vld [vmem:[#allocation4 + $0xa0] sm:$0xff]  ;;  %v7259_v49 = vld [vmem:[#allocation4 + $0xb0] sm:$0xff] }
 0x515   :  { %2158 = vmatpush1.msra.mxu0 %v7244_v31  ;;  %2229 = vmatpush1.msra.mxu1 %v7247_v61  ;;  %10525 = vst [vmem:[#allocation123_spill] sm:$0xff] %v7256_v9  ;;  %10526 = vst [vmem:[#allocation124_spill] sm:$0xff] %v7259_v49  ;;  %v7262_v31 = vld [vmem:[#allocation4 + $0x68] sm:$0xff]  ;;  %v7265_v61 = vld [vmem:[#allocation4 + $0x78] sm:$0xff] }
 0x516   :  { %2159 = vmatprep.subr.mxu0 %v7250_v7  ;;  %2230 = vmatprep.subr.mxu1 %v7253_v24  ;;  %10527 = vst [vmem:[#allocation125_spill] sm:$0xff] %v7262_v31  ;;  %10528 = vst [vmem:[#allocation126_spill] sm:$0xff] %v7265_v61  ;;  %v7268_v7 = vld [vmem:[#allocation4 + $0x60] sm:$0xff]  ;;  %v7271_v24 = vld [vmem:[#allocation4 + $0x70] sm:$0xff] }
 0x517   :  { %2160 = vmatpush1.msra.mxu0 %v7256_v9  ;;  %2231 = vmatpush1.msra.mxu1 %v7259_v49  ;;  %10529 = vst [vmem:[#allocation127_spill] sm:$0xff] %v7268_v7  ;;  %10530 = vst [vmem:[#allocation128_spill] sm:$0xff] %v7271_v24  ;;  %v7274_v9 = vld [vmem:[#allocation4 + $0x28] sm:$0xff]  ;;  %v7277_v49 = vld [vmem:[#allocation4 + $0x38] sm:$0xff] }
 0x518   :  { %2161 = vmatprep.subr.mxu0 %v7262_v31  ;;  %2232 = vmatprep.subr.mxu1 %v7265_v61  ;;  %10531 = vst [vmem:[#allocation129_spill] sm:$0xff] %v7274_v9  ;;  %10532 = vst [vmem:[#allocation130_spill] sm:$0xff] %v7277_v49  ;;  %v7280_v31 = vld [vmem:[#allocation4 + $0x20] sm:$0xff]  ;;  %v7283_v61 = vld [vmem:[#allocation4 + $0x30] sm:$0xff] }
 0x519   :  { %2162 = vmatpush1.msra.mxu0 %v7268_v7  ;;  %2233 = vmatpush1.msra.mxu1 %v7271_v24  ;;  %10533 = vst [vmem:[#allocation131_spill] sm:$0xff] %v7280_v31  ;;  %10534 = vst [vmem:[#allocation132_spill] sm:$0xff] %v7283_v61  ;;  %v7286_v7 = vld [vmem:[#allocation4 + $0x7e8] sm:$0xff]  ;;  %v7289_v24 = vld [vmem:[#allocation4 + $0x7f8] sm:$0xff] }
 0x51a   :  { %2163 = vmatprep.subr.mxu0 %v7274_v9  ;;  %2234 = vmatprep.subr.mxu1 %v7277_v49  ;;  %10535 = vst [vmem:[#allocation133_spill] sm:$0xff] %v7286_v7  ;;  %10536 = vst [vmem:[#allocation134_spill] sm:$0xff] %v7289_v24  ;;  %v7292_v9 = vld [vmem:[#allocation4 + $0x7e0] sm:$0xff]  ;;  %v7295_v49 = vld [vmem:[#allocation4 + $0x7f0] sm:$0xff] }
 0x51b   :  { %2164 = vmatpush1.msra.mxu0 %v7280_v31  ;;  %2235 = vmatpush1.msra.mxu1 %v7283_v61  ;;  %10537 = vst [vmem:[#allocation135_spill] sm:$0xff] %v7292_v9  ;;  %10538 = vst [vmem:[#allocation136_spill] sm:$0xff] %v7295_v49  ;;  %v7298_v31 = vld [vmem:[#allocation4 + $0x7a8] sm:$0xff]  ;;  %v7301_v61 = vld [vmem:[#allocation4 + $0x7b8] sm:$0xff] }
 0x51c   :  { %2165 = vmatprep.subr.mxu0 %v7286_v7  ;;  %2236 = vmatprep.subr.mxu1 %v7289_v24  ;;  %10539 = vst [vmem:[#allocation137_spill] sm:$0xff] %v7298_v31  ;;  %10540 = vst [vmem:[#allocation138_spill] sm:$0xff] %v7301_v61  ;;  %v7304_v7 = vld [vmem:[#allocation4 + $0x7a0] sm:$0xff]  ;;  %v7307_v24 = vld [vmem:[#allocation4 + $0x7b0] sm:$0xff] }
 0x51d   :  { %2166 = vmatpush2.msra.mxu0 %v7292_v9  ;;  %2237 = vmatpush2.msra.mxu1 %v7295_v49  ;;  %10541 = vst [vmem:[#allocation139_spill] sm:$0xff] %v7304_v7  ;;  %10542 = vst [vmem:[#allocation140_spill] sm:$0xff] %v7307_v24  ;;  %v7310_v9 = vld [vmem:[#allocation4 + $0x768] sm:$0xff]  ;;  %v7313_v49 = vld [vmem:[#allocation4 + $0x778] sm:$0xff] }
 0x51e   :  { %2167 = vmatprep.subr.mxu0 %v7298_v31  ;;  %2238 = vmatprep.subr.mxu1 %v7301_v61  ;;  %10543 = vst [vmem:[#allocation141_spill] sm:$0xff] %v7310_v9  ;;  %10544 = vst [vmem:[#allocation142_spill] sm:$0xff] %v7313_v49  ;;  %v7316_v31 = vld [vmem:[#allocation4 + $0x760] sm:$0xff]  ;;  %v7319_v61 = vld [vmem:[#allocation4 + $0x770] sm:$0xff] }
 0x51f   :  { %2168 = vmatpush2.msra.mxu0 %v7304_v7  ;;  %2239 = vmatpush2.msra.mxu1 %v7307_v24  ;;  %10545 = vst [vmem:[#allocation143_spill] sm:$0xff] %v7316_v31  ;;  %10546 = vst [vmem:[#allocation144_spill] sm:$0xff] %v7319_v61  ;;  %v7322_v7 = vld [vmem:[#allocation4 + $0x728] sm:$0xff]  ;;  %v7325_v24 = vld [vmem:[#allocation4 + $0x738] sm:$0xff] }
 0x520   :  { %2169 = vmatprep.subr.mxu0 %v7310_v9  ;;  %2240 = vmatprep.subr.mxu1 %v7313_v49  ;;  %10547 = vst [vmem:[#allocation145_spill] sm:$0xff] %v7322_v7  ;;  %10548 = vst [vmem:[#allocation146_spill] sm:$0xff] %v7325_v24  ;;  %v7328_v9 = vld [vmem:[#allocation4 + $0x720] sm:$0xff]  ;;  %v7331_v49 = vld [vmem:[#allocation4 + $0x730] sm:$0xff] }
 0x521   :  { %2170 = vmatpush2.msra.mxu0 %v7316_v31  ;;  %2241 = vmatpush2.msra.mxu1 %v7319_v61  ;;  %10549 = vst [vmem:[#allocation147_spill] sm:$0xff] %v7328_v9  ;;  %10550 = vst [vmem:[#allocation148_spill] sm:$0xff] %v7331_v49  ;;  %v7334_v31 = vld [vmem:[#allocation4 + $0x6e8] sm:$0xff]  ;;  %v7337_v61 = vld [vmem:[#allocation4 + $0x6f8] sm:$0xff] }
 0x522   :  { %2171 = vmatprep.subr.mxu0 %v7322_v7  ;;  %2242 = vmatprep.subr.mxu1 %v7325_v24  ;;  %10551 = vst [vmem:[#allocation149_spill] sm:$0xff] %v7334_v31  ;;  %10552 = vst [vmem:[#allocation150_spill] sm:$0xff] %v7337_v61  ;;  %v7340_v7 = vld [vmem:[#allocation4 + $0x6e0] sm:$0xff]  ;;  %v7343_v24 = vld [vmem:[#allocation4 + $0x6f0] sm:$0xff] }
 0x523   :  { %2172 = vmatpush2.msra.mxu0 %v7328_v9  ;;  %2243 = vmatpush2.msra.mxu1 %v7331_v49  ;;  %10553 = vst [vmem:[#allocation151_spill] sm:$0xff] %v7340_v7  ;;  %10554 = vst [vmem:[#allocation152_spill] sm:$0xff] %v7343_v24  ;;  %v7346_v9 = vld [vmem:[#allocation4 + $0x6a8] sm:$0xff]  ;;  %v7349_v49 = vld [vmem:[#allocation4 + $0x6b8] sm:$0xff] }
 0x524   :  { %2173 = vmatprep.subr.mxu0 %v7334_v31  ;;  %2244 = vmatprep.subr.mxu1 %v7337_v61  ;;  %10555 = vst [vmem:[#allocation153_spill] sm:$0xff] %v7346_v9  ;;  %10556 = vst [vmem:[#allocation154_spill] sm:$0xff] %v7349_v49  ;;  %v7352_v31 = vld [vmem:[#allocation4 + $0x6a0] sm:$0xff]  ;;  %v7355_v61 = vld [vmem:[#allocation4 + $0x6b0] sm:$0xff] }
 0x525   :  { %2174 = vmatpush2.msra.mxu0 %v7340_v7  ;;  %2245 = vmatpush2.msra.mxu1 %v7343_v24  ;;  %10557 = vst [vmem:[#allocation155_spill] sm:$0xff] %v7352_v31  ;;  %10558 = vst [vmem:[#allocation156_spill] sm:$0xff] %v7355_v61  ;;  %v7358_v7 = vld [vmem:[#allocation4 + $0x668] sm:$0xff]  ;;  %v7361_v24 = vld [vmem:[#allocation4 + $0x678] sm:$0xff] }
 0x526   :  { %2175 = vmatprep.subr.mxu0 %v7346_v9  ;;  %2246 = vmatprep.subr.mxu1 %v7349_v49  ;;  %10559 = vst [vmem:[#allocation157_spill] sm:$0xff] %v7358_v7  ;;  %10560 = vst [vmem:[#allocation158_spill] sm:$0xff] %v7361_v24  ;;  %v7364_v9 = vld [vmem:[#allocation4 + $0x660] sm:$0xff]  ;;  %v7367_v49 = vld [vmem:[#allocation4 + $0x670] sm:$0xff] }
 0x527   :  { %2176 = vmatpush2.msra.mxu0 %v7352_v31  ;;  %2247 = vmatpush2.msra.mxu1 %v7355_v61  ;;  %10561 = vst [vmem:[#allocation159_spill] sm:$0xff] %v7364_v9  ;;  %10562 = vst [vmem:[#allocation160_spill] sm:$0xff] %v7367_v49  ;;  %v7370_v31 = vld [vmem:[#allocation4 + $0x628] sm:$0xff]  ;;  %v7373_v61 = vld [vmem:[#allocation4 + $0x638] sm:$0xff] }
 0x528   :  { %2177 = vmatprep.subr.mxu0 %v7358_v7  ;;  %2248 = vmatprep.subr.mxu1 %v7361_v24  ;;  %10563 = vst [vmem:[#allocation161_spill] sm:$0xff] %v7370_v31  ;;  %10564 = vst [vmem:[#allocation162_spill] sm:$0xff] %v7373_v61  ;;  %v7376_v7 = vld [vmem:[#allocation4 + $0x620] sm:$0xff]  ;;  %v7379_v24 = vld [vmem:[#allocation4 + $0x630] sm:$0xff] }
 0x529   :  { %2178 = vmatpush2.msra.mxu0 %v7364_v9  ;;  %2249 = vmatpush2.msra.mxu1 %v7367_v49  ;;  %10565 = vst [vmem:[#allocation163_spill] sm:$0xff] %v7376_v7  ;;  %10566 = vst [vmem:[#allocation164_spill] sm:$0xff] %v7379_v24  ;;  %v7382_v9 = vld [vmem:[#allocation4 + $0x5e8] sm:$0xff]  ;;  %v7385_v49 = vld [vmem:[#allocation4 + $0x5f8] sm:$0xff] }
 0x52a   :  { %2179 = vmatprep.subr.mxu0 %v7370_v31  ;;  %2250 = vmatprep.subr.mxu1 %v7373_v61  ;;  %10567 = vst [vmem:[#allocation165_spill] sm:$0xff] %v7382_v9  ;;  %10568 = vst [vmem:[#allocation166_spill] sm:$0xff] %v7385_v49  ;;  %v7388_v31 = vld [vmem:[#allocation4 + $0x5e0] sm:$0xff]  ;;  %v7391_v61 = vld [vmem:[#allocation4 + $0x5f0] sm:$0xff] }
 0x52b   :  { %2180 = vmatpush2.msra.mxu0 %v7376_v7  ;;  %2251 = vmatpush2.msra.mxu1 %v7379_v24  ;;  %10569 = vst [vmem:[#allocation167_spill] sm:$0xff] %v7388_v31  ;;  %10570 = vst [vmem:[#allocation168_spill] sm:$0xff] %v7391_v61  ;;  %v7394_v7 = vld [vmem:[#allocation4 + $0x5a8] sm:$0xff]  ;;  %v7397_v24 = vld [vmem:[#allocation4 + $0x5b8] sm:$0xff] }
 0x52c   :  { %2181 = vmatprep.subr.mxu0 %v7382_v9  ;;  %2252 = vmatprep.subr.mxu1 %v7385_v49  ;;  %10571 = vst [vmem:[#allocation169_spill] sm:$0xff] %v7394_v7  ;;  %10572 = vst [vmem:[#allocation170_spill] sm:$0xff] %v7397_v24  ;;  %v7400_v9 = vld [vmem:[#allocation4 + $0x5a0] sm:$0xff]  ;;  %v7403_v49 = vld [vmem:[#allocation4 + $0x5b0] sm:$0xff] }
 0x52d   :  { %2182 = vmatpush2.msra.mxu0 %v7388_v31  ;;  %2253 = vmatpush2.msra.mxu1 %v7391_v61  ;;  %10573 = vst [vmem:[#allocation171_spill] sm:$0xff] %v7400_v9  ;;  %10574 = vst [vmem:[#allocation172_spill] sm:$0xff] %v7403_v49  ;;  %v7406_v31 = vld [vmem:[#allocation4 + $0x568] sm:$0xff]  ;;  %v7409_v61 = vld [vmem:[#allocation4 + $0x578] sm:$0xff] }
 0x52e   :  { %2183 = vmatprep.subr.mxu0 %v7394_v7  ;;  %2254 = vmatprep.subr.mxu1 %v7397_v24  ;;  %10575 = vst [vmem:[#allocation173_spill] sm:$0xff] %v7406_v31  ;;  %10576 = vst [vmem:[#allocation174_spill] sm:$0xff] %v7409_v61  ;;  %v7412_v7 = vld [vmem:[#allocation4 + $0x560] sm:$0xff]  ;;  %v7415_v24 = vld [vmem:[#allocation4 + $0x570] sm:$0xff] }
 0x52f   :  { %2184 = vmatpush2.msra.mxu0 %v7400_v9  ;;  %2255 = vmatpush2.msra.mxu1 %v7403_v49  ;;  %10577 = vst [vmem:[#allocation175_spill] sm:$0xff] %v7412_v7  ;;  %10578 = vst [vmem:[#allocation176_spill] sm:$0xff] %v7415_v24  ;;  %v7418_v9 = vld [vmem:[#allocation4 + $0x528] sm:$0xff]  ;;  %v7421_v49 = vld [vmem:[#allocation4 + $0x538] sm:$0xff] }
 0x530   :  { %2185 = vmatprep.subr.mxu0 %v7406_v31  ;;  %2256 = vmatprep.subr.mxu1 %v7409_v61  ;;  %10579 = vst [vmem:[#allocation177_spill] sm:$0xff] %v7418_v9  ;;  %10580 = vst [vmem:[#allocation178_spill] sm:$0xff] %v7421_v49  ;;  %v7424_v31 = vld [vmem:[#allocation4 + $0x520] sm:$0xff]  ;;  %v7427_v61 = vld [vmem:[#allocation4 + $0x530] sm:$0xff] }
 0x531   :  { %2186 = vmatpush2.msra.mxu0 %v7412_v7  ;;  %2257 = vmatpush2.msra.mxu1 %v7415_v24  ;;  %10581 = vst [vmem:[#allocation179_spill] sm:$0xff] %v7424_v31  ;;  %10582 = vst [vmem:[#allocation180_spill] sm:$0xff] %v7427_v61  ;;  %v7430_v7 = vld [vmem:[#allocation4 + $0x4e8] sm:$0xff]  ;;  %v7433_v24 = vld [vmem:[#allocation4 + $0x4f8] sm:$0xff] }
 0x532   :  { %2187 = vmatprep.subr.mxu0 %v7418_v9  ;;  %2258 = vmatprep.subr.mxu1 %v7421_v49  ;;  %10583 = vst [vmem:[#allocation181_spill] sm:$0xff] %v7430_v7  ;;  %10584 = vst [vmem:[#allocation182_spill] sm:$0xff] %v7433_v24  ;;  %v7436_v9 = vld [vmem:[#allocation4 + $0x4e0] sm:$0xff]  ;;  %v7439_v49 = vld [vmem:[#allocation4 + $0x4f0] sm:$0xff] }
 0x533   :  { %2188 = vmatpush2.msra.mxu0 %v7424_v31  ;;  %2259 = vmatpush2.msra.mxu1 %v7427_v61  ;;  %10585 = vst [vmem:[#allocation183_spill] sm:$0xff] %v7436_v9  ;;  %10586 = vst [vmem:[#allocation184_spill] sm:$0xff] %v7439_v49  ;;  %v7442_v31 = vld [vmem:[#allocation4 + $0x4a8] sm:$0xff]  ;;  %v7445_v61 = vld [vmem:[#allocation4 + $0x4b8] sm:$0xff] }
 0x534   :  { %2189 = vmatprep.subr.mxu0 %v7430_v7  ;;  %2260 = vmatprep.subr.mxu1 %v7433_v24  ;;  %10587 = vst [vmem:[#allocation185_spill] sm:$0xff] %v7442_v31  ;;  %10588 = vst [vmem:[#allocation186_spill] sm:$0xff] %v7445_v61  ;;  %v7448_v7 = vld [vmem:[#allocation4 + $0x4a0] sm:$0xff]  ;;  %v7451_v24 = vld [vmem:[#allocation4 + $0x4b0] sm:$0xff] }
 0x535   :  { %2190 = vmatpush2.msra.mxu0 %v7436_v9  ;;  %2261 = vmatpush2.msra.mxu1 %v7439_v49  ;;  %10589 = vst [vmem:[#allocation187_spill] sm:$0xff] %v7448_v7  ;;  %10590 = vst [vmem:[#allocation188_spill] sm:$0xff] %v7451_v24  ;;  %v7454_v9 = vld [vmem:[#allocation4 + $0x468] sm:$0xff]  ;;  %v7457_v49 = vld [vmem:[#allocation4 + $0x478] sm:$0xff] }
 0x536   :  { %2191 = vmatprep.subr.mxu0 %v7442_v31  ;;  %2262 = vmatprep.subr.mxu1 %v7445_v61  ;;  %10591 = vst [vmem:[#allocation189_spill] sm:$0xff] %v7454_v9  ;;  %10592 = vst [vmem:[#allocation190_spill] sm:$0xff] %v7457_v49  ;;  %v7460_v31 = vld [vmem:[#allocation4 + $0x460] sm:$0xff]  ;;  %v7463_v61 = vld [vmem:[#allocation4 + $0x470] sm:$0xff] }
 0x537   :  { %2192 = vmatpush2.msra.mxu0 %v7448_v7  ;;  %2263 = vmatpush2.msra.mxu1 %v7451_v24  ;;  %10593 = vst [vmem:[#allocation191_spill] sm:$0xff] %v7463_v61  ;;  %v7466_v7 = vld [vmem:[#allocation4 + $0x428] sm:$0xff]  ;;  %v7469_v24 = vld [vmem:[#allocation4 + $0x438] sm:$0xff] }
 0x538   :  { %2193 = vmatprep.subr.mxu0 %v7454_v9  ;;  %2264 = vmatprep.subr.mxu1 %v7457_v49  ;;  %10594 = vst [vmem:[#allocation192_spill] sm:$0xff] %v7466_v7  ;;  %10595 = vst [vmem:[#allocation193_spill] sm:$0xff] %v7469_v24  ;;  %v7472_v9 = vld [vmem:[#allocation4 + $0x420] sm:$0xff]  ;;  %v7475_v49 = vld [vmem:[#allocation4 + $0x430] sm:$0xff] }
 0x539   :  { %2194 = vmatpush2.msra.mxu0 %v7460_v31  ;;  %2265 = vmatpush2.msra.mxu1 %v7463_v61  ;;  %10596 = vst [vmem:[#allocation194_spill] sm:$0xff] %v7472_v9  ;;  %10597 = vst [vmem:[#allocation195_spill] sm:$0xff] %v7475_v49  ;;  %v7480_v61 = vld [vmem:[#allocation4 + $0x3c8] sm:$0xff] }
 0x53a   :  { %2195 = vmatprep.subr.mxu0 %v7466_v7  ;;  %2266 = vmatprep.subr.mxu1 %v7469_v24  ;;  %10598 = vst [vmem:[#allocation196_spill] sm:$0xff] %v7480_v61  ;;  %v7483_v7 = vld [vmem:[#allocation4 + $0x3d8] sm:$0xff]  ;;  %v7486_v24 = vld [vmem:[#allocation4 + $0x3c0] sm:$0xff] }
 0x53b   :  { %2196 = vmatpush2.msra.mxu0 %v7472_v9  ;;  %2267 = vmatpush2.msra.mxu1 %v7475_v49  ;;  %10599 = vst [vmem:[#allocation197_spill] sm:$0xff] %v7483_v7  ;;  %10600 = vst [vmem:[#allocation198_spill] sm:$0xff] %v7486_v24  ;;  %v7489_v9 = vld [vmem:[#allocation4 + $0x3d0] sm:$0xff]  ;;  %v7492_v49 = vld [vmem:[#allocation4 + $0x388] sm:$0xff] }
 0x53c   :  { %2198 = vmatmul.mubr.f32.vlgmr.msra.gmra.mxu0 %v7116_v41  ;;  %2269 = vmatmul.mubr.f32.vlgmr.msra.gmra.mxu1 %v7116_v41  ;;  %10601 = vst [vmem:[#allocation199_spill] sm:$0xff] %v7489_v9  ;;  %10602 = vst [vmem:[#allocation200_spill] sm:$0xff] %v7492_v49  ;;  %v7495_v41 = vld [vmem:[#allocation4 + $0x398] sm:$0xff] }
 0x53d   :  { %2332 = vmatprep.subr.mxu0 %v7480_v61  ;;  %2403 = vmatprep.subr.mxu1 %v7483_v7  ;;  %10603 = vst [vmem:[#allocation201_spill] sm:$0xff] %v7495_v41  ;;  %v7498_v61 = vld [vmem:[#allocation4 + $0x380] sm:$0xff]  ;;  %v7501_v7 = vld [vmem:[#allocation4 + $0x390] sm:$0xff] }
 0x53e   :  { %2333 = vmatpush1.msra.mxu0 %v7486_v24  ;;  %2404 = vmatpush1.msra.mxu1 %v7489_v9  ;;  %10604 = vst [vmem:[#allocation202_spill] sm:$0xff] %v7498_v61  ;;  %10605 = vst [vmem:[#allocation203_spill] sm:$0xff] %v7501_v7  ;;  %v7504_v24 = vld [vmem:[#allocation4 + $0x348] sm:$0xff]  ;;  %v7507_v9 = vld [vmem:[#allocation4 + $0x358] sm:$0xff] }
 0x53f   :  { %2334 = vmatprep.subr.mxu0 %v7492_v49  ;;  %2405 = vmatprep.subr.mxu1 %v7495_v41  ;;  %10606 = vst [vmem:[#allocation204_spill] sm:$0xff] %v7504_v24  ;;  %10607 = vst [vmem:[#allocation205_spill] sm:$0xff] %v7507_v9  ;;  %v7510_v49 = vld [vmem:[#allocation4 + $0x340] sm:$0xff]  ;;  %v7513_v41 = vld [vmem:[#allocation4 + $0x350] sm:$0xff] }
 0x540   :  { %2335 = vmatpush1.msra.mxu0 %v7498_v61  ;;  %2406 = vmatpush1.msra.mxu1 %v7501_v7  ;;  %10608 = vst [vmem:[#allocation206_spill] sm:$0xff] %v7510_v49  ;;  %10609 = vst [vmem:[#allocation207_spill] sm:$0xff] %v7513_v41  ;;  %v7516_v61 = vld [vmem:[#allocation4 + $0x308] sm:$0xff]  ;;  %v7519_v7 = vld [vmem:[#allocation4 + $0x318] sm:$0xff] }
 0x541   :  { %2336 = vmatprep.subr.mxu0 %v7504_v24  ;;  %2407 = vmatprep.subr.mxu1 %v7507_v9  ;;  %10610 = vst [vmem:[#allocation208_spill] sm:$0xff] %v7516_v61  ;;  %10611 = vst [vmem:[#allocation209_spill] sm:$0xff] %v7519_v7  ;;  %v7522_v24 = vld [vmem:[#allocation4 + $0x300] sm:$0xff]  ;;  %v7525_v9 = vld [vmem:[#allocation4 + $0x310] sm:$0xff] }
 0x542   :  { %2337 = vmatpush1.msra.mxu0 %v7510_v49  ;;  %2408 = vmatpush1.msra.mxu1 %v7513_v41  ;;  %v7528_v49 = vld [vmem:[#allocation4 + $0x2c8] sm:$0xff]  ;;  %v7531_v41 = vld [vmem:[#allocation4 + $0x2d8] sm:$0xff] }
 0x543   :  { %2338 = vmatprep.subr.mxu0 %v7516_v61  ;;  %2409 = vmatprep.subr.mxu1 %v7519_v7  ;;  %10612 = vst [vmem:[#allocation210_spill] sm:$0xff] %v7528_v49  ;;  %10613 = vst [vmem:[#allocation211_spill] sm:$0xff] %v7531_v41  ;;  %v7534_v61 = vld [vmem:[#allocation4 + $0x2c0] sm:$0xff]  ;;  %v7537_v7 = vld [vmem:[#allocation4 + $0x2d0] sm:$0xff] }
 0x544   :  { %2339 = vmatpush1.msra.mxu0 %v7522_v24  ;;  %2410 = vmatpush1.msra.mxu1 %v7525_v9  ;;  %10614 = vst [vmem:[#allocation12_spill] sm:$0xff] %v7534_v61  ;;  %10615 = vst [vmem:[#allocation212_spill] sm:$0xff] %v7537_v7 }
 0x545   :  { %2340 = vmatprep.subr.mxu0 %v7528_v49  ;;  %2411 = vmatprep.subr.mxu1 %v7531_v41 }
 0x546   :  { %2341 = vmatpush1.msra.mxu0 %v7534_v61  ;;  %2412 = vmatpush1.msra.mxu1 %v7537_v7 }
 0x547   :  { %2342 = vmatprep.subr.mxu0 %v6762_v62  ;;  %2413 = vmatprep.subr.mxu1 %v6765_v63  ;;  %v10616_v62 = vld [vmem:[#allocation15_spill] sm:$0xff]  ;;  %v10617_v63 = vld [vmem:[#allocation16_spill] sm:$0xff] }
 0x548   :  { %2343 = vmatpush1.msra.mxu0 %v6768_v0  ;;  %2414 = vmatpush1.msra.mxu1 %v6771_v40  ;;  %v10618_v0 = vld [vmem:[#allocation17_spill] sm:$0xff]  ;;  %v10619_v40 = vld [vmem:[#allocation18_spill] sm:$0xff] }
 0x549   :  { %2344 = vmatprep.subr.mxu0 %v6774_v32  ;;  %2415 = vmatprep.subr.mxu1 %v6777_v23  ;;  %v10620_v32 = vld [vmem:[#allocation19_spill] sm:$0xff]  ;;  %v10621_v23 = vld [vmem:[#allocation20_spill] sm:$0xff] }
 0x54a   :  { %2345 = vmatpush1.msra.mxu0 %v6780_v1  ;;  %2416 = vmatpush1.msra.mxu1 %v6783_v16  ;;  %v10622_v1 = vld [vmem:[#allocation21_spill] sm:$0xff]  ;;  %v10623_v16 = vld [vmem:[#allocation22_spill] sm:$0xff] }
 0x54b   :  { %2346 = vmatprep.subr.mxu0 %v6786_v42  ;;  %2417 = vmatprep.subr.mxu1 %v6789_v43  ;;  %v10624_v42 = vld [vmem:[#allocation23_spill] sm:$0xff]  ;;  %v10625_v43 = vld [vmem:[#allocation24_spill] sm:$0xff] }
 0x54c   :  { %2347 = vmatpush1.msra.mxu0 %v6792_v2  ;;  %2418 = vmatpush1.msra.mxu1 %v6795_v3  ;;  %v10626_v2 = vld [vmem:[#allocation25_spill] sm:$0xff]  ;;  %v10627_v3 = vld [vmem:[#allocation26_spill] sm:$0xff] }
 0x54d   :  { %2348 = vmatprep.subr.mxu0 %v6798_v4  ;;  %2419 = vmatprep.subr.mxu1 %v6801_v5  ;;  %v10628_v4 = vld [vmem:[#allocation27_spill] sm:$0xff]  ;;  %v10629_v5 = vld [vmem:[#allocation28_spill] sm:$0xff] }
 0x54e   :  { %2349 = vmatpush1.msra.mxu0 %v6804_v45  ;;  %2420 = vmatpush1.msra.mxu1 %v6807_v57  ;;  %v10630_v45 = vld [vmem:[#allocation29_spill] sm:$0xff]  ;;  %v10631_v57 = vld [vmem:[#allocation30_spill] sm:$0xff] }
 0x54f   :  { %2350 = vmatprep.subr.mxu0 %v6810_v10  ;;  %2421 = vmatprep.subr.mxu1 %v6813_v58  ;;  %v10632_v10 = vld [vmem:[#allocation31_spill] sm:$0xff]  ;;  %v10633_v58 = vld [vmem:[#allocation32_spill] sm:$0xff] }
 0x550   :  { %2351 = vmatpush1.msra.mxu0 %v10616_v62  ;;  %2422 = vmatpush1.msra.mxu1 %v10617_v63  ;;  %v10634_v62 = vld [vmem:[#allocation33_spill] sm:$0xff]  ;;  %v10635_v63 = vld [vmem:[#allocation34_spill] sm:$0xff] }
 0x551   :  { %2352 = vmatprep.subr.mxu0 %v10618_v0  ;;  %2423 = vmatprep.subr.mxu1 %v10619_v40  ;;  %v10636_v0 = vld [vmem:[#allocation35_spill] sm:$0xff]  ;;  %v10637_v40 = vld [vmem:[#allocation36_spill] sm:$0xff] }
 0x552   :  { %2353 = vmatpush1.msra.mxu0 %v10620_v32  ;;  %2424 = vmatpush1.msra.mxu1 %v10621_v23  ;;  %v10638_v32 = vld [vmem:[#allocation37_spill] sm:$0xff]  ;;  %v10639_v23 = vld [vmem:[#allocation38_spill] sm:$0xff] }
 0x553   :  { %2354 = vmatprep.subr.mxu0 %v10622_v1  ;;  %2425 = vmatprep.subr.mxu1 %v10623_v16  ;;  %v10640_v1 = vld [vmem:[#allocation39_spill] sm:$0xff]  ;;  %v10641_v16 = vld [vmem:[#allocation40_spill] sm:$0xff] }
 0x554   :  { %2355 = vmatpush1.msra.mxu0 %v10624_v42  ;;  %2426 = vmatpush1.msra.mxu1 %v10625_v43  ;;  %v10642_v42 = vld [vmem:[#allocation41_spill] sm:$0xff]  ;;  %v10643_v43 = vld [vmem:[#allocation42_spill] sm:$0xff] }
 0x555   :  { %2356 = vmatprep.subr.mxu0 %v10626_v2  ;;  %2427 = vmatprep.subr.mxu1 %v10627_v3  ;;  %v10644_v2 = vld [vmem:[#allocation43_spill] sm:$0xff]  ;;  %v10645_v3 = vld [vmem:[#allocation44_spill] sm:$0xff] }
 0x556   :  { %2357 = vmatpush1.msra.mxu0 %v10628_v4  ;;  %2428 = vmatpush1.msra.mxu1 %v10629_v5  ;;  %v10646_v4 = vld [vmem:[#allocation45_spill] sm:$0xff]  ;;  %v10647_v5 = vld [vmem:[#allocation46_spill] sm:$0xff] }
 0x557   :  { %2358 = vmatprep.subr.mxu0 %v10630_v45  ;;  %2429 = vmatprep.subr.mxu1 %v10631_v57  ;;  %v10648_v45 = vld [vmem:[#allocation47_spill] sm:$0xff]  ;;  %v10649_v57 = vld [vmem:[#allocation48_spill] sm:$0xff] }
 0x558   :  { %2359 = vmatpush1.msra.mxu0 %v10632_v10  ;;  %2430 = vmatpush1.msra.mxu1 %v10633_v58  ;;  %v10650_v10 = vld [vmem:[#allocation49_spill] sm:$0xff]  ;;  %v10651_v58 = vld [vmem:[#allocation50_spill] sm:$0xff] }
 0x559   :  { %2360 = vmatprep.subr.mxu0 %v10634_v62  ;;  %2431 = vmatprep.subr.mxu1 %v10635_v63  ;;  %v10652_v62 = vld [vmem:[#allocation51_spill] sm:$0xff]  ;;  %v10653_v63 = vld [vmem:[#allocation52_spill] sm:$0xff] }
 0x55a   :  { %2361 = vmatpush1.msra.mxu0 %v10636_v0  ;;  %2432 = vmatpush1.msra.mxu1 %v10637_v40  ;;  %v10654_v0 = vld [vmem:[#allocation53_spill] sm:$0xff]  ;;  %v10655_v40 = vld [vmem:[#allocation54_spill] sm:$0xff] }
 0x55b   :  { %2362 = vmatprep.subr.mxu0 %v10638_v32  ;;  %2433 = vmatprep.subr.mxu1 %v10639_v23  ;;  %v10656_v32 = vld [vmem:[#allocation55_spill] sm:$0xff]  ;;  %v10657_v23 = vld [vmem:[#allocation56_spill] sm:$0xff] }
 0x55c   :  { %2363 = vmatpush1.msra.mxu0 %v10640_v1  ;;  %2434 = vmatpush1.msra.mxu1 %v10641_v16  ;;  %v10658_v1 = vld [vmem:[#allocation57_spill] sm:$0xff]  ;;  %v10659_v16 = vld [vmem:[#allocation58_spill] sm:$0xff] }
 0x55d   :  { %2364 = vmatprep.subr.mxu0 %v10642_v42  ;;  %2435 = vmatprep.subr.mxu1 %v10643_v43  ;;  %v10660_v42 = vld [vmem:[#allocation59_spill] sm:$0xff]  ;;  %v10661_v43 = vld [vmem:[#allocation60_spill] sm:$0xff] }
 0x55e   :  { %2365 = vmatpush2.msra.mxu0 %v10644_v2  ;;  %2436 = vmatpush2.msra.mxu1 %v10645_v3  ;;  %v10662_v2 = vld [vmem:[#allocation61_spill] sm:$0xff]  ;;  %v10663_v3 = vld [vmem:[#allocation62_spill] sm:$0xff] }
 0x55f   :  { %2366 = vmatprep.subr.mxu0 %v10646_v4  ;;  %2437 = vmatprep.subr.mxu1 %v10647_v5  ;;  %v10664_v4 = vld [vmem:[#allocation63_spill] sm:$0xff]  ;;  %v10665_v5 = vld [vmem:[#allocation64_spill] sm:$0xff] }
 0x560   :  { %2367 = vmatpush2.msra.mxu0 %v10648_v45  ;;  %2438 = vmatpush2.msra.mxu1 %v10649_v57  ;;  %v10666_v45 = vld [vmem:[#allocation65_spill] sm:$0xff]  ;;  %v10667_v57 = vld [vmem:[#allocation66_spill] sm:$0xff] }
 0x561   :  { %2368 = vmatprep.subr.mxu0 %v10650_v10  ;;  %2439 = vmatprep.subr.mxu1 %v10651_v58  ;;  %v10668_v10 = vld [vmem:[#allocation67_spill] sm:$0xff]  ;;  %v10669_v58 = vld [vmem:[#allocation68_spill] sm:$0xff] }
 0x562   :  { %2369 = vmatpush2.msra.mxu0 %v10652_v62  ;;  %2440 = vmatpush2.msra.mxu1 %v10653_v63  ;;  %v10670_v62 = vld [vmem:[#allocation69_spill] sm:$0xff]  ;;  %v10671_v63 = vld [vmem:[#allocation70_spill] sm:$0xff] }
 0x563   :  { %2370 = vmatprep.subr.mxu0 %v10654_v0  ;;  %2441 = vmatprep.subr.mxu1 %v10655_v40  ;;  %v10672_v0 = vld [vmem:[#allocation71_spill] sm:$0xff]  ;;  %v10673_v40 = vld [vmem:[#allocation72_spill] sm:$0xff] }
 0x564   :  { %2371 = vmatpush2.msra.mxu0 %v10656_v32  ;;  %2442 = vmatpush2.msra.mxu1 %v10657_v23  ;;  %v10674_v32 = vld [vmem:[#allocation73_spill] sm:$0xff]  ;;  %v10675_v23 = vld [vmem:[#allocation74_spill] sm:$0xff] }
 0x565   :  { %2372 = vmatprep.subr.mxu0 %v10658_v1  ;;  %2443 = vmatprep.subr.mxu1 %v10659_v16  ;;  %v10676_v1 = vld [vmem:[#allocation75_spill] sm:$0xff]  ;;  %v10677_v16 = vld [vmem:[#allocation76_spill] sm:$0xff] }
 0x566   :  { %2373 = vmatpush2.msra.mxu0 %v10660_v42  ;;  %2444 = vmatpush2.msra.mxu1 %v10661_v43  ;;  %v10678_v42 = vld [vmem:[#allocation77_spill] sm:$0xff]  ;;  %v10679_v43 = vld [vmem:[#allocation78_spill] sm:$0xff] }
 0x567   :  { %2374 = vmatprep.subr.mxu0 %v10662_v2  ;;  %2445 = vmatprep.subr.mxu1 %v10663_v3  ;;  %v10680_v2 = vld [vmem:[#allocation79_spill] sm:$0xff]  ;;  %v10681_v3 = vld [vmem:[#allocation80_spill] sm:$0xff] }
 0x568   :  { %2375 = vmatpush2.msra.mxu0 %v10664_v4  ;;  %2446 = vmatpush2.msra.mxu1 %v10665_v5  ;;  %v10682_v4 = vld [vmem:[#allocation81_spill] sm:$0xff]  ;;  %v10683_v5 = vld [vmem:[#allocation82_spill] sm:$0xff] }
 0x569   :  { %2376 = vmatprep.subr.mxu0 %v10666_v45  ;;  %2447 = vmatprep.subr.mxu1 %v10667_v57  ;;  %v10684_v45 = vld [vmem:[#allocation83_spill] sm:$0xff]  ;;  %v10685_v57 = vld [vmem:[#allocation84_spill] sm:$0xff] }
 0x56a   :  { %2377 = vmatpush2.msra.mxu0 %v10668_v10  ;;  %2448 = vmatpush2.msra.mxu1 %v10669_v58  ;;  %v10686_v10 = vld [vmem:[#allocation85_spill] sm:$0xff]  ;;  %v10687_v58 = vld [vmem:[#allocation86_spill] sm:$0xff] }
 0x56b   :  { %2378 = vmatprep.subr.mxu0 %v10670_v62  ;;  %2449 = vmatprep.subr.mxu1 %v10671_v63  ;;  %v10688_v62 = vld [vmem:[#allocation87_spill] sm:$0xff]  ;;  %v10689_v63 = vld [vmem:[#allocation88_spill] sm:$0xff] }
 0x56c   :  { %2379 = vmatpush2.msra.mxu0 %v10672_v0  ;;  %2450 = vmatpush2.msra.mxu1 %v10673_v40  ;;  %v10690_v0 = vld [vmem:[#allocation89_spill] sm:$0xff]  ;;  %v10691_v40 = vld [vmem:[#allocation90_spill] sm:$0xff] }
 0x56d   :  { %2380 = vmatprep.subr.mxu0 %v10674_v32  ;;  %2451 = vmatprep.subr.mxu1 %v10675_v23  ;;  %v10692_v32 = vld [vmem:[#allocation91_spill] sm:$0xff]  ;;  %v10693_v23 = vld [vmem:[#allocation92_spill] sm:$0xff] }
 0x56e   :  { %2381 = vmatpush2.msra.mxu0 %v10676_v1  ;;  %2452 = vmatpush2.msra.mxu1 %v10677_v16  ;;  %v10694_v1 = vld [vmem:[#allocation93_spill] sm:$0xff]  ;;  %v10695_v16 = vld [vmem:[#allocation94_spill] sm:$0xff] }
 0x56f   :  { %2382 = vmatprep.subr.mxu0 %v10678_v42  ;;  %2453 = vmatprep.subr.mxu1 %v10679_v43  ;;  %v10696_v42 = vld [vmem:[#allocation95_spill] sm:$0xff]  ;;  %v10697_v43 = vld [vmem:[#allocation96_spill] sm:$0xff] }
 0x570   :  { %2383 = vmatpush2.msra.mxu0 %v10680_v2  ;;  %2454 = vmatpush2.msra.mxu1 %v10681_v3  ;;  %v10698_v2 = vld [vmem:[#allocation97_spill] sm:$0xff]  ;;  %v10699_v3 = vld [vmem:[#allocation98_spill] sm:$0xff] }
 0x571   :  { %2384 = vmatprep.subr.mxu0 %v10682_v4  ;;  %2455 = vmatprep.subr.mxu1 %v10683_v5  ;;  %v10700_v4 = vld [vmem:[#allocation99_spill] sm:$0xff]  ;;  %v10701_v5 = vld [vmem:[#allocation100_spill] sm:$0xff] }
 0x572   :  { %2385 = vmatpush2.msra.mxu0 %v10684_v45  ;;  %2456 = vmatpush2.msra.mxu1 %v10685_v57  ;;  %v10702_v45 = vld [vmem:[#allocation101_spill] sm:$0xff]  ;;  %v10703_v57 = vld [vmem:[#allocation102_spill] sm:$0xff] }
 0x573   :  { %2386 = vmatprep.subr.mxu0 %v10686_v10  ;;  %2457 = vmatprep.subr.mxu1 %v10687_v58  ;;  %v10704_v10 = vld [vmem:[#allocation103_spill] sm:$0xff]  ;;  %v10705_v58 = vld [vmem:[#allocation104_spill] sm:$0xff] }
 0x574   :  { %2387 = vmatpush2.msra.mxu0 %v10688_v62  ;;  %2458 = vmatpush2.msra.mxu1 %v10689_v63  ;;  %v10706_v62 = vld [vmem:[#allocation105_spill] sm:$0xff]  ;;  %v10707_v63 = vld [vmem:[#allocation14_spill] sm:$0xff] }
 0x575   :  { %2388 = vmatprep.subr.mxu0 %v10690_v0  ;;  %2459 = vmatprep.subr.mxu1 %v10691_v40  ;;  %v71_v0 = vpop.permute.xlu0 %70  ;;  %v10708_v40 = vld [vmem:[#allocation9_spill] sm:$0xff] }
 0x576   :  { %2389 = vmatpush2.msra.mxu0 %v10692_v32  ;;  %2460 = vmatpush2.msra.mxu1 %v10693_v23  ;;  %v161_v32 = vmul.f32 %v10708_v40, %v71_v0 }
 0x577   :  { %2390 = vmatprep.subr.mxu0 %v10694_v1  ;;  %2461 = vmatprep.subr.mxu1 %v10695_v16  ;;  %v10709_v1 = vld [vmem:[#allocation10_spill] sm:$0xff] }
 0x578   :  { %2391 = vmatpush2.msra.mxu0 %v10696_v42  ;;  %2462 = vmatpush2.msra.mxu1 %v10697_v43  ;;  %v163_v16 = vmul.f32 %v10709_v1, %v71_v0  ;;  %v10710_v42 = vld [vmem:[#allocation11_spill] sm:$0xff] }
 0x579   :  { %2392 = vmatprep.subr.mxu0 %v10698_v2  ;;  %2463 = vmatprep.subr.mxu1 %v10699_v3  ;;  %v162_v43 = vmul.f32 %v10710_v42, %v71_v0  ;;  %v267_v3 = vadd.f32 %v5446_v47, %v161_v32 }
 0x57a   :  { %2393 = vmatpush2.msra.mxu0 %v10700_v4  ;;  %2464 = vmatpush2.msra.mxu1 %v10701_v5  ;;  %v164_v4 = vmul.f32 %v10506_v48, %v71_v0  ;;  %v10711_v5 = vld [vmem:[#allocation13_spill] sm:$0xff] }
 0x57b   :  { %2394 = vmatprep.subr.mxu0 %v10702_v45  ;;  %2465 = vmatprep.subr.mxu1 %v10703_v57  ;;  %v269_v45 = vadd.f32 %v10711_v5, %v163_v16 }
 0x57c   :  { %2395 = vmatpush2.msra.mxu0 %v10704_v10  ;;  %2466 = vmatpush2.msra.mxu1 %v10705_v58  ;;  %v268_v58 = vadd.f32 %v5455_v52, %v162_v43  ;;  %v270_v40 = vadd.f32 %v5459_v56, %v164_v4  ;;  %v167_v43 = vmul.f32 %v5466_v26, %v71_v0 }
 0x57d   :  { %2474 = vmatprep.subr.mxu0 %v10706_v62  ;;  %2545 = vmatprep.subr.mxu1 %v10707_v63 }
 0x5bb   :  { %v2057_v23 = vpop.f32.mrf.mxu0  ;;  %v2128_v2 = vpop.f32.mrf.mxu1 }
 0x5bc   :  { %v2058_v10 = vadd.f32 %v2057_v23, %v267_v3  ;;  %v2129_v62 = vadd.f32 %v2128_v2, %v269_v45  ;;  %v165_v23 = vmul.f32 %v5464_v25, %v71_v0  ;;  %v166_v3 = vmul.f32 %v10304_v21, %v71_v0 }
 0x5bd   :  { %v2059_v57 = vpop.f32.mrf.mxu0  ;;  %v2130_v63 = vpop.f32.mrf.mxu1 }
 0x5be   :  { %v2060_v7 = vadd.f32 %v2059_v57, %v268_v58  ;;  %v3402_v61 = vmul.f32 -1.442695, %v2058_v10  ;;  %v2131_v1 = vadd.f32 %v2130_v63, %v270_v40  ;;  %v3404_v41 = vmul.f32 -1.442695, %v2129_v62 }
 0x5bf   :  { %v168_v40 = vmul.f32 %v5470_v29, %v71_v0  ;;  %v272_v57 = vadd.f32 %v5479_v46, %v166_v3 }
 0x5c0   :  { %v3403_v42 = vmul.f32 -1.442695, %v2060_v7  ;;  %3562 = vpow2.f32 %v3402_v61  ;;  %v3405_v49 = vmul.f32 -1.442695, %v2131_v1  ;;  %v271_v61 = vadd.f32 %v5473_v33, %v165_v23 }
 0x5c1   :  { %3564 = vpow2.f32 %v3404_v41  ;;  %v273_v41 = vadd.f32 %v5476_v38, %v167_v43  ;;  %v274_v62 = vadd.f32 %v5482_v53, %v168_v40 }
 0x5c2   :  { %3566 = vpow2.f32 %v3403_v42 }
 0x5c3   :  { %3568 = vpow2.f32 %v3405_v49 }
 0x5cd   :  { %v3563_v32 = vpop.eup %3562 }
 0x5ce   :  { %v3565_v16 = vpop.eup %3564  ;;  %v2281_v2 = vadd.f32 1.0, %v3563_v32 }
 0x5cf   :  { %v3567_v5 = vpop.eup %3566  ;;  %v2293_v45 = vadd.f32 1.0, %v3565_v16 }
 0x5d0   :  { %v3569_v4 = vpop.eup %3568  ;;  %v2282_v7 = vadd.f32 1.0, %v3567_v5  ;;  %3570 = vrcp.f32 %v2281_v2 }
 0x5d1   :  { %v2294_v49 = vadd.f32 1.0, %v3569_v4  ;;  %3572 = vrcp.f32 %v2293_v45 }
 0x5d2   :  { %3574 = vrcp.f32 %v2282_v7 }
 0x5dd   :  { %v3571_v43 = vpop.eup %3570 }
 0x5de   :  { %v3573_v2 = vpop.eup %3572 }
 0x5df   :  { %v3575_v3 = vpop.eup %3574 }
 0x5fc   :  { %v2199_v1 = vpop.f32.mrf.mxu0  ;;  %v2270_v42 = vpop.f32.mrf.mxu1 }
 0x5fd   :  { %v2200_v10 = vadd.f32 %v2199_v1, %v271_v61  ;;  %v2271_v58 = vadd.f32 %v2270_v42, %v273_v41  ;;  %v2313_v61 = vmul.f32 %v3573_v2, %v7109_v55  ;;  %v7687_v2 = vld [vmem:[#allocation4 + $0x3b8] sm:$0xff] }
 0x5fe   :  { %v2201_v63 = vpop.f32.mrf.mxu0  ;;  %v2272_v32 = vpop.f32.mrf.mxu1 }
 0x5ff   :  { %3576 = vtanh.f32 %v2200_v10  ;;  %v3406_v0 = vmul.f32 -1.442695, %v2271_v58  ;;  %v2202_v5 = vadd.f32 %v2201_v63, %v272_v57  ;;  %v2273_v16 = vadd.f32 %v2272_v32, %v274_v62 }
 0x600   :  { %3578 = vrcp.f32 %v2294_v49 }
 0x601   :  { %3580 = vpow2.f32 %v3406_v0  ;;  %v3407_v23 = vmul.f32 -1.442695, %v2273_v16 }
 0x602   :  { %3582 = vtanh.f32 %v2202_v5 }
 0x603   :  { %3584 = vpow2.f32 %v3407_v23  ;;  %v7681_v23 = vld [vmem:[#allocation4 + $0x3f0] sm:$0xff] }
 0x60c   :  { %v3577_v4 = vpop.eup %3576 }
 0x60d   :  { %v3579_v45 = vpop.eup %3578  ;;  %v2315_v40 = vmul.f32 %v3577_v4, %v3571_v43  ;;  %v7684_v43 = vld [vmem:[#allocation4 + $0x3a8] sm:$0xff]  ;;  %v7693_v4 = vld [vmem:[#allocation4 + $0x3b0] sm:$0xff] }
 0x60e   :  { %v3581_v7 = vpop.eup %3580  ;;  %v2314_v49 = vmul.f32 %v3579_v45, %v7113_v37  ;;  %v7678_v37 = vld [vmem:[#allocation4 + $0x3e0] sm:$0xff]  ;;  %v7696_v45 = vld [vmem:[#allocation4 + $0x368] sm:$0xff] }
 0x60f   :  { %v3583_v41 = vpop.eup %3582  ;;  %v7667_v1 = vadd.f32 %v2315_v40, %v2313_v61  ;;  %v2307_v42 = vadd.f32 1.0, %v3581_v7  ;;  %v7699_v61 = vld [vmem:[#allocation4 + $0x378] sm:$0xff]  ;;  %v7702_v40 = vld [vmem:[#allocation4 + $0x360] sm:$0xff]  ;;  %v7705_v7 = vld [vmem:[#allocation4 + $0x370] sm:$0xff] }
 0x610   :  { %v3585_v57 = vpop.eup %3584  ;;  %v2316_v10 = vmul.f32 %v3583_v41, %v3575_v3  ;;  %v7690_v3 = vld [vmem:[#allocation4 + $0x3a0] sm:$0xff] }
 0x611   :  { %3586 = vtanh.f32 %v7667_v1  ;;  %v2308_v58 = vadd.f32 1.0, %v3585_v57  ;;  %v10737_v41 = vld [vmem:[#allocation131_spill] sm:$0xff]  ;;  %v10739_v57 = vld [vmem:[#allocation133_spill] sm:$0xff] }
 0x612   :  { %3588 = vrcp.f32 %v2307_v42  ;;  %v7671_v62 = vadd.f32 %v2316_v10, %v2314_v49  ;;  %v10738_v42 = vld [vmem:[#allocation132_spill] sm:$0xff]  ;;  %v10740_v49 = vld [vmem:[#allocation134_spill] sm:$0xff]  ;;  %v10741_v10 = vld [vmem:[#allocation135_spill] sm:$0xff] }
 0x613   :  { %3590 = vrcp.f32 %v2308_v58  ;;  %v10742_v58 = vld [vmem:[#allocation136_spill] sm:$0xff] }
 0x614   :  { %3592 = vtanh.f32 %v7671_v62 }
 0x61e   :  { %v3587_v55 = vpop.eup %3586 }
 0x61f   :  { %v3589_v63 = vpop.eup %3588 }
 0x620   :  { %v3591_v32 = vpop.eup %3590  ;;  %v7674_v16 = vmul.f32 %v3589_v63, %v3587_v55  ;;  %v10743_v55 = vld [vmem:[#allocation137_spill] sm:$0xff]  ;;  %v10744_v63 = vld [vmem:[#allocation138_spill] sm:$0xff] }
 0x621   :  { %v3593_v0 = vpop.eup %3592 }
 0x622   :  { %v2322_v5 = vmul.f32 %v3593_v0, %v3591_v32  ;;  %v10745_v32 = vld [vmem:[#allocation139_spill] sm:$0xff]  ;;  %v10746_v0 = vld [vmem:[#allocation140_spill] sm:$0xff] }
 0x624   :  { %2396 = vmatprep.mubr.f32.mxu0 %v2322_v5  ;;  %2467 = vmatprep.mubr.f32.mxu1 %v2322_v5 }
 0x625   :  { %2397 = vmatmul.mubr.f32.vlgmr.msra.gmra.mxu0 %v7674_v16  ;;  %2468 = vmatmul.mubr.f32.vlgmr.msra.gmra.mxu1 %v7674_v16 }
 0x626   :  { %2475 = vmatpush1.msra.mxu0 %v7678_v37  ;;  %2546 = vmatpush1.msra.mxu1 %v7681_v23 }
 0x627   :  { %2476 = vmatprep.subr.mxu0 %v7684_v43  ;;  %2538 = vmatprep.mubr.f32.mxu0 %v2322_v5 }
 0x628   :  { %2547 = vmatprep.subr.mxu1 %v7687_v2  ;;  %2609 = vmatprep.mubr.f32.mxu1 %v2322_v5  ;;  %v10747_v5 = vld [vmem:[#allocation141_spill] sm:$0xff] }
 0x629   :  { %2477 = vmatpush1.msra.mxu0 %v7690_v3  ;;  %2548 = vmatpush1.msra.mxu1 %v7693_v4 }
 0x62a   :  { %2478 = vmatprep.subr.mxu0 %v7696_v45  ;;  %2549 = vmatprep.subr.mxu1 %v7699_v61 }
 0x62b   :  { %2479 = vmatpush1.msra.mxu0 %v7702_v40  ;;  %2550 = vmatpush1.msra.mxu1 %v7705_v7 }
 0x62c   :  { %2480 = vmatprep.subr.mxu0 %v7130_v50  ;;  %2551 = vmatprep.subr.mxu1 %v7133_v18  ;;  %v10712_v50 = vld [vmem:[#allocation106_spill] sm:$0xff]  ;;  %v10713_v18 = vld [vmem:[#allocation107_spill] sm:$0xff] }
 0x62d   :  { %2481 = vmatpush1.msra.mxu0 %v7136_v12  ;;  %2552 = vmatpush1.msra.mxu1 %v7139_v17  ;;  %v10714_v12 = vld [vmem:[#allocation108_spill] sm:$0xff]  ;;  %v10715_v17 = vld [vmem:[#allocation109_spill] sm:$0xff] }
 0x62e   :  { %2482 = vmatprep.subr.mxu0 %v7142_v19  ;;  %2553 = vmatprep.subr.mxu1 %v7145_v20  ;;  %v10716_v19 = vld [vmem:[#allocation110_spill] sm:$0xff]  ;;  %v10717_v20 = vld [vmem:[#allocation111_spill] sm:$0xff] }
 0x62f   :  { %2483 = vmatpush1.msra.mxu0 %v7148_v51  ;;  %2554 = vmatpush1.msra.mxu1 %v7151_v11  ;;  %v10718_v51 = vld [vmem:[#allocation112_spill] sm:$0xff]  ;;  %v10719_v11 = vld [vmem:[#allocation113_spill] sm:$0xff] }
 0x630   :  { %2484 = vmatprep.subr.mxu0 %v7154_v8  ;;  %2555 = vmatprep.subr.mxu1 %v7157_v14  ;;  %v10720_v8 = vld [vmem:[#allocation114_spill] sm:$0xff]  ;;  %v10721_v14 = vld [vmem:[#allocation115_spill] sm:$0xff] }
 0x631   :  { %2485 = vmatpush1.msra.mxu0 %v7160_v30  ;;  %2556 = vmatpush1.msra.mxu1 %v7163_v34  ;;  %v10722_v30 = vld [vmem:[#allocation116_spill] sm:$0xff]  ;;  %v10723_v34 = vld [vmem:[#allocation117_spill] sm:$0xff] }
 0x632   :  { %2486 = vmatprep.subr.mxu0 %v7166_v27  ;;  %2557 = vmatprep.subr.mxu1 %v7169_v44  ;;  %v10724_v27 = vld [vmem:[#allocation118_spill] sm:$0xff]  ;;  %v10725_v44 = vld [vmem:[#allocation119_spill] sm:$0xff] }
 0x633   :  { %2487 = vmatpush1.msra.mxu0 %v7172_v36  ;;  %2558 = vmatpush1.msra.mxu1 %v7175_v35  ;;  %v10726_v36 = vld [vmem:[#allocation120_spill] sm:$0xff]  ;;  %v10727_v35 = vld [vmem:[#allocation121_spill] sm:$0xff] }
 0x634   :  { %2488 = vmatprep.subr.mxu0 %v7178_v39  ;;  %2559 = vmatprep.subr.mxu1 %v7181_v59  ;;  %v10728_v39 = vld [vmem:[#allocation122_spill] sm:$0xff]  ;;  %v10729_v59 = vld [vmem:[#allocation123_spill] sm:$0xff] }
 0x635   :  { %2489 = vmatpush1.msra.mxu0 %v7184_v15  ;;  %2560 = vmatpush1.msra.mxu1 %v7187_v6  ;;  %v10730_v15 = vld [vmem:[#allocation124_spill] sm:$0xff]  ;;  %v10731_v6 = vld [vmem:[#allocation125_spill] sm:$0xff] }
 0x636   :  { %2490 = vmatprep.subr.mxu0 %v7190_v22  ;;  %2561 = vmatprep.subr.mxu1 %v7193_v54  ;;  %v10732_v22 = vld [vmem:[#allocation126_spill] sm:$0xff]  ;;  %v10733_v54 = vld [vmem:[#allocation127_spill] sm:$0xff] }
 0x637   :  { %2491 = vmatpush1.msra.mxu0 %v7196_v28  ;;  %2562 = vmatpush1.msra.mxu1 %v7199_v60  ;;  %v10734_v28 = vld [vmem:[#allocation128_spill] sm:$0xff]  ;;  %v10735_v60 = vld [vmem:[#allocation129_spill] sm:$0xff] }
 0x638   :  { %2492 = vmatprep.subr.mxu0 %v7202_v13  ;;  %2563 = vmatprep.subr.mxu1 %v10712_v50  ;;  %v10736_v13 = vld [vmem:[#allocation130_spill] sm:$0xff] }
 0x639   :  { %2493 = vmatpush1.msra.mxu0 %v10713_v18  ;;  %2564 = vmatpush1.msra.mxu1 %v10714_v12  ;;  %v10748_v50 = vld [vmem:[#allocation142_spill] sm:$0xff]  ;;  %v10749_v18 = vld [vmem:[#allocation143_spill] sm:$0xff]  ;;  %v10750_v12 = vld [vmem:[#allocation144_spill] sm:$0xff] }
 0x63a   :  { %2494 = vmatprep.subr.mxu0 %v10715_v17  ;;  %2565 = vmatprep.subr.mxu1 %v10716_v19  ;;  %v10751_v17 = vld [vmem:[#allocation145_spill] sm:$0xff]  ;;  %v10752_v19 = vld [vmem:[#allocation146_spill] sm:$0xff] }
 0x63b   :  { %2495 = vmatpush1.msra.mxu0 %v10717_v20  ;;  %2566 = vmatpush1.msra.mxu1 %v10718_v51  ;;  %v10753_v20 = vld [vmem:[#allocation147_spill] sm:$0xff]  ;;  %v10754_v51 = vld [vmem:[#allocation148_spill] sm:$0xff] }
 0x63c   :  { %2496 = vmatprep.subr.mxu0 %v10719_v11  ;;  %2567 = vmatprep.subr.mxu1 %v10720_v8  ;;  %v10755_v11 = vld [vmem:[#allocation149_spill] sm:$0xff]  ;;  %v10756_v8 = vld [vmem:[#allocation150_spill] sm:$0xff] }
 0x63d   :  { %2497 = vmatpush1.msra.mxu0 %v10721_v14  ;;  %2568 = vmatpush1.msra.mxu1 %v10722_v30  ;;  %v10757_v14 = vld [vmem:[#allocation151_spill] sm:$0xff]  ;;  %v10758_v30 = vld [vmem:[#allocation152_spill] sm:$0xff] }
 0x63e   :  { %2498 = vmatprep.subr.mxu0 %v10723_v34  ;;  %2569 = vmatprep.subr.mxu1 %v10724_v27  ;;  %v10759_v34 = vld [vmem:[#allocation153_spill] sm:$0xff]  ;;  %v10760_v27 = vld [vmem:[#allocation154_spill] sm:$0xff] }
 0x63f   :  { %2499 = vmatpush1.msra.mxu0 %v10725_v44  ;;  %2570 = vmatpush1.msra.mxu1 %v10726_v36  ;;  %v10761_v44 = vld [vmem:[#allocation155_spill] sm:$0xff]  ;;  %v10762_v36 = vld [vmem:[#allocation156_spill] sm:$0xff] }
 0x640   :  { %2500 = vmatprep.subr.mxu0 %v10727_v35  ;;  %2571 = vmatprep.subr.mxu1 %v10728_v39  ;;  %v10763_v35 = vld [vmem:[#allocation157_spill] sm:$0xff]  ;;  %v10764_v39 = vld [vmem:[#allocation158_spill] sm:$0xff] }
 0x641   :  { %2501 = vmatpush1.msra.mxu0 %v10729_v59  ;;  %2572 = vmatpush1.msra.mxu1 %v10730_v15  ;;  %v10765_v59 = vld [vmem:[#allocation159_spill] sm:$0xff]  ;;  %v10766_v15 = vld [vmem:[#allocation160_spill] sm:$0xff] }
 0x642   :  { %2502 = vmatprep.subr.mxu0 %v10731_v6  ;;  %2573 = vmatprep.subr.mxu1 %v10732_v22  ;;  %v10767_v6 = vld [vmem:[#allocation161_spill] sm:$0xff]  ;;  %v10768_v22 = vld [vmem:[#allocation162_spill] sm:$0xff] }
 0x643   :  { %2503 = vmatpush1.msra.mxu0 %v10733_v54  ;;  %2574 = vmatpush1.msra.mxu1 %v10734_v28  ;;  %v10769_v54 = vld [vmem:[#allocation163_spill] sm:$0xff]  ;;  %v10770_v28 = vld [vmem:[#allocation164_spill] sm:$0xff] }
 0x644   :  { %2504 = vmatprep.subr.mxu0 %v10735_v60  ;;  %2575 = vmatprep.subr.mxu1 %v10736_v13  ;;  %v10771_v60 = vld [vmem:[#allocation165_spill] sm:$0xff]  ;;  %v10772_v13 = vld [vmem:[#allocation166_spill] sm:$0xff] }
 0x645   :  { %2505 = vmatpush1.msra.mxu0 %v10737_v41  ;;  %2576 = vmatpush1.msra.mxu1 %v10738_v42  ;;  %v10773_v41 = vld [vmem:[#allocation167_spill] sm:$0xff]  ;;  %v10774_v42 = vld [vmem:[#allocation168_spill] sm:$0xff] }
 0x646   :  { %2506 = vmatprep.subr.mxu0 %v10739_v57  ;;  %2577 = vmatprep.subr.mxu1 %v10740_v49  ;;  %v10775_v57 = vld [vmem:[#allocation169_spill] sm:$0xff]  ;;  %v10776_v49 = vld [vmem:[#allocation170_spill] sm:$0xff] }
 0x647   :  { %2507 = vmatpush2.msra.mxu0 %v10741_v10  ;;  %2578 = vmatpush2.msra.mxu1 %v10742_v58  ;;  %v10777_v10 = vld [vmem:[#allocation171_spill] sm:$0xff]  ;;  %v10778_v58 = vld [vmem:[#allocation172_spill] sm:$0xff] }
 0x648   :  { %2508 = vmatprep.subr.mxu0 %v10743_v55  ;;  %2579 = vmatprep.subr.mxu1 %v10744_v63  ;;  %v10779_v55 = vld [vmem:[#allocation173_spill] sm:$0xff]  ;;  %v10780_v63 = vld [vmem:[#allocation174_spill] sm:$0xff] }
 0x649   :  { %2509 = vmatpush2.msra.mxu0 %v10745_v32  ;;  %2580 = vmatpush2.msra.mxu1 %v10746_v0  ;;  %v10781_v32 = vld [vmem:[#allocation175_spill] sm:$0xff]  ;;  %v10782_v0 = vld [vmem:[#allocation176_spill] sm:$0xff] }
 0x64a   :  { %2510 = vmatprep.subr.mxu0 %v10747_v5  ;;  %2581 = vmatprep.subr.mxu1 %v10748_v50  ;;  %v10783_v5 = vld [vmem:[#allocation177_spill] sm:$0xff]  ;;  %v10784_v50 = vld [vmem:[#allocation178_spill] sm:$0xff] }
 0x64b   :  { %2511 = vmatpush2.msra.mxu0 %v10749_v18  ;;  %2582 = vmatpush2.msra.mxu1 %v10750_v12  ;;  %v10785_v18 = vld [vmem:[#allocation179_spill] sm:$0xff]  ;;  %v10786_v12 = vld [vmem:[#allocation180_spill] sm:$0xff] }
 0x64c   :  { %2512 = vmatprep.subr.mxu0 %v10751_v17  ;;  %2583 = vmatprep.subr.mxu1 %v10752_v19  ;;  %v10787_v17 = vld [vmem:[#allocation181_spill] sm:$0xff]  ;;  %v10788_v19 = vld [vmem:[#allocation182_spill] sm:$0xff] }
 0x64d   :  { %2513 = vmatpush2.msra.mxu0 %v10753_v20  ;;  %2584 = vmatpush2.msra.mxu1 %v10754_v51  ;;  %v10789_v20 = vld [vmem:[#allocation183_spill] sm:$0xff]  ;;  %v10790_v51 = vld [vmem:[#allocation184_spill] sm:$0xff] }
 0x64e   :  { %2514 = vmatprep.subr.mxu0 %v10755_v11  ;;  %2585 = vmatprep.subr.mxu1 %v10756_v8  ;;  %v10791_v11 = vld [vmem:[#allocation185_spill] sm:$0xff]  ;;  %v10792_v8 = vld [vmem:[#allocation186_spill] sm:$0xff] }
 0x64f   :  { %2515 = vmatpush2.msra.mxu0 %v10757_v14  ;;  %2586 = vmatpush2.msra.mxu1 %v10758_v30  ;;  %v10793_v14 = vld [vmem:[#allocation187_spill] sm:$0xff]  ;;  %v10794_v30 = vld [vmem:[#allocation188_spill] sm:$0xff] }
 0x650   :  { %2516 = vmatprep.subr.mxu0 %v10759_v34  ;;  %2587 = vmatprep.subr.mxu1 %v10760_v27  ;;  %v10795_v34 = vld [vmem:[#allocation189_spill] sm:$0xff]  ;;  %v10796_v27 = vld [vmem:[#allocation190_spill] sm:$0xff] }
 0x651   :  { %2517 = vmatpush2.msra.mxu0 %v10761_v44  ;;  %2588 = vmatpush2.msra.mxu1 %v10762_v36  ;;  %v10797_v44 = vld [vmem:[#allocation191_spill] sm:$0xff]  ;;  %v10798_v36 = vld [vmem:[#allocation192_spill] sm:$0xff] }
 0x652   :  { %2518 = vmatprep.subr.mxu0 %v10763_v35  ;;  %2589 = vmatprep.subr.mxu1 %v10764_v39  ;;  %v10799_v35 = vld [vmem:[#allocation193_spill] sm:$0xff]  ;;  %v10800_v39 = vld [vmem:[#allocation194_spill] sm:$0xff] }
 0x653   :  { %2519 = vmatpush2.msra.mxu0 %v10765_v59  ;;  %2590 = vmatpush2.msra.mxu1 %v10766_v15  ;;  %v10801_v59 = vld [vmem:[#allocation195_spill] sm:$0xff]  ;;  %v10802_v15 = vld [vmem:[#allocation196_spill] sm:$0xff] }
 0x654   :  { %2520 = vmatprep.subr.mxu0 %v10767_v6  ;;  %2591 = vmatprep.subr.mxu1 %v10768_v22  ;;  %v10803_v6 = vld [vmem:[#allocation197_spill] sm:$0xff]  ;;  %v10804_v22 = vld [vmem:[#allocation198_spill] sm:$0xff] }
 0x655   :  { %2521 = vmatpush2.msra.mxu0 %v10769_v54  ;;  %2592 = vmatpush2.msra.mxu1 %v10770_v28  ;;  %v10806_v54 = vld [vmem:[#allocation200_spill] sm:$0xff]  ;;  %v10807_v28 = vld [vmem:[#allocation201_spill] sm:$0xff] }
 0x656   :  { %2522 = vmatprep.subr.mxu0 %v10771_v60  ;;  %2593 = vmatprep.subr.mxu1 %v10772_v13  ;;  %v10808_v60 = vld [vmem:[#allocation202_spill] sm:$0xff]  ;;  %v10809_v13 = vld [vmem:[#allocation203_spill] sm:$0xff] }
 0x657   :  { %2523 = vmatpush2.msra.mxu0 %v10773_v41  ;;  %2594 = vmatpush2.msra.mxu1 %v10774_v42  ;;  %v10810_v41 = vld [vmem:[#allocation204_spill] sm:$0xff]  ;;  %v10811_v42 = vld [vmem:[#allocation205_spill] sm:$0xff] }
 0x658   :  { %2524 = vmatprep.subr.mxu0 %v10775_v57  ;;  %2595 = vmatprep.subr.mxu1 %v10776_v49  ;;  %v10813_v57 = vld [vmem:[#allocation207_spill] sm:$0xff]  ;;  %v10814_v49 = vld [vmem:[#allocation208_spill] sm:$0xff] }
 0x659   :  { %2525 = vmatpush2.msra.mxu0 %v10777_v10  ;;  %2596 = vmatpush2.msra.mxu1 %v10778_v58  ;;  %v10815_v10 = vld [vmem:[#allocation209_spill] sm:$0xff]  ;;  %v10816_v58 = vld [vmem:[#allocation210_spill] sm:$0xff] }
 0x65a   :  { %2526 = vmatprep.subr.mxu0 %v10779_v55  ;;  %2597 = vmatprep.subr.mxu1 %v10780_v63  ;;  %v10817_v55 = vld [vmem:[#allocation211_spill] sm:$0xff]  ;;  %v10818_v63 = vld [vmem:[#allocation12_spill] sm:$0xff] }
 0x65b   :  { %2527 = vmatpush2.msra.mxu0 %v10781_v32  ;;  %2598 = vmatpush2.msra.mxu1 %v10782_v0  ;;  %v10819_v32 = vld [vmem:[#allocation212_spill] sm:$0xff] }
 0x65c   :  { %2528 = vmatprep.subr.mxu0 %v10783_v5  ;;  %2599 = vmatprep.subr.mxu1 %v10784_v50  ;;  %v7846_v0 = vld [vmem:[#allocation4 + $0x288] sm:$0xff]  ;;  %v7849_v5 = vld [vmem:[#allocation4 + $0x298] sm:$0xff]  ;;  %v7852_v50 = vld [vmem:[#allocation4 + $0x280] sm:$0xff] }
 0x65d   :  { %2529 = vmatpush2.msra.mxu0 %v10785_v18  ;;  %2600 = vmatpush2.msra.mxu1 %v10786_v12  ;;  %v7861_v18 = vld [vmem:[#allocation4 + $0x258] sm:$0xff]  ;;  %v7864_v12 = vld [vmem:[#allocation4 + $0x240] sm:$0xff] }
 0x65e   :  { %2530 = vmatprep.subr.mxu0 %v10787_v17  ;;  %2601 = vmatprep.subr.mxu1 %v10788_v19  ;;  %v7867_v17 = vld [vmem:[#allocation4 + $0x250] sm:$0xff]  ;;  %v7870_v19 = vld [vmem:[#allocation4 + $0x208] sm:$0xff] }
 0x65f   :  { %2531 = vmatpush2.msra.mxu0 %v10789_v20  ;;  %2602 = vmatpush2.msra.mxu1 %v10790_v51  ;;  %v7873_v20 = vld [vmem:[#allocation4 + $0x218] sm:$0xff]  ;;  %v7876_v51 = vld [vmem:[#allocation4 + $0x200] sm:$0xff] }
 0x660   :  { %2532 = vmatprep.subr.mxu0 %v10791_v11  ;;  %2603 = vmatprep.subr.mxu1 %v10792_v8  ;;  %v7879_v11 = vld [vmem:[#allocation4 + $0x210] sm:$0xff]  ;;  %v7882_v8 = vld [vmem:[#allocation4 + $0x1c8] sm:$0xff] }
 0x661   :  { %2533 = vmatpush2.msra.mxu0 %v10793_v14  ;;  %2604 = vmatpush2.msra.mxu1 %v10794_v30  ;;  %v7885_v14 = vld [vmem:[#allocation4 + $0x1d8] sm:$0xff]  ;;  %v7888_v30 = vld [vmem:[#allocation4 + $0x1c0] sm:$0xff] }
 0x662   :  { %2534 = vmatprep.subr.mxu0 %v10795_v34  ;;  %2605 = vmatprep.subr.mxu1 %v10796_v27  ;;  %v7891_v34 = vld [vmem:[#allocation4 + $0x1d0] sm:$0xff]  ;;  %v7894_v27 = vld [vmem:[#allocation4 + $0x188] sm:$0xff] }
 0x663   :  { %2535 = vmatpush2.msra.mxu0 %v7460_v31  ;;  %2606 = vmatpush2.msra.mxu1 %v10797_v44  ;;  %v10805_v31 = vld [vmem:[#allocation199_spill] sm:$0xff]  ;;  %v7897_v44 = vld [vmem:[#allocation4 + $0x198] sm:$0xff] }
 0x664   :  { %2536 = vmatprep.subr.mxu0 %v10798_v36  ;;  %2607 = vmatprep.subr.mxu1 %v10799_v35  ;;  %v7900_v36 = vld [vmem:[#allocation4 + $0x180] sm:$0xff]  ;;  %v7903_v35 = vld [vmem:[#allocation4 + $0x190] sm:$0xff] }
 0x665   :  { %2537 = vmatpush2.msra.mxu0 %v10800_v39  ;;  %2608 = vmatpush2.msra.mxu1 %v10801_v59  ;;  %10820 = vst [vmem:[#allocation15_spill] sm:$0xff] %v7900_v36  ;;  %10821 = vst [vmem:[#allocation16_spill] sm:$0xff] %v7903_v35  ;;  %v7906_v39 = vld [vmem:[#allocation4 + $0x148] sm:$0xff]  ;;  %v7909_v59 = vld [vmem:[#allocation4 + $0x158] sm:$0xff] }
 0x666   :  { %2539 = vmatmul.mubr.f32.vlgmr.msra.gmra.mxu0 %v7674_v16  ;;  %2610 = vmatmul.mubr.f32.vlgmr.msra.gmra.mxu1 %v7674_v16  ;;  %v10812_v16 = vld [vmem:[#allocation206_spill] sm:$0xff]  ;;  %10822 = vst [vmem:[#allocation17_spill] sm:$0xff] %v7906_v39  ;;  %10823 = vst [vmem:[#allocation18_spill] sm:$0xff] %v7909_v59 }
 0x667   :  { %2673 = vmatprep.subr.mxu0 %v10802_v15  ;;  %2744 = vmatprep.subr.mxu1 %v10803_v6  ;;  %v7912_v15 = vld [vmem:[#allocation4 + $0x140] sm:$0xff]  ;;  %v7915_v6 = vld [vmem:[#allocation4 + $0x150] sm:$0xff] }
 0x668   :  { %2674 = vmatpush1.msra.mxu0 %v10804_v22  ;;  %2745 = vmatpush1.msra.mxu1 %v10805_v31  ;;  %10824 = vst [vmem:[#allocation19_spill] sm:$0xff] %v7912_v15  ;;  %10825 = vst [vmem:[#allocation20_spill] sm:$0xff] %v7915_v6  ;;  %v7918_v22 = vld [vmem:[#allocation4 + $0x108] sm:$0xff]  ;;  %v7921_v31 = vld [vmem:[#allocation4 + $0x118] sm:$0xff] }
 0x669   :  { %2675 = vmatprep.subr.mxu0 %v10806_v54  ;;  %2746 = vmatprep.subr.mxu1 %v10807_v28  ;;  %10826 = vst [vmem:[#allocation21_spill] sm:$0xff] %v7918_v22  ;;  %10827 = vst [vmem:[#allocation22_spill] sm:$0xff] %v7921_v31  ;;  %v7924_v54 = vld [vmem:[#allocation4 + $0x100] sm:$0xff]  ;;  %v7927_v28 = vld [vmem:[#allocation4 + $0x110] sm:$0xff] }
 0x66a   :  { %2676 = vmatpush1.msra.mxu0 %v10808_v60  ;;  %2747 = vmatpush1.msra.mxu1 %v10809_v13  ;;  %10828 = vst [vmem:[#allocation23_spill] sm:$0xff] %v7924_v54  ;;  %10829 = vst [vmem:[#allocation24_spill] sm:$0xff] %v7927_v28  ;;  %v7930_v60 = vld [vmem:[#allocation4 + $0xc8] sm:$0xff]  ;;  %v7933_v13 = vld [vmem:[#allocation4 + $0xd8] sm:$0xff] }
 0x66b   :  { %2677 = vmatprep.subr.mxu0 %v10810_v41  ;;  %2748 = vmatprep.subr.mxu1 %v10811_v42  ;;  %10830 = vst [vmem:[#allocation25_spill] sm:$0xff] %v7930_v60  ;;  %10831 = vst [vmem:[#allocation26_spill] sm:$0xff] %v7933_v13  ;;  %v7936_v41 = vld [vmem:[#allocation4 + $0xc0] sm:$0xff]  ;;  %v7939_v42 = vld [vmem:[#allocation4 + $0xd0] sm:$0xff] }
 0x66c   :  { %2678 = vmatpush1.msra.mxu0 %v10812_v16  ;;  %2749 = vmatpush1.msra.mxu1 %v10813_v57  ;;  %10832 = vst [vmem:[#allocation27_spill] sm:$0xff] %v7936_v41  ;;  %10833 = vst [vmem:[#allocation28_spill] sm:$0xff] %v7939_v42  ;;  %v7942_v16 = vld [vmem:[#allocation4 + $0x88] sm:$0xff]  ;;  %v7945_v57 = vld [vmem:[#allocation4 + $0x98] sm:$0xff] }
 0x66d   :  { %2679 = vmatprep.subr.mxu0 %v10814_v49  ;;  %2750 = vmatprep.subr.mxu1 %v10815_v10  ;;  %10834 = vst [vmem:[#allocation29_spill] sm:$0xff] %v7942_v16  ;;  %10835 = vst [vmem:[#allocation30_spill] sm:$0xff] %v7945_v57  ;;  %v7948_v49 = vld [vmem:[#allocation4 + $0x80] sm:$0xff]  ;;  %v7951_v10 = vld [vmem:[#allocation4 + $0x90] sm:$0xff] }
 0x66e   :  { %2680 = vmatpush1.msra.mxu0 %v7522_v24  ;;  %2751 = vmatpush1.msra.mxu1 %v7525_v9  ;;  %v7855_v24 = vld [vmem:[#allocation4 + $0x290] sm:$0xff]  ;;  %v7858_v9 = vld [vmem:[#allocation4 + $0x248] sm:$0xff]  ;;  %10836 = vst [vmem:[#allocation31_spill] sm:$0xff] %v7948_v49  ;;  %10837 = vst [vmem:[#allocation32_spill] sm:$0xff] %v7951_v10 }
 0x66f   :  { %2681 = vmatprep.subr.mxu0 %v10816_v58  ;;  %2752 = vmatprep.subr.mxu1 %v10817_v55  ;;  %v7954_v58 = vld [vmem:[#allocation4 + $0x48] sm:$0xff]  ;;  %v7957_v55 = vld [vmem:[#allocation4 + $0x58] sm:$0xff] }
 0x670   :  { %2682 = vmatpush1.msra.mxu0 %v10818_v63  ;;  %2753 = vmatpush1.msra.mxu1 %v10819_v32  ;;  %10838 = vst [vmem:[#allocation33_spill] sm:$0xff] %v7954_v58  ;;  %10839 = vst [vmem:[#allocation34_spill] sm:$0xff] %v7957_v55  ;;  %v7960_v63 = vld [vmem:[#allocation4 + $0x40] sm:$0xff]  ;;  %v7963_v32 = vld [vmem:[#allocation4 + $0x50] sm:$0xff] }
 0x671   :  { %2683 = vmatprep.subr.mxu0 %v7846_v0  ;;  %2754 = vmatprep.subr.mxu1 %v7849_v5  ;;  %10840 = vst [vmem:[#allocation35_spill] sm:$0xff] %v7960_v63  ;;  %10841 = vst [vmem:[#allocation36_spill] sm:$0xff] %v7963_v32 }
 0x672   :  { %2684 = vmatpush1.msra.mxu0 %v7852_v50  ;;  %2755 = vmatpush1.msra.mxu1 %v7855_v24 }
 0x673   :  { %2685 = vmatprep.subr.mxu0 %v7858_v9  ;;  %2756 = vmatprep.subr.mxu1 %v7861_v18 }
 0x674   :  { %2686 = vmatpush1.msra.mxu0 %v7864_v12  ;;  %2757 = vmatpush1.msra.mxu1 %v7867_v17 }
 0x675   :  { %2687 = vmatprep.subr.mxu0 %v7870_v19  ;;  %2758 = vmatprep.subr.mxu1 %v7873_v20 }
 0x676   :  { %2688 = vmatpush1.msra.mxu0 %v7876_v51  ;;  %2759 = vmatpush1.msra.mxu1 %v7879_v11 }
 0x677   :  { %2689 = vmatprep.subr.mxu0 %v7882_v8  ;;  %2760 = vmatprep.subr.mxu1 %v7885_v14 }
 0x678   :  { %2690 = vmatpush1.msra.mxu0 %v7888_v30  ;;  %2761 = vmatpush1.msra.mxu1 %v7891_v34 }
 0x679   :  { %2691 = vmatprep.subr.mxu0 %v7894_v27  ;;  %2762 = vmatprep.subr.mxu1 %v7897_v44 }
 0x67a   :  { %2692 = vmatpush1.msra.mxu0 %v7900_v36  ;;  %2763 = vmatpush1.msra.mxu1 %v7903_v35 }
 0x67b   :  { %2693 = vmatprep.subr.mxu0 %v7906_v39  ;;  %2764 = vmatprep.subr.mxu1 %v7909_v59 }
 0x67c   :  { %2694 = vmatpush1.msra.mxu0 %v7912_v15  ;;  %2765 = vmatpush1.msra.mxu1 %v7915_v6 }
 0x67d   :  { %2695 = vmatprep.subr.mxu0 %v7918_v22  ;;  %2766 = vmatprep.subr.mxu1 %v7921_v31 }
 0x67e   :  { %2696 = vmatpush1.msra.mxu0 %v7924_v54  ;;  %2767 = vmatpush1.msra.mxu1 %v7927_v28  ;;  %v10915_v54 = vld [vmem:[#allocation13_spill] sm:$0xff] }
 0x67f   :  { %2697 = vmatprep.subr.mxu0 %v7930_v60  ;;  %2768 = vmatprep.subr.mxu1 %v7933_v13  ;;  %v10914_v13 = vld [vmem:[#allocation11_spill] sm:$0xff] }
 0x680   :  { %2698 = vmatpush1.msra.mxu0 %v7936_v41  ;;  %2769 = vmatpush1.msra.mxu1 %v7939_v42  ;;  %v10913_v42 = vld [vmem:[#allocation10_spill] sm:$0xff] }
 0x681   :  { %2699 = vmatprep.subr.mxu0 %v7942_v16  ;;  %2770 = vmatprep.subr.mxu1 %v7945_v57  ;;  %v10912_v57 = vld [vmem:[#allocation9_spill] sm:$0xff] }
 0x682   :  { %2700 = vmatpush1.msra.mxu0 %v7948_v49  ;;  %2771 = vmatpush1.msra.mxu1 %v7951_v10  ;;  %v7966_v49 = vld [vmem:[#allocation4 + $0x8] sm:$0xff]  ;;  %v7969_v10 = vld [vmem:[#allocation4 + $0x18] sm:$0xff] }
 0x683   :  { %2701 = vmatprep.subr.mxu0 %v7954_v58  ;;  %2772 = vmatprep.subr.mxu1 %v7957_v55  ;;  %10842 = vst [vmem:[#allocation37_spill] sm:$0xff] %v7966_v49  ;;  %10843 = vst [vmem:[#allocation38_spill] sm:$0xff] %v7969_v10  ;;  %v7972_v58 = vld [vmem:[#allocation4] sm:$0xff]  ;;  %v7975_v55 = vld [vmem:[#allocation4 + $0x10] sm:$0xff] }
 0x684   :  { %2702 = vmatpush1.msra.mxu0 %v7960_v63  ;;  %2773 = vmatpush1.msra.mxu1 %v7963_v32  ;;  %10844 = vst [vmem:[#allocation39_spill] sm:$0xff] %v7972_v58  ;;  %10845 = vst [vmem:[#allocation40_spill] sm:$0xff] %v7975_v55  ;;  %v7978_v63 = vld [vmem:[#allocation4 + $0x7c8] sm:$0xff]  ;;  %v7981_v32 = vld [vmem:[#allocation4 + $0x7d8] sm:$0xff] }
 0x685   :  { %2703 = vmatprep.subr.mxu0 %v7966_v49  ;;  %2774 = vmatprep.subr.mxu1 %v7969_v10  ;;  %10846 = vst [vmem:[#allocation41_spill] sm:$0xff] %v7978_v63  ;;  %10847 = vst [vmem:[#allocation42_spill] sm:$0xff] %v7981_v32  ;;  %v7984_v49 = vld [vmem:[#allocation4 + $0x7c0] sm:$0xff]  ;;  %v7987_v10 = vld [vmem:[#allocation4 + $0x7d0] sm:$0xff] }
 0x686   :  { %2704 = vmatpush1.msra.mxu0 %v7972_v58  ;;  %2775 = vmatpush1.msra.mxu1 %v7975_v55  ;;  %10848 = vst [vmem:[#allocation43_spill] sm:$0xff] %v7984_v49  ;;  %10849 = vst [vmem:[#allocation44_spill] sm:$0xff] %v7987_v10  ;;  %v7990_v58 = vld [vmem:[#allocation4 + $0x788] sm:$0xff]  ;;  %v7993_v55 = vld [vmem:[#allocation4 + $0x798] sm:$0xff] }
 0x687   :  { %2705 = vmatprep.subr.mxu0 %v7978_v63  ;;  %2776 = vmatprep.subr.mxu1 %v7981_v32  ;;  %10850 = vst [vmem:[#allocation45_spill] sm:$0xff] %v7990_v58  ;;  %10851 = vst [vmem:[#allocation46_spill] sm:$0xff] %v7993_v55  ;;  %v7996_v63 = vld [vmem:[#allocation4 + $0x780] sm:$0xff]  ;;  %v7999_v32 = vld [vmem:[#allocation4 + $0x790] sm:$0xff] }
 0x688   :  { %2706 = vmatpush2.msra.mxu0 %v7984_v49  ;;  %2777 = vmatpush2.msra.mxu1 %v7987_v10  ;;  %10852 = vst [vmem:[#allocation47_spill] sm:$0xff] %v7996_v63  ;;  %10853 = vst [vmem:[#allocation48_spill] sm:$0xff] %v7999_v32  ;;  %v8002_v49 = vld [vmem:[#allocation4 + $0x748] sm:$0xff]  ;;  %v8005_v10 = vld [vmem:[#allocation4 + $0x758] sm:$0xff] }
 0x689   :  { %2707 = vmatprep.subr.mxu0 %v7990_v58  ;;  %2778 = vmatprep.subr.mxu1 %v7993_v55  ;;  %10854 = vst [vmem:[#allocation49_spill] sm:$0xff] %v8002_v49  ;;  %10855 = vst [vmem:[#allocation50_spill] sm:$0xff] %v8005_v10  ;;  %v8008_v58 = vld [vmem:[#allocation4 + $0x740] sm:$0xff]  ;;  %v8011_v55 = vld [vmem:[#allocation4 + $0x750] sm:$0xff] }
 0x68a   :  { %2708 = vmatpush2.msra.mxu0 %v7996_v63  ;;  %2779 = vmatpush2.msra.mxu1 %v7999_v32  ;;  %10856 = vst [vmem:[#allocation51_spill] sm:$0xff] %v8008_v58  ;;  %10857 = vst [vmem:[#allocation52_spill] sm:$0xff] %v8011_v55  ;;  %v8014_v63 = vld [vmem:[#allocation4 + $0x708] sm:$0xff]  ;;  %v8017_v32 = vld [vmem:[#allocation4 + $0x718] sm:$0xff] }
 0x68b   :  { %2709 = vmatprep.subr.mxu0 %v8002_v49  ;;  %2780 = vmatprep.subr.mxu1 %v8005_v10  ;;  %10858 = vst [vmem:[#allocation53_spill] sm:$0xff] %v8014_v63  ;;  %10859 = vst [vmem:[#allocation54_spill] sm:$0xff] %v8017_v32  ;;  %v8020_v49 = vld [vmem:[#allocation4 + $0x700] sm:$0xff]  ;;  %v8023_v10 = vld [vmem:[#allocation4 + $0x710] sm:$0xff] }
 0x68c   :  { %2710 = vmatpush2.msra.mxu0 %v8008_v58  ;;  %2781 = vmatpush2.msra.mxu1 %v8011_v55  ;;  %10860 = vst [vmem:[#allocation55_spill] sm:$0xff] %v8020_v49  ;;  %10861 = vst [vmem:[#allocation56_spill] sm:$0xff] %v8023_v10  ;;  %v8026_v58 = vld [vmem:[#allocation4 + $0x6c8] sm:$0xff]  ;;  %v8029_v55 = vld [vmem:[#allocation4 + $0x6d8] sm:$0xff] }
 0x68d   :  { %2711 = vmatprep.subr.mxu0 %v8014_v63  ;;  %2782 = vmatprep.subr.mxu1 %v8017_v32  ;;  %10862 = vst [vmem:[#allocation57_spill] sm:$0xff] %v8026_v58  ;;  %10863 = vst [vmem:[#allocation58_spill] sm:$0xff] %v8029_v55  ;;  %v8032_v63 = vld [vmem:[#allocation4 + $0x6c0] sm:$0xff]  ;;  %v8035_v32 = vld [vmem:[#allocation4 + $0x6d0] sm:$0xff] }
 0x68e   :  { %2712 = vmatpush2.msra.mxu0 %v8020_v49  ;;  %2783 = vmatpush2.msra.mxu1 %v8023_v10  ;;  %10864 = vst [vmem:[#allocation59_spill] sm:$0xff] %v8032_v63  ;;  %10865 = vst [vmem:[#allocation60_spill] sm:$0xff] %v8035_v32  ;;  %v8038_v49 = vld [vmem:[#allocation4 + $0x688] sm:$0xff]  ;;  %v8041_v10 = vld [vmem:[#allocation4 + $0x698] sm:$0xff] }
 0x68f   :  { %2713 = vmatprep.subr.mxu0 %v8026_v58  ;;  %2784 = vmatprep.subr.mxu1 %v8029_v55  ;;  %10866 = vst [vmem:[#allocation61_spill] sm:$0xff] %v8038_v49  ;;  %10867 = vst [vmem:[#allocation62_spill] sm:$0xff] %v8041_v10  ;;  %v8044_v58 = vld [vmem:[#allocation4 + $0x680] sm:$0xff]  ;;  %v8047_v55 = vld [vmem:[#allocation4 + $0x690] sm:$0xff] }
 0x690   :  { %2714 = vmatpush2.msra.mxu0 %v8032_v63  ;;  %2785 = vmatpush2.msra.mxu1 %v8035_v32  ;;  %10868 = vst [vmem:[#allocation63_spill] sm:$0xff] %v8044_v58  ;;  %10869 = vst [vmem:[#allocation64_spill] sm:$0xff] %v8047_v55  ;;  %v8050_v63 = vld [vmem:[#allocation4 + $0x648] sm:$0xff]  ;;  %v8053_v32 = vld [vmem:[#allocation4 + $0x658] sm:$0xff] }
 0x691   :  { %2715 = vmatprep.subr.mxu0 %v8038_v49  ;;  %2786 = vmatprep.subr.mxu1 %v8041_v10  ;;  %10870 = vst [vmem:[#allocation65_spill] sm:$0xff] %v8050_v63  ;;  %10871 = vst [vmem:[#allocation66_spill] sm:$0xff] %v8053_v32  ;;  %v8056_v49 = vld [vmem:[#allocation4 + $0x640] sm:$0xff]  ;;  %v8059_v10 = vld [vmem:[#allocation4 + $0x650] sm:$0xff] }
 0x692   :  { %2716 = vmatpush2.msra.mxu0 %v8044_v58  ;;  %2787 = vmatpush2.msra.mxu1 %v8047_v55  ;;  %10872 = vst [vmem:[#allocation67_spill] sm:$0xff] %v8056_v49  ;;  %10873 = vst [vmem:[#allocation68_spill] sm:$0xff] %v8059_v10  ;;  %v8062_v58 = vld [vmem:[#allocation4 + $0x608] sm:$0xff]  ;;  %v8065_v55 = vld [vmem:[#allocation4 + $0x618] sm:$0xff] }
 0x693   :  { %2717 = vmatprep.subr.mxu0 %v8050_v63  ;;  %2788 = vmatprep.subr.mxu1 %v8053_v32  ;;  %10874 = vst [vmem:[#allocation69_spill] sm:$0xff] %v8062_v58  ;;  %10875 = vst [vmem:[#allocation70_spill] sm:$0xff] %v8065_v55  ;;  %v8068_v63 = vld [vmem:[#allocation4 + $0x600] sm:$0xff]  ;;  %v8071_v32 = vld [vmem:[#allocation4 + $0x610] sm:$0xff] }
 0x694   :  { %2718 = vmatpush2.msra.mxu0 %v8056_v49  ;;  %2789 = vmatpush2.msra.mxu1 %v8059_v10  ;;  %10876 = vst [vmem:[#allocation71_spill] sm:$0xff] %v8068_v63  ;;  %10877 = vst [vmem:[#allocation72_spill] sm:$0xff] %v8071_v32  ;;  %v8074_v49 = vld [vmem:[#allocation4 + $0x5c8] sm:$0xff]  ;;  %v8077_v10 = vld [vmem:[#allocation4 + $0x5d8] sm:$0xff] }
 0x695   :  { %2719 = vmatprep.subr.mxu0 %v8062_v58  ;;  %2790 = vmatprep.subr.mxu1 %v8065_v55  ;;  %10878 = vst [vmem:[#allocation73_spill] sm:$0xff] %v8074_v49  ;;  %10879 = vst [vmem:[#allocation74_spill] sm:$0xff] %v8077_v10  ;;  %v8080_v58 = vld [vmem:[#allocation4 + $0x5c0] sm:$0xff]  ;;  %v8083_v55 = vld [vmem:[#allocation4 + $0x5d0] sm:$0xff] }
 0x696   :  { %2720 = vmatpush2.msra.mxu0 %v8068_v63  ;;  %2791 = vmatpush2.msra.mxu1 %v8071_v32  ;;  %10880 = vst [vmem:[#allocation75_spill] sm:$0xff] %v8080_v58  ;;  %10881 = vst [vmem:[#allocation76_spill] sm:$0xff] %v8083_v55  ;;  %v8086_v63 = vld [vmem:[#allocation4 + $0x588] sm:$0xff]  ;;  %v8089_v32 = vld [vmem:[#allocation4 + $0x598] sm:$0xff] }
 0x697   :  { %2721 = vmatprep.subr.mxu0 %v8074_v49  ;;  %2792 = vmatprep.subr.mxu1 %v8077_v10  ;;  %10882 = vst [vmem:[#allocation77_spill] sm:$0xff] %v8086_v63  ;;  %10883 = vst [vmem:[#allocation78_spill] sm:$0xff] %v8089_v32  ;;  %v8092_v49 = vld [vmem:[#allocation4 + $0x580] sm:$0xff]  ;;  %v8095_v10 = vld [vmem:[#allocation4 + $0x590] sm:$0xff] }
 0x698   :  { %2722 = vmatpush2.msra.mxu0 %v8080_v58  ;;  %2793 = vmatpush2.msra.mxu1 %v8083_v55  ;;  %10884 = vst [vmem:[#allocation79_spill] sm:$0xff] %v8092_v49  ;;  %10885 = vst [vmem:[#allocation80_spill] sm:$0xff] %v8095_v10  ;;  %v8098_v58 = vld [vmem:[#allocation4 + $0x548] sm:$0xff]  ;;  %v8101_v55 = vld [vmem:[#allocation4 + $0x558] sm:$0xff] }
 0x699   :  { %2723 = vmatprep.subr.mxu0 %v8086_v63  ;;  %2794 = vmatprep.subr.mxu1 %v8089_v32  ;;  %10886 = vst [vmem:[#allocation81_spill] sm:$0xff] %v8098_v58  ;;  %10887 = vst [vmem:[#allocation82_spill] sm:$0xff] %v8101_v55  ;;  %v8104_v63 = vld [vmem:[#allocation4 + $0x540] sm:$0xff]  ;;  %v8107_v32 = vld [vmem:[#allocation4 + $0x550] sm:$0xff] }
 0x69a   :  { %2724 = vmatpush2.msra.mxu0 %v8092_v49  ;;  %2795 = vmatpush2.msra.mxu1 %v8095_v10  ;;  %10888 = vst [vmem:[#allocation83_spill] sm:$0xff] %v8104_v63  ;;  %10889 = vst [vmem:[#allocation84_spill] sm:$0xff] %v8107_v32  ;;  %v8110_v49 = vld [vmem:[#allocation4 + $0x508] sm:$0xff]  ;;  %v8113_v10 = vld [vmem:[#allocation4 + $0x518] sm:$0xff] }
 0x69b   :  { %2725 = vmatprep.subr.mxu0 %v8098_v58  ;;  %2796 = vmatprep.subr.mxu1 %v8101_v55  ;;  %10890 = vst [vmem:[#allocation85_spill] sm:$0xff] %v8110_v49  ;;  %10891 = vst [vmem:[#allocation86_spill] sm:$0xff] %v8113_v10  ;;  %v8116_v58 = vld [vmem:[#allocation4 + $0x500] sm:$0xff]  ;;  %v8119_v55 = vld [vmem:[#allocation4 + $0x510] sm:$0xff] }
 0x69c   :  { %2726 = vmatpush2.msra.mxu0 %v8104_v63  ;;  %2797 = vmatpush2.msra.mxu1 %v8107_v32  ;;  %10892 = vst [vmem:[#allocation87_spill] sm:$0xff] %v8116_v58  ;;  %10893 = vst [vmem:[#allocation88_spill] sm:$0xff] %v8119_v55  ;;  %v8122_v63 = vld [vmem:[#allocation4 + $0x4c8] sm:$0xff]  ;;  %v8125_v32 = vld [vmem:[#allocation4 + $0x4d8] sm:$0xff] }
 0x69d   :  { %2727 = vmatprep.subr.mxu0 %v8110_v49  ;;  %2798 = vmatprep.subr.mxu1 %v8113_v10  ;;  %10894 = vst [vmem:[#allocation89_spill] sm:$0xff] %v8122_v63  ;;  %10895 = vst [vmem:[#allocation90_spill] sm:$0xff] %v8125_v32  ;;  %v8128_v49 = vld [vmem:[#allocation4 + $0x4c0] sm:$0xff]  ;;  %v8131_v10 = vld [vmem:[#allocation4 + $0x4d0] sm:$0xff] }
 0x69e   :  { %2728 = vmatpush2.msra.mxu0 %v8116_v58  ;;  %2799 = vmatpush2.msra.mxu1 %v8119_v55  ;;  %10896 = vst [vmem:[#allocation91_spill] sm:$0xff] %v8128_v49  ;;  %10897 = vst [vmem:[#allocation92_spill] sm:$0xff] %v8131_v10  ;;  %v8134_v58 = vld [vmem:[#allocation4 + $0x488] sm:$0xff]  ;;  %v8137_v55 = vld [vmem:[#allocation4 + $0x498] sm:$0xff] }
 0x69f   :  { %2729 = vmatprep.subr.mxu0 %v8122_v63  ;;  %2800 = vmatprep.subr.mxu1 %v8125_v32  ;;  %10898 = vst [vmem:[#allocation93_spill] sm:$0xff] %v8134_v58  ;;  %10899 = vst [vmem:[#allocation94_spill] sm:$0xff] %v8137_v55  ;;  %v8140_v63 = vld [vmem:[#allocation4 + $0x480] sm:$0xff]  ;;  %v8143_v32 = vld [vmem:[#allocation4 + $0x490] sm:$0xff] }
 0x6a0   :  { %2730 = vmatpush2.msra.mxu0 %v8128_v49  ;;  %2801 = vmatpush2.msra.mxu1 %v8131_v10  ;;  %10900 = vst [vmem:[#allocation95_spill] sm:$0xff] %v8140_v63  ;;  %10901 = vst [vmem:[#allocation96_spill] sm:$0xff] %v8143_v32  ;;  %v8146_v49 = vld [vmem:[#allocation4 + $0x448] sm:$0xff]  ;;  %v8149_v10 = vld [vmem:[#allocation4 + $0x458] sm:$0xff] }
 0x6a1   :  { %2731 = vmatprep.subr.mxu0 %v8134_v58  ;;  %2802 = vmatprep.subr.mxu1 %v8137_v55  ;;  %10902 = vst [vmem:[#allocation97_spill] sm:$0xff] %v8146_v49  ;;  %10903 = vst [vmem:[#allocation98_spill] sm:$0xff] %v8149_v10  ;;  %v8152_v58 = vld [vmem:[#allocation4 + $0x440] sm:$0xff]  ;;  %v8155_v55 = vld [vmem:[#allocation4 + $0x450] sm:$0xff] }
 0x6a2   :  { %2732 = vmatpush2.msra.mxu0 %v8140_v63  ;;  %2803 = vmatpush2.msra.mxu1 %v8143_v32  ;;  %10904 = vst [vmem:[#allocation99_spill] sm:$0xff] %v8152_v58  ;;  %10905 = vst [vmem:[#allocation100_spill] sm:$0xff] %v8155_v55  ;;  %v8158_v63 = vld [vmem:[#allocation4 + $0x408] sm:$0xff]  ;;  %v8161_v32 = vld [vmem:[#allocation4 + $0x418] sm:$0xff] }
 0x6a3   :  { %2733 = vmatprep.subr.mxu0 %v8146_v49  ;;  %2804 = vmatprep.subr.mxu1 %v8149_v10  ;;  %10906 = vst [vmem:[#allocation101_spill] sm:$0xff] %v8158_v63  ;;  %10907 = vst [vmem:[#allocation102_spill] sm:$0xff] %v8161_v32  ;;  %v8164_v49 = vld [vmem:[#allocation4 + $0x400] sm:$0xff]  ;;  %v8167_v10 = vld [vmem:[#allocation4 + $0x410] sm:$0xff] }
 0x6a4   :  { %2734 = vmatpush2.msra.mxu0 %v8152_v58  ;;  %2805 = vmatpush2.msra.mxu1 %v8155_v55  ;;  %10908 = vst [vmem:[#allocation103_spill] sm:$0xff] %v8164_v49  ;;  %10909 = vst [vmem:[#allocation104_spill] sm:$0xff] %v8167_v10  ;;  %v8170_v58 = vld [vmem:[#allocation4 + $0x3e8] sm:$0xff]  ;;  %v8173_v55 = vld [vmem:[#allocation4 + $0x3f8] sm:$0xff] }
 0x6a5   :  { %2735 = vmatprep.subr.mxu0 %v8158_v63  ;;  %2806 = vmatprep.subr.mxu1 %v8161_v32  ;;  %10910 = vst [vmem:[#allocation105_spill] sm:$0xff] %v8170_v58  ;;  %10911 = vst [vmem:[#allocation14_spill] sm:$0xff] %v8173_v55  ;;  %v76_v63 = vpop.permute.xlu1 %75 }
 0x6a6   :  { %2736 = vmatpush2.msra.mxu0 %v8164_v49  ;;  %2807 = vmatpush2.msra.mxu1 %v8167_v10  ;;  %v169_v16 = vmul.f32 %v10912_v57, %v76_v63  ;;  %v171_v41 = vmul.f32 %v10913_v42, %v76_v63  ;;  %v170_v49 = vmul.f32 %v10914_v13, %v76_v63 }
 0x6a7   :  { %2815 = vmatprep.subr.mxu0 %v8170_v58  ;;  %2886 = vmatprep.subr.mxu1 %v8173_v55  ;;  %v172_v10 = vmul.f32 %v10506_v48, %v76_v63 }
 0x6a8   :  { %v275_v28 = vadd.f32 %v5446_v47, %v169_v16  ;;  %v277_v31 = vadd.f32 %v10915_v54, %v171_v41  ;;  %v276_v6 = vadd.f32 %v5455_v52, %v170_v49 }
 0x6a9   :  { %v278_v57 = vadd.f32 %v5459_v56, %v172_v10 }
 0x6e5   :  { %v2398_v32 = vpop.f32.mrf.mxu0  ;;  %v2469_v60 = vpop.f32.mrf.mxu1 }
 0x6e6   :  { %v2399_v22 = vadd.f32 %v2398_v32, %v275_v28  ;;  %v2470_v55 = vadd.f32 %v2469_v60, %v277_v31  ;;  %v173_v28 = vmul.f32 %v5464_v25, %v76_v63  ;;  %v175_v31 = vmul.f32 %v5466_v26, %v76_v63 }
 0x6e7   :  { %v2400_v58 = vpop.f32.mrf.mxu0  ;;  %v2471_v15 = vpop.f32.mrf.mxu1 }
 0x6e8   :  { %v2401_v59 = vadd.f32 %v2400_v58, %v276_v6  ;;  %v3408_v39 = vmul.f32 -1.442695, %v2399_v22  ;;  %v2472_v42 = vadd.f32 %v2471_v15, %v278_v57  ;;  %v3410_v35 = vmul.f32 -1.442695, %v2470_v55 }
 0x6e9   :  { %v174_v6 = vmul.f32 %v10304_v21, %v76_v63  ;;  %v176_v15 = vmul.f32 %v5470_v29, %v76_v63 }
 0x6ea   :  { %v3409_v13 = vmul.f32 -1.442695, %v2401_v59  ;;  %3594 = vpow2.f32 %v3408_v39  ;;  %v3411_v36 = vmul.f32 -1.442695, %v2472_v42  ;;  %v279_v39 = vadd.f32 %v5473_v33, %v173_v28 }
 0x6eb   :  { %3596 = vpow2.f32 %v3410_v35  ;;  %v281_v35 = vadd.f32 %v5476_v38, %v175_v31  ;;  %v280_v57 = vadd.f32 %v5479_v46, %v174_v6  ;;  %v282_v55 = vadd.f32 %v5482_v53, %v176_v15 }
 0x6ec   :  { %3598 = vpow2.f32 %v3409_v13 }
 0x6ed   :  { %3600 = vpow2.f32 %v3411_v36 }
 0x6f7   :  { %v3595_v16 = vpop.eup %3594 }
 0x6f8   :  { %v3597_v41 = vpop.eup %3596  ;;  %v2622_v60 = vadd.f32 1.0, %v3595_v16 }
 0x6f9   :  { %v3599_v54 = vpop.eup %3598  ;;  %v2634_v22 = vadd.f32 1.0, %v3597_v41 }
 0x6fa   :  { %v3601_v49 = vpop.eup %3600  ;;  %v2623_v59 = vadd.f32 1.0, %v3599_v54  ;;  %3602 = vrcp.f32 %v2622_v60 }
 0x6fb   :  { %v2635_v36 = vadd.f32 1.0, %v3601_v49  ;;  %3604 = vrcp.f32 %v2634_v22 }
 0x6fc   :  { %3606 = vrcp.f32 %v2623_v59 }
 0x707   :  { %v3603_v31 = vpop.eup %3602 }
 0x708   :  { %v3605_v60 = vpop.eup %3604 }
 0x709   :  { %v3607_v6 = vpop.eup %3606 }
 0x726   :  { %v2540_v13 = vpop.f32.mrf.mxu0  ;;  %v2611_v42 = vpop.f32.mrf.mxu1 }
 0x727   :  { %v2541_v10 = vadd.f32 %v2540_v13, %v279_v39  ;;  %v2612_v58 = vadd.f32 %v2611_v42, %v281_v35  ;;  %v2654_v39 = vmul.f32 %v3605_v60, %v7667_v1  ;;  %v8253_v60 = vld [vmem:[#allocation4 + $0x278] sm:$0xff] }
 0x728   :  { %v2542_v32 = vpop.f32.mrf.mxu0  ;;  %v2613_v16 = vpop.f32.mrf.mxu1 }
 0x729   :  { %3608 = vtanh.f32 %v2541_v10  ;;  %v3412_v54 = vmul.f32 -1.442695, %v2612_v58  ;;  %v2543_v63 = vadd.f32 %v2542_v32, %v280_v57  ;;  %v2614_v41 = vadd.f32 %v2613_v16, %v282_v55 }
 0x72a   :  { %3610 = vrcp.f32 %v2635_v36 }
 0x72b   :  { %3612 = vpow2.f32 %v3412_v54  ;;  %v3413_v28 = vmul.f32 -1.442695, %v2614_v41 }
 0x72c   :  { %3614 = vtanh.f32 %v2543_v63 }
 0x72d   :  { %3616 = vpow2.f32 %v3413_v28  ;;  %v8247_v28 = vld [vmem:[#allocation4 + $0x2b0] sm:$0xff] }
 0x736   :  { %v3609_v49 = vpop.eup %3608 }
 0x737   :  { %v3611_v22 = vpop.eup %3610  ;;  %v2656_v15 = vmul.f32 %v3609_v49, %v3603_v31  ;;  %v8250_v31 = vld [vmem:[#allocation4 + $0x268] sm:$0xff]  ;;  %v8259_v49 = vld [vmem:[#allocation4 + $0x270] sm:$0xff] }
 0x738   :  { %v3613_v59 = vpop.eup %3612  ;;  %v2655_v36 = vmul.f32 %v3611_v22, %v7671_v62  ;;  %v8214_v62 = vld [vmem:[#allocation4 + $0x328] sm:$0xff] }
 0x739   :  { %v3615_v35 = vpop.eup %3614  ;;  %v8193_v13 = vadd.f32 %v2656_v15, %v2654_v39  ;;  %v2648_v42 = vadd.f32 1.0, %v3613_v59  ;;  %v8262_v22 = vld [vmem:[#allocation4 + $0x228] sm:$0xff]  ;;  %v8265_v39 = vld [vmem:[#allocation4 + $0x238] sm:$0xff]  ;;  %v8268_v15 = vld [vmem:[#allocation4 + $0x220] sm:$0xff] }
 0x73a   :  { %v3617_v57 = vpop.eup %3616  ;;  %v2657_v10 = vmul.f32 %v3615_v35, %v3607_v6  ;;  %v8256_v6 = vld [vmem:[#allocation4 + $0x260] sm:$0xff]  ;;  %v8271_v59 = vld [vmem:[#allocation4 + $0x230] sm:$0xff]  ;;  %v8274_v35 = vld [vmem:[#allocation4 + $0x1e8] sm:$0xff] }
 0x73b   :  { %3618 = vtanh.f32 %v8193_v13  ;;  %v2649_v58 = vadd.f32 1.0, %v3617_v57  ;;  %v8280_v57 = vld [vmem:[#allocation4 + $0x1e0] sm:$0xff] }
 0x73c   :  { %3620 = vrcp.f32 %v2648_v42  ;;  %v8197_v55 = vadd.f32 %v2657_v10, %v2655_v36  ;;  %v8277_v42 = vld [vmem:[#allocation4 + $0x1f8] sm:$0xff]  ;;  %10917 = vst [vmem:[#allocation107_spill] sm:$0xff] %v8280_v57  ;;  %v8283_v36 = vld [vmem:[#allocation4 + $0x1f0] sm:$0xff]  ;;  %v8286_v10 = vld [vmem:[#allocation4 + $0x1a8] sm:$0xff] }
 0x73d   :  { %3622 = vrcp.f32 %v2649_v58  ;;  %10916 = vst [vmem:[#allocation106_spill] sm:$0xff] %v8277_v42  ;;  %10918 = vst [vmem:[#allocation108_spill] sm:$0xff] %v8283_v36  ;;  %v8289_v58 = vld [vmem:[#allocation4 + $0x1b8] sm:$0xff] }
 0x73e   :  { %3624 = vtanh.f32 %v8197_v55  ;;  %10919 = vst [vmem:[#allocation109_spill] sm:$0xff] %v8286_v10  ;;  %10920 = vst [vmem:[#allocation110_spill] sm:$0xff] %v8289_v58 }
 0x748   :  { %v3619_v1 = vpop.eup %3618 }
 0x749   :  { %v3621_v32 = vpop.eup %3620 }
 0x74a   :  { %v3623_v16 = vpop.eup %3622  ;;  %v8200_v41 = vmul.f32 %v3621_v32, %v3619_v1  ;;  %v8292_v1 = vld [vmem:[#allocation4 + $0x1a0] sm:$0xff]  ;;  %v8295_v32 = vld [vmem:[#allocation4 + $0x1b0] sm:$0xff] }
 0x74b   :  { %v3625_v54 = vpop.eup %3624  ;;  %10921 = vst [vmem:[#allocation111_spill] sm:$0xff] %v8292_v1  ;;  %10922 = vst [vmem:[#allocation112_spill] sm:$0xff] %v8295_v32 }
 0x74c   :  { %v2663_v63 = vmul.f32 %v3625_v54, %v3623_v16  ;;  %v8298_v16 = vld [vmem:[#allocation4 + $0x168] sm:$0xff]  ;;  %v8301_v54 = vld [vmem:[#allocation4 + $0x178] sm:$0xff] }
 0x74d   :  { %10923 = vst [vmem:[#allocation113_spill] sm:$0xff] %v8298_v16  ;;  %10924 = vst [vmem:[#allocation114_spill] sm:$0xff] %v8301_v54 }
 0x74e   :  { %2737 = vmatprep.mubr.f32.mxu0 %v2663_v63  ;;  %2808 = vmatprep.mubr.f32.mxu1 %v2663_v63 }
 0x74f   :  { %2738 = vmatmul.mubr.f32.vlgmr.msra.gmra.mxu0 %v8200_v41  ;;  %2809 = vmatmul.mubr.f32.vlgmr.msra.gmra.mxu1 %v8200_v41 }
 0x750   :  { %2816 = vmatpush1.msra.mxu0 %v7678_v37  ;;  %2887 = vmatpush1.msra.mxu1 %v7681_v23  ;;  %v8217_v37 = vld [vmem:[#allocation4 + $0x338] sm:$0xff]  ;;  %v8220_v23 = vld [vmem:[#allocation4 + $0x320] sm:$0xff] }
 0x751   :  { %2817 = vmatprep.subr.mxu0 %v7684_v43  ;;  %2879 = vmatprep.mubr.f32.mxu0 %v2663_v63  ;;  %v8223_v43 = vld [vmem:[#allocation4 + $0x330] sm:$0xff] }
 0x752   :  { %2888 = vmatprep.subr.mxu1 %v7687_v2  ;;  %2950 = vmatprep.mubr.f32.mxu1 %v2663_v63  ;;  %v8226_v2 = vld [vmem:[#allocation4 + $0x2e8] sm:$0xff]  ;;  %v8304_v63 = vld [vmem:[#allocation4 + $0x160] sm:$0xff] }
 0x753   :  { %2818 = vmatpush1.msra.mxu0 %v7690_v3  ;;  %2889 = vmatpush1.msra.mxu1 %v7693_v4  ;;  %v8229_v3 = vld [vmem:[#allocation4 + $0x2f8] sm:$0xff]  ;;  %v8232_v4 = vld [vmem:[#allocation4 + $0x2e0] sm:$0xff]  ;;  %10925 = vst [vmem:[#allocation115_spill] sm:$0xff] %v8304_v63 }
 0x754   :  { %2819 = vmatprep.subr.mxu0 %v7696_v45  ;;  %2890 = vmatprep.subr.mxu1 %v7699_v61  ;;  %v8235_v45 = vld [vmem:[#allocation4 + $0x2f0] sm:$0xff]  ;;  %v8238_v61 = vld [vmem:[#allocation4 + $0x2a8] sm:$0xff] }
 0x755   :  { %2820 = vmatpush1.msra.mxu0 %v7702_v40  ;;  %2891 = vmatpush1.msra.mxu1 %v7705_v7  ;;  %v8241_v40 = vld [vmem:[#allocation4 + $0x2b8] sm:$0xff]  ;;  %v8244_v7 = vld [vmem:[#allocation4 + $0x2a0] sm:$0xff] }
 0x756   :  { %2821 = vmatprep.subr.mxu0 %v8214_v62  ;;  %2892 = vmatprep.subr.mxu1 %v8217_v37 }
 0x757   :  { %2822 = vmatpush1.msra.mxu0 %v8220_v23  ;;  %2893 = vmatpush1.msra.mxu1 %v8223_v43 }
 0x758   :  { %2823 = vmatprep.subr.mxu0 %v8226_v2  ;;  %2894 = vmatprep.subr.mxu1 %v8229_v3 }
 0x759   :  { %2824 = vmatpush1.msra.mxu0 %v8232_v4  ;;  %2895 = vmatpush1.msra.mxu1 %v8235_v45 }
 0x75a   :  { %2825 = vmatprep.subr.mxu0 %v8238_v61  ;;  %2896 = vmatprep.subr.mxu1 %v8241_v40 }
 0x75b   :  { %2826 = vmatpush1.msra.mxu0 %v8244_v7  ;;  %2897 = vmatpush1.msra.mxu1 %v8247_v28 }
 0x75c   :  { %2827 = vmatprep.subr.mxu0 %v8250_v31  ;;  %2898 = vmatprep.subr.mxu1 %v8253_v60 }
 0x75d   :  { %2828 = vmatpush1.msra.mxu0 %v8256_v6  ;;  %2899 = vmatpush1.msra.mxu1 %v8259_v49 }
 0x75e   :  { %2829 = vmatprep.subr.mxu0 %v8262_v22  ;;  %2900 = vmatprep.subr.mxu1 %v8265_v39 }
 0x75f   :  { %2830 = vmatpush1.msra.mxu0 %v8268_v15  ;;  %2901 = vmatpush1.msra.mxu1 %v8271_v59 }
 0x760   :  { %2831 = vmatprep.subr.mxu0 %v8274_v35  ;;  %2902 = vmatprep.subr.mxu1 %v8277_v42  ;;  %v4467_v42 = vld [vmem:[#allocation4 + $0x358] sm:$0xff] }
 0x761   :  { %2832 = vmatpush1.msra.mxu0 %v8280_v57  ;;  %2903 = vmatpush1.msra.mxu1 %v8283_v36  ;;  %v4463_v36 = vld [vmem:[#allocation4 + $0x398] sm:$0xff]  ;;  %v4465_v57 = vld [vmem:[#allocation4 + $0x390] sm:$0xff] }
 0x762   :  { %2833 = vmatprep.subr.mxu0 %v8286_v10  ;;  %2904 = vmatprep.subr.mxu1 %v8289_v58  ;;  %v8307_v58 = vld [vmem:[#allocation4 + $0x170] sm:$0xff] }
 0x763   :  { %2834 = vmatpush1.msra.mxu0 %v8292_v1  ;;  %2905 = vmatpush1.msra.mxu1 %v8295_v32  ;;  %10926 = vst [vmem:[#allocation116_spill] sm:$0xff] %v8307_v58  ;;  %v8310_v1 = vld [vmem:[#allocation4 + $0x128] sm:$0xff]  ;;  %v8313_v32 = vld [vmem:[#allocation4 + $0x138] sm:$0xff]  ;;  %v4461_v10 = vld [vmem:[#allocation4 + $0x3d0] sm:$0xff] }
 0x764   :  { %2835 = vmatprep.subr.mxu0 %v8298_v16  ;;  %2906 = vmatprep.subr.mxu1 %v8301_v54  ;;  %10927 = vst [vmem:[#allocation117_spill] sm:$0xff] %v8310_v1  ;;  %10928 = vst [vmem:[#allocation118_spill] sm:$0xff] %v8313_v32  ;;  %v8316_v16 = vld [vmem:[#allocation4 + $0x120] sm:$0xff]  ;;  %v8319_v54 = vld [vmem:[#allocation4 + $0x130] sm:$0xff] }
 0x765   :  { %2836 = vmatpush1.msra.mxu0 %v8304_v63  ;;  %2907 = vmatpush1.msra.mxu1 %v8307_v58  ;;  %10929 = vst [vmem:[#allocation119_spill] sm:$0xff] %v8316_v16  ;;  %10930 = vst [vmem:[#allocation120_spill] sm:$0xff] %v8319_v54  ;;  %v8322_v63 = vld [vmem:[#allocation4 + $0xe8] sm:$0xff]  ;;  %v8325_v58 = vld [vmem:[#allocation4 + $0xf8] sm:$0xff] }
 0x766   :  { %2837 = vmatprep.subr.mxu0 %v8310_v1  ;;  %2908 = vmatprep.subr.mxu1 %v8313_v32  ;;  %10931 = vst [vmem:[#allocation121_spill] sm:$0xff] %v8322_v63  ;;  %10932 = vst [vmem:[#allocation122_spill] sm:$0xff] %v8325_v58  ;;  %v8328_v1 = vld [vmem:[#allocation4 + $0xe0] sm:$0xff]  ;;  %v8331_v32 = vld [vmem:[#allocation4 + $0xf0] sm:$0xff] }
 0x767   :  { %2838 = vmatpush1.msra.mxu0 %v8316_v16  ;;  %2909 = vmatpush1.msra.mxu1 %v8319_v54  ;;  %10933 = vst [vmem:[#allocation123_spill] sm:$0xff] %v8328_v1  ;;  %10934 = vst [vmem:[#allocation124_spill] sm:$0xff] %v8331_v32  ;;  %v8334_v16 = vld [vmem:[#allocation4 + $0xa8] sm:$0xff]  ;;  %v8337_v54 = vld [vmem:[#allocation4 + $0xb8] sm:$0xff] }
 0x768   :  { %2839 = vmatprep.subr.mxu0 %v8322_v63  ;;  %2910 = vmatprep.subr.mxu1 %v8325_v58  ;;  %10935 = vst [vmem:[#allocation125_spill] sm:$0xff] %v8334_v16  ;;  %10936 = vst [vmem:[#allocation126_spill] sm:$0xff] %v8337_v54  ;;  %v8340_v63 = vld [vmem:[#allocation4 + $0xa0] sm:$0xff]  ;;  %v8343_v58 = vld [vmem:[#allocation4 + $0xb0] sm:$0xff] }
 0x769   :  { %2840 = vmatpush1.msra.mxu0 %v8328_v1  ;;  %2911 = vmatpush1.msra.mxu1 %v8331_v32  ;;  %10937 = vst [vmem:[#allocation127_spill] sm:$0xff] %v8340_v63  ;;  %10938 = vst [vmem:[#allocation128_spill] sm:$0xff] %v8343_v58  ;;  %v8346_v1 = vld [vmem:[#allocation4 + $0x68] sm:$0xff]  ;;  %v8349_v32 = vld [vmem:[#allocation4 + $0x78] sm:$0xff] }
 0x76a   :  { %2841 = vmatprep.subr.mxu0 %v8334_v16  ;;  %2912 = vmatprep.subr.mxu1 %v8337_v54  ;;  %10939 = vst [vmem:[#allocation129_spill] sm:$0xff] %v8346_v1  ;;  %10940 = vst [vmem:[#allocation130_spill] sm:$0xff] %v8349_v32  ;;  %v8352_v16 = vld [vmem:[#allocation4 + $0x60] sm:$0xff]  ;;  %v8355_v54 = vld [vmem:[#allocation4 + $0x70] sm:$0xff] }
 0x76b   :  { %2842 = vmatpush1.msra.mxu0 %v8340_v63  ;;  %2913 = vmatpush1.msra.mxu1 %v8343_v58  ;;  %10941 = vst [vmem:[#allocation131_spill] sm:$0xff] %v8352_v16  ;;  %10942 = vst [vmem:[#allocation132_spill] sm:$0xff] %v8355_v54  ;;  %v8358_v63 = vld [vmem:[#allocation4 + $0x28] sm:$0xff]  ;;  %v8361_v58 = vld [vmem:[#allocation4 + $0x38] sm:$0xff] }
 0x76c   :  { %2843 = vmatprep.subr.mxu0 %v8346_v1  ;;  %2914 = vmatprep.subr.mxu1 %v8349_v32  ;;  %10943 = vst [vmem:[#allocation133_spill] sm:$0xff] %v8358_v63  ;;  %10944 = vst [vmem:[#allocation134_spill] sm:$0xff] %v8361_v58  ;;  %v8364_v1 = vld [vmem:[#allocation4 + $0x20] sm:$0xff]  ;;  %v8367_v32 = vld [vmem:[#allocation4 + $0x30] sm:$0xff] }
 0x76d   :  { %2844 = vmatpush1.msra.mxu0 %v8352_v16  ;;  %2915 = vmatpush1.msra.mxu1 %v8355_v54  ;;  %10945 = vst [vmem:[#allocation135_spill] sm:$0xff] %v8364_v1  ;;  %10946 = vst [vmem:[#allocation136_spill] sm:$0xff] %v8367_v32  ;;  %v8370_v16 = vld [vmem:[#allocation4 + $0x7e8] sm:$0xff]  ;;  %v8373_v54 = vld [vmem:[#allocation4 + $0x7f8] sm:$0xff] }
 0x76e   :  { %2845 = vmatprep.subr.mxu0 %v8358_v63  ;;  %2916 = vmatprep.subr.mxu1 %v8361_v58  ;;  %10947 = vst [vmem:[#allocation137_spill] sm:$0xff] %v8370_v16  ;;  %10948 = vst [vmem:[#allocation138_spill] sm:$0xff] %v8373_v54  ;;  %v8376_v63 = vld [vmem:[#allocation4 + $0x7e0] sm:$0xff]  ;;  %v8379_v58 = vld [vmem:[#allocation4 + $0x7f0] sm:$0xff] }
 0x76f   :  { %2846 = vmatpush1.msra.mxu0 %v8364_v1  ;;  %2917 = vmatpush1.msra.mxu1 %v8367_v32  ;;  %10949 = vst [vmem:[#allocation139_spill] sm:$0xff] %v8376_v63  ;;  %10950 = vst [vmem:[#allocation140_spill] sm:$0xff] %v8379_v58  ;;  %v8382_v1 = vld [vmem:[#allocation4 + $0x7a8] sm:$0xff]  ;;  %v8385_v32 = vld [vmem:[#allocation4 + $0x7b8] sm:$0xff] }
 0x770   :  { %2847 = vmatprep.subr.mxu0 %v8370_v16  ;;  %2918 = vmatprep.subr.mxu1 %v8373_v54  ;;  %10951 = vst [vmem:[#allocation141_spill] sm:$0xff] %v8382_v1  ;;  %10952 = vst [vmem:[#allocation142_spill] sm:$0xff] %v8385_v32  ;;  %v8388_v16 = vld [vmem:[#allocation4 + $0x7a0] sm:$0xff]  ;;  %v8391_v54 = vld [vmem:[#allocation4 + $0x7b0] sm:$0xff] }
 0x771   :  { %2848 = vmatpush2.msra.mxu0 %v8376_v63  ;;  %2919 = vmatpush2.msra.mxu1 %v8379_v58  ;;  %10953 = vst [vmem:[#allocation143_spill] sm:$0xff] %v8388_v16  ;;  %10954 = vst [vmem:[#allocation144_spill] sm:$0xff] %v8391_v54  ;;  %v8394_v63 = vld [vmem:[#allocation4 + $0x768] sm:$0xff]  ;;  %v8397_v58 = vld [vmem:[#allocation4 + $0x778] sm:$0xff] }
 0x772   :  { %2849 = vmatprep.subr.mxu0 %v8382_v1  ;;  %2920 = vmatprep.subr.mxu1 %v8385_v32  ;;  %10955 = vst [vmem:[#allocation145_spill] sm:$0xff] %v8394_v63  ;;  %10956 = vst [vmem:[#allocation146_spill] sm:$0xff] %v8397_v58  ;;  %v8400_v1 = vld [vmem:[#allocation4 + $0x760] sm:$0xff]  ;;  %v8403_v32 = vld [vmem:[#allocation4 + $0x770] sm:$0xff] }
 0x773   :  { %2850 = vmatpush2.msra.mxu0 %v8388_v16  ;;  %2921 = vmatpush2.msra.mxu1 %v8391_v54  ;;  %10957 = vst [vmem:[#allocation147_spill] sm:$0xff] %v8400_v1  ;;  %10958 = vst [vmem:[#allocation148_spill] sm:$0xff] %v8403_v32  ;;  %v8406_v16 = vld [vmem:[#allocation4 + $0x728] sm:$0xff]  ;;  %v8409_v54 = vld [vmem:[#allocation4 + $0x738] sm:$0xff] }
 0x774   :  { %2851 = vmatprep.subr.mxu0 %v8394_v63  ;;  %2922 = vmatprep.subr.mxu1 %v8397_v58  ;;  %10959 = vst [vmem:[#allocation149_spill] sm:$0xff] %v8406_v16  ;;  %10960 = vst [vmem:[#allocation150_spill] sm:$0xff] %v8409_v54  ;;  %v8412_v63 = vld [vmem:[#allocation4 + $0x720] sm:$0xff]  ;;  %v8415_v58 = vld [vmem:[#allocation4 + $0x730] sm:$0xff] }
 0x775   :  { %2852 = vmatpush2.msra.mxu0 %v8400_v1  ;;  %2923 = vmatpush2.msra.mxu1 %v8403_v32  ;;  %10961 = vst [vmem:[#allocation151_spill] sm:$0xff] %v8412_v63  ;;  %10962 = vst [vmem:[#allocation152_spill] sm:$0xff] %v8415_v58  ;;  %v8418_v1 = vld [vmem:[#allocation4 + $0x6e8] sm:$0xff]  ;;  %v8421_v32 = vld [vmem:[#allocation4 + $0x6f8] sm:$0xff] }
 0x776   :  { %2853 = vmatprep.subr.mxu0 %v8406_v16  ;;  %2924 = vmatprep.subr.mxu1 %v8409_v54  ;;  %10963 = vst [vmem:[#allocation153_spill] sm:$0xff] %v8418_v1  ;;  %10964 = vst [vmem:[#allocation154_spill] sm:$0xff] %v8421_v32  ;;  %v8424_v16 = vld [vmem:[#allocation4 + $0x6e0] sm:$0xff]  ;;  %v8427_v54 = vld [vmem:[#allocation4 + $0x6f0] sm:$0xff] }
 0x777   :  { %2854 = vmatpush2.msra.mxu0 %v8412_v63  ;;  %2925 = vmatpush2.msra.mxu1 %v8415_v58  ;;  %10965 = vst [vmem:[#allocation155_spill] sm:$0xff] %v8424_v16  ;;  %10966 = vst [vmem:[#allocation156_spill] sm:$0xff] %v8427_v54  ;;  %v8430_v63 = vld [vmem:[#allocation4 + $0x6a8] sm:$0xff]  ;;  %v8433_v58 = vld [vmem:[#allocation4 + $0x6b8] sm:$0xff] }
 0x778   :  { %2855 = vmatprep.subr.mxu0 %v8418_v1  ;;  %2926 = vmatprep.subr.mxu1 %v8421_v32  ;;  %10967 = vst [vmem:[#allocation157_spill] sm:$0xff] %v8430_v63  ;;  %10968 = vst [vmem:[#allocation158_spill] sm:$0xff] %v8433_v58  ;;  %v8436_v1 = vld [vmem:[#allocation4 + $0x6a0] sm:$0xff]  ;;  %v8439_v32 = vld [vmem:[#allocation4 + $0x6b0] sm:$0xff] }
 0x779   :  { %2856 = vmatpush2.msra.mxu0 %v8424_v16  ;;  %2927 = vmatpush2.msra.mxu1 %v8427_v54  ;;  %10969 = vst [vmem:[#allocation159_spill] sm:$0xff] %v8436_v1  ;;  %10970 = vst [vmem:[#allocation160_spill] sm:$0xff] %v8439_v32  ;;  %v8442_v16 = vld [vmem:[#allocation4 + $0x668] sm:$0xff]  ;;  %v8445_v54 = vld [vmem:[#allocation4 + $0x678] sm:$0xff] }
 0x77a   :  { %2857 = vmatprep.subr.mxu0 %v8430_v63  ;;  %2928 = vmatprep.subr.mxu1 %v8433_v58  ;;  %10971 = vst [vmem:[#allocation161_spill] sm:$0xff] %v8442_v16  ;;  %10972 = vst [vmem:[#allocation162_spill] sm:$0xff] %v8445_v54  ;;  %v8448_v63 = vld [vmem:[#allocation4 + $0x660] sm:$0xff]  ;;  %v8451_v58 = vld [vmem:[#allocation4 + $0x670] sm:$0xff] }
 0x77b   :  { %2858 = vmatpush2.msra.mxu0 %v8436_v1  ;;  %2929 = vmatpush2.msra.mxu1 %v8439_v32  ;;  %10973 = vst [vmem:[#allocation163_spill] sm:$0xff] %v8448_v63  ;;  %10974 = vst [vmem:[#allocation164_spill] sm:$0xff] %v8451_v58  ;;  %v8454_v1 = vld [vmem:[#allocation4 + $0x628] sm:$0xff]  ;;  %v8457_v32 = vld [vmem:[#allocation4 + $0x638] sm:$0xff] }
 0x77c   :  { %2859 = vmatprep.subr.mxu0 %v8442_v16  ;;  %2930 = vmatprep.subr.mxu1 %v8445_v54  ;;  %10975 = vst [vmem:[#allocation165_spill] sm:$0xff] %v8454_v1  ;;  %10976 = vst [vmem:[#allocation166_spill] sm:$0xff] %v8457_v32  ;;  %v8460_v16 = vld [vmem:[#allocation4 + $0x620] sm:$0xff]  ;;  %v8463_v54 = vld [vmem:[#allocation4 + $0x630] sm:$0xff] }
 0x77d   :  { %2860 = vmatpush2.msra.mxu0 %v8448_v63  ;;  %2931 = vmatpush2.msra.mxu1 %v8451_v58  ;;  %10977 = vst [vmem:[#allocation167_spill] sm:$0xff] %v8460_v16  ;;  %10978 = vst [vmem:[#allocation168_spill] sm:$0xff] %v8463_v54  ;;  %v8466_v63 = vld [vmem:[#allocation4 + $0x5e8] sm:$0xff]  ;;  %v8469_v58 = vld [vmem:[#allocation4 + $0x5f8] sm:$0xff] }
 0x77e   :  { %2861 = vmatprep.subr.mxu0 %v8454_v1  ;;  %2932 = vmatprep.subr.mxu1 %v8457_v32  ;;  %10979 = vst [vmem:[#allocation169_spill] sm:$0xff] %v8466_v63  ;;  %10980 = vst [vmem:[#allocation170_spill] sm:$0xff] %v8469_v58  ;;  %v8472_v1 = vld [vmem:[#allocation4 + $0x5e0] sm:$0xff]  ;;  %v8475_v32 = vld [vmem:[#allocation4 + $0x5f0] sm:$0xff] }
 0x77f   :  { %2862 = vmatpush2.msra.mxu0 %v8460_v16  ;;  %2933 = vmatpush2.msra.mxu1 %v8463_v54  ;;  %10981 = vst [vmem:[#allocation171_spill] sm:$0xff] %v8472_v1  ;;  %10982 = vst [vmem:[#allocation172_spill] sm:$0xff] %v8475_v32  ;;  %v8478_v16 = vld [vmem:[#allocation4 + $0x5a8] sm:$0xff]  ;;  %v8481_v54 = vld [vmem:[#allocation4 + $0x5b8] sm:$0xff] }
 0x780   :  { %2863 = vmatprep.subr.mxu0 %v8466_v63  ;;  %2934 = vmatprep.subr.mxu1 %v8469_v58  ;;  %10983 = vst [vmem:[#allocation173_spill] sm:$0xff] %v8478_v16  ;;  %10984 = vst [vmem:[#allocation174_spill] sm:$0xff] %v8481_v54  ;;  %v8484_v63 = vld [vmem:[#allocation4 + $0x5a0] sm:$0xff]  ;;  %v8487_v58 = vld [vmem:[#allocation4 + $0x5b0] sm:$0xff] }
 0x781   :  { %2864 = vmatpush2.msra.mxu0 %v8472_v1  ;;  %2935 = vmatpush2.msra.mxu1 %v8475_v32  ;;  %10985 = vst [vmem:[#allocation175_spill] sm:$0xff] %v8484_v63  ;;  %10986 = vst [vmem:[#allocation176_spill] sm:$0xff] %v8487_v58  ;;  %v8490_v1 = vld [vmem:[#allocation4 + $0x568] sm:$0xff]  ;;  %v8493_v32 = vld [vmem:[#allocation4 + $0x578] sm:$0xff] }
 0x782   :  { %2865 = vmatprep.subr.mxu0 %v8478_v16  ;;  %2936 = vmatprep.subr.mxu1 %v8481_v54  ;;  %10987 = vst [vmem:[#allocation177_spill] sm:$0xff] %v8490_v1  ;;  %10988 = vst [vmem:[#allocation178_spill] sm:$0xff] %v8493_v32  ;;  %v8496_v16 = vld [vmem:[#allocation4 + $0x560] sm:$0xff]  ;;  %v8499_v54 = vld [vmem:[#allocation4 + $0x570] sm:$0xff] }
 0x783   :  { %2866 = vmatpush2.msra.mxu0 %v8484_v63  ;;  %2937 = vmatpush2.msra.mxu1 %v8487_v58  ;;  %10989 = vst [vmem:[#allocation179_spill] sm:$0xff] %v8496_v16  ;;  %10990 = vst [vmem:[#allocation180_spill] sm:$0xff] %v8499_v54  ;;  %v8502_v63 = vld [vmem:[#allocation4 + $0x528] sm:$0xff]  ;;  %v8505_v58 = vld [vmem:[#allocation4 + $0x538] sm:$0xff] }
 0x784   :  { %2867 = vmatprep.subr.mxu0 %v8490_v1  ;;  %2938 = vmatprep.subr.mxu1 %v8493_v32  ;;  %10991 = vst [vmem:[#allocation181_spill] sm:$0xff] %v8502_v63  ;;  %10992 = vst [vmem:[#allocation182_spill] sm:$0xff] %v8505_v58  ;;  %v8508_v1 = vld [vmem:[#allocation4 + $0x520] sm:$0xff]  ;;  %v8511_v32 = vld [vmem:[#allocation4 + $0x530] sm:$0xff] }
 0x785   :  { %2868 = vmatpush2.msra.mxu0 %v8496_v16  ;;  %2939 = vmatpush2.msra.mxu1 %v8499_v54  ;;  %10993 = vst [vmem:[#allocation183_spill] sm:$0xff] %v8508_v1  ;;  %10994 = vst [vmem:[#allocation184_spill] sm:$0xff] %v8511_v32  ;;  %v8514_v16 = vld [vmem:[#allocation4 + $0x4e8] sm:$0xff]  ;;  %v8517_v54 = vld [vmem:[#allocation4 + $0x4f8] sm:$0xff] }
 0x786   :  { %2869 = vmatprep.subr.mxu0 %v8502_v63  ;;  %2940 = vmatprep.subr.mxu1 %v8505_v58  ;;  %10995 = vst [vmem:[#allocation185_spill] sm:$0xff] %v8514_v16  ;;  %10996 = vst [vmem:[#allocation186_spill] sm:$0xff] %v8517_v54  ;;  %v8520_v63 = vld [vmem:[#allocation4 + $0x4e0] sm:$0xff]  ;;  %v8523_v58 = vld [vmem:[#allocation4 + $0x4f0] sm:$0xff] }
 0x787   :  { %2870 = vmatpush2.msra.mxu0 %v8508_v1  ;;  %2941 = vmatpush2.msra.mxu1 %v8511_v32  ;;  %10997 = vst [vmem:[#allocation187_spill] sm:$0xff] %v8520_v63  ;;  %10998 = vst [vmem:[#allocation188_spill] sm:$0xff] %v8523_v58  ;;  %v8526_v1 = vld [vmem:[#allocation4 + $0x4a8] sm:$0xff]  ;;  %v8529_v32 = vld [vmem:[#allocation4 + $0x4b8] sm:$0xff] }
 0x788   :  { %2871 = vmatprep.subr.mxu0 %v8514_v16  ;;  %2942 = vmatprep.subr.mxu1 %v8517_v54  ;;  %10999 = vst [vmem:[#allocation189_spill] sm:$0xff] %v8526_v1  ;;  %11000 = vst [vmem:[#allocation190_spill] sm:$0xff] %v8529_v32  ;;  %v8532_v16 = vld [vmem:[#allocation4 + $0x4a0] sm:$0xff]  ;;  %v8535_v54 = vld [vmem:[#allocation4 + $0x4b0] sm:$0xff] }
 0x789   :  { %2872 = vmatpush2.msra.mxu0 %v8520_v63  ;;  %2943 = vmatpush2.msra.mxu1 %v8523_v58  ;;  %11001 = vst [vmem:[#allocation191_spill] sm:$0xff] %v8532_v16  ;;  %11002 = vst [vmem:[#allocation192_spill] sm:$0xff] %v8535_v54  ;;  %v8538_v63 = vld [vmem:[#allocation4 + $0x468] sm:$0xff]  ;;  %v8541_v58 = vld [vmem:[#allocation4 + $0x478] sm:$0xff] }
 0x78a   :  { %2873 = vmatprep.subr.mxu0 %v8526_v1  ;;  %2944 = vmatprep.subr.mxu1 %v8529_v32  ;;  %11003 = vst [vmem:[#allocation193_spill] sm:$0xff] %v8538_v63  ;;  %11004 = vst [vmem:[#allocation194_spill] sm:$0xff] %v8541_v58  ;;  %v8544_v1 = vld [vmem:[#allocation4 + $0x460] sm:$0xff]  ;;  %v8547_v32 = vld [vmem:[#allocation4 + $0x470] sm:$0xff] }
 0x78b   :  { %2874 = vmatpush2.msra.mxu0 %v8532_v16  ;;  %2945 = vmatpush2.msra.mxu1 %v8535_v54  ;;  %11005 = vst [vmem:[#allocation195_spill] sm:$0xff] %v8544_v1  ;;  %11006 = vst [vmem:[#allocation196_spill] sm:$0xff] %v8547_v32  ;;  %v8550_v16 = vld [vmem:[#allocation4 + $0x428] sm:$0xff]  ;;  %v8553_v54 = vld [vmem:[#allocation4 + $0x438] sm:$0xff] }
 0x78c   :  { %2875 = vmatprep.subr.mxu0 %v8538_v63  ;;  %2946 = vmatprep.subr.mxu1 %v8541_v58  ;;  %11007 = vst [vmem:[#allocation197_spill] sm:$0xff] %v8550_v16  ;;  %11008 = vst [vmem:[#allocation198_spill] sm:$0xff] %v8553_v54  ;;  %v8556_v63 = vld [vmem:[#allocation4 + $0x420] sm:$0xff]  ;;  %v8559_v58 = vld [vmem:[#allocation4 + $0x430] sm:$0xff] }
 0x78d   :  { %2876 = vmatpush2.msra.mxu0 %v8544_v1  ;;  %2947 = vmatpush2.msra.mxu1 %v8547_v32  ;;  %11009 = vst [vmem:[#allocation199_spill] sm:$0xff] %v8556_v63  ;;  %11010 = vst [vmem:[#allocation200_spill] sm:$0xff] %v8559_v58  ;;  %v4458_v32 = vld [vmem:[#allocation4 + $0x3c8] sm:$0xff]  ;;  %v4459_v1 = vld [vmem:[#allocation4 + $0x3d8] sm:$0xff] }
 0x78e   :  { %2877 = vmatprep.subr.mxu0 %v8550_v16  ;;  %2948 = vmatprep.subr.mxu1 %v8553_v54  ;;  %v4460_v16 = vld [vmem:[#allocation4 + $0x3c0] sm:$0xff]  ;;  %v4462_v54 = vld [vmem:[#allocation4 + $0x388] sm:$0xff] }
 0x78f   :  { %2878 = vmatpush2.msra.mxu0 %v8556_v63  ;;  %2949 = vmatpush2.msra.mxu1 %v8559_v58  ;;  %v4464_v63 = vld [vmem:[#allocation4 + $0x380] sm:$0xff]  ;;  %v4466_v58 = vld [vmem:[#allocation4 + $0x348] sm:$0xff] }
 0x790   :  { %2880 = vmatmul.mubr.f32.vlgmr.msra.gmra.mxu0 %v8200_v41  ;;  %2951 = vmatmul.mubr.f32.vlgmr.msra.gmra.mxu1 %v8200_v41  ;;  %v4468_v41 = vld [vmem:[#allocation4 + $0x340] sm:$0xff] }
 0x791   :  { %3014 = vmatprep.subr.mxu0 %v4458_v32  ;;  %3085 = vmatprep.subr.mxu1 %v4459_v1  ;;  %v4469_v32 = vld [vmem:[#allocation4 + $0x350] sm:$0xff]  ;;  %v4470_v1 = vld [vmem:[#allocation4 + $0x308] sm:$0xff] }
 0x792   :  { %3015 = vmatpush1.msra.mxu0 %v4460_v16  ;;  %3086 = vmatpush1.msra.mxu1 %v4461_v10  ;;  %v4471_v16 = vld [vmem:[#allocation4 + $0x318] sm:$0xff]  ;;  %v4472_v10 = vld [vmem:[#allocation4 + $0x300] sm:$0xff] }
 0x793   :  { %3016 = vmatprep.subr.mxu0 %v4462_v54  ;;  %3087 = vmatprep.subr.mxu1 %v4463_v36  ;;  %v4473_v54 = vld [vmem:[#allocation4 + $0x310] sm:$0xff]  ;;  %v4474_v36 = vld [vmem:[#allocation4 + $0x2c8] sm:$0xff] }
 0x794   :  { %3017 = vmatpush1.msra.mxu0 %v4464_v63  ;;  %3088 = vmatpush1.msra.mxu1 %v4465_v57  ;;  %v4475_v63 = vld [vmem:[#allocation4 + $0x2d8] sm:$0xff]  ;;  %v4476_v57 = vld [vmem:[#allocation4 + $0x2c0] sm:$0xff] }
 0x795   :  { %3018 = vmatprep.subr.mxu0 %v4466_v58  ;;  %3089 = vmatprep.subr.mxu1 %v4467_v42  ;;  %v4477_v58 = vld [vmem:[#allocation4 + $0x2d0] sm:$0xff] }
 0x796   :  { %3019 = vmatpush1.msra.mxu0 %v4468_v41  ;;  %3090 = vmatpush1.msra.mxu1 %v4469_v32  ;;  %v11029_v42 = vld [vmem:[#allocation33_spill] sm:$0xff]  ;;  %v11030_v41 = vld [vmem:[#allocation34_spill] sm:$0xff]  ;;  %v11031_v32 = vld [vmem:[#allocation35_spill] sm:$0xff] }
 0x797   :  { %3020 = vmatprep.subr.mxu0 %v4470_v1  ;;  %3091 = vmatprep.subr.mxu1 %v4471_v16  ;;  %v11032_v1 = vld [vmem:[#allocation36_spill] sm:$0xff]  ;;  %v11033_v16 = vld [vmem:[#allocation37_spill] sm:$0xff] }
 0x798   :  { %3021 = vmatpush1.msra.mxu0 %v4472_v10  ;;  %3092 = vmatpush1.msra.mxu1 %v4473_v54  ;;  %v11034_v10 = vld [vmem:[#allocation38_spill] sm:$0xff]  ;;  %v11035_v54 = vld [vmem:[#allocation39_spill] sm:$0xff] }
 0x799   :  { %3022 = vmatprep.subr.mxu0 %v4474_v36  ;;  %3093 = vmatprep.subr.mxu1 %v4475_v63  ;;  %v11036_v36 = vld [vmem:[#allocation40_spill] sm:$0xff]  ;;  %v11037_v63 = vld [vmem:[#allocation41_spill] sm:$0xff] }
 0x79a   :  { %3023 = vmatpush1.msra.mxu0 %v4476_v57  ;;  %3094 = vmatpush1.msra.mxu1 %v4477_v58  ;;  %v11038_v57 = vld [vmem:[#allocation42_spill] sm:$0xff]  ;;  %v11039_v58 = vld [vmem:[#allocation43_spill] sm:$0xff] }
 0x79b   :  { %3024 = vmatprep.subr.mxu0 %v7846_v0  ;;  %3095 = vmatprep.subr.mxu1 %v7849_v5  ;;  %v11011_v0 = vld [vmem:[#allocation15_spill] sm:$0xff]  ;;  %v11012_v5 = vld [vmem:[#allocation16_spill] sm:$0xff] }
 0x79c   :  { %3025 = vmatpush1.msra.mxu0 %v7852_v50  ;;  %3096 = vmatpush1.msra.mxu1 %v7855_v24  ;;  %v11013_v50 = vld [vmem:[#allocation17_spill] sm:$0xff]  ;;  %v11014_v24 = vld [vmem:[#allocation18_spill] sm:$0xff] }
 0x79d   :  { %3026 = vmatprep.subr.mxu0 %v7858_v9  ;;  %3097 = vmatprep.subr.mxu1 %v7861_v18  ;;  %v11015_v9 = vld [vmem:[#allocation19_spill] sm:$0xff]  ;;  %v11016_v18 = vld [vmem:[#allocation20_spill] sm:$0xff] }
 0x79e   :  { %3027 = vmatpush1.msra.mxu0 %v7864_v12  ;;  %3098 = vmatpush1.msra.mxu1 %v7867_v17  ;;  %v11017_v12 = vld [vmem:[#allocation21_spill] sm:$0xff]  ;;  %v11018_v17 = vld [vmem:[#allocation22_spill] sm:$0xff] }
 0x79f   :  { %3028 = vmatprep.subr.mxu0 %v7870_v19  ;;  %3099 = vmatprep.subr.mxu1 %v7873_v20  ;;  %v11019_v19 = vld [vmem:[#allocation23_spill] sm:$0xff]  ;;  %v11020_v20 = vld [vmem:[#allocation24_spill] sm:$0xff] }
 0x7a0   :  { %3029 = vmatpush1.msra.mxu0 %v7876_v51  ;;  %3100 = vmatpush1.msra.mxu1 %v7879_v11  ;;  %v11021_v51 = vld [vmem:[#allocation25_spill] sm:$0xff]  ;;  %v11022_v11 = vld [vmem:[#allocation26_spill] sm:$0xff] }
 0x7a1   :  { %3030 = vmatprep.subr.mxu0 %v7882_v8  ;;  %3101 = vmatprep.subr.mxu1 %v7885_v14  ;;  %v11023_v8 = vld [vmem:[#allocation27_spill] sm:$0xff]  ;;  %v11024_v14 = vld [vmem:[#allocation28_spill] sm:$0xff] }
 0x7a2   :  { %3031 = vmatpush1.msra.mxu0 %v7888_v30  ;;  %3102 = vmatpush1.msra.mxu1 %v7891_v34  ;;  %v11025_v30 = vld [vmem:[#allocation29_spill] sm:$0xff]  ;;  %v11026_v34 = vld [vmem:[#allocation30_spill] sm:$0xff] }
 0x7a3   :  { %3032 = vmatprep.subr.mxu0 %v7894_v27  ;;  %3103 = vmatprep.subr.mxu1 %v7897_v44  ;;  %v11027_v27 = vld [vmem:[#allocation31_spill] sm:$0xff]  ;;  %v11028_v44 = vld [vmem:[#allocation32_spill] sm:$0xff] }
 0x7a4   :  { %3033 = vmatpush1.msra.mxu0 %v11011_v0  ;;  %3104 = vmatpush1.msra.mxu1 %v11012_v5  ;;  %v11040_v0 = vld [vmem:[#allocation44_spill] sm:$0xff]  ;;  %v11041_v5 = vld [vmem:[#allocation45_spill] sm:$0xff] }
 0x7a5   :  { %3034 = vmatprep.subr.mxu0 %v11013_v50  ;;  %3105 = vmatprep.subr.mxu1 %v11014_v24  ;;  %v11042_v50 = vld [vmem:[#allocation46_spill] sm:$0xff]  ;;  %v11043_v24 = vld [vmem:[#allocation47_spill] sm:$0xff] }
 0x7a6   :  { %3035 = vmatpush1.msra.mxu0 %v11015_v9  ;;  %3106 = vmatpush1.msra.mxu1 %v11016_v18  ;;  %v11044_v9 = vld [vmem:[#allocation48_spill] sm:$0xff]  ;;  %v11045_v18 = vld [vmem:[#allocation49_spill] sm:$0xff] }
 0x7a7   :  { %3036 = vmatprep.subr.mxu0 %v11017_v12  ;;  %3107 = vmatprep.subr.mxu1 %v11018_v17  ;;  %v11046_v12 = vld [vmem:[#allocation50_spill] sm:$0xff]  ;;  %v11047_v17 = vld [vmem:[#allocation51_spill] sm:$0xff] }
 0x7a8   :  { %3037 = vmatpush1.msra.mxu0 %v11019_v19  ;;  %3108 = vmatpush1.msra.mxu1 %v11020_v20  ;;  %v11048_v19 = vld [vmem:[#allocation52_spill] sm:$0xff]  ;;  %v11049_v20 = vld [vmem:[#allocation53_spill] sm:$0xff] }
 0x7a9   :  { %3038 = vmatprep.subr.mxu0 %v11021_v51  ;;  %3109 = vmatprep.subr.mxu1 %v11022_v11  ;;  %v11050_v51 = vld [vmem:[#allocation54_spill] sm:$0xff]  ;;  %v11051_v11 = vld [vmem:[#allocation55_spill] sm:$0xff] }
 0x7aa   :  { %3039 = vmatpush1.msra.mxu0 %v11023_v8  ;;  %3110 = vmatpush1.msra.mxu1 %v11024_v14  ;;  %v11052_v8 = vld [vmem:[#allocation56_spill] sm:$0xff]  ;;  %v11053_v14 = vld [vmem:[#allocation57_spill] sm:$0xff] }
 0x7ab   :  { %3040 = vmatprep.subr.mxu0 %v11025_v30  ;;  %3111 = vmatprep.subr.mxu1 %v11026_v34  ;;  %v11054_v30 = vld [vmem:[#allocation58_spill] sm:$0xff]  ;;  %v11055_v34 = vld [vmem:[#allocation59_spill] sm:$0xff] }
 0x7ac   :  { %3041 = vmatpush1.msra.mxu0 %v11027_v27  ;;  %3112 = vmatpush1.msra.mxu1 %v11028_v44  ;;  %v11056_v27 = vld [vmem:[#allocation60_spill] sm:$0xff]  ;;  %v11057_v44 = vld [vmem:[#allocation61_spill] sm:$0xff] }
 0x7ad   :  { %3042 = vmatprep.subr.mxu0 %v11029_v42  ;;  %3113 = vmatprep.subr.mxu1 %v11030_v41  ;;  %v11058_v42 = vld [vmem:[#allocation62_spill] sm:$0xff]  ;;  %v11059_v41 = vld [vmem:[#allocation63_spill] sm:$0xff] }
 0x7ae   :  { %3043 = vmatpush1.msra.mxu0 %v11031_v32  ;;  %3114 = vmatpush1.msra.mxu1 %v11032_v1  ;;  %v11060_v32 = vld [vmem:[#allocation64_spill] sm:$0xff]  ;;  %v11061_v1 = vld [vmem:[#allocation65_spill] sm:$0xff] }
 0x7af   :  { %3044 = vmatprep.subr.mxu0 %v11033_v16  ;;  %3115 = vmatprep.subr.mxu1 %v11034_v10  ;;  %v11062_v16 = vld [vmem:[#allocation66_spill] sm:$0xff]  ;;  %v11063_v10 = vld [vmem:[#allocation67_spill] sm:$0xff] }
 0x7b0   :  { %3045 = vmatpush1.msra.mxu0 %v11035_v54  ;;  %3116 = vmatpush1.msra.mxu1 %v11036_v36  ;;  %v11064_v54 = vld [vmem:[#allocation68_spill] sm:$0xff]  ;;  %v11065_v36 = vld [vmem:[#allocation69_spill] sm:$0xff] }
 0x7b1   :  { %3046 = vmatprep.subr.mxu0 %v11037_v63  ;;  %3117 = vmatprep.subr.mxu1 %v11038_v57  ;;  %v11066_v63 = vld [vmem:[#allocation70_spill] sm:$0xff]  ;;  %v11067_v57 = vld [vmem:[#allocation71_spill] sm:$0xff] }
 0x7b2   :  { %3047 = vmatpush2.msra.mxu0 %v11039_v58  ;;  %3118 = vmatpush2.msra.mxu1 %v11040_v0  ;;  %v11068_v58 = vld [vmem:[#allocation72_spill] sm:$0xff]  ;;  %v11069_v0 = vld [vmem:[#allocation73_spill] sm:$0xff] }
 0x7b3   :  { %3048 = vmatprep.subr.mxu0 %v11041_v5  ;;  %3119 = vmatprep.subr.mxu1 %v11042_v50  ;;  %v11070_v5 = vld [vmem:[#allocation74_spill] sm:$0xff]  ;;  %v11071_v50 = vld [vmem:[#allocation75_spill] sm:$0xff] }
 0x7b4   :  { %3049 = vmatpush2.msra.mxu0 %v11043_v24  ;;  %3120 = vmatpush2.msra.mxu1 %v11044_v9  ;;  %v11072_v24 = vld [vmem:[#allocation76_spill] sm:$0xff]  ;;  %v11073_v9 = vld [vmem:[#allocation77_spill] sm:$0xff] }
 0x7b5   :  { %3050 = vmatprep.subr.mxu0 %v11045_v18  ;;  %3121 = vmatprep.subr.mxu1 %v11046_v12  ;;  %v11074_v18 = vld [vmem:[#allocation78_spill] sm:$0xff]  ;;  %v11075_v12 = vld [vmem:[#allocation79_spill] sm:$0xff] }
 0x7b6   :  { %3051 = vmatpush2.msra.mxu0 %v11047_v17  ;;  %3122 = vmatpush2.msra.mxu1 %v11048_v19  ;;  %v11076_v17 = vld [vmem:[#allocation80_spill] sm:$0xff]  ;;  %v11077_v19 = vld [vmem:[#allocation81_spill] sm:$0xff] }
 0x7b7   :  { %3052 = vmatprep.subr.mxu0 %v11049_v20  ;;  %3123 = vmatprep.subr.mxu1 %v11050_v51  ;;  %v11078_v20 = vld [vmem:[#allocation82_spill] sm:$0xff]  ;;  %v11079_v51 = vld [vmem:[#allocation83_spill] sm:$0xff] }
 0x7b8   :  { %3053 = vmatpush2.msra.mxu0 %v11051_v11  ;;  %3124 = vmatpush2.msra.mxu1 %v11052_v8  ;;  %v11080_v11 = vld [vmem:[#allocation84_spill] sm:$0xff]  ;;  %v11081_v8 = vld [vmem:[#allocation85_spill] sm:$0xff] }
 0x7b9   :  { %3054 = vmatprep.subr.mxu0 %v11053_v14  ;;  %3125 = vmatprep.subr.mxu1 %v11054_v30  ;;  %v11082_v14 = vld [vmem:[#allocation86_spill] sm:$0xff]  ;;  %v11083_v30 = vld [vmem:[#allocation87_spill] sm:$0xff] }
 0x7ba   :  { %3055 = vmatpush2.msra.mxu0 %v11055_v34  ;;  %3126 = vmatpush2.msra.mxu1 %v11056_v27  ;;  %v11084_v34 = vld [vmem:[#allocation88_spill] sm:$0xff]  ;;  %v11085_v27 = vld [vmem:[#allocation89_spill] sm:$0xff] }
 0x7bb   :  { %3056 = vmatprep.subr.mxu0 %v11057_v44  ;;  %3127 = vmatprep.subr.mxu1 %v11058_v42  ;;  %v11086_v44 = vld [vmem:[#allocation90_spill] sm:$0xff]  ;;  %v11087_v42 = vld [vmem:[#allocation91_spill] sm:$0xff] }
 0x7bc   :  { %3057 = vmatpush2.msra.mxu0 %v11059_v41  ;;  %3128 = vmatpush2.msra.mxu1 %v11060_v32  ;;  %v11088_v41 = vld [vmem:[#allocation92_spill] sm:$0xff]  ;;  %v11089_v32 = vld [vmem:[#allocation93_spill] sm:$0xff] }
 0x7bd   :  { %3058 = vmatprep.subr.mxu0 %v11061_v1  ;;  %3129 = vmatprep.subr.mxu1 %v11062_v16  ;;  %v11090_v1 = vld [vmem:[#allocation94_spill] sm:$0xff]  ;;  %v11091_v16 = vld [vmem:[#allocation95_spill] sm:$0xff] }
 0x7be   :  { %3059 = vmatpush2.msra.mxu0 %v11063_v10  ;;  %3130 = vmatpush2.msra.mxu1 %v11064_v54  ;;  %v11092_v10 = vld [vmem:[#allocation96_spill] sm:$0xff]  ;;  %v11093_v54 = vld [vmem:[#allocation97_spill] sm:$0xff] }
 0x7bf   :  { %3060 = vmatprep.subr.mxu0 %v11065_v36  ;;  %3131 = vmatprep.subr.mxu1 %v11066_v63  ;;  %v11094_v36 = vld [vmem:[#allocation98_spill] sm:$0xff]  ;;  %v11095_v63 = vld [vmem:[#allocation99_spill] sm:$0xff] }
 0x7c0   :  { %3061 = vmatpush2.msra.mxu0 %v11067_v57  ;;  %3132 = vmatpush2.msra.mxu1 %v11068_v58  ;;  %v11096_v57 = vld [vmem:[#allocation100_spill] sm:$0xff]  ;;  %v11097_v58 = vld [vmem:[#allocation101_spill] sm:$0xff] }
 0x7c1   :  { %3062 = vmatprep.subr.mxu0 %v11069_v0  ;;  %3133 = vmatprep.subr.mxu1 %v11070_v5  ;;  %v11098_v0 = vld [vmem:[#allocation102_spill] sm:$0xff]  ;;  %v11099_v5 = vld [vmem:[#allocation103_spill] sm:$0xff] }
 0x7c2   :  { %3063 = vmatpush2.msra.mxu0 %v11071_v50  ;;  %3134 = vmatpush2.msra.mxu1 %v11072_v24  ;;  %v11100_v50 = vld [vmem:[#allocation104_spill] sm:$0xff]  ;;  %v11101_v24 = vld [vmem:[#allocation105_spill] sm:$0xff] }
 0x7c3   :  { %3064 = vmatprep.subr.mxu0 %v11073_v9  ;;  %3135 = vmatprep.subr.mxu1 %v11074_v18  ;;  %v11102_v9 = vld [vmem:[#allocation14_spill] sm:$0xff]  ;;  %v81_v18 = vpop.permute.xlu0 %80 }
 0x7c4   :  { %3065 = vmatpush2.msra.mxu0 %v11075_v12  ;;  %3136 = vmatpush2.msra.mxu1 %v11076_v17  ;;  %v11103_v12 = vld [vmem:[#allocation9_spill] sm:$0xff] }
 0x7c5   :  { %3066 = vmatprep.subr.mxu0 %v11077_v19  ;;  %3137 = vmatprep.subr.mxu1 %v11078_v20  ;;  %v177_v17 = vmul.f32 %v11103_v12, %v81_v18  ;;  %v11104_v20 = vld [vmem:[#allocation10_spill] sm:$0xff] }
 0x7c6   :  { %3067 = vmatpush2.msra.mxu0 %v11079_v51  ;;  %3138 = vmatpush2.msra.mxu1 %v11080_v11  ;;  %v179_v51 = vmul.f32 %v11104_v20, %v81_v18  ;;  %v11105_v11 = vld [vmem:[#allocation11_spill] sm:$0xff] }
 0x7c7   :  { %3068 = vmatprep.subr.mxu0 %v11081_v8  ;;  %3139 = vmatprep.subr.mxu1 %v11082_v14  ;;  %v178_v8 = vmul.f32 %v11105_v11, %v81_v18 }
 0x7c8   :  { %3069 = vmatpush2.msra.mxu0 %v11083_v30  ;;  %3140 = vmatpush2.msra.mxu1 %v11084_v34  ;;  %v283_v30 = vadd.f32 %v5446_v47, %v177_v17  ;;  %v180_v34 = vmul.f32 %v10506_v48, %v81_v18  ;;  %v183_v17 = vmul.f32 %v5466_v26, %v81_v18 }
 0x7c9   :  { %3070 = vmatprep.subr.mxu0 %v11085_v27  ;;  %3141 = vmatprep.subr.mxu1 %v11086_v44  ;;  %v11106_v27 = vld [vmem:[#allocation13_spill] sm:$0xff] }
 0x7ca   :  { %3071 = vmatpush2.msra.mxu0 %v11087_v42  ;;  %3142 = vmatpush2.msra.mxu1 %v11088_v41  ;;  %v285_v44 = vadd.f32 %v11106_v27, %v179_v51  ;;  %v182_v51 = vmul.f32 %v10304_v21, %v81_v18 }
 0x7cb   :  { %3072 = vmatprep.subr.mxu0 %v11089_v32  ;;  %3143 = vmatprep.subr.mxu1 %v11090_v1  ;;  %v284_v32 = vadd.f32 %v5455_v52, %v178_v8 }
 0x7cc   :  { %3073 = vmatpush2.msra.mxu0 %v11091_v16  ;;  %3144 = vmatpush2.msra.mxu1 %v11092_v10 }
 0x7cd   :  { %3074 = vmatprep.subr.mxu0 %v11093_v54  ;;  %3145 = vmatprep.subr.mxu1 %v11094_v36  ;;  %v286_v54 = vadd.f32 %v5459_v56, %v180_v34 }
 0x7ce   :  { %3075 = vmatpush2.msra.mxu0 %v11095_v63  ;;  %3146 = vmatpush2.msra.mxu1 %v11096_v57 }
 0x7cf   :  { %3076 = vmatprep.subr.mxu0 %v11097_v58  ;;  %3147 = vmatprep.subr.mxu1 %v11098_v0 }
 0x7d0   :  { %3077 = vmatpush2.msra.mxu0 %v11099_v5  ;;  %3148 = vmatpush2.msra.mxu1 %v11100_v50 }
 0x7d1   :  { %3156 = vmatprep.subr.mxu0 %v11101_v24  ;;  %3227 = vmatprep.subr.mxu1 %v11102_v9  ;;  %v181_v9 = vmul.f32 %v5464_v25, %v81_v18 }
 0x80f   :  { %v2739_v19 = vpop.f32.mrf.mxu0  ;;  %v2810_v14 = vpop.f32.mrf.mxu1 }
 0x810   :  { %v2740_v41 = vadd.f32 %v2739_v19, %v283_v30  ;;  %v2811_v1 = vadd.f32 %v2810_v14, %v285_v44  ;;  %v184_v30 = vmul.f32 %v5470_v29, %v81_v18  ;;  %v287_v44 = vadd.f32 %v5473_v33, %v181_v9 }
 0x811   :  { %v2741_v42 = vpop.f32.mrf.mxu0  ;;  %v2812_v16 = vpop.f32.mrf.mxu1 }
 0x812   :  { %v2742_v10 = vadd.f32 %v2741_v42, %v284_v32  ;;  %v3414_v36 = vmul.f32 -1.442695, %v2740_v41  ;;  %v2813_v63 = vadd.f32 %v2812_v16, %v286_v54  ;;  %v3416_v57 = vmul.f32 -1.442695, %v2811_v1 }
 0x813   :  { %v289_v42 = vadd.f32 %v5476_v38, %v183_v17  ;;  %v288_v16 = vadd.f32 %v5479_v46, %v182_v51 }
 0x814   :  { %v3415_v58 = vmul.f32 -1.442695, %v2742_v10  ;;  %3626 = vpow2.f32 %v3414_v36  ;;  %v3417_v0 = vmul.f32 -1.442695, %v2813_v63  ;;  %v290_v36 = vadd.f32 %v5482_v53, %v184_v30 }
 0x815   :  { %3628 = vpow2.f32 %v3416_v57 }
 0x816   :  { %3630 = vpow2.f32 %v3415_v58 }
 0x817   :  { %3632 = vpow2.f32 %v3417_v0 }
 0x821   :  { %v3627_v5 = vpop.eup %3626 }
 0x822   :  { %v3629_v50 = vpop.eup %3628  ;;  %v2963_v19 = vadd.f32 1.0, %v3627_v5 }
 0x823   :  { %v3631_v24 = vpop.eup %3630  ;;  %v2975_v14 = vadd.f32 1.0, %v3629_v50 }
 0x824   :  { %v3633_v8 = vpop.eup %3632  ;;  %v2964_v34 = vadd.f32 1.0, %v3631_v24  ;;  %3634 = vrcp.f32 %v2963_v19 }
 0x825   :  { %v2976_v41 = vadd.f32 1.0, %v3633_v8  ;;  %3636 = vrcp.f32 %v2975_v14 }
 0x826   :  { %3638 = vrcp.f32 %v2964_v34 }
 0x831   :  { %v3635_v50 = vpop.eup %3634 }
 0x832   :  { %v3637_v24 = vpop.eup %3636 }
 0x833   :  { %v3639_v9 = vpop.eup %3638  ;;  %v2995_v51 = vmul.f32 %v3637_v24, %v8193_v13  ;;  %v4484_v24 = vld [vmem:[#allocation4 + $0x368] sm:$0xff] }
 0x850   :  { %v2881_v32 = vpop.f32.mrf.mxu0  ;;  %v2952_v1 = vpop.f32.mrf.mxu1 }
 0x851   :  { %v2882_v10 = vadd.f32 %v2881_v32, %v287_v44  ;;  %v2953_v54 = vadd.f32 %v2952_v1, %v289_v42 }
 0x852   :  { %v2883_v63 = vpop.f32.mrf.mxu0  ;;  %v2954_v57 = vpop.f32.mrf.mxu1 }
 0x853   :  { %3640 = vtanh.f32 %v2882_v10  ;;  %v3418_v18 = vmul.f32 -1.442695, %v2953_v54  ;;  %v2884_v58 = vadd.f32 %v2883_v63, %v288_v16  ;;  %v2955_v0 = vadd.f32 %v2954_v57, %v290_v36 }
 0x854   :  { %3642 = vrcp.f32 %v2976_v41 }
 0x855   :  { %3644 = vpow2.f32 %v3418_v18  ;;  %v3419_v5 = vmul.f32 -1.442695, %v2955_v0  ;;  %v4479_v18 = vld [vmem:[#allocation4 + $0x3f0] sm:$0xff]  ;;  %v4481_v0 = vld [vmem:[#allocation4 + $0x3b8] sm:$0xff] }
 0x856   :  { %3646 = vtanh.f32 %v2884_v58  ;;  %v4480_v58 = vld [vmem:[#allocation4 + $0x3a8] sm:$0xff] }
 0x857   :  { %3648 = vpow2.f32 %v3419_v5  ;;  %v4482_v5 = vld [vmem:[#allocation4 + $0x3a0] sm:$0xff] }
 0x860   :  { %v3641_v17 = vpop.eup %3640 }
 0x861   :  { %v3643_v19 = vpop.eup %3642  ;;  %v2997_v8 = vmul.f32 %v3641_v17, %v3635_v50  ;;  %v4483_v50 = vld [vmem:[#allocation4 + $0x3b0] sm:$0xff]  ;;  %v4486_v17 = vld [vmem:[#allocation4 + $0x360] sm:$0xff] }
 0x862   :  { %v3645_v14 = vpop.eup %3644  ;;  %v2996_v41 = vmul.f32 %v3643_v19, %v8197_v55  ;;  %v4478_v55 = vld [vmem:[#allocation4 + $0x3e0] sm:$0xff]  ;;  %v4487_v19 = vld [vmem:[#allocation4 + $0x370] sm:$0xff] }
 0x863   :  { %v3647_v30 = vpop.eup %3646  ;;  %v8691_v34 = vadd.f32 %v2997_v8, %v2995_v51  ;;  %v2989_v44 = vadd.f32 1.0, %v3645_v14  ;;  %v11128_v51 = vld [vmem:[#allocation127_spill] sm:$0xff]  ;;  %v11129_v8 = vld [vmem:[#allocation128_spill] sm:$0xff]  ;;  %v11130_v14 = vld [vmem:[#allocation129_spill] sm:$0xff] }
 0x864   :  { %v3649_v42 = vpop.eup %3648  ;;  %v2998_v32 = vmul.f32 %v3647_v30, %v3639_v9  ;;  %v4485_v9 = vld [vmem:[#allocation4 + $0x378] sm:$0xff] }
 0x865   :  { %3650 = vtanh.f32 %v8691_v34  ;;  %v2990_v1 = vadd.f32 1.0, %v3649_v42  ;;  %v11131_v30 = vld [vmem:[#allocation130_spill] sm:$0xff]  ;;  %v11133_v42 = vld [vmem:[#allocation132_spill] sm:$0xff] }
 0x866   :  { %3652 = vrcp.f32 %v2989_v44  ;;  %v8695_v16 = vadd.f32 %v2998_v32, %v2996_v41  ;;  %v11132_v44 = vld [vmem:[#allocation131_spill] sm:$0xff]  ;;  %v11134_v41 = vld [vmem:[#allocation133_spill] sm:$0xff]  ;;  %v11135_v32 = vld [vmem:[#allocation134_spill] sm:$0xff] }
 0x867   :  { %3654 = vrcp.f32 %v2990_v1  ;;  %v11136_v1 = vld [vmem:[#allocation135_spill] sm:$0xff] }
 0x868   :  { %3656 = vtanh.f32 %v8695_v16 }
 0x872   :  { %v3651_v13 = vpop.eup %3650 }
 0x873   :  { %v3653_v10 = vpop.eup %3652 }
 0x874   :  { %v3655_v54 = vpop.eup %3654  ;;  %v8698_v57 = vmul.f32 %v3653_v10, %v3651_v13  ;;  %v11137_v13 = vld [vmem:[#allocation136_spill] sm:$0xff]  ;;  %v11138_v10 = vld [vmem:[#allocation137_spill] sm:$0xff] }
 0x875   :  { %v3657_v36 = vpop.eup %3656 }
 0x876   :  { %v3004_v63 = vmul.f32 %v3657_v36, %v3655_v54  ;;  %v11139_v54 = vld [vmem:[#allocation138_spill] sm:$0xff]  ;;  %v11140_v36 = vld [vmem:[#allocation139_spill] sm:$0xff] }
 0x878   :  { %3078 = vmatprep.mubr.f32.mxu0 %v3004_v63  ;;  %3149 = vmatprep.mubr.f32.mxu1 %v3004_v63 }
 0x879   :  { %3079 = vmatmul.mubr.f32.vlgmr.msra.gmra.mxu0 %v8698_v57  ;;  %3150 = vmatmul.mubr.f32.vlgmr.msra.gmra.mxu1 %v8698_v57 }
 0x87a   :  { %3157 = vmatpush1.msra.mxu0 %v4478_v55  ;;  %3228 = vmatpush1.msra.mxu1 %v4479_v18  ;;  %v11142_v55 = vld [vmem:[#allocation141_spill] sm:$0xff]  ;;  %v11143_v18 = vld [vmem:[#allocation142_spill] sm:$0xff] }
 0x87b   :  { %3158 = vmatprep.subr.mxu0 %v4480_v58  ;;  %3220 = vmatprep.mubr.f32.mxu0 %v3004_v63  ;;  %v11144_v58 = vld [vmem:[#allocation143_spill] sm:$0xff] }
 0x87c   :  { %3229 = vmatprep.subr.mxu1 %v4481_v0  ;;  %3291 = vmatprep.mubr.f32.mxu1 %v3004_v63  ;;  %v11141_v63 = vld [vmem:[#allocation140_spill] sm:$0xff] }
 0x87d   :  { %3159 = vmatpush1.msra.mxu0 %v4482_v5  ;;  %3230 = vmatpush1.msra.mxu1 %v4483_v50  ;;  %v11145_v0 = vld [vmem:[#allocation144_spill] sm:$0xff]  ;;  %v11146_v5 = vld [vmem:[#allocation145_spill] sm:$0xff]  ;;  %v11147_v50 = vld [vmem:[#allocation146_spill] sm:$0xff] }
 0x87e   :  { %3160 = vmatprep.subr.mxu0 %v4484_v24  ;;  %3231 = vmatprep.subr.mxu1 %v4485_v9  ;;  %v11148_v24 = vld [vmem:[#allocation147_spill] sm:$0xff]  ;;  %v11149_v9 = vld [vmem:[#allocation148_spill] sm:$0xff] }
 0x87f   :  { %3161 = vmatpush1.msra.mxu0 %v4486_v17  ;;  %3232 = vmatpush1.msra.mxu1 %v4487_v19  ;;  %v11150_v17 = vld [vmem:[#allocation149_spill] sm:$0xff]  ;;  %v11151_v19 = vld [vmem:[#allocation150_spill] sm:$0xff] }
 0x880   :  { %3162 = vmatprep.subr.mxu0 %v8214_v62  ;;  %3233 = vmatprep.subr.mxu1 %v8217_v37  ;;  %v11107_v62 = vld [vmem:[#allocation106_spill] sm:$0xff]  ;;  %v11108_v37 = vld [vmem:[#allocation107_spill] sm:$0xff] }
 0x881   :  { %3163 = vmatpush1.msra.mxu0 %v8220_v23  ;;  %3234 = vmatpush1.msra.mxu1 %v8223_v43  ;;  %v11109_v23 = vld [vmem:[#allocation108_spill] sm:$0xff]  ;;  %v11110_v43 = vld [vmem:[#allocation109_spill] sm:$0xff] }
 0x882   :  { %3164 = vmatprep.subr.mxu0 %v8226_v2  ;;  %3235 = vmatprep.subr.mxu1 %v8229_v3  ;;  %v11111_v2 = vld [vmem:[#allocation110_spill] sm:$0xff]  ;;  %v11112_v3 = vld [vmem:[#allocation111_spill] sm:$0xff] }
 0x883   :  { %3165 = vmatpush1.msra.mxu0 %v8232_v4  ;;  %3236 = vmatpush1.msra.mxu1 %v8235_v45  ;;  %v11113_v4 = vld [vmem:[#allocation112_spill] sm:$0xff]  ;;  %v11114_v45 = vld [vmem:[#allocation113_spill] sm:$0xff] }
 0x884   :  { %3166 = vmatprep.subr.mxu0 %v8238_v61  ;;  %3237 = vmatprep.subr.mxu1 %v8241_v40  ;;  %v11115_v61 = vld [vmem:[#allocation114_spill] sm:$0xff]  ;;  %v11116_v40 = vld [vmem:[#allocation115_spill] sm:$0xff] }
 0x885   :  { %3167 = vmatpush1.msra.mxu0 %v8244_v7  ;;  %3238 = vmatpush1.msra.mxu1 %v8247_v28  ;;  %v11117_v7 = vld [vmem:[#allocation116_spill] sm:$0xff]  ;;  %v11118_v28 = vld [vmem:[#allocation117_spill] sm:$0xff] }
 0x886   :  { %3168 = vmatprep.subr.mxu0 %v8250_v31  ;;  %3239 = vmatprep.subr.mxu1 %v8253_v60  ;;  %v11119_v31 = vld [vmem:[#allocation118_spill] sm:$0xff]  ;;  %v11120_v60 = vld [vmem:[#allocation119_spill] sm:$0xff] }
 0x887   :  { %3169 = vmatpush1.msra.mxu0 %v8256_v6  ;;  %3240 = vmatpush1.msra.mxu1 %v8259_v49  ;;  %v11121_v6 = vld [vmem:[#allocation120_spill] sm:$0xff]  ;;  %v11122_v49 = vld [vmem:[#allocation121_spill] sm:$0xff] }
 0x888   :  { %3170 = vmatprep.subr.mxu0 %v8262_v22  ;;  %3241 = vmatprep.subr.mxu1 %v8265_v39  ;;  %v11123_v22 = vld [vmem:[#allocation122_spill] sm:$0xff]  ;;  %v11124_v39 = vld [vmem:[#allocation123_spill] sm:$0xff] }
 0x889   :  { %3171 = vmatpush1.msra.mxu0 %v8268_v15  ;;  %3242 = vmatpush1.msra.mxu1 %v8271_v59  ;;  %v11125_v15 = vld [vmem:[#allocation124_spill] sm:$0xff]  ;;  %v11126_v59 = vld [vmem:[#allocation125_spill] sm:$0xff] }
 0x88a   :  { %3172 = vmatprep.subr.mxu0 %v8274_v35  ;;  %3243 = vmatprep.subr.mxu1 %v11107_v62  ;;  %v11127_v35 = vld [vmem:[#allocation126_spill] sm:$0xff]  ;;  %v11152_v62 = vld [vmem:[#allocation151_spill] sm:$0xff] }
 0x88b   :  { %3173 = vmatpush1.msra.mxu0 %v11108_v37  ;;  %3244 = vmatpush1.msra.mxu1 %v11109_v23  ;;  %v11153_v37 = vld [vmem:[#allocation152_spill] sm:$0xff]  ;;  %v11154_v23 = vld [vmem:[#allocation153_spill] sm:$0xff] }
 0x88c   :  { %3174 = vmatprep.subr.mxu0 %v11110_v43  ;;  %3245 = vmatprep.subr.mxu1 %v11111_v2  ;;  %v11155_v43 = vld [vmem:[#allocation154_spill] sm:$0xff]  ;;  %v11156_v2 = vld [vmem:[#allocation155_spill] sm:$0xff] }
 0x88d   :  { %3175 = vmatpush1.msra.mxu0 %v11112_v3  ;;  %3246 = vmatpush1.msra.mxu1 %v11113_v4  ;;  %v11157_v3 = vld [vmem:[#allocation156_spill] sm:$0xff]  ;;  %v11158_v4 = vld [vmem:[#allocation157_spill] sm:$0xff] }
 0x88e   :  { %3176 = vmatprep.subr.mxu0 %v11114_v45  ;;  %3247 = vmatprep.subr.mxu1 %v11115_v61  ;;  %v11159_v45 = vld [vmem:[#allocation158_spill] sm:$0xff]  ;;  %v11160_v61 = vld [vmem:[#allocation159_spill] sm:$0xff] }
 0x88f   :  { %3177 = vmatpush1.msra.mxu0 %v11116_v40  ;;  %3248 = vmatpush1.msra.mxu1 %v11117_v7  ;;  %v11161_v40 = vld [vmem:[#allocation160_spill] sm:$0xff]  ;;  %v11162_v7 = vld [vmem:[#allocation161_spill] sm:$0xff] }
 0x890   :  { %3178 = vmatprep.subr.mxu0 %v11118_v28  ;;  %3249 = vmatprep.subr.mxu1 %v11119_v31  ;;  %v11163_v28 = vld [vmem:[#allocation162_spill] sm:$0xff]  ;;  %v11164_v31 = vld [vmem:[#allocation163_spill] sm:$0xff] }
 0x891   :  { %3179 = vmatpush1.msra.mxu0 %v11120_v60  ;;  %3250 = vmatpush1.msra.mxu1 %v11121_v6  ;;  %v11165_v60 = vld [vmem:[#allocation164_spill] sm:$0xff]  ;;  %v11166_v6 = vld [vmem:[#allocation165_spill] sm:$0xff] }
 0x892   :  { %3180 = vmatprep.subr.mxu0 %v11122_v49  ;;  %3251 = vmatprep.subr.mxu1 %v11123_v22  ;;  %v11167_v49 = vld [vmem:[#allocation166_spill] sm:$0xff]  ;;  %v11168_v22 = vld [vmem:[#allocation167_spill] sm:$0xff] }
 0x893   :  { %3181 = vmatpush1.msra.mxu0 %v11124_v39  ;;  %3252 = vmatpush1.msra.mxu1 %v11125_v15  ;;  %v11169_v39 = vld [vmem:[#allocation168_spill] sm:$0xff]  ;;  %v11170_v15 = vld [vmem:[#allocation169_spill] sm:$0xff] }
 0x894   :  { %3182 = vmatprep.subr.mxu0 %v11126_v59  ;;  %3253 = vmatprep.subr.mxu1 %v11127_v35  ;;  %v11171_v59 = vld [vmem:[#allocation170_spill] sm:$0xff]  ;;  %v11172_v35 = vld [vmem:[#allocation171_spill] sm:$0xff] }
 0x895   :  { %3183 = vmatpush1.msra.mxu0 %v11128_v51  ;;  %3254 = vmatpush1.msra.mxu1 %v11129_v8  ;;  %v11173_v51 = vld [vmem:[#allocation172_spill] sm:$0xff]  ;;  %v11174_v8 = vld [vmem:[#allocation173_spill] sm:$0xff] }
 0x896   :  { %3184 = vmatprep.subr.mxu0 %v11130_v14  ;;  %3255 = vmatprep.subr.mxu1 %v11131_v30  ;;  %v11175_v14 = vld [vmem:[#allocation174_spill] sm:$0xff]  ;;  %v11176_v30 = vld [vmem:[#allocation175_spill] sm:$0xff] }
 0x897   :  { %3185 = vmatpush1.msra.mxu0 %v11132_v44  ;;  %3256 = vmatpush1.msra.mxu1 %v11133_v42  ;;  %v11177_v44 = vld [vmem:[#allocation176_spill] sm:$0xff]  ;;  %v11178_v42 = vld [vmem:[#allocation177_spill] sm:$0xff] }
 0x898   :  { %3186 = vmatprep.subr.mxu0 %v11134_v41  ;;  %3257 = vmatprep.subr.mxu1 %v11135_v32  ;;  %v11179_v41 = vld [vmem:[#allocation178_spill] sm:$0xff]  ;;  %v11180_v32 = vld [vmem:[#allocation179_spill] sm:$0xff] }
 0x899   :  { %3187 = vmatpush1.msra.mxu0 %v11136_v1  ;;  %3258 = vmatpush1.msra.mxu1 %v11137_v13  ;;  %v11181_v1 = vld [vmem:[#allocation180_spill] sm:$0xff]  ;;  %v11182_v13 = vld [vmem:[#allocation181_spill] sm:$0xff] }
 0x89a   :  { %3188 = vmatprep.subr.mxu0 %v11138_v10  ;;  %3259 = vmatprep.subr.mxu1 %v11139_v54  ;;  %v11183_v10 = vld [vmem:[#allocation182_spill] sm:$0xff]  ;;  %v11184_v54 = vld [vmem:[#allocation183_spill] sm:$0xff] }
 0x89b   :  { %3189 = vmatpush2.msra.mxu0 %v11140_v36  ;;  %3260 = vmatpush2.msra.mxu1 %v11141_v63  ;;  %v11185_v36 = vld [vmem:[#allocation184_spill] sm:$0xff]  ;;  %v11186_v63 = vld [vmem:[#allocation185_spill] sm:$0xff] }
 0x89c   :  { %3190 = vmatprep.subr.mxu0 %v11142_v55  ;;  %3261 = vmatprep.subr.mxu1 %v11143_v18  ;;  %v11187_v55 = vld [vmem:[#allocation186_spill] sm:$0xff]  ;;  %v11188_v18 = vld [vmem:[#allocation187_spill] sm:$0xff] }
 0x89d   :  { %3191 = vmatpush2.msra.mxu0 %v11144_v58  ;;  %3262 = vmatpush2.msra.mxu1 %v11145_v0  ;;  %v11189_v58 = vld [vmem:[#allocation188_spill] sm:$0xff]  ;;  %v11190_v0 = vld [vmem:[#allocation189_spill] sm:$0xff] }
 0x89e   :  { %3192 = vmatprep.subr.mxu0 %v11146_v5  ;;  %3263 = vmatprep.subr.mxu1 %v11147_v50  ;;  %v11191_v5 = vld [vmem:[#allocation190_spill] sm:$0xff]  ;;  %v11192_v50 = vld [vmem:[#allocation191_spill] sm:$0xff] }
 0x89f   :  { %3193 = vmatpush2.msra.mxu0 %v11148_v24  ;;  %3264 = vmatpush2.msra.mxu1 %v11149_v9  ;;  %v11193_v24 = vld [vmem:[#allocation192_spill] sm:$0xff]  ;;  %v11194_v9 = vld [vmem:[#allocation193_spill] sm:$0xff] }
 0x8a0   :  { %3194 = vmatprep.subr.mxu0 %v11150_v17  ;;  %3265 = vmatprep.subr.mxu1 %v11151_v19  ;;  %v11195_v17 = vld [vmem:[#allocation194_spill] sm:$0xff]  ;;  %v11196_v19 = vld [vmem:[#allocation195_spill] sm:$0xff] }
 0x8a1   :  { %3195 = vmatpush2.msra.mxu0 %v11152_v62  ;;  %3266 = vmatpush2.msra.mxu1 %v11153_v37  ;;  %v11197_v62 = vld [vmem:[#allocation196_spill] sm:$0xff]  ;;  %v11198_v37 = vld [vmem:[#allocation197_spill] sm:$0xff] }
 0x8a2   :  { %3196 = vmatprep.subr.mxu0 %v11154_v23  ;;  %3267 = vmatprep.subr.mxu1 %v11155_v43  ;;  %v11199_v23 = vld [vmem:[#allocation198_spill] sm:$0xff]  ;;  %v11200_v43 = vld [vmem:[#allocation199_spill] sm:$0xff] }
 0x8a3   :  { %3197 = vmatpush2.msra.mxu0 %v11156_v2  ;;  %3268 = vmatpush2.msra.mxu1 %v11157_v3  ;;  %v11201_v2 = vld [vmem:[#allocation200_spill] sm:$0xff]  ;;  %v86_v3 = vpop.permute.xlu1 %85 }
 0x8a4   :  { %3198 = vmatprep.subr.mxu0 %v11158_v4  ;;  %3269 = vmatprep.subr.mxu1 %v11159_v45  ;;  %v185_v4 = vmul.f32 %v11103_v12, %v86_v3 }
 0x8a5   :  { %3199 = vmatpush2.msra.mxu0 %v11160_v61  ;;  %3270 = vmatpush2.msra.mxu1 %v11161_v40  ;;  %v187_v61 = vmul.f32 %v11104_v20, %v86_v3  ;;  %v186_v40 = vmul.f32 %v11105_v11, %v86_v3 }
 0x8a6   :  { %3200 = vmatprep.subr.mxu0 %v11162_v7  ;;  %3271 = vmatprep.subr.mxu1 %v11163_v28  ;;  %v291_v28 = vadd.f32 %v5446_v47, %v185_v4  ;;  %v3346_v4 = vld [vmem:[%s8850_s4] sm:$0x3] }
 0x8a7   :  { %3201 = vmatpush2.msra.mxu0 %v11164_v31  ;;  %3272 = vmatpush2.msra.mxu1 %v11165_v60  ;;  %v188_v31 = vmul.f32 %v10506_v48, %v86_v3  ;;  %v293_v60 = vadd.f32 %v11106_v27, %v187_v61 }
 0x8a8   :  { %3202 = vmatprep.subr.mxu0 %v11166_v6  ;;  %3273 = vmatprep.subr.mxu1 %v11167_v49 }
 0x8a9   :  { %3203 = vmatpush2.msra.mxu0 %v11168_v22  ;;  %3274 = vmatpush2.msra.mxu1 %v11169_v39  ;;  %v292_v22 = vadd.f32 %v5455_v52, %v186_v40  ;;  %v294_v12 = vadd.f32 %v5459_v56, %v188_v31  ;;  %v191_v52 = vmul.f32 %v5466_v26, %v86_v3  ;;  %v11203_v31 = vld [vmem:[#allocation8_spill] sm:$0xff] }
 0x8aa   :  { %3204 = vmatprep.subr.mxu0 %v11170_v15  ;;  %3275 = vmatprep.subr.mxu1 %v11171_v59 }
 0x8ab   :  { %3205 = vmatpush2.msra.mxu0 %v11172_v35  ;;  %3276 = vmatpush2.msra.mxu1 %v11173_v51 }
 0x8ac   :  { %3206 = vmatprep.subr.mxu0 %v11174_v8  ;;  %3277 = vmatprep.subr.mxu1 %v11175_v14  ;;  %v189_v8 = vmul.f32 %v5464_v25, %v86_v3 }
 0x8ad   :  { %3207 = vmatpush2.msra.mxu0 %v11176_v30  ;;  %3278 = vmatpush2.msra.mxu1 %v11177_v44  ;;  %v190_v30 = vmul.f32 %v10304_v21, %v86_v3 }
 0x8ae   :  { %3208 = vmatprep.subr.mxu0 %v11178_v42  ;;  %3279 = vmatprep.subr.mxu1 %v11179_v41  ;;  %v192_v42 = vmul.f32 %v5470_v29, %v86_v3 }
 0x8af   :  { %3209 = vmatpush2.msra.mxu0 %v11180_v32  ;;  %3280 = vmatpush2.msra.mxu1 %v11181_v1  ;;  %v295_v32 = vadd.f32 %v5473_v33, %v189_v8  ;;  %v297_v1 = vadd.f32 %v5476_v38, %v191_v52  ;;  %v296_v25 = vadd.f32 %v5479_v46, %v190_v30 }
 0x8b0   :  { %3210 = vmatprep.subr.mxu0 %v11182_v13  ;;  %3281 = vmatprep.subr.mxu1 %v11183_v10  ;;  %v298_v21 = vadd.f32 %v5482_v53, %v192_v42 }
 0x8b1   :  { %3211 = vmatpush2.msra.mxu0 %v11184_v54  ;;  %3282 = vmatpush2.msra.mxu1 %v11185_v36 }
 0x8b2   :  { %3212 = vmatprep.subr.mxu0 %v11186_v63  ;;  %3283 = vmatprep.subr.mxu1 %v11187_v55 }
 0x8b3   :  { %3213 = vmatpush2.msra.mxu0 %v11188_v18  ;;  %3284 = vmatpush2.msra.mxu1 %v11189_v58 }
 0x8b4   :  { %3214 = vmatprep.subr.mxu0 %v11190_v0  ;;  %3285 = vmatprep.subr.mxu1 %v11191_v5 }
 0x8b5   :  { %3215 = vmatpush2.msra.mxu0 %v11192_v50  ;;  %3286 = vmatpush2.msra.mxu1 %v11193_v24 }
 0x8b6   :  { %3216 = vmatprep.subr.mxu0 %v11194_v9  ;;  %3287 = vmatprep.subr.mxu1 %v11195_v17 }
 0x8b7   :  { %3217 = vmatpush2.msra.mxu0 %v11196_v19  ;;  %3288 = vmatpush2.msra.mxu1 %v11197_v62 }
 0x8b8   :  { %3218 = vmatprep.subr.mxu0 %v11198_v37  ;;  %3289 = vmatprep.subr.mxu1 %v11199_v23 }
 0x8b9   :  { %3219 = vmatpush2.msra.mxu0 %v11200_v43  ;;  %3290 = vmatpush2.msra.mxu1 %v11201_v2 }
 0x8ba   :  { %3221 = vmatmul.mubr.f32.vlgmr.msra.gmra.mxu0 %v8698_v57  ;;  %3292 = vmatmul.mubr.f32.vlgmr.msra.gmra.mxu1 %v8698_v57 }
 0x939   :  { %v3080_v45 = vpop.f32.mrf.mxu0  ;;  %v3151_v7 = vpop.f32.mrf.mxu1 }
 0x93a   :  { %v3081_v49 = vadd.f32 %v3080_v45, %v291_v28  ;;  %v3152_v57 = vadd.f32 %v3151_v7, %v293_v60  ;;  %v11202_v7 = vld [vmem:[#allocation7_spill] sm:$0xff]  ;;  %v3355_v60 = vrot.slane %v3346_v4, %v11203_v31 }
 0x93b   :  { %v3082_v6 = vpop.f32.mrf.mxu0  ;;  %v3153_v39 = vpop.f32.mrf.mxu1  ;;  %v3351_v28 = vrot.slane %v3346_v4, %v11202_v7 }
 0x93c   :  { %v3083_v15 = vadd.f32 %v3082_v6, %v292_v22  ;;  %v3420_v59 = vmul.f32 -1.442695, %v3081_v49  ;;  %v3154_v20 = vadd.f32 %v3153_v39, %v294_v12  ;;  %v3422_v35 = vmul.f32 -1.442695, %v3152_v57  ;;  %v3426_v39 = vld [vmem:[#allocation3] ss:$0 sm:$0xff] }
 0x93e   :  { %v3421_v11 = vmul.f32 -1.442695, %v3083_v15  ;;  %3658 = vpow2.f32 %v3420_v59  ;;  %v3423_v51 = vmul.f32 -1.442695, %v3154_v20 }
 0x93f   :  { %3660 = vpow2.f32 %v3422_v35 }
 0x940   :  { %3662 = vpow2.f32 %v3421_v11 }
 0x941   :  { %3664 = vpow2.f32 %v3423_v51 }
 0x94b   :  { %v3659_v47 = vpop.eup %3658 }
 0x94c   :  { %v3661_v48 = vpop.eup %3660  ;;  %v3304_v14 = vadd.f32 1.0, %v3659_v47 }
 0x94d   :  { %v3663_v27 = vpop.eup %3662  ;;  %v3316_v44 = vadd.f32 1.0, %v3661_v48 }
 0x94e   :  { %v3665_v56 = vpop.eup %3664  ;;  %v3305_v41 = vadd.f32 1.0, %v3663_v27  ;;  %3666 = vrcp.f32 %v3304_v14 }
 0x94f   :  { %v3317_v13 = vadd.f32 1.0, %v3665_v56  ;;  %3668 = vrcp.f32 %v3316_v44 }
 0x950   :  { %3670 = vrcp.f32 %v3305_v41 }
 0x95b   :  { %v3667_v58 = vpop.eup %3666 }
 0x95c   :  { %v3669_v0 = vpop.eup %3668 }
 0x95d   :  { %v3671_v46 = vpop.eup %3670  ;;  %v3336_v24 = vmul.f32 %v3669_v0, %v8691_v34 }
 0x97a   :  { %v3222_v10 = vpop.f32.mrf.mxu0  ;;  %v3293_v54 = vpop.f32.mrf.mxu1 }
 0x97b   :  { %v3223_v26 = vadd.f32 %v3222_v10, %v295_v32  ;;  %v3294_v36 = vadd.f32 %v3293_v54, %v297_v1 }
 0x97c   :  { %v3224_v63 = vpop.f32.mrf.mxu0  ;;  %v3295_v55 = vpop.f32.mrf.mxu1 }
 0x97d   :  { %3672 = vtanh.f32 %v3223_v26  ;;  %v3424_v29 = vmul.f32 -1.442695, %v3294_v36  ;;  %v3225_v18 = vadd.f32 %v3224_v63, %v296_v25  ;;  %v3296_v33 = vadd.f32 %v3295_v55, %v298_v21 }
 0x97e   :  { %3674 = vrcp.f32 %v3317_v13 }
 0x97f   :  { %3676 = vpow2.f32 %v3424_v29  ;;  %v3425_v38 = vmul.f32 -1.442695, %v3296_v33 }
 0x980   :  { %3678 = vtanh.f32 %v3225_v18 }
 0x981   :  { %3680 = vpow2.f32 %v3425_v38 }
 0x98a   :  { %v3673_v5 = vpop.eup %3672 }
 0x98b   :  { %v3675_v50 = vpop.eup %3674  ;;  %v3338_v53 = vmul.f32 %v3673_v5, %v3667_v58 }
 0x98c   :  { %v3677_v9 = vpop.eup %3676  ;;  %v3337_v23 = vmul.f32 %v3675_v50, %v8695_v16 }
 0x98d   :  { %v3679_v17 = vpop.eup %3678  ;;  %v3340_v19 = vadd.f32 %v3338_v53, %v3336_v24  ;;  %v3330_v62 = vadd.f32 1.0, %v3677_v9 }
 0x98e   :  { %v3681_v37 = vpop.eup %3680  ;;  %v3339_v43 = vmul.f32 %v3679_v17, %v3671_v46 }
 0x98f   :  { %3682 = vtanh.f32 %v3340_v19  ;;  %v3331_v2 = vadd.f32 1.0, %v3681_v37 }
 0x990   :  { %3684 = vrcp.f32 %v3330_v62  ;;  %v3341_v3 = vadd.f32 %v3339_v43, %v3337_v23 }
 0x991   :  { %3686 = vrcp.f32 %v3331_v2 }
 0x992   :  { %3688 = vtanh.f32 %v3341_v3 }
 0x99c   :  { %v3683_v34 = vpop.eup %3682 }
 0x99d   :  { %v3685_v45 = vpop.eup %3684 }
 0x99e   :  { %v3687_v61 = vpop.eup %3686  ;;  %v3344_v40 = vmul.f32 %v3685_v45, %v3683_v34 }
 0x99f   :  { %v3689_v16 = vpop.eup %3688 }
 0x9a0   :  { %v3345_v6 = vmul.f32 %v3689_v16, %v3687_v61  ;;  %v3358_v49 = vmul.f32 %v3351_v28, %v3344_v40 }
 0x9a2   :  { %v3359_v22 = vmul.f32 %v3355_v60, %v3345_v6 }
 0x9a4   :  { %v3360_v57 = vadd.f32 %v3359_v22, %v3358_v49 }
 0x9a6   :  { %3361 = vadd.xlane.f32.xlu0 %v3360_v57 }
 0xa2f   :  { %v3362_v15 = vpop.xlane.xlu0 %3361 }
 0xa30   :  { %v3370_v12 = vadd.f32 %v3426_v39, %v3362_v15 }
 0xa32   :  { %3372 = vst.msk [vmem:[%s8852_s6] sm:$0xff] %vm3371_vm0, %v3370_v12 }
 0xa33   :  { %3377 = vsyncpa [#allocation5], 1 }

</bundles_post_ra>
